<compile_context>
chip_gen: v5e
topology: v5e:2x2
jax: 0.10.0
libtpu: 0.0.40
codegen_flags: <defaults>
</compile_context>

<pallas_src>
import jax
import jax.numpy as jnp
from jax.experimental import pallas as pl
from jax.experimental.pallas import tpu as pltpu


# ----------------------------- fused kernel ---------------------------------

def _dblock_kernel(num_res: int, C: int, L: int, Wp: int):
    """Fused DBlock: num_res x (conv3x3 -> ReLU -> conv3x3 -> +residual).

    Refs:
      x_ref    : (C, L)              zero-padded, flattened activation (lanes = spatial)
      mask_ref : (C, L)              1.0 at interior (non-halo) positions, else 0.0
      w_ref    : (num_res, 2, C, 9C) per-block [w1, w2] in transposed-GEMM layout
      b_ref    : (num_res, 2, C, 1)  per-block [b1, b2]
      o_ref    : (C, L)              output (still padded/flattened; wrapper unpads)
    """
    # Tap offsets in the flattened padded layout, (ky, kx) row-major -- must
    # match the host-side weight packing order (Co, ky, kx, Ci).
    offs = [(ky - 1) * Wp + (kx - 1) for ky in range(3) for kx in range(3)]

    def shift_lanes(v, off):
        # out[:, p] = v[:, (p + off) % L].  For interior positions the shift
        # never crosses an image's padded block, and wrapped lanes only land
        # on halo positions which are masked back to zero afterwards.
        s = off % L
        if s == 0:
            return v
        return jnp.concatenate([v[:, s:], v[:, :s]], axis=1)

    def kernel(x_ref, mask_ref, w_ref, b_ref, o_ref):
        act = x_ref[...].astype(jnp.float32)       # (C, L); halo lanes are 0
        mask = mask_ref[...]                       # (C, L)

        def conv3x3(a, w2d, bias):
            # Build the 9-tap patch in registers (no VMEM scratch), then
            # contract all of (ky, kx, c_in) in one MXU GEMM of depth 9*C.
            patch = jnp.concatenate(
                [shift_lanes(a, off) for off in offs], axis=0)      # (9C, L)
            y = jax.lax.dot_general(
                w2d, patch, (((1,), (0,)), ((), ())),
                preferred_element_type=jnp.float32)                 # (C, L)
            return y + bias

        # Statically unrolled chain of ResBlocks (num_res is small & static).
        for r in range(num_res):
            w1 = w_ref[r, 0]                       # (C, 9C)
            w2 = w_ref[r, 1]                       # (C, 9C)
            b1 = b_ref[r, 0]                       # (C, 1)
            b2 = b_ref[r, 1]                       # (C, 1)

            res = act                              # residual, carried in regs
            h = jnp.maximum(conv3x3(act, w1, b1), 0.0) * mask
            act = conv3x3(h, w2, b2) * mask + res  # halo stays exactly zero

        o_ref[...] = act.astype(o_ref.dtype)       # single lane-dense store

    return kernel


@jax.jit
def dblock_forward(x_nchw, w_packed, b_packed):
    """x_nchw: (N, C, H, W) f32 (PyTorch layout).  Returns (N, C, H, W)."""
    N, C, H, W = x_nchw.shape
    num_res = w_packed.shape[0]
    Hp, Wp = H + 2, W + 2
    L = N * Hp * Wp

    # Wrapper-side layout prep: zero-pad, put C in sublanes, flatten padded
    # spatial into the lane dimension.
    xp = jnp.pad(x_nchw, ((0, 0), (0, 0), (1, 1), (1, 1)))
    x_flat = jnp.transpose(xp, (1, 0, 2, 3)).reshape(C, L)

    interior = jnp.zeros((Hp, Wp), jnp.float32).at[1:H + 1, 1:W + 1].set(1.0)
    mask = jnp.broadcast_to(interior[None], (N, Hp, Wp)).reshape(1, L)
    mask = jnp.broadcast_to(mask, (C, L))

    kernel = _dblock_kernel(num_res, C, L, Wp)
    vmem = pl.BlockSpec(memory_space=pltpu.MemorySpace.VMEM)
    y_flat = pl.pallas_call(
        kernel,
        out_shape=jax.ShapeDtypeStruct((C, L), x_nchw.dtype),
        in_specs=[vmem, vmem, vmem, vmem],
        out_specs=vmem,
    )(x_flat, mask, w_packed, b_packed)

    # Un-pad and transpose back to NCHW outside the kernel (keeps the kernel's
    # output store lane-dense).
    y = y_flat.reshape(C, N, Hp, Wp)[:, :, 1:H + 1, 1:W + 1]
    return jnp.transpose(y, (1, 0, 2, 3))


# ------------------------- parameter construction ---------------------------

def init_dblock_params(key, channel, num_res=8):
    """Deterministic synthetic parameters (kaiming-ish scale), HWIO weights."""
    blocks = []
    scale = (2.0 / (9.0 * channel)) ** 0.5
    for _ in range(num_res):
        key, k1, k2, k3, k4 = jax.random.split(key, 5)
        blocks.append(dict(
            w1=scale * jax.random.normal(k1, (3, 3, channel, channel), jnp.float32),
            b1=0.05 * jax.random.normal(k3, (channel,), jnp.float32),
            w2=scale * jax.random.normal(k2, (3, 3, channel, channel), jnp.float32),
            b2=0.05 * jax.random.normal(k4, (channel,), jnp.float32),
        ))
    return blocks


def pack_params(blocks):
    """Pack to the kernel's transposed-GEMM layout.

    Weights: HWIO (3,3,Ci,Co) -> (Co, ky, kx, Ci) -> (Co, 9*Ci); contraction
    index k = (ky*3 + kx)*C + ci matches the kernel's tap ordering.
    Returns (num_res, 2, C, 9C) weights and (num_res, 2, C, 1) biases.
    """
    C = blocks[0]["w1"].shape[-1]
    ws, bs = [], []
    for p in blocks:
        w1 = jnp.transpose(p["w1"], (3, 0, 1, 2)).reshape(C, 9 * C)
        w2 = jnp.transpose(p["w2"], (3, 0, 1, 2)).reshape(C, 9 * C)
        ws.append(jnp.stack([w1, w2], axis=0))                          # (2, C, 9C)
        bs.append(jnp.stack([p["b1"].reshape(C, 1),
                             p["b2"].reshape(C, 1)], axis=0))           # (2, C, 1)
    return jnp.stack(ws, axis=0), jnp.stack(bs, axis=0)


# ---------------- pure-JAX reference (for correctness check) ----------------

def _conv3x3_ref(x, w, b):
    y = jax.lax.conv_general_dilated(
        x, w, window_strides=(1, 1), padding="SAME",
        dimension_numbers=("NCHW", "HWIO", "NCHW"),
        precision=jax.lax.Precision.HIGHEST)
    return y + b.reshape(1, -1, 1, 1)


def dblock_ref(x, blocks):
    for p in blocks:
        h = jnp.maximum(_conv3x3_ref(x, p["w1"], p["b1"]), 0.0)
        x = _conv3x3_ref(h, p["w2"], p["b2"]) + x
    return x


if __name__ == "__main__":
    key = jax.random.PRNGKey(0)
    kx, kp = jax.random.split(key)

    # PyTorch-style input: x of shape (N, C, H, W) = (2, 4, 16, 16)
    N, C, H, W = 2, 4, 16, 16
    x = jax.random.normal(kx, (N, C, H, W), jnp.float32)

    blocks = init_dblock_params(kp, C, num_res=8)
    w_packed, b_packed = pack_params(blocks)

    out = dblock_forward(x, w_packed, b_packed)
    out = jax.block_until_ready(out)
    assert out.shape == (N, C, H, W)

    ref = dblock_ref(x, blocks)
    err = float(jnp.max(jnp.abs(out - ref)))
    assert err < 1e-3, f"Pallas/reference mismatch: max abs err = {err}"

    print("KERNEL_OK")
</pallas_src>

<mosaic_0001>
module attributes {stable_mosaic.version = 11 : i64} {
  func.func @kernel(%arg0: memref<4x648xf32, #tpu.memory_space<vmem>>, %arg1: memref<4x648xf32, #tpu.memory_space<vmem>>, %arg2: memref<8x2x4x36xf32, #tpu.memory_space<vmem>>, %arg3: memref<8x2x4x1xf32, #tpu.memory_space<vmem>>, %arg4: memref<4x648xf32, #tpu.memory_space<vmem>>) attributes {dimension_semantics = [], scalar_prefetch = 0 : i64, scratch_operands = 0 : i64, tpu.core_type = #tpu.core_type<tc>} {
    %c0 = arith.constant 0 : index
    %c0_0 = arith.constant 0 : index
    %0 = vector.load %arg0[%c0, %c0_0] : memref<4x648xf32, #tpu.memory_space<vmem>>, vector<4x648xf32>
    %c0_1 = arith.constant 0 : index
    %c0_2 = arith.constant 0 : index
    %1 = vector.load %arg1[%c0_1, %c0_2] : memref<4x648xf32, #tpu.memory_space<vmem>>, vector<4x648xf32>
    %c0_3 = arith.constant 0 : index
    %c0_4 = arith.constant 0 : index
    %c0_5 = arith.constant 0 : index
    %c0_6 = arith.constant 0 : index
    %2 = vector.load %arg2[%c0_3, %c0_4, %c0_5, %c0_6] : memref<8x2x4x36xf32, #tpu.memory_space<vmem>>, vector<1x1x4x36xf32>
    %3 = vector.shape_cast %2 : vector<1x1x4x36xf32> to vector<4x36xf32>
    %c0_7 = arith.constant 0 : index
    %c1 = arith.constant 1 : index
    %c0_8 = arith.constant 0 : index
    %c0_9 = arith.constant 0 : index
    %4 = vector.load %arg2[%c0_7, %c1, %c0_8, %c0_9] : memref<8x2x4x36xf32, #tpu.memory_space<vmem>>, vector<1x1x4x36xf32>
    %5 = vector.shape_cast %4 : vector<1x1x4x36xf32> to vector<4x36xf32>
    %c0_10 = arith.constant 0 : index
    %c0_11 = arith.constant 0 : index
    %c0_12 = arith.constant 0 : index
    %c0_13 = arith.constant 0 : index
    %6 = vector.load %arg3[%c0_10, %c0_11, %c0_12, %c0_13] : memref<8x2x4x1xf32, #tpu.memory_space<vmem>>, vector<1x1x4x1xf32>
    %7 = vector.shape_cast %6 : vector<1x1x4x1xf32> to vector<4x1xf32>
    %c0_14 = arith.constant 0 : index
    %c1_15 = arith.constant 1 : index
    %c0_16 = arith.constant 0 : index
    %c0_17 = arith.constant 0 : index
    %8 = vector.load %arg3[%c0_14, %c1_15, %c0_16, %c0_17] : memref<8x2x4x1xf32, #tpu.memory_space<vmem>>, vector<1x1x4x1xf32>
    %9 = vector.shape_cast %8 : vector<1x1x4x1xf32> to vector<4x1xf32>
    %10 = vector.extract_strided_slice %0 {offsets = [0, 629], sizes = [4, 19], strides = [1, 1]} : vector<4x648xf32> to vector<4x19xf32>
    %11 = vector.extract_strided_slice %0 {offsets = [0, 0], sizes = [4, 629], strides = [1, 1]} : vector<4x648xf32> to vector<4x629xf32>
    %12 = tpu.concatenate %10, %11 in 1 : vector<4x19xf32>, vector<4x629xf32> -> vector<4x648xf32>
    %13 = vector.extract_strided_slice %0 {offsets = [0, 630], sizes = [4, 18], strides = [1, 1]} : vector<4x648xf32> to vector<4x18xf32>
    %14 = vector.extract_strided_slice %0 {offsets = [0, 0], sizes = [4, 630], strides = [1, 1]} : vector<4x648xf32> to vector<4x630xf32>
    %15 = tpu.concatenate %13, %14 in 1 : vector<4x18xf32>, vector<4x630xf32> -> vector<4x648xf32>
    %16 = vector.extract_strided_slice %0 {offsets = [0, 631], sizes = [4, 17], strides = [1, 1]} : vector<4x648xf32> to vector<4x17xf32>
    %17 = vector.extract_strided_slice %0 {offsets = [0, 0], sizes = [4, 631], strides = [1, 1]} : vector<4x648xf32> to vector<4x631xf32>
    %18 = tpu.concatenate %16, %17 in 1 : vector<4x17xf32>, vector<4x631xf32> -> vector<4x648xf32>
    %19 = vector.extract_strided_slice %0 {offsets = [0, 647], sizes = [4, 1], strides = [1, 1]} : vector<4x648xf32> to vector<4x1xf32>
    %20 = vector.extract_strided_slice %0 {offsets = [0, 0], sizes = [4, 647], strides = [1, 1]} : vector<4x648xf32> to vector<4x647xf32>
    %21 = tpu.concatenate %19, %20 in 1 : vector<4x1xf32>, vector<4x647xf32> -> vector<4x648xf32>
    %22 = vector.extract_strided_slice %0 {offsets = [0, 1], sizes = [4, 647], strides = [1, 1]} : vector<4x648xf32> to vector<4x647xf32>
    %23 = vector.extract_strided_slice %0 {offsets = [0, 0], sizes = [4, 1], strides = [1, 1]} : vector<4x648xf32> to vector<4x1xf32>
    %24 = tpu.concatenate %22, %23 in 1 : vector<4x647xf32>, vector<4x1xf32> -> vector<4x648xf32>
    %25 = vector.extract_strided_slice %0 {offsets = [0, 17], sizes = [4, 631], strides = [1, 1]} : vector<4x648xf32> to vector<4x631xf32>
    %26 = vector.extract_strided_slice %0 {offsets = [0, 0], sizes = [4, 17], strides = [1, 1]} : vector<4x648xf32> to vector<4x17xf32>
    %27 = tpu.concatenate %25, %26 in 1 : vector<4x631xf32>, vector<4x17xf32> -> vector<4x648xf32>
    %28 = vector.extract_strided_slice %0 {offsets = [0, 18], sizes = [4, 630], strides = [1, 1]} : vector<4x648xf32> to vector<4x630xf32>
    %29 = vector.extract_strided_slice %0 {offsets = [0, 0], sizes = [4, 18], strides = [1, 1]} : vector<4x648xf32> to vector<4x18xf32>
    %30 = tpu.concatenate %28, %29 in 1 : vector<4x630xf32>, vector<4x18xf32> -> vector<4x648xf32>
    %31 = vector.extract_strided_slice %0 {offsets = [0, 19], sizes = [4, 629], strides = [1, 1]} : vector<4x648xf32> to vector<4x629xf32>
    %32 = vector.extract_strided_slice %0 {offsets = [0, 0], sizes = [4, 19], strides = [1, 1]} : vector<4x648xf32> to vector<4x19xf32>
    %33 = tpu.concatenate %31, %32 in 1 : vector<4x629xf32>, vector<4x19xf32> -> vector<4x648xf32>
    %34 = tpu.concatenate %12, %15, %18, %21, %0, %24, %27, %30, %33 in 0 : vector<4x648xf32>, vector<4x648xf32>, vector<4x648xf32>, vector<4x648xf32>, vector<4x648xf32>, vector<4x648xf32>, vector<4x648xf32>, vector<4x648xf32>, vector<4x648xf32> -> vector<36x648xf32>
    %cst = arith.constant dense<0.000000e+00> : vector<4x648xf32>
    %35 = tpu.matmul %3, %34, %cst {dimension_numbers = #tpu.dot_dimension_numbers<[1], [0], [0], [1], [0, 0, 1, 1], [], []>} : vector<4x36xf32>, vector<36x648xf32>, vector<4x648xf32> -> vector<4x648xf32>
    %36 = vector.broadcast %7 : vector<4x1xf32> to vector<4x648xf32>
    %37 = arith.addf %35, %36 : vector<4x648xf32>
    %cst_18 = arith.constant 0.000000e+00 : f32
    %38 = vector.broadcast %cst_18 : f32 to vector<4x648xf32>
    %39 = arith.maximumf %37, %38 : vector<4x648xf32>
    %40 = arith.mulf %39, %1 : vector<4x648xf32>
    %41 = vector.extract_strided_slice %40 {offsets = [0, 629], sizes = [4, 19], strides = [1, 1]} : vector<4x648xf32> to vector<4x19xf32>
    %42 = vector.extract_strided_slice %40 {offsets = [0, 0], sizes = [4, 629], strides = [1, 1]} : vector<4x648xf32> to vector<4x629xf32>
    %43 = tpu.concatenate %41, %42 in 1 : vector<4x19xf32>, vector<4x629xf32> -> vector<4x648xf32>
    %44 = vector.extract_strided_slice %40 {offsets = [0, 630], sizes = [4, 18], strides = [1, 1]} : vector<4x648xf32> to vector<4x18xf32>
    %45 = vector.extract_strided_slice %40 {offsets = [0, 0], sizes = [4, 630], strides = [1, 1]} : vector<4x648xf32> to vector<4x630xf32>
    %46 = tpu.concatenate %44, %45 in 1 : vector<4x18xf32>, vector<4x630xf32> -> vector<4x648xf32>
    %47 = vector.extract_strided_slice %40 {offsets = [0, 631], sizes = [4, 17], strides = [1, 1]} : vector<4x648xf32> to vector<4x17xf32>
    %48 = vector.extract_strided_slice %40 {offsets = [0, 0], sizes = [4, 631], strides = [1, 1]} : vector<4x648xf32> to vector<4x631xf32>
    %49 = tpu.concatenate %47, %48 in 1 : vector<4x17xf32>, vector<4x631xf32> -> vector<4x648xf32>
    %50 = vector.extract_strided_slice %40 {offsets = [0, 647], sizes = [4, 1], strides = [1, 1]} : vector<4x648xf32> to vector<4x1xf32>
    %51 = vector.extract_strided_slice %40 {offsets = [0, 0], sizes = [4, 647], strides = [1, 1]} : vector<4x648xf32> to vector<4x647xf32>
    %52 = tpu.concatenate %50, %51 in 1 : vector<4x1xf32>, vector<4x647xf32> -> vector<4x648xf32>
    %53 = vector.extract_strided_slice %40 {offsets = [0, 1], sizes = [4, 647], strides = [1, 1]} : vector<4x648xf32> to vector<4x647xf32>
    %54 = vector.extract_strided_slice %40 {offsets = [0, 0], sizes = [4, 1], strides = [1, 1]} : vector<4x648xf32> to vector<4x1xf32>
    %55 = tpu.concatenate %53, %54 in 1 : vector<4x647xf32>, vector<4x1xf32> -> vector<4x648xf32>
    %56 = vector.extract_strided_slice %40 {offsets = [0, 17], sizes = [4, 631], strides = [1, 1]} : vector<4x648xf32> to vector<4x631xf32>
    %57 = vector.extract_strided_slice %40 {offsets = [0, 0], sizes = [4, 17], strides = [1, 1]} : vector<4x648xf32> to vector<4x17xf32>
    %58 = tpu.concatenate %56, %57 in 1 : vector<4x631xf32>, vector<4x17xf32> -> vector<4x648xf32>
    %59 = vector.extract_strided_slice %40 {offsets = [0, 18], sizes = [4, 630], strides = [1, 1]} : vector<4x648xf32> to vector<4x630xf32>
    %60 = vector.extract_strided_slice %40 {offsets = [0, 0], sizes = [4, 18], strides = [1, 1]} : vector<4x648xf32> to vector<4x18xf32>
    %61 = tpu.concatenate %59, %60 in 1 : vector<4x630xf32>, vector<4x18xf32> -> vector<4x648xf32>
    %62 = vector.extract_strided_slice %40 {offsets = [0, 19], sizes = [4, 629], strides = [1, 1]} : vector<4x648xf32> to vector<4x629xf32>
    %63 = vector.extract_strided_slice %40 {offsets = [0, 0], sizes = [4, 19], strides = [1, 1]} : vector<4x648xf32> to vector<4x19xf32>
    %64 = tpu.concatenate %62, %63 in 1 : vector<4x629xf32>, vector<4x19xf32> -> vector<4x648xf32>
    %65 = tpu.concatenate %43, %46, %49, %52, %40, %55, %58, %61, %64 in 0 : vector<4x648xf32>, vector<4x648xf32>, vector<4x648xf32>, vector<4x648xf32>, vector<4x648xf32>, vector<4x648xf32>, vector<4x648xf32>, vector<4x648xf32>, vector<4x648xf32> -> vector<36x648xf32>
    %cst_19 = arith.constant dense<0.000000e+00> : vector<4x648xf32>
    %66 = tpu.matmul %5, %65, %cst_19 {dimension_numbers = #tpu.dot_dimension_numbers<[1], [0], [0], [1], [0, 0, 1, 1], [], []>} : vector<4x36xf32>, vector<36x648xf32>, vector<4x648xf32> -> vector<4x648xf32>
    %67 = vector.broadcast %9 : vector<4x1xf32> to vector<4x648xf32>
    %68 = arith.addf %66, %67 : vector<4x648xf32>
    %69 = arith.mulf %68, %1 : vector<4x648xf32>
    %70 = arith.addf %69, %0 : vector<4x648xf32>
    %c1_20 = arith.constant 1 : index
    %c0_21 = arith.constant 0 : index
    %c0_22 = arith.constant 0 : index
    %c0_23 = arith.constant 0 : index
    %71 = vector.load %arg2[%c1_20, %c0_21, %c0_22, %c0_23] : memref<8x2x4x36xf32, #tpu.memory_space<vmem>>, vector<1x1x4x36xf32>
    %72 = vector.shape_cast %71 : vector<1x1x4x36xf32> to vector<4x36xf32>
    %c1_24 = arith.constant 1 : index
    %c1_25 = arith.constant 1 : index
    %c0_26 = arith.constant 0 : index
    %c0_27 = arith.constant 0 : index
    %73 = vector.load %arg2[%c1_24, %c1_25, %c0_26, %c0_27] : memref<8x2x4x36xf32, #tpu.memory_space<vmem>>, vector<1x1x4x36xf32>
    %74 = vector.shape_cast %73 : vector<1x1x4x36xf32> to vector<4x36xf32>
    %c1_28 = arith.constant 1 : index
    %c0_29 = arith.constant 0 : index
    %c0_30 = arith.constant 0 : index
    %c0_31 = arith.constant 0 : index
    %75 = vector.load %arg3[%c1_28, %c0_29, %c0_30, %c0_31] : memref<8x2x4x1xf32, #tpu.memory_space<vmem>>, vector<1x1x4x1xf32>
    %76 = vector.shape_cast %75 : vector<1x1x4x1xf32> to vector<4x1xf32>
    %c1_32 = arith.constant 1 : index
    %c1_33 = arith.constant 1 : index
    %c0_34 = arith.constant 0 : index
    %c0_35 = arith.constant 0 : index
    %77 = vector.load %arg3[%c1_32, %c1_33, %c0_34, %c0_35] : memref<8x2x4x1xf32, #tpu.memory_space<vmem>>, vector<1x1x4x1xf32>
    %78 = vector.shape_cast %77 : vector<1x1x4x1xf32> to vector<4x1xf32>
    %79 = vector.extract_strided_slice %70 {offsets = [0, 629], sizes = [4, 19], strides = [1, 1]} : vector<4x648xf32> to vector<4x19xf32>
    %80 = vector.extract_strided_slice %70 {offsets = [0, 0], sizes = [4, 629], strides = [1, 1]} : vector<4x648xf32> to vector<4x629xf32>
    %81 = tpu.concatenate %79, %80 in 1 : vector<4x19xf32>, vector<4x629xf32> -> vector<4x648xf32>
    %82 = vector.extract_strided_slice %70 {offsets = [0, 630], sizes = [4, 18], strides = [1, 1]} : vector<4x648xf32> to vector<4x18xf32>
    %83 = vector.extract_strided_slice %70 {offsets = [0, 0], sizes = [4, 630], strides = [1, 1]} : vector<4x648xf32> to vector<4x630xf32>
    %84 = tpu.concatenate %82, %83 in 1 : vector<4x18xf32>, vector<4x630xf32> -> vector<4x648xf32>
    %85 = vector.extract_strided_slice %70 {offsets = [0, 631], sizes = [4, 17], strides = [1, 1]} : vector<4x648xf32> to vector<4x17xf32>
    %86 = vector.extract_strided_slice %70 {offsets = [0, 0], sizes = [4, 631], strides = [1, 1]} : vector<4x648xf32> to vector<4x631xf32>
    %87 = tpu.concatenate %85, %86 in 1 : vector<4x17xf32>, vector<4x631xf32> -> vector<4x648xf32>
    %88 = vector.extract_strided_slice %70 {offsets = [0, 647], sizes = [4, 1], strides = [1, 1]} : vector<4x648xf32> to vector<4x1xf32>
    %89 = vector.extract_strided_slice %70 {offsets = [0, 0], sizes = [4, 647], strides = [1, 1]} : vector<4x648xf32> to vector<4x647xf32>
    %90 = tpu.concatenate %88, %89 in 1 : vector<4x1xf32>, vector<4x647xf32> -> vector<4x648xf32>
    %91 = vector.extract_strided_slice %70 {offsets = [0, 1], sizes = [4, 647], strides = [1, 1]} : vector<4x648xf32> to vector<4x647xf32>
    %92 = vector.extract_strided_slice %70 {offsets = [0, 0], sizes = [4, 1], strides = [1, 1]} : vector<4x648xf32> to vector<4x1xf32>
    %93 = tpu.concatenate %91, %92 in 1 : vector<4x647xf32>, vector<4x1xf32> -> vector<4x648xf32>
    %94 = vector.extract_strided_slice %70 {offsets = [0, 17], sizes = [4, 631], strides = [1, 1]} : vector<4x648xf32> to vector<4x631xf32>
    %95 = vector.extract_strided_slice %70 {offsets = [0, 0], sizes = [4, 17], strides = [1, 1]} : vector<4x648xf32> to vector<4x17xf32>
    %96 = tpu.concatenate %94, %95 in 1 : vector<4x631xf32>, vector<4x17xf32> -> vector<4x648xf32>
    %97 = vector.extract_strided_slice %70 {offsets = [0, 18], sizes = [4, 630], strides = [1, 1]} : vector<4x648xf32> to vector<4x630xf32>
    %98 = vector.extract_strided_slice %70 {offsets = [0, 0], sizes = [4, 18], strides = [1, 1]} : vector<4x648xf32> to vector<4x18xf32>
    %99 = tpu.concatenate %97, %98 in 1 : vector<4x630xf32>, vector<4x18xf32> -> vector<4x648xf32>
    %100 = vector.extract_strided_slice %70 {offsets = [0, 19], sizes = [4, 629], strides = [1, 1]} : vector<4x648xf32> to vector<4x629xf32>
    %101 = vector.extract_strided_slice %70 {offsets = [0, 0], sizes = [4, 19], strides = [1, 1]} : vector<4x648xf32> to vector<4x19xf32>
    %102 = tpu.concatenate %100, %101 in 1 : vector<4x629xf32>, vector<4x19xf32> -> vector<4x648xf32>
    %103 = tpu.concatenate %81, %84, %87, %90, %70, %93, %96, %99, %102 in 0 : vector<4x648xf32>, vector<4x648xf32>, vector<4x648xf32>, vector<4x648xf32>, vector<4x648xf32>, vector<4x648xf32>, vector<4x648xf32>, vector<4x648xf32>, vector<4x648xf32> -> vector<36x648xf32>
    %cst_36 = arith.constant dense<0.000000e+00> : vector<4x648xf32>
    %104 = tpu.matmul %72, %103, %cst_36 {dimension_numbers = #tpu.dot_dimension_numbers<[1], [0], [0], [1], [0, 0, 1, 1], [], []>} : vector<4x36xf32>, vector<36x648xf32>, vector<4x648xf32> -> vector<4x648xf32>
    %105 = vector.broadcast %76 : vector<4x1xf32> to vector<4x648xf32>
    %106 = arith.addf %104, %105 : vector<4x648xf32>
    %cst_37 = arith.constant 0.000000e+00 : f32
    %107 = vector.broadcast %cst_37 : f32 to vector<4x648xf32>
    %108 = arith.maximumf %106, %107 : vector<4x648xf32>
    %109 = arith.mulf %108, %1 : vector<4x648xf32>
    %110 = vector.extract_strided_slice %109 {offsets = [0, 629], sizes = [4, 19], strides = [1, 1]} : vector<4x648xf32> to vector<4x19xf32>
    %111 = vector.extract_strided_slice %109 {offsets = [0, 0], sizes = [4, 629], strides = [1, 1]} : vector<4x648xf32> to vector<4x629xf32>
    %112 = tpu.concatenate %110, %111 in 1 : vector<4x19xf32>, vector<4x629xf32> -> vector<4x648xf32>
    %113 = vector.extract_strided_slice %109 {offsets = [0, 630], sizes = [4, 18], strides = [1, 1]} : vector<4x648xf32> to vector<4x18xf32>
    %114 = vector.extract_strided_slice %109 {offsets = [0, 0], sizes = [4, 630], strides = [1, 1]} : vector<4x648xf32> to vector<4x630xf32>
    %115 = tpu.concatenate %113, %114 in 1 : vector<4x18xf32>, vector<4x630xf32> -> vector<4x648xf32>
    %116 = vector.extract_strided_slice %109 {offsets = [0, 631], sizes = [4, 17], strides = [1, 1]} : vector<4x648xf32> to vector<4x17xf32>
    %117 = vector.extract_strided_slice %109 {offsets = [0, 0], sizes = [4, 631], strides = [1, 1]} : vector<4x648xf32> to vector<4x631xf32>
    %118 = tpu.concatenate %116, %117 in 1 : vector<4x17xf32>, vector<4x631xf32> -> vector<4x648xf32>
    %119 = vector.extract_strided_slice %109 {offsets = [0, 647], sizes = [4, 1], strides = [1, 1]} : vector<4x648xf32> to vector<4x1xf32>
    %120 = vector.extract_strided_slice %109 {offsets = [0, 0], sizes = [4, 647], strides = [1, 1]} : vector<4x648xf32> to vector<4x647xf32>
    %121 = tpu.concatenate %119, %120 in 1 : vector<4x1xf32>, vector<4x647xf32> -> vector<4x648xf32>
    %122 = vector.extract_strided_slice %109 {offsets = [0, 1], sizes = [4, 647], strides = [1, 1]} : vector<4x648xf32> to vector<4x647xf32>
    %123 = vector.extract_strided_slice %109 {offsets = [0, 0], sizes = [4, 1], strides = [1, 1]} : vector<4x648xf32> to vector<4x1xf32>
    %124 = tpu.concatenate %122, %123 in 1 : vector<4x647xf32>, vector<4x1xf32> -> vector<4x648xf32>
    %125 = vector.extract_strided_slice %109 {offsets = [0, 17], sizes = [4, 631], strides = [1, 1]} : vector<4x648xf32> to vector<4x631xf32>
    %126 = vector.extract_strided_slice %109 {offsets = [0, 0], sizes = [4, 17], strides = [1, 1]} : vector<4x648xf32> to vector<4x17xf32>
    %127 = tpu.concatenate %125, %126 in 1 : vector<4x631xf32>, vector<4x17xf32> -> vector<4x648xf32>
    %128 = vector.extract_strided_slice %109 {offsets = [0, 18], sizes = [4, 630], strides = [1, 1]} : vector<4x648xf32> to vector<4x630xf32>
    %129 = vector.extract_strided_slice %109 {offsets = [0, 0], sizes = [4, 18], strides = [1, 1]} : vector<4x648xf32> to vector<4x18xf32>
    %130 = tpu.concatenate %128, %129 in 1 : vector<4x630xf32>, vector<4x18xf32> -> vector<4x648xf32>
    %131 = vector.extract_strided_slice %109 {offsets = [0, 19], sizes = [4, 629], strides = [1, 1]} : vector<4x648xf32> to vector<4x629xf32>
    %132 = vector.extract_strided_slice %109 {offsets = [0, 0], sizes = [4, 19], strides = [1, 1]} : vector<4x648xf32> to vector<4x19xf32>
    %133 = tpu.concatenate %131, %132 in 1 : vector<4x629xf32>, vector<4x19xf32> -> vector<4x648xf32>
    %134 = tpu.concatenate %112, %115, %118, %121, %109, %124, %127, %130, %133 in 0 : vector<4x648xf32>, vector<4x648xf32>, vector<4x648xf32>, vector<4x648xf32>, vector<4x648xf32>, vector<4x648xf32>, vector<4x648xf32>, vector<4x648xf32>, vector<4x648xf32> -> vector<36x648xf32>
    %cst_38 = arith.constant dense<0.000000e+00> : vector<4x648xf32>
    %135 = tpu.matmul %74, %134, %cst_38 {dimension_numbers = #tpu.dot_dimension_numbers<[1], [0], [0], [1], [0, 0, 1, 1], [], []>} : vector<4x36xf32>, vector<36x648xf32>, vector<4x648xf32> -> vector<4x648xf32>
    %136 = vector.broadcast %78 : vector<4x1xf32> to vector<4x648xf32>
    %137 = arith.addf %135, %136 : vector<4x648xf32>
    %138 = arith.mulf %137, %1 : vector<4x648xf32>
    %139 = arith.addf %138, %70 : vector<4x648xf32>
    %c2 = arith.constant 2 : index
    %c0_39 = arith.constant 0 : index
    %c0_40 = arith.constant 0 : index
    %c0_41 = arith.constant 0 : index
    %140 = vector.load %arg2[%c2, %c0_39, %c0_40, %c0_41] : memref<8x2x4x36xf32, #tpu.memory_space<vmem>>, vector<1x1x4x36xf32>
    %141 = vector.shape_cast %140 : vector<1x1x4x36xf32> to vector<4x36xf32>
    %c2_42 = arith.constant 2 : index
    %c1_43 = arith.constant 1 : index
    %c0_44 = arith.constant 0 : index
    %c0_45 = arith.constant 0 : index
    %142 = vector.load %arg2[%c2_42, %c1_43, %c0_44, %c0_45] : memref<8x2x4x36xf32, #tpu.memory_space<vmem>>, vector<1x1x4x36xf32>
    %143 = vector.shape_cast %142 : vector<1x1x4x36xf32> to vector<4x36xf32>
    %c2_46 = arith.constant 2 : index
    %c0_47 = arith.constant 0 : index
    %c0_48 = arith.constant 0 : index
    %c0_49 = arith.constant 0 : index
    %144 = vector.load %arg3[%c2_46, %c0_47, %c0_48, %c0_49] : memref<8x2x4x1xf32, #tpu.memory_space<vmem>>, vector<1x1x4x1xf32>
    %145 = vector.shape_cast %144 : vector<1x1x4x1xf32> to vector<4x1xf32>
    %c2_50 = arith.constant 2 : index
    %c1_51 = arith.constant 1 : index
    %c0_52 = arith.constant 0 : index
    %c0_53 = arith.constant 0 : index
    %146 = vector.load %arg3[%c2_50, %c1_51, %c0_52, %c0_53] : memref<8x2x4x1xf32, #tpu.memory_space<vmem>>, vector<1x1x4x1xf32>
    %147 = vector.shape_cast %146 : vector<1x1x4x1xf32> to vector<4x1xf32>
    %148 = vector.extract_strided_slice %139 {offsets = [0, 629], sizes = [4, 19], strides = [1, 1]} : vector<4x648xf32> to vector<4x19xf32>
    %149 = vector.extract_strided_slice %139 {offsets = [0, 0], sizes = [4, 629], strides = [1, 1]} : vector<4x648xf32> to vector<4x629xf32>
    %150 = tpu.concatenate %148, %149 in 1 : vector<4x19xf32>, vector<4x629xf32> -> vector<4x648xf32>
    %151 = vector.extract_strided_slice %139 {offsets = [0, 630], sizes = [4, 18], strides = [1, 1]} : vector<4x648xf32> to vector<4x18xf32>
    %152 = vector.extract_strided_slice %139 {offsets = [0, 0], sizes = [4, 630], strides = [1, 1]} : vector<4x648xf32> to vector<4x630xf32>
    %153 = tpu.concatenate %151, %152 in 1 : vector<4x18xf32>, vector<4x630xf32> -> vector<4x648xf32>
    %154 = vector.extract_strided_slice %139 {offsets = [0, 631], sizes = [4, 17], strides = [1, 1]} : vector<4x648xf32> to vector<4x17xf32>
    %155 = vector.extract_strided_slice %139 {offsets = [0, 0], sizes = [4, 631], strides = [1, 1]} : vector<4x648xf32> to vector<4x631xf32>
    %156 = tpu.concatenate %154, %155 in 1 : vector<4x17xf32>, vector<4x631xf32> -> vector<4x648xf32>
    %157 = vector.extract_strided_slice %139 {offsets = [0, 647], sizes = [4, 1], strides = [1, 1]} : vector<4x648xf32> to vector<4x1xf32>
    %158 = vector.extract_strided_slice %139 {offsets = [0, 0], sizes = [4, 647], strides = [1, 1]} : vector<4x648xf32> to vector<4x647xf32>
    %159 = tpu.concatenate %157, %158 in 1 : vector<4x1xf32>, vector<4x647xf32> -> vector<4x648xf32>
    %160 = vector.extract_strided_slice %139 {offsets = [0, 1], sizes = [4, 647], strides = [1, 1]} : vector<4x648xf32> to vector<4x647xf32>
    %161 = vector.extract_strided_slice %139 {offsets = [0, 0], sizes = [4, 1], strides = [1, 1]} : vector<4x648xf32> to vector<4x1xf32>
    %162 = tpu.concatenate %160, %161 in 1 : vector<4x647xf32>, vector<4x1xf32> -> vector<4x648xf32>
    %163 = vector.extract_strided_slice %139 {offsets = [0, 17], sizes = [4, 631], strides = [1, 1]} : vector<4x648xf32> to vector<4x631xf32>
    %164 = vector.extract_strided_slice %139 {offsets = [0, 0], sizes = [4, 17], strides = [1, 1]} : vector<4x648xf32> to vector<4x17xf32>
    %165 = tpu.concatenate %163, %164 in 1 : vector<4x631xf32>, vector<4x17xf32> -> vector<4x648xf32>
    %166 = vector.extract_strided_slice %139 {offsets = [0, 18], sizes = [4, 630], strides = [1, 1]} : vector<4x648xf32> to vector<4x630xf32>
    %167 = vector.extract_strided_slice %139 {offsets = [0, 0], sizes = [4, 18], strides = [1, 1]} : vector<4x648xf32> to vector<4x18xf32>
    %168 = tpu.concatenate %166, %167 in 1 : vector<4x630xf32>, vector<4x18xf32> -> vector<4x648xf32>
    %169 = vector.extract_strided_slice %139 {offsets = [0, 19], sizes = [4, 629], strides = [1, 1]} : vector<4x648xf32> to vector<4x629xf32>
    %170 = vector.extract_strided_slice %139 {offsets = [0, 0], sizes = [4, 19], strides = [1, 1]} : vector<4x648xf32> to vector<4x19xf32>
    %171 = tpu.concatenate %169, %170 in 1 : vector<4x629xf32>, vector<4x19xf32> -> vector<4x648xf32>
    %172 = tpu.concatenate %150, %153, %156, %159, %139, %162, %165, %168, %171 in 0 : vector<4x648xf32>, vector<4x648xf32>, vector<4x648xf32>, vector<4x648xf32>, vector<4x648xf32>, vector<4x648xf32>, vector<4x648xf32>, vector<4x648xf32>, vector<4x648xf32> -> vector<36x648xf32>
    %cst_54 = arith.constant dense<0.000000e+00> : vector<4x648xf32>
    %173 = tpu.matmul %141, %172, %cst_54 {dimension_numbers = #tpu.dot_dimension_numbers<[1], [0], [0], [1], [0, 0, 1, 1], [], []>} : vector<4x36xf32>, vector<36x648xf32>, vector<4x648xf32> -> vector<4x648xf32>
    %174 = vector.broadcast %145 : vector<4x1xf32> to vector<4x648xf32>
    %175 = arith.addf %173, %174 : vector<4x648xf32>
    %cst_55 = arith.constant 0.000000e+00 : f32
    %176 = vector.broadcast %cst_55 : f32 to vector<4x648xf32>
    %177 = arith.maximumf %175, %176 : vector<4x648xf32>
    %178 = arith.mulf %177, %1 : vector<4x648xf32>
    %179 = vector.extract_strided_slice %178 {offsets = [0, 629], sizes = [4, 19], strides = [1, 1]} : vector<4x648xf32> to vector<4x19xf32>
    %180 = vector.extract_strided_slice %178 {offsets = [0, 0], sizes = [4, 629], strides = [1, 1]} : vector<4x648xf32> to vector<4x629xf32>
    %181 = tpu.concatenate %179, %180 in 1 : vector<4x19xf32>, vector<4x629xf32> -> vector<4x648xf32>
    %182 = vector.extract_strided_slice %178 {offsets = [0, 630], sizes = [4, 18], strides = [1, 1]} : vector<4x648xf32> to vector<4x18xf32>
    %183 = vector.extract_strided_slice %178 {offsets = [0, 0], sizes = [4, 630], strides = [1, 1]} : vector<4x648xf32> to vector<4x630xf32>
    %184 = tpu.concatenate %182, %183 in 1 : vector<4x18xf32>, vector<4x630xf32> -> vector<4x648xf32>
    %185 = vector.extract_strided_slice %178 {offsets = [0, 631], sizes = [4, 17], strides = [1, 1]} : vector<4x648xf32> to vector<4x17xf32>
    %186 = vector.extract_strided_slice %178 {offsets = [0, 0], sizes = [4, 631], strides = [1, 1]} : vector<4x648xf32> to vector<4x631xf32>
    %187 = tpu.concatenate %185, %186 in 1 : vector<4x17xf32>, vector<4x631xf32> -> vector<4x648xf32>
    %188 = vector.extract_strided_slice %178 {offsets = [0, 647], sizes = [4, 1], strides = [1, 1]} : vector<4x648xf32> to vector<4x1xf32>
    %189 = vector.extract_strided_slice %178 {offsets = [0, 0], sizes = [4, 647], strides = [1, 1]} : vector<4x648xf32> to vector<4x647xf32>
    %190 = tpu.concatenate %188, %189 in 1 : vector<4x1xf32>, vector<4x647xf32> -> vector<4x648xf32>
    %191 = vector.extract_strided_slice %178 {offsets = [0, 1], sizes = [4, 647], strides = [1, 1]} : vector<4x648xf32> to vector<4x647xf32>
    %192 = vector.extract_strided_slice %178 {offsets = [0, 0], sizes = [4, 1], strides = [1, 1]} : vector<4x648xf32> to vector<4x1xf32>
    %193 = tpu.concatenate %191, %192 in 1 : vector<4x647xf32>, vector<4x1xf32> -> vector<4x648xf32>
    %194 = vector.extract_strided_slice %178 {offsets = [0, 17], sizes = [4, 631], strides = [1, 1]} : vector<4x648xf32> to vector<4x631xf32>
    %195 = vector.extract_strided_slice %178 {offsets = [0, 0], sizes = [4, 17], strides = [1, 1]} : vector<4x648xf32> to vector<4x17xf32>
    %196 = tpu.concatenate %194, %195 in 1 : vector<4x631xf32>, vector<4x17xf32> -> vector<4x648xf32>
    %197 = vector.extract_strided_slice %178 {offsets = [0, 18], sizes = [4, 630], strides = [1, 1]} : vector<4x648xf32> to vector<4x630xf32>
    %198 = vector.extract_strided_slice %178 {offsets = [0, 0], sizes = [4, 18], strides = [1, 1]} : vector<4x648xf32> to vector<4x18xf32>
    %199 = tpu.concatenate %197, %198 in 1 : vector<4x630xf32>, vector<4x18xf32> -> vector<4x648xf32>
    %200 = vector.extract_strided_slice %178 {offsets = [0, 19], sizes = [4, 629], strides = [1, 1]} : vector<4x648xf32> to vector<4x629xf32>
    %201 = vector.extract_strided_slice %178 {offsets = [0, 0], sizes = [4, 19], strides = [1, 1]} : vector<4x648xf32> to vector<4x19xf32>
    %202 = tpu.concatenate %200, %201 in 1 : vector<4x629xf32>, vector<4x19xf32> -> vector<4x648xf32>
    %203 = tpu.concatenate %181, %184, %187, %190, %178, %193, %196, %199, %202 in 0 : vector<4x648xf32>, vector<4x648xf32>, vector<4x648xf32>, vector<4x648xf32>, vector<4x648xf32>, vector<4x648xf32>, vector<4x648xf32>, vector<4x648xf32>, vector<4x648xf32> -> vector<36x648xf32>
    %cst_56 = arith.constant dense<0.000000e+00> : vector<4x648xf32>
    %204 = tpu.matmul %143, %203, %cst_56 {dimension_numbers = #tpu.dot_dimension_numbers<[1], [0], [0], [1], [0, 0, 1, 1], [], []>} : vector<4x36xf32>, vector<36x648xf32>, vector<4x648xf32> -> vector<4x648xf32>
    %205 = vector.broadcast %147 : vector<4x1xf32> to vector<4x648xf32>
    %206 = arith.addf %204, %205 : vector<4x648xf32>
    %207 = arith.mulf %206, %1 : vector<4x648xf32>
    %208 = arith.addf %207, %139 : vector<4x648xf32>
    %c3 = arith.constant 3 : index
    %c0_57 = arith.constant 0 : index
    %c0_58 = arith.constant 0 : index
    %c0_59 = arith.constant 0 : index
    %209 = vector.load %arg2[%c3, %c0_57, %c0_58, %c0_59] : memref<8x2x4x36xf32, #tpu.memory_space<vmem>>, vector<1x1x4x36xf32>
    %210 = vector.shape_cast %209 : vector<1x1x4x36xf32> to vector<4x36xf32>
    %c3_60 = arith.constant 3 : index
    %c1_61 = arith.constant 1 : index
    %c0_62 = arith.constant 0 : index
    %c0_63 = arith.constant 0 : index
    %211 = vector.load %arg2[%c3_60, %c1_61, %c0_62, %c0_63] : memref<8x2x4x36xf32, #tpu.memory_space<vmem>>, vector<1x1x4x36xf32>
    %212 = vector.shape_cast %211 : vector<1x1x4x36xf32> to vector<4x36xf32>
    %c3_64 = arith.constant 3 : index
    %c0_65 = arith.constant 0 : index
    %c0_66 = arith.constant 0 : index
    %c0_67 = arith.constant 0 : index
    %213 = vector.load %arg3[%c3_64, %c0_65, %c0_66, %c0_67] : memref<8x2x4x1xf32, #tpu.memory_space<vmem>>, vector<1x1x4x1xf32>
    %214 = vector.shape_cast %213 : vector<1x1x4x1xf32> to vector<4x1xf32>
    %c3_68 = arith.constant 3 : index
    %c1_69 = arith.constant 1 : index
    %c0_70 = arith.constant 0 : index
    %c0_71 = arith.constant 0 : index
    %215 = vector.load %arg3[%c3_68, %c1_69, %c0_70, %c0_71] : memref<8x2x4x1xf32, #tpu.memory_space<vmem>>, vector<1x1x4x1xf32>
    %216 = vector.shape_cast %215 : vector<1x1x4x1xf32> to vector<4x1xf32>
    %217 = vector.extract_strided_slice %208 {offsets = [0, 629], sizes = [4, 19], strides = [1, 1]} : vector<4x648xf32> to vector<4x19xf32>
    %218 = vector.extract_strided_slice %208 {offsets = [0, 0], sizes = [4, 629], strides = [1, 1]} : vector<4x648xf32> to vector<4x629xf32>
    %219 = tpu.concatenate %217, %218 in 1 : vector<4x19xf32>, vector<4x629xf32> -> vector<4x648xf32>
    %220 = vector.extract_strided_slice %208 {offsets = [0, 630], sizes = [4, 18], strides = [1, 1]} : vector<4x648xf32> to vector<4x18xf32>
    %221 = vector.extract_strided_slice %208 {offsets = [0, 0], sizes = [4, 630], strides = [1, 1]} : vector<4x648xf32> to vector<4x630xf32>
    %222 = tpu.concatenate %220, %221 in 1 : vector<4x18xf32>, vector<4x630xf32> -> vector<4x648xf32>
    %223 = vector.extract_strided_slice %208 {offsets = [0, 631], sizes = [4, 17], strides = [1, 1]} : vector<4x648xf32> to vector<4x17xf32>
    %224 = vector.extract_strided_slice %208 {offsets = [0, 0], sizes = [4, 631], strides = [1, 1]} : vector<4x648xf32> to vector<4x631xf32>
    %225 = tpu.concatenate %223, %224 in 1 : vector<4x17xf32>, vector<4x631xf32> -> vector<4x648xf32>
    %226 = vector.extract_strided_slice %208 {offsets = [0, 647], sizes = [4, 1], strides = [1, 1]} : vector<4x648xf32> to vector<4x1xf32>
    %227 = vector.extract_strided_slice %208 {offsets = [0, 0], sizes = [4, 647], strides = [1, 1]} : vector<4x648xf32> to vector<4x647xf32>
    %228 = tpu.concatenate %226, %227 in 1 : vector<4x1xf32>, vector<4x647xf32> -> vector<4x648xf32>
    %229 = vector.extract_strided_slice %208 {offsets = [0, 1], sizes = [4, 647], strides = [1, 1]} : vector<4x648xf32> to vector<4x647xf32>
    %230 = vector.extract_strided_slice %208 {offsets = [0, 0], sizes = [4, 1], strides = [1, 1]} : vector<4x648xf32> to vector<4x1xf32>
    %231 = tpu.concatenate %229, %230 in 1 : vector<4x647xf32>, vector<4x1xf32> -> vector<4x648xf32>
    %232 = vector.extract_strided_slice %208 {offsets = [0, 17], sizes = [4, 631], strides = [1, 1]} : vector<4x648xf32> to vector<4x631xf32>
    %233 = vector.extract_strided_slice %208 {offsets = [0, 0], sizes = [4, 17], strides = [1, 1]} : vector<4x648xf32> to vector<4x17xf32>
    %234 = tpu.concatenate %232, %233 in 1 : vector<4x631xf32>, vector<4x17xf32> -> vector<4x648xf32>
    %235 = vector.extract_strided_slice %208 {offsets = [0, 18], sizes = [4, 630], strides = [1, 1]} : vector<4x648xf32> to vector<4x630xf32>
    %236 = vector.extract_strided_slice %208 {offsets = [0, 0], sizes = [4, 18], strides = [1, 1]} : vector<4x648xf32> to vector<4x18xf32>
    %237 = tpu.concatenate %235, %236 in 1 : vector<4x630xf32>, vector<4x18xf32> -> vector<4x648xf32>
    %238 = vector.extract_strided_slice %208 {offsets = [0, 19], sizes = [4, 629], strides = [1, 1]} : vector<4x648xf32> to vector<4x629xf32>
    %239 = vector.extract_strided_slice %208 {offsets = [0, 0], sizes = [4, 19], strides = [1, 1]} : vector<4x648xf32> to vector<4x19xf32>
    %240 = tpu.concatenate %238, %239 in 1 : vector<4x629xf32>, vector<4x19xf32> -> vector<4x648xf32>
    %241 = tpu.concatenate %219, %222, %225, %228, %208, %231, %234, %237, %240 in 0 : vector<4x648xf32>, vector<4x648xf32>, vector<4x648xf32>, vector<4x648xf32>, vector<4x648xf32>, vector<4x648xf32>, vector<4x648xf32>, vector<4x648xf32>, vector<4x648xf32> -> vector<36x648xf32>
    %cst_72 = arith.constant dense<0.000000e+00> : vector<4x648xf32>
    %242 = tpu.matmul %210, %241, %cst_72 {dimension_numbers = #tpu.dot_dimension_numbers<[1], [0], [0], [1], [0, 0, 1, 1], [], []>} : vector<4x36xf32>, vector<36x648xf32>, vector<4x648xf32> -> vector<4x648xf32>
    %243 = vector.broadcast %214 : vector<4x1xf32> to vector<4x648xf32>
    %244 = arith.addf %242, %243 : vector<4x648xf32>
    %cst_73 = arith.constant 0.000000e+00 : f32
    %245 = vector.broadcast %cst_73 : f32 to vector<4x648xf32>
    %246 = arith.maximumf %244, %245 : vector<4x648xf32>
    %247 = arith.mulf %246, %1 : vector<4x648xf32>
    %248 = vector.extract_strided_slice %247 {offsets = [0, 629], sizes = [4, 19], strides = [1, 1]} : vector<4x648xf32> to vector<4x19xf32>
    %249 = vector.extract_strided_slice %247 {offsets = [0, 0], sizes = [4, 629], strides = [1, 1]} : vector<4x648xf32> to vector<4x629xf32>
    %250 = tpu.concatenate %248, %249 in 1 : vector<4x19xf32>, vector<4x629xf32> -> vector<4x648xf32>
    %251 = vector.extract_strided_slice %247 {offsets = [0, 630], sizes = [4, 18], strides = [1, 1]} : vector<4x648xf32> to vector<4x18xf32>
    %252 = vector.extract_strided_slice %247 {offsets = [0, 0], sizes = [4, 630], strides = [1, 1]} : vector<4x648xf32> to vector<4x630xf32>
    %253 = tpu.concatenate %251, %252 in 1 : vector<4x18xf32>, vector<4x630xf32> -> vector<4x648xf32>
    %254 = vector.extract_strided_slice %247 {offsets = [0, 631], sizes = [4, 17], strides = [1, 1]} : vector<4x648xf32> to vector<4x17xf32>
    %255 = vector.extract_strided_slice %247 {offsets = [0, 0], sizes = [4, 631], strides = [1, 1]} : vector<4x648xf32> to vector<4x631xf32>
    %256 = tpu.concatenate %254, %255 in 1 : vector<4x17xf32>, vector<4x631xf32> -> vector<4x648xf32>
    %257 = vector.extract_strided_slice %247 {offsets = [0, 647], sizes = [4, 1], strides = [1, 1]} : vector<4x648xf32> to vector<4x1xf32>
    %258 = vector.extract_strided_slice %247 {offsets = [0, 0], sizes = [4, 647], strides = [1, 1]} : vector<4x648xf32> to vector<4x647xf32>
    %259 = tpu.concatenate %257, %258 in 1 : vector<4x1xf32>, vector<4x647xf32> -> vector<4x648xf32>
    %260 = vector.extract_strided_slice %247 {offsets = [0, 1], sizes = [4, 647], strides = [1, 1]} : vector<4x648xf32> to vector<4x647xf32>
    %261 = vector.extract_strided_slice %247 {offsets = [0, 0], sizes = [4, 1], strides = [1, 1]} : vector<4x648xf32> to vector<4x1xf32>
    %262 = tpu.concatenate %260, %261 in 1 : vector<4x647xf32>, vector<4x1xf32> -> vector<4x648xf32>
    %263 = vector.extract_strided_slice %247 {offsets = [0, 17], sizes = [4, 631], strides = [1, 1]} : vector<4x648xf32> to vector<4x631xf32>
    %264 = vector.extract_strided_slice %247 {offsets = [0, 0], sizes = [4, 17], strides = [1, 1]} : vector<4x648xf32> to vector<4x17xf32>
    %265 = tpu.concatenate %263, %264 in 1 : vector<4x631xf32>, vector<4x17xf32> -> vector<4x648xf32>
    %266 = vector.extract_strided_slice %247 {offsets = [0, 18], sizes = [4, 630], strides = [1, 1]} : vector<4x648xf32> to vector<4x630xf32>
    %267 = vector.extract_strided_slice %247 {offsets = [0, 0], sizes = [4, 18], strides = [1, 1]} : vector<4x648xf32> to vector<4x18xf32>
    %268 = tpu.concatenate %266, %267 in 1 : vector<4x630xf32>, vector<4x18xf32> -> vector<4x648xf32>
    %269 = vector.extract_strided_slice %247 {offsets = [0, 19], sizes = [4, 629], strides = [1, 1]} : vector<4x648xf32> to vector<4x629xf32>
    %270 = vector.extract_strided_slice %247 {offsets = [0, 0], sizes = [4, 19], strides = [1, 1]} : vector<4x648xf32> to vector<4x19xf32>
    %271 = tpu.concatenate %269, %270 in 1 : vector<4x629xf32>, vector<4x19xf32> -> vector<4x648xf32>
    %272 = tpu.concatenate %250, %253, %256, %259, %247, %262, %265, %268, %271 in 0 : vector<4x648xf32>, vector<4x648xf32>, vector<4x648xf32>, vector<4x648xf32>, vector<4x648xf32>, vector<4x648xf32>, vector<4x648xf32>, vector<4x648xf32>, vector<4x648xf32> -> vector<36x648xf32>
    %cst_74 = arith.constant dense<0.000000e+00> : vector<4x648xf32>
    %273 = tpu.matmul %212, %272, %cst_74 {dimension_numbers = #tpu.dot_dimension_numbers<[1], [0], [0], [1], [0, 0, 1, 1], [], []>} : vector<4x36xf32>, vector<36x648xf32>, vector<4x648xf32> -> vector<4x648xf32>
    %274 = vector.broadcast %216 : vector<4x1xf32> to vector<4x648xf32>
    %275 = arith.addf %273, %274 : vector<4x648xf32>
    %276 = arith.mulf %275, %1 : vector<4x648xf32>
    %277 = arith.addf %276, %208 : vector<4x648xf32>
    %c4 = arith.constant 4 : index
    %c0_75 = arith.constant 0 : index
    %c0_76 = arith.constant 0 : index
    %c0_77 = arith.constant 0 : index
    %278 = vector.load %arg2[%c4, %c0_75, %c0_76, %c0_77] : memref<8x2x4x36xf32, #tpu.memory_space<vmem>>, vector<1x1x4x36xf32>
    %279 = vector.shape_cast %278 : vector<1x1x4x36xf32> to vector<4x36xf32>
    %c4_78 = arith.constant 4 : index
    %c1_79 = arith.constant 1 : index
    %c0_80 = arith.constant 0 : index
    %c0_81 = arith.constant 0 : index
    %280 = vector.load %arg2[%c4_78, %c1_79, %c0_80, %c0_81] : memref<8x2x4x36xf32, #tpu.memory_space<vmem>>, vector<1x1x4x36xf32>
    %281 = vector.shape_cast %280 : vector<1x1x4x36xf32> to vector<4x36xf32>
    %c4_82 = arith.constant 4 : index
    %c0_83 = arith.constant 0 : index
    %c0_84 = arith.constant 0 : index
    %c0_85 = arith.constant 0 : index
    %282 = vector.load %arg3[%c4_82, %c0_83, %c0_84, %c0_85] : memref<8x2x4x1xf32, #tpu.memory_space<vmem>>, vector<1x1x4x1xf32>
    %283 = vector.shape_cast %282 : vector<1x1x4x1xf32> to vector<4x1xf32>
    %c4_86 = arith.constant 4 : index
    %c1_87 = arith.constant 1 : index
    %c0_88 = arith.constant 0 : index
    %c0_89 = arith.constant 0 : index
    %284 = vector.load %arg3[%c4_86, %c1_87, %c0_88, %c0_89] : memref<8x2x4x1xf32, #tpu.memory_space<vmem>>, vector<1x1x4x1xf32>
    %285 = vector.shape_cast %284 : vector<1x1x4x1xf32> to vector<4x1xf32>
    %286 = vector.extract_strided_slice %277 {offsets = [0, 629], sizes = [4, 19], strides = [1, 1]} : vector<4x648xf32> to vector<4x19xf32>
    %287 = vector.extract_strided_slice %277 {offsets = [0, 0], sizes = [4, 629], strides = [1, 1]} : vector<4x648xf32> to vector<4x629xf32>
    %288 = tpu.concatenate %286, %287 in 1 : vector<4x19xf32>, vector<4x629xf32> -> vector<4x648xf32>
    %289 = vector.extract_strided_slice %277 {offsets = [0, 630], sizes = [4, 18], strides = [1, 1]} : vector<4x648xf32> to vector<4x18xf32>
    %290 = vector.extract_strided_slice %277 {offsets = [0, 0], sizes = [4, 630], strides = [1, 1]} : vector<4x648xf32> to vector<4x630xf32>
    %291 = tpu.concatenate %289, %290 in 1 : vector<4x18xf32>, vector<4x630xf32> -> vector<4x648xf32>
    %292 = vector.extract_strided_slice %277 {offsets = [0, 631], sizes = [4, 17], strides = [1, 1]} : vector<4x648xf32> to vector<4x17xf32>
    %293 = vector.extract_strided_slice %277 {offsets = [0, 0], sizes = [4, 631], strides = [1, 1]} : vector<4x648xf32> to vector<4x631xf32>
    %294 = tpu.concatenate %292, %293 in 1 : vector<4x17xf32>, vector<4x631xf32> -> vector<4x648xf32>
    %295 = vector.extract_strided_slice %277 {offsets = [0, 647], sizes = [4, 1], strides = [1, 1]} : vector<4x648xf32> to vector<4x1xf32>
    %296 = vector.extract_strided_slice %277 {offsets = [0, 0], sizes = [4, 647], strides = [1, 1]} : vector<4x648xf32> to vector<4x647xf32>
    %297 = tpu.concatenate %295, %296 in 1 : vector<4x1xf32>, vector<4x647xf32> -> vector<4x648xf32>
    %298 = vector.extract_strided_slice %277 {offsets = [0, 1], sizes = [4, 647], strides = [1, 1]} : vector<4x648xf32> to vector<4x647xf32>
    %299 = vector.extract_strided_slice %277 {offsets = [0, 0], sizes = [4, 1], strides = [1, 1]} : vector<4x648xf32> to vector<4x1xf32>
    %300 = tpu.concatenate %298, %299 in 1 : vector<4x647xf32>, vector<4x1xf32> -> vector<4x648xf32>
    %301 = vector.extract_strided_slice %277 {offsets = [0, 17], sizes = [4, 631], strides = [1, 1]} : vector<4x648xf32> to vector<4x631xf32>
    %302 = vector.extract_strided_slice %277 {offsets = [0, 0], sizes = [4, 17], strides = [1, 1]} : vector<4x648xf32> to vector<4x17xf32>
    %303 = tpu.concatenate %301, %302 in 1 : vector<4x631xf32>, vector<4x17xf32> -> vector<4x648xf32>
    %304 = vector.extract_strided_slice %277 {offsets = [0, 18], sizes = [4, 630], strides = [1, 1]} : vector<4x648xf32> to vector<4x630xf32>
    %305 = vector.extract_strided_slice %277 {offsets = [0, 0], sizes = [4, 18], strides = [1, 1]} : vector<4x648xf32> to vector<4x18xf32>
    %306 = tpu.concatenate %304, %305 in 1 : vector<4x630xf32>, vector<4x18xf32> -> vector<4x648xf32>
    %307 = vector.extract_strided_slice %277 {offsets = [0, 19], sizes = [4, 629], strides = [1, 1]} : vector<4x648xf32> to vector<4x629xf32>
    %308 = vector.extract_strided_slice %277 {offsets = [0, 0], sizes = [4, 19], strides = [1, 1]} : vector<4x648xf32> to vector<4x19xf32>
    %309 = tpu.concatenate %307, %308 in 1 : vector<4x629xf32>, vector<4x19xf32> -> vector<4x648xf32>
    %310 = tpu.concatenate %288, %291, %294, %297, %277, %300, %303, %306, %309 in 0 : vector<4x648xf32>, vector<4x648xf32>, vector<4x648xf32>, vector<4x648xf32>, vector<4x648xf32>, vector<4x648xf32>, vector<4x648xf32>, vector<4x648xf32>, vector<4x648xf32> -> vector<36x648xf32>
    %cst_90 = arith.constant dense<0.000000e+00> : vector<4x648xf32>
    %311 = tpu.matmul %279, %310, %cst_90 {dimension_numbers = #tpu.dot_dimension_numbers<[1], [0], [0], [1], [0, 0, 1, 1], [], []>} : vector<4x36xf32>, vector<36x648xf32>, vector<4x648xf32> -> vector<4x648xf32>
    %312 = vector.broadcast %283 : vector<4x1xf32> to vector<4x648xf32>
    %313 = arith.addf %311, %312 : vector<4x648xf32>
    %cst_91 = arith.constant 0.000000e+00 : f32
    %314 = vector.broadcast %cst_91 : f32 to vector<4x648xf32>
    %315 = arith.maximumf %313, %314 : vector<4x648xf32>
    %316 = arith.mulf %315, %1 : vector<4x648xf32>
    %317 = vector.extract_strided_slice %316 {offsets = [0, 629], sizes = [4, 19], strides = [1, 1]} : vector<4x648xf32> to vector<4x19xf32>
    %318 = vector.extract_strided_slice %316 {offsets = [0, 0], sizes = [4, 629], strides = [1, 1]} : vector<4x648xf32> to vector<4x629xf32>
    %319 = tpu.concatenate %317, %318 in 1 : vector<4x19xf32>, vector<4x629xf32> -> vector<4x648xf32>
    %320 = vector.extract_strided_slice %316 {offsets = [0, 630], sizes = [4, 18], strides = [1, 1]} : vector<4x648xf32> to vector<4x18xf32>
    %321 = vector.extract_strided_slice %316 {offsets = [0, 0], sizes = [4, 630], strides = [1, 1]} : vector<4x648xf32> to vector<4x630xf32>
    %322 = tpu.concatenate %320, %321 in 1 : vector<4x18xf32>, vector<4x630xf32> -> vector<4x648xf32>
    %323 = vector.extract_strided_slice %316 {offsets = [0, 631], sizes = [4, 17], strides = [1, 1]} : vector<4x648xf32> to vector<4x17xf32>
    %324 = vector.extract_strided_slice %316 {offsets = [0, 0], sizes = [4, 631], strides = [1, 1]} : vector<4x648xf32> to vector<4x631xf32>
    %325 = tpu.concatenate %323, %324 in 1 : vector<4x17xf32>, vector<4x631xf32> -> vector<4x648xf32>
    %326 = vector.extract_strided_slice %316 {offsets = [0, 647], sizes = [4, 1], strides = [1, 1]} : vector<4x648xf32> to vector<4x1xf32>
    %327 = vector.extract_strided_slice %316 {offsets = [0, 0], sizes = [4, 647], strides = [1, 1]} : vector<4x648xf32> to vector<4x647xf32>
    %328 = tpu.concatenate %326, %327 in 1 : vector<4x1xf32>, vector<4x647xf32> -> vector<4x648xf32>
    %329 = vector.extract_strided_slice %316 {offsets = [0, 1], sizes = [4, 647], strides = [1, 1]} : vector<4x648xf32> to vector<4x647xf32>
    %330 = vector.extract_strided_slice %316 {offsets = [0, 0], sizes = [4, 1], strides = [1, 1]} : vector<4x648xf32> to vector<4x1xf32>
    %331 = tpu.concatenate %329, %330 in 1 : vector<4x647xf32>, vector<4x1xf32> -> vector<4x648xf32>
    %332 = vector.extract_strided_slice %316 {offsets = [0, 17], sizes = [4, 631], strides = [1, 1]} : vector<4x648xf32> to vector<4x631xf32>
    %333 = vector.extract_strided_slice %316 {offsets = [0, 0], sizes = [4, 17], strides = [1, 1]} : vector<4x648xf32> to vector<4x17xf32>
    %334 = tpu.concatenate %332, %333 in 1 : vector<4x631xf32>, vector<4x17xf32> -> vector<4x648xf32>
    %335 = vector.extract_strided_slice %316 {offsets = [0, 18], sizes = [4, 630], strides = [1, 1]} : vector<4x648xf32> to vector<4x630xf32>
    %336 = vector.extract_strided_slice %316 {offsets = [0, 0], sizes = [4, 18], strides = [1, 1]} : vector<4x648xf32> to vector<4x18xf32>
    %337 = tpu.concatenate %335, %336 in 1 : vector<4x630xf32>, vector<4x18xf32> -> vector<4x648xf32>
    %338 = vector.extract_strided_slice %316 {offsets = [0, 19], sizes = [4, 629], strides = [1, 1]} : vector<4x648xf32> to vector<4x629xf32>
    %339 = vector.extract_strided_slice %316 {offsets = [0, 0], sizes = [4, 19], strides = [1, 1]} : vector<4x648xf32> to vector<4x19xf32>
    %340 = tpu.concatenate %338, %339 in 1 : vector<4x629xf32>, vector<4x19xf32> -> vector<4x648xf32>
    %341 = tpu.concatenate %319, %322, %325, %328, %316, %331, %334, %337, %340 in 0 : vector<4x648xf32>, vector<4x648xf32>, vector<4x648xf32>, vector<4x648xf32>, vector<4x648xf32>, vector<4x648xf32>, vector<4x648xf32>, vector<4x648xf32>, vector<4x648xf32> -> vector<36x648xf32>
    %cst_92 = arith.constant dense<0.000000e+00> : vector<4x648xf32>
    %342 = tpu.matmul %281, %341, %cst_92 {dimension_numbers = #tpu.dot_dimension_numbers<[1], [0], [0], [1], [0, 0, 1, 1], [], []>} : vector<4x36xf32>, vector<36x648xf32>, vector<4x648xf32> -> vector<4x648xf32>
    %343 = vector.broadcast %285 : vector<4x1xf32> to vector<4x648xf32>
    %344 = arith.addf %342, %343 : vector<4x648xf32>
    %345 = arith.mulf %344, %1 : vector<4x648xf32>
    %346 = arith.addf %345, %277 : vector<4x648xf32>
    %c5 = arith.constant 5 : index
    %c0_93 = arith.constant 0 : index
    %c0_94 = arith.constant 0 : index
    %c0_95 = arith.constant 0 : index
    %347 = vector.load %arg2[%c5, %c0_93, %c0_94, %c0_95] : memref<8x2x4x36xf32, #tpu.memory_space<vmem>>, vector<1x1x4x36xf32>
    %348 = vector.shape_cast %347 : vector<1x1x4x36xf32> to vector<4x36xf32>
    %c5_96 = arith.constant 5 : index
    %c1_97 = arith.constant 1 : index
    %c0_98 = arith.constant 0 : index
    %c0_99 = arith.constant 0 : index
    %349 = vector.load %arg2[%c5_96, %c1_97, %c0_98, %c0_99] : memref<8x2x4x36xf32, #tpu.memory_space<vmem>>, vector<1x1x4x36xf32>
    %350 = vector.shape_cast %349 : vector<1x1x4x36xf32> to vector<4x36xf32>
    %c5_100 = arith.constant 5 : index
    %c0_101 = arith.constant 0 : index
    %c0_102 = arith.constant 0 : index
    %c0_103 = arith.constant 0 : index
    %351 = vector.load %arg3[%c5_100, %c0_101, %c0_102, %c0_103] : memref<8x2x4x1xf32, #tpu.memory_space<vmem>>, vector<1x1x4x1xf32>
    %352 = vector.shape_cast %351 : vector<1x1x4x1xf32> to vector<4x1xf32>
    %c5_104 = arith.constant 5 : index
    %c1_105 = arith.constant 1 : index
    %c0_106 = arith.constant 0 : index
    %c0_107 = arith.constant 0 : index
    %353 = vector.load %arg3[%c5_104, %c1_105, %c0_106, %c0_107] : memref<8x2x4x1xf32, #tpu.memory_space<vmem>>, vector<1x1x4x1xf32>
    %354 = vector.shape_cast %353 : vector<1x1x4x1xf32> to vector<4x1xf32>
    %355 = vector.extract_strided_slice %346 {offsets = [0, 629], sizes = [4, 19], strides = [1, 1]} : vector<4x648xf32> to vector<4x19xf32>
    %356 = vector.extract_strided_slice %346 {offsets = [0, 0], sizes = [4, 629], strides = [1, 1]} : vector<4x648xf32> to vector<4x629xf32>
    %357 = tpu.concatenate %355, %356 in 1 : vector<4x19xf32>, vector<4x629xf32> -> vector<4x648xf32>
    %358 = vector.extract_strided_slice %346 {offsets = [0, 630], sizes = [4, 18], strides = [1, 1]} : vector<4x648xf32> to vector<4x18xf32>
    %359 = vector.extract_strided_slice %346 {offsets = [0, 0], sizes = [4, 630], strides = [1, 1]} : vector<4x648xf32> to vector<4x630xf32>
    %360 = tpu.concatenate %358, %359 in 1 : vector<4x18xf32>, vector<4x630xf32> -> vector<4x648xf32>
    %361 = vector.extract_strided_slice %346 {offsets = [0, 631], sizes = [4, 17], strides = [1, 1]} : vector<4x648xf32> to vector<4x17xf32>
    %362 = vector.extract_strided_slice %346 {offsets = [0, 0], sizes = [4, 631], strides = [1, 1]} : vector<4x648xf32> to vector<4x631xf32>
    %363 = tpu.concatenate %361, %362 in 1 : vector<4x17xf32>, vector<4x631xf32> -> vector<4x648xf32>
    %364 = vector.extract_strided_slice %346 {offsets = [0, 647], sizes = [4, 1], strides = [1, 1]} : vector<4x648xf32> to vector<4x1xf32>
    %365 = vector.extract_strided_slice %346 {offsets = [0, 0], sizes = [4, 647], strides = [1, 1]} : vector<4x648xf32> to vector<4x647xf32>
    %366 = tpu.concatenate %364, %365 in 1 : vector<4x1xf32>, vector<4x647xf32> -> vector<4x648xf32>
    %367 = vector.extract_strided_slice %346 {offsets = [0, 1], sizes = [4, 647], strides = [1, 1]} : vector<4x648xf32> to vector<4x647xf32>
    %368 = vector.extract_strided_slice %346 {offsets = [0, 0], sizes = [4, 1], strides = [1, 1]} : vector<4x648xf32> to vector<4x1xf32>
    %369 = tpu.concatenate %367, %368 in 1 : vector<4x647xf32>, vector<4x1xf32> -> vector<4x648xf32>
    %370 = vector.extract_strided_slice %346 {offsets = [0, 17], sizes = [4, 631], strides = [1, 1]} : vector<4x648xf32> to vector<4x631xf32>
    %371 = vector.extract_strided_slice %346 {offsets = [0, 0], sizes = [4, 17], strides = [1, 1]} : vector<4x648xf32> to vector<4x17xf32>
    %372 = tpu.concatenate %370, %371 in 1 : vector<4x631xf32>, vector<4x17xf32> -> vector<4x648xf32>
    %373 = vector.extract_strided_slice %346 {offsets = [0, 18], sizes = [4, 630], strides = [1, 1]} : vector<4x648xf32> to vector<4x630xf32>
    %374 = vector.extract_strided_slice %346 {offsets = [0, 0], sizes = [4, 18], strides = [1, 1]} : vector<4x648xf32> to vector<4x18xf32>
    %375 = tpu.concatenate %373, %374 in 1 : vector<4x630xf32>, vector<4x18xf32> -> vector<4x648xf32>
    %376 = vector.extract_strided_slice %346 {offsets = [0, 19], sizes = [4, 629], strides = [1, 1]} : vector<4x648xf32> to vector<4x629xf32>
    %377 = vector.extract_strided_slice %346 {offsets = [0, 0], sizes = [4, 19], strides = [1, 1]} : vector<4x648xf32> to vector<4x19xf32>
    %378 = tpu.concatenate %376, %377 in 1 : vector<4x629xf32>, vector<4x19xf32> -> vector<4x648xf32>
    %379 = tpu.concatenate %357, %360, %363, %366, %346, %369, %372, %375, %378 in 0 : vector<4x648xf32>, vector<4x648xf32>, vector<4x648xf32>, vector<4x648xf32>, vector<4x648xf32>, vector<4x648xf32>, vector<4x648xf32>, vector<4x648xf32>, vector<4x648xf32> -> vector<36x648xf32>
    %cst_108 = arith.constant dense<0.000000e+00> : vector<4x648xf32>
    %380 = tpu.matmul %348, %379, %cst_108 {dimension_numbers = #tpu.dot_dimension_numbers<[1], [0], [0], [1], [0, 0, 1, 1], [], []>} : vector<4x36xf32>, vector<36x648xf32>, vector<4x648xf32> -> vector<4x648xf32>
    %381 = vector.broadcast %352 : vector<4x1xf32> to vector<4x648xf32>
    %382 = arith.addf %380, %381 : vector<4x648xf32>
    %cst_109 = arith.constant 0.000000e+00 : f32
    %383 = vector.broadcast %cst_109 : f32 to vector<4x648xf32>
    %384 = arith.maximumf %382, %383 : vector<4x648xf32>
    %385 = arith.mulf %384, %1 : vector<4x648xf32>
    %386 = vector.extract_strided_slice %385 {offsets = [0, 629], sizes = [4, 19], strides = [1, 1]} : vector<4x648xf32> to vector<4x19xf32>
    %387 = vector.extract_strided_slice %385 {offsets = [0, 0], sizes = [4, 629], strides = [1, 1]} : vector<4x648xf32> to vector<4x629xf32>
    %388 = tpu.concatenate %386, %387 in 1 : vector<4x19xf32>, vector<4x629xf32> -> vector<4x648xf32>
    %389 = vector.extract_strided_slice %385 {offsets = [0, 630], sizes = [4, 18], strides = [1, 1]} : vector<4x648xf32> to vector<4x18xf32>
    %390 = vector.extract_strided_slice %385 {offsets = [0, 0], sizes = [4, 630], strides = [1, 1]} : vector<4x648xf32> to vector<4x630xf32>
    %391 = tpu.concatenate %389, %390 in 1 : vector<4x18xf32>, vector<4x630xf32> -> vector<4x648xf32>
    %392 = vector.extract_strided_slice %385 {offsets = [0, 631], sizes = [4, 17], strides = [1, 1]} : vector<4x648xf32> to vector<4x17xf32>
    %393 = vector.extract_strided_slice %385 {offsets = [0, 0], sizes = [4, 631], strides = [1, 1]} : vector<4x648xf32> to vector<4x631xf32>
    %394 = tpu.concatenate %392, %393 in 1 : vector<4x17xf32>, vector<4x631xf32> -> vector<4x648xf32>
    %395 = vector.extract_strided_slice %385 {offsets = [0, 647], sizes = [4, 1], strides = [1, 1]} : vector<4x648xf32> to vector<4x1xf32>
    %396 = vector.extract_strided_slice %385 {offsets = [0, 0], sizes = [4, 647], strides = [1, 1]} : vector<4x648xf32> to vector<4x647xf32>
    %397 = tpu.concatenate %395, %396 in 1 : vector<4x1xf32>, vector<4x647xf32> -> vector<4x648xf32>
    %398 = vector.extract_strided_slice %385 {offsets = [0, 1], sizes = [4, 647], strides = [1, 1]} : vector<4x648xf32> to vector<4x647xf32>
    %399 = vector.extract_strided_slice %385 {offsets = [0, 0], sizes = [4, 1], strides = [1, 1]} : vector<4x648xf32> to vector<4x1xf32>
    %400 = tpu.concatenate %398, %399 in 1 : vector<4x647xf32>, vector<4x1xf32> -> vector<4x648xf32>
    %401 = vector.extract_strided_slice %385 {offsets = [0, 17], sizes = [4, 631], strides = [1, 1]} : vector<4x648xf32> to vector<4x631xf32>
    %402 = vector.extract_strided_slice %385 {offsets = [0, 0], sizes = [4, 17], strides = [1, 1]} : vector<4x648xf32> to vector<4x17xf32>
    %403 = tpu.concatenate %401, %402 in 1 : vector<4x631xf32>, vector<4x17xf32> -> vector<4x648xf32>
    %404 = vector.extract_strided_slice %385 {offsets = [0, 18], sizes = [4, 630], strides = [1, 1]} : vector<4x648xf32> to vector<4x630xf32>
    %405 = vector.extract_strided_slice %385 {offsets = [0, 0], sizes = [4, 18], strides = [1, 1]} : vector<4x648xf32> to vector<4x18xf32>
    %406 = tpu.concatenate %404, %405 in 1 : vector<4x630xf32>, vector<4x18xf32> -> vector<4x648xf32>
    %407 = vector.extract_strided_slice %385 {offsets = [0, 19], sizes = [4, 629], strides = [1, 1]} : vector<4x648xf32> to vector<4x629xf32>
    %408 = vector.extract_strided_slice %385 {offsets = [0, 0], sizes = [4, 19], strides = [1, 1]} : vector<4x648xf32> to vector<4x19xf32>
    %409 = tpu.concatenate %407, %408 in 1 : vector<4x629xf32>, vector<4x19xf32> -> vector<4x648xf32>
    %410 = tpu.concatenate %388, %391, %394, %397, %385, %400, %403, %406, %409 in 0 : vector<4x648xf32>, vector<4x648xf32>, vector<4x648xf32>, vector<4x648xf32>, vector<4x648xf32>, vector<4x648xf32>, vector<4x648xf32>, vector<4x648xf32>, vector<4x648xf32> -> vector<36x648xf32>
    %cst_110 = arith.constant dense<0.000000e+00> : vector<4x648xf32>
    %411 = tpu.matmul %350, %410, %cst_110 {dimension_numbers = #tpu.dot_dimension_numbers<[1], [0], [0], [1], [0, 0, 1, 1], [], []>} : vector<4x36xf32>, vector<36x648xf32>, vector<4x648xf32> -> vector<4x648xf32>
    %412 = vector.broadcast %354 : vector<4x1xf32> to vector<4x648xf32>
    %413 = arith.addf %411, %412 : vector<4x648xf32>
    %414 = arith.mulf %413, %1 : vector<4x648xf32>
    %415 = arith.addf %414, %346 : vector<4x648xf32>
    %c6 = arith.constant 6 : index
    %c0_111 = arith.constant 0 : index
    %c0_112 = arith.constant 0 : index
    %c0_113 = arith.constant 0 : index
    %416 = vector.load %arg2[%c6, %c0_111, %c0_112, %c0_113] : memref<8x2x4x36xf32, #tpu.memory_space<vmem>>, vector<1x1x4x36xf32>
    %417 = vector.shape_cast %416 : vector<1x1x4x36xf32> to vector<4x36xf32>
    %c6_114 = arith.constant 6 : index
    %c1_115 = arith.constant 1 : index
    %c0_116 = arith.constant 0 : index
    %c0_117 = arith.constant 0 : index
    %418 = vector.load %arg2[%c6_114, %c1_115, %c0_116, %c0_117] : memref<8x2x4x36xf32, #tpu.memory_space<vmem>>, vector<1x1x4x36xf32>
    %419 = vector.shape_cast %418 : vector<1x1x4x36xf32> to vector<4x36xf32>
    %c6_118 = arith.constant 6 : index
    %c0_119 = arith.constant 0 : index
    %c0_120 = arith.constant 0 : index
    %c0_121 = arith.constant 0 : index
    %420 = vector.load %arg3[%c6_118, %c0_119, %c0_120, %c0_121] : memref<8x2x4x1xf32, #tpu.memory_space<vmem>>, vector<1x1x4x1xf32>
    %421 = vector.shape_cast %420 : vector<1x1x4x1xf32> to vector<4x1xf32>
    %c6_122 = arith.constant 6 : index
    %c1_123 = arith.constant 1 : index
    %c0_124 = arith.constant 0 : index
    %c0_125 = arith.constant 0 : index
    %422 = vector.load %arg3[%c6_122, %c1_123, %c0_124, %c0_125] : memref<8x2x4x1xf32, #tpu.memory_space<vmem>>, vector<1x1x4x1xf32>
    %423 = vector.shape_cast %422 : vector<1x1x4x1xf32> to vector<4x1xf32>
    %424 = vector.extract_strided_slice %415 {offsets = [0, 629], sizes = [4, 19], strides = [1, 1]} : vector<4x648xf32> to vector<4x19xf32>
    %425 = vector.extract_strided_slice %415 {offsets = [0, 0], sizes = [4, 629], strides = [1, 1]} : vector<4x648xf32> to vector<4x629xf32>
    %426 = tpu.concatenate %424, %425 in 1 : vector<4x19xf32>, vector<4x629xf32> -> vector<4x648xf32>
    %427 = vector.extract_strided_slice %415 {offsets = [0, 630], sizes = [4, 18], strides = [1, 1]} : vector<4x648xf32> to vector<4x18xf32>
    %428 = vector.extract_strided_slice %415 {offsets = [0, 0], sizes = [4, 630], strides = [1, 1]} : vector<4x648xf32> to vector<4x630xf32>
    %429 = tpu.concatenate %427, %428 in 1 : vector<4x18xf32>, vector<4x630xf32> -> vector<4x648xf32>
    %430 = vector.extract_strided_slice %415 {offsets = [0, 631], sizes = [4, 17], strides = [1, 1]} : vector<4x648xf32> to vector<4x17xf32>
    %431 = vector.extract_strided_slice %415 {offsets = [0, 0], sizes = [4, 631], strides = [1, 1]} : vector<4x648xf32> to vector<4x631xf32>
    %432 = tpu.concatenate %430, %431 in 1 : vector<4x17xf32>, vector<4x631xf32> -> vector<4x648xf32>
    %433 = vector.extract_strided_slice %415 {offsets = [0, 647], sizes = [4, 1], strides = [1, 1]} : vector<4x648xf32> to vector<4x1xf32>
    %434 = vector.extract_strided_slice %415 {offsets = [0, 0], sizes = [4, 647], strides = [1, 1]} : vector<4x648xf32> to vector<4x647xf32>
    %435 = tpu.concatenate %433, %434 in 1 : vector<4x1xf32>, vector<4x647xf32> -> vector<4x648xf32>
    %436 = vector.extract_strided_slice %415 {offsets = [0, 1], sizes = [4, 647], strides = [1, 1]} : vector<4x648xf32> to vector<4x647xf32>
    %437 = vector.extract_strided_slice %415 {offsets = [0, 0], sizes = [4, 1], strides = [1, 1]} : vector<4x648xf32> to vector<4x1xf32>
    %438 = tpu.concatenate %436, %437 in 1 : vector<4x647xf32>, vector<4x1xf32> -> vector<4x648xf32>
    %439 = vector.extract_strided_slice %415 {offsets = [0, 17], sizes = [4, 631], strides = [1, 1]} : vector<4x648xf32> to vector<4x631xf32>
    %440 = vector.extract_strided_slice %415 {offsets = [0, 0], sizes = [4, 17], strides = [1, 1]} : vector<4x648xf32> to vector<4x17xf32>
    %441 = tpu.concatenate %439, %440 in 1 : vector<4x631xf32>, vector<4x17xf32> -> vector<4x648xf32>
    %442 = vector.extract_strided_slice %415 {offsets = [0, 18], sizes = [4, 630], strides = [1, 1]} : vector<4x648xf32> to vector<4x630xf32>
    %443 = vector.extract_strided_slice %415 {offsets = [0, 0], sizes = [4, 18], strides = [1, 1]} : vector<4x648xf32> to vector<4x18xf32>
    %444 = tpu.concatenate %442, %443 in 1 : vector<4x630xf32>, vector<4x18xf32> -> vector<4x648xf32>
    %445 = vector.extract_strided_slice %415 {offsets = [0, 19], sizes = [4, 629], strides = [1, 1]} : vector<4x648xf32> to vector<4x629xf32>
    %446 = vector.extract_strided_slice %415 {offsets = [0, 0], sizes = [4, 19], strides = [1, 1]} : vector<4x648xf32> to vector<4x19xf32>
    %447 = tpu.concatenate %445, %446 in 1 : vector<4x629xf32>, vector<4x19xf32> -> vector<4x648xf32>
    %448 = tpu.concatenate %426, %429, %432, %435, %415, %438, %441, %444, %447 in 0 : vector<4x648xf32>, vector<4x648xf32>, vector<4x648xf32>, vector<4x648xf32>, vector<4x648xf32>, vector<4x648xf32>, vector<4x648xf32>, vector<4x648xf32>, vector<4x648xf32> -> vector<36x648xf32>
    %cst_126 = arith.constant dense<0.000000e+00> : vector<4x648xf32>
    %449 = tpu.matmul %417, %448, %cst_126 {dimension_numbers = #tpu.dot_dimension_numbers<[1], [0], [0], [1], [0, 0, 1, 1], [], []>} : vector<4x36xf32>, vector<36x648xf32>, vector<4x648xf32> -> vector<4x648xf32>
    %450 = vector.broadcast %421 : vector<4x1xf32> to vector<4x648xf32>
    %451 = arith.addf %449, %450 : vector<4x648xf32>
    %cst_127 = arith.constant 0.000000e+00 : f32
    %452 = vector.broadcast %cst_127 : f32 to vector<4x648xf32>
    %453 = arith.maximumf %451, %452 : vector<4x648xf32>
    %454 = arith.mulf %453, %1 : vector<4x648xf32>
    %455 = vector.extract_strided_slice %454 {offsets = [0, 629], sizes = [4, 19], strides = [1, 1]} : vector<4x648xf32> to vector<4x19xf32>
    %456 = vector.extract_strided_slice %454 {offsets = [0, 0], sizes = [4, 629], strides = [1, 1]} : vector<4x648xf32> to vector<4x629xf32>
    %457 = tpu.concatenate %455, %456 in 1 : vector<4x19xf32>, vector<4x629xf32> -> vector<4x648xf32>
    %458 = vector.extract_strided_slice %454 {offsets = [0, 630], sizes = [4, 18], strides = [1, 1]} : vector<4x648xf32> to vector<4x18xf32>
    %459 = vector.extract_strided_slice %454 {offsets = [0, 0], sizes = [4, 630], strides = [1, 1]} : vector<4x648xf32> to vector<4x630xf32>
    %460 = tpu.concatenate %458, %459 in 1 : vector<4x18xf32>, vector<4x630xf32> -> vector<4x648xf32>
    %461 = vector.extract_strided_slice %454 {offsets = [0, 631], sizes = [4, 17], strides = [1, 1]} : vector<4x648xf32> to vector<4x17xf32>
    %462 = vector.extract_strided_slice %454 {offsets = [0, 0], sizes = [4, 631], strides = [1, 1]} : vector<4x648xf32> to vector<4x631xf32>
    %463 = tpu.concatenate %461, %462 in 1 : vector<4x17xf32>, vector<4x631xf32> -> vector<4x648xf32>
    %464 = vector.extract_strided_slice %454 {offsets = [0, 647], sizes = [4, 1], strides = [1, 1]} : vector<4x648xf32> to vector<4x1xf32>
    %465 = vector.extract_strided_slice %454 {offsets = [0, 0], sizes = [4, 647], strides = [1, 1]} : vector<4x648xf32> to vector<4x647xf32>
    %466 = tpu.concatenate %464, %465 in 1 : vector<4x1xf32>, vector<4x647xf32> -> vector<4x648xf32>
    %467 = vector.extract_strided_slice %454 {offsets = [0, 1], sizes = [4, 647], strides = [1, 1]} : vector<4x648xf32> to vector<4x647xf32>
    %468 = vector.extract_strided_slice %454 {offsets = [0, 0], sizes = [4, 1], strides = [1, 1]} : vector<4x648xf32> to vector<4x1xf32>
    %469 = tpu.concatenate %467, %468 in 1 : vector<4x647xf32>, vector<4x1xf32> -> vector<4x648xf32>
    %470 = vector.extract_strided_slice %454 {offsets = [0, 17], sizes = [4, 631], strides = [1, 1]} : vector<4x648xf32> to vector<4x631xf32>
    %471 = vector.extract_strided_slice %454 {offsets = [0, 0], sizes = [4, 17], strides = [1, 1]} : vector<4x648xf32> to vector<4x17xf32>
    %472 = tpu.concatenate %470, %471 in 1 : vector<4x631xf32>, vector<4x17xf32> -> vector<4x648xf32>
    %473 = vector.extract_strided_slice %454 {offsets = [0, 18], sizes = [4, 630], strides = [1, 1]} : vector<4x648xf32> to vector<4x630xf32>
    %474 = vector.extract_strided_slice %454 {offsets = [0, 0], sizes = [4, 18], strides = [1, 1]} : vector<4x648xf32> to vector<4x18xf32>
    %475 = tpu.concatenate %473, %474 in 1 : vector<4x630xf32>, vector<4x18xf32> -> vector<4x648xf32>
    %476 = vector.extract_strided_slice %454 {offsets = [0, 19], sizes = [4, 629], strides = [1, 1]} : vector<4x648xf32> to vector<4x629xf32>
    %477 = vector.extract_strided_slice %454 {offsets = [0, 0], sizes = [4, 19], strides = [1, 1]} : vector<4x648xf32> to vector<4x19xf32>
    %478 = tpu.concatenate %476, %477 in 1 : vector<4x629xf32>, vector<4x19xf32> -> vector<4x648xf32>
    %479 = tpu.concatenate %457, %460, %463, %466, %454, %469, %472, %475, %478 in 0 : vector<4x648xf32>, vector<4x648xf32>, vector<4x648xf32>, vector<4x648xf32>, vector<4x648xf32>, vector<4x648xf32>, vector<4x648xf32>, vector<4x648xf32>, vector<4x648xf32> -> vector<36x648xf32>
    %cst_128 = arith.constant dense<0.000000e+00> : vector<4x648xf32>
    %480 = tpu.matmul %419, %479, %cst_128 {dimension_numbers = #tpu.dot_dimension_numbers<[1], [0], [0], [1], [0, 0, 1, 1], [], []>} : vector<4x36xf32>, vector<36x648xf32>, vector<4x648xf32> -> vector<4x648xf32>
    %481 = vector.broadcast %423 : vector<4x1xf32> to vector<4x648xf32>
    %482 = arith.addf %480, %481 : vector<4x648xf32>
    %483 = arith.mulf %482, %1 : vector<4x648xf32>
    %484 = arith.addf %483, %415 : vector<4x648xf32>
    %c7 = arith.constant 7 : index
    %c0_129 = arith.constant 0 : index
    %c0_130 = arith.constant 0 : index
    %c0_131 = arith.constant 0 : index
    %485 = vector.load %arg2[%c7, %c0_129, %c0_130, %c0_131] : memref<8x2x4x36xf32, #tpu.memory_space<vmem>>, vector<1x1x4x36xf32>
    %486 = vector.shape_cast %485 : vector<1x1x4x36xf32> to vector<4x36xf32>
    %c7_132 = arith.constant 7 : index
    %c1_133 = arith.constant 1 : index
    %c0_134 = arith.constant 0 : index
    %c0_135 = arith.constant 0 : index
    %487 = vector.load %arg2[%c7_132, %c1_133, %c0_134, %c0_135] : memref<8x2x4x36xf32, #tpu.memory_space<vmem>>, vector<1x1x4x36xf32>
    %488 = vector.shape_cast %487 : vector<1x1x4x36xf32> to vector<4x36xf32>
    %c7_136 = arith.constant 7 : index
    %c0_137 = arith.constant 0 : index
    %c0_138 = arith.constant 0 : index
    %c0_139 = arith.constant 0 : index
    %489 = vector.load %arg3[%c7_136, %c0_137, %c0_138, %c0_139] : memref<8x2x4x1xf32, #tpu.memory_space<vmem>>, vector<1x1x4x1xf32>
    %490 = vector.shape_cast %489 : vector<1x1x4x1xf32> to vector<4x1xf32>
    %c7_140 = arith.constant 7 : index
    %c1_141 = arith.constant 1 : index
    %c0_142 = arith.constant 0 : index
    %c0_143 = arith.constant 0 : index
    %491 = vector.load %arg3[%c7_140, %c1_141, %c0_142, %c0_143] : memref<8x2x4x1xf32, #tpu.memory_space<vmem>>, vector<1x1x4x1xf32>
    %492 = vector.shape_cast %491 : vector<1x1x4x1xf32> to vector<4x1xf32>
    %493 = vector.extract_strided_slice %484 {offsets = [0, 629], sizes = [4, 19], strides = [1, 1]} : vector<4x648xf32> to vector<4x19xf32>
    %494 = vector.extract_strided_slice %484 {offsets = [0, 0], sizes = [4, 629], strides = [1, 1]} : vector<4x648xf32> to vector<4x629xf32>
    %495 = tpu.concatenate %493, %494 in 1 : vector<4x19xf32>, vector<4x629xf32> -> vector<4x648xf32>
    %496 = vector.extract_strided_slice %484 {offsets = [0, 630], sizes = [4, 18], strides = [1, 1]} : vector<4x648xf32> to vector<4x18xf32>
    %497 = vector.extract_strided_slice %484 {offsets = [0, 0], sizes = [4, 630], strides = [1, 1]} : vector<4x648xf32> to vector<4x630xf32>
    %498 = tpu.concatenate %496, %497 in 1 : vector<4x18xf32>, vector<4x630xf32> -> vector<4x648xf32>
    %499 = vector.extract_strided_slice %484 {offsets = [0, 631], sizes = [4, 17], strides = [1, 1]} : vector<4x648xf32> to vector<4x17xf32>
    %500 = vector.extract_strided_slice %484 {offsets = [0, 0], sizes = [4, 631], strides = [1, 1]} : vector<4x648xf32> to vector<4x631xf32>
    %501 = tpu.concatenate %499, %500 in 1 : vector<4x17xf32>, vector<4x631xf32> -> vector<4x648xf32>
    %502 = vector.extract_strided_slice %484 {offsets = [0, 647], sizes = [4, 1], strides = [1, 1]} : vector<4x648xf32> to vector<4x1xf32>
    %503 = vector.extract_strided_slice %484 {offsets = [0, 0], sizes = [4, 647], strides = [1, 1]} : vector<4x648xf32> to vector<4x647xf32>
    %504 = tpu.concatenate %502, %503 in 1 : vector<4x1xf32>, vector<4x647xf32> -> vector<4x648xf32>
    %505 = vector.extract_strided_slice %484 {offsets = [0, 1], sizes = [4, 647], strides = [1, 1]} : vector<4x648xf32> to vector<4x647xf32>
    %506 = vector.extract_strided_slice %484 {offsets = [0, 0], sizes = [4, 1], strides = [1, 1]} : vector<4x648xf32> to vector<4x1xf32>
    %507 = tpu.concatenate %505, %506 in 1 : vector<4x647xf32>, vector<4x1xf32> -> vector<4x648xf32>
    %508 = vector.extract_strided_slice %484 {offsets = [0, 17], sizes = [4, 631], strides = [1, 1]} : vector<4x648xf32> to vector<4x631xf32>
    %509 = vector.extract_strided_slice %484 {offsets = [0, 0], sizes = [4, 17], strides = [1, 1]} : vector<4x648xf32> to vector<4x17xf32>
    %510 = tpu.concatenate %508, %509 in 1 : vector<4x631xf32>, vector<4x17xf32> -> vector<4x648xf32>
    %511 = vector.extract_strided_slice %484 {offsets = [0, 18], sizes = [4, 630], strides = [1, 1]} : vector<4x648xf32> to vector<4x630xf32>
    %512 = vector.extract_strided_slice %484 {offsets = [0, 0], sizes = [4, 18], strides = [1, 1]} : vector<4x648xf32> to vector<4x18xf32>
    %513 = tpu.concatenate %511, %512 in 1 : vector<4x630xf32>, vector<4x18xf32> -> vector<4x648xf32>
    %514 = vector.extract_strided_slice %484 {offsets = [0, 19], sizes = [4, 629], strides = [1, 1]} : vector<4x648xf32> to vector<4x629xf32>
    %515 = vector.extract_strided_slice %484 {offsets = [0, 0], sizes = [4, 19], strides = [1, 1]} : vector<4x648xf32> to vector<4x19xf32>
    %516 = tpu.concatenate %514, %515 in 1 : vector<4x629xf32>, vector<4x19xf32> -> vector<4x648xf32>
    %517 = tpu.concatenate %495, %498, %501, %504, %484, %507, %510, %513, %516 in 0 : vector<4x648xf32>, vector<4x648xf32>, vector<4x648xf32>, vector<4x648xf32>, vector<4x648xf32>, vector<4x648xf32>, vector<4x648xf32>, vector<4x648xf32>, vector<4x648xf32> -> vector<36x648xf32>
    %cst_144 = arith.constant dense<0.000000e+00> : vector<4x648xf32>
    %518 = tpu.matmul %486, %517, %cst_144 {dimension_numbers = #tpu.dot_dimension_numbers<[1], [0], [0], [1], [0, 0, 1, 1], [], []>} : vector<4x36xf32>, vector<36x648xf32>, vector<4x648xf32> -> vector<4x648xf32>
    %519 = vector.broadcast %490 : vector<4x1xf32> to vector<4x648xf32>
    %520 = arith.addf %518, %519 : vector<4x648xf32>
    %cst_145 = arith.constant 0.000000e+00 : f32
    %521 = vector.broadcast %cst_145 : f32 to vector<4x648xf32>
    %522 = arith.maximumf %520, %521 : vector<4x648xf32>
    %523 = arith.mulf %522, %1 : vector<4x648xf32>
    %524 = vector.extract_strided_slice %523 {offsets = [0, 629], sizes = [4, 19], strides = [1, 1]} : vector<4x648xf32> to vector<4x19xf32>
    %525 = vector.extract_strided_slice %523 {offsets = [0, 0], sizes = [4, 629], strides = [1, 1]} : vector<4x648xf32> to vector<4x629xf32>
    %526 = tpu.concatenate %524, %525 in 1 : vector<4x19xf32>, vector<4x629xf32> -> vector<4x648xf32>
    %527 = vector.extract_strided_slice %523 {offsets = [0, 630], sizes = [4, 18], strides = [1, 1]} : vector<4x648xf32> to vector<4x18xf32>
    %528 = vector.extract_strided_slice %523 {offsets = [0, 0], sizes = [4, 630], strides = [1, 1]} : vector<4x648xf32> to vector<4x630xf32>
    %529 = tpu.concatenate %527, %528 in 1 : vector<4x18xf32>, vector<4x630xf32> -> vector<4x648xf32>
    %530 = vector.extract_strided_slice %523 {offsets = [0, 631], sizes = [4, 17], strides = [1, 1]} : vector<4x648xf32> to vector<4x17xf32>
    %531 = vector.extract_strided_slice %523 {offsets = [0, 0], sizes = [4, 631], strides = [1, 1]} : vector<4x648xf32> to vector<4x631xf32>
    %532 = tpu.concatenate %530, %531 in 1 : vector<4x17xf32>, vector<4x631xf32> -> vector<4x648xf32>
    %533 = vector.extract_strided_slice %523 {offsets = [0, 647], sizes = [4, 1], strides = [1, 1]} : vector<4x648xf32> to vector<4x1xf32>
    %534 = vector.extract_strided_slice %523 {offsets = [0, 0], sizes = [4, 647], strides = [1, 1]} : vector<4x648xf32> to vector<4x647xf32>
    %535 = tpu.concatenate %533, %534 in 1 : vector<4x1xf32>, vector<4x647xf32> -> vector<4x648xf32>
    %536 = vector.extract_strided_slice %523 {offsets = [0, 1], sizes = [4, 647], strides = [1, 1]} : vector<4x648xf32> to vector<4x647xf32>
    %537 = vector.extract_strided_slice %523 {offsets = [0, 0], sizes = [4, 1], strides = [1, 1]} : vector<4x648xf32> to vector<4x1xf32>
    %538 = tpu.concatenate %536, %537 in 1 : vector<4x647xf32>, vector<4x1xf32> -> vector<4x648xf32>
    %539 = vector.extract_strided_slice %523 {offsets = [0, 17], sizes = [4, 631], strides = [1, 1]} : vector<4x648xf32> to vector<4x631xf32>
    %540 = vector.extract_strided_slice %523 {offsets = [0, 0], sizes = [4, 17], strides = [1, 1]} : vector<4x648xf32> to vector<4x17xf32>
    %541 = tpu.concatenate %539, %540 in 1 : vector<4x631xf32>, vector<4x17xf32> -> vector<4x648xf32>
    %542 = vector.extract_strided_slice %523 {offsets = [0, 18], sizes = [4, 630], strides = [1, 1]} : vector<4x648xf32> to vector<4x630xf32>
    %543 = vector.extract_strided_slice %523 {offsets = [0, 0], sizes = [4, 18], strides = [1, 1]} : vector<4x648xf32> to vector<4x18xf32>
    %544 = tpu.concatenate %542, %543 in 1 : vector<4x630xf32>, vector<4x18xf32> -> vector<4x648xf32>
    %545 = vector.extract_strided_slice %523 {offsets = [0, 19], sizes = [4, 629], strides = [1, 1]} : vector<4x648xf32> to vector<4x629xf32>
    %546 = vector.extract_strided_slice %523 {offsets = [0, 0], sizes = [4, 19], strides = [1, 1]} : vector<4x648xf32> to vector<4x19xf32>
    %547 = tpu.concatenate %545, %546 in 1 : vector<4x629xf32>, vector<4x19xf32> -> vector<4x648xf32>
    %548 = tpu.concatenate %526, %529, %532, %535, %523, %538, %541, %544, %547 in 0 : vector<4x648xf32>, vector<4x648xf32>, vector<4x648xf32>, vector<4x648xf32>, vector<4x648xf32>, vector<4x648xf32>, vector<4x648xf32>, vector<4x648xf32>, vector<4x648xf32> -> vector<36x648xf32>
    %cst_146 = arith.constant dense<0.000000e+00> : vector<4x648xf32>
    %549 = tpu.matmul %488, %548, %cst_146 {dimension_numbers = #tpu.dot_dimension_numbers<[1], [0], [0], [1], [0, 0, 1, 1], [], []>} : vector<4x36xf32>, vector<36x648xf32>, vector<4x648xf32> -> vector<4x648xf32>
    %550 = vector.broadcast %492 : vector<4x1xf32> to vector<4x648xf32>
    %551 = arith.addf %549, %550 : vector<4x648xf32>
    %552 = arith.mulf %551, %1 : vector<4x648xf32>
    %553 = arith.addf %552, %484 : vector<4x648xf32>
    %c0_147 = arith.constant 0 : index
    %c0_148 = arith.constant 0 : index
    %554 = vector.load %arg4[%c0_147, %c0_148] : memref<4x648xf32, #tpu.memory_space<vmem>>, vector<4x648xf32>
    tpu.vector_store %arg4[%c0_147, %c0_148], %553 {strides = array<i32>} : memref<4x648xf32, #tpu.memory_space<vmem>>, vector<4x648xf32>,
    return
  }
}

</mosaic_0001>

<bundles_post_ra>
// kernel: dblock_forward.1
= control target key start
LH: loop header
LB: loop body
LE: loop exit
PB: predicated region body
PF: predicated region fallthrough
CT: control target
= control target key end

     0   :  { %s9257_s21 = smov 11   ;;  %s9259_s22 = smov 10   ;;  %vm290_vm0 = vcmask 900096   ;;  %vm249_vm1 = vcmask 908288   ;;  %vm212_vm2 = vcmask 1039360   ;;  %vm327_vm3 = vcmask 891904   ;;  %s14020_s0 = inlined_call_operand.vmem [shape: f32[4,648], index: 0, kind: input, shape index: {}]   ;;  %s14021_s2 = inlined_call_operand.vmem [shape: f32[8,2,4,36], index: 2, kind: input, shape index: {}]   ;;  %s14022_s3 = inlined_call_operand.vmem [shape: f32[8,2,4,1], index: 3, kind: input, shape index: {}]   ;;  %s14023_s1 = inlined_call_operand.vmem [shape: f32[4,648], index: 1, kind: input, shape index: {}]   ;;  %s14024_s4 = inlined_call_operand.vmem [shape: f32[4,648], index: 4, kind: output, shape index: {}]  }
   0x1   :  { %v9302_v0 = vld [vmem:[%s14020_s0 + $0x10] sm:$0xff]  ;;  %v9307_v1 = vld [vmem:[%s14020_s0 + $0x8] sm:$0xff]  ;;  %v9315_v2 = vld [vmem:[%s14020_s0] sm:$0xff]  ;;  %s9258_s0 = smov 19   ;;  %s9260_s23 = smov 18   ;;  %vm410_vm4 = vcmask 1043456  }
   0x2   :  { %30 = vst [vmem:[#allocation1] ss:$2 sm:$0xff] %v9302_v0  ;;  %s9261_s24 = smov 127   ;;  %s9262_s25 = smov 9   ;;  %vm141_vm5 = vcmask 138240   ;;  %vm181_vm6 = vcmask 7168  }
   0x3   :  { %46 = vst [vmem:[#allocation1 + $0x20] ss:$2 sm:$0xff] %v9302_v0  ;;  %s9263_s26 = smov 111   ;;  %s9264_s27 = smov 17   ;;  %vm104_vm7 = vcmask 146432   ;;  %vm62_vm8 = vcmask 154624  }
   0x4   :  { %44 = vst [vmem:[#allocation1 + $0x10] ss:$2 sm:$0xff] %v9307_v1  ;;  %s9265_s28 = smov 110   ;;  %s9266_s29 = smov 121   ;;  %vm440_vm9 = vcmask 293888   ;;  %vm81_vm10 = vcmask 80896  }
   0x5   :  { %s9267_s30 = smov 109   ;;  %s9268_s5 = smov 1   ;;  %vm14026_vm11 = vcmask 56320   ;;  %vm14025_vm12 = vcmask 72704   ;;  %vm37_vm13 = vcmask 89088   ;;  %vm302_vm14 = vcmask 965632  }
   0x6   :  { %s9269_s6 = smov 7   ;;  %s9270_s7 = smov 119   ;;  %vm265_vm15 = vcmask 973824  }
   0x7   :  { %s9271_s8 = smov 118   ;;  %s9272_s9 = smov 117  }
   0x9   :  { %v31_v3 = vld.sshfl [vmem:[#allocation1] sm:$0xff pattern:$0x75316420]  ;;  %v32_v4 = vld.sshfl [vmem:[#allocation1 + $0x8] sm:$0xff pattern:$0x75316420] }
   0xa   :  { %v7575_v5 = vpack.i.bf16 %v32_v4, %v31_v3  ;;  %42 = vst [vmem:[#allocation1] ss:$2 sm:$0xff] %v9315_v2  ;;  %v9318_v6 = vld.sshfl [vmem:[#allocation1 + $0x20] sm:$0xff pattern:$0x75316420] }
   0xb   :  { %v49_v7 = vld.sshfl [vmem:[#allocation1 + $0x10] sm:$0xff pattern:$0x75316420]  ;;  %v50_v8 = vld.sshfl [vmem:[#allocation1 + $0x18] sm:$0xff pattern:$0x75316420] }
   0xc   :  { %7576 = vrot.lane.b32.xlu0 %v7575_v5, %s9257_s21  ;;  %86 = vst [vmem:[#allocation1 + $0x10] ss:$2 sm:$0xff] %v9307_v1 }
   0xd   :  { %88 = vst [vmem:[#allocation1 + $0x20] ss:$2 sm:$0xff] %v9302_v0 }
  0x11   :  { %v48_v9 = vld.sshfl [vmem:[#allocation1 + $0x8] sm:$0xff pattern:$0x75316420]  ;;  %v47_v10 = vld.sshfl [vmem:[#allocation1] sm:$0xff pattern:$0x75316420] }
  0x12   :  { %v7580_v11 = vpack.i.bf16 %v49_v7, %v48_v9  ;;  %74 = vst [vmem:[#allocation1] ss:$2 sm:$0xff] %v9302_v0  ;;  %v7585_v15 = vpack.i.bf16 %v50_v8, %v47_v10 }
  0x13   :  { %v91_v12 = vld.sshfl [vmem:[#allocation1 + $0x10] sm:$0xff pattern:$0x75316420]  ;;  %v92_v13 = vld.sshfl [vmem:[#allocation1 + $0x18] sm:$0xff pattern:$0x75316420] }
  0x14   :  { %7581 = vrot.lane.b32.xlu1 %v7580_v11, %s9258_s0  ;;  %123 = vst [vmem:[#allocation1 + $0x10] ss:$2 sm:$0xff] %v9307_v1  ;;  %v9326_v14 = vld.sshfl [vmem:[#allocation1 + $0x20] sm:$0xff pattern:$0x75316420] }
  0x15   :  { %125 = vst [vmem:[#allocation1 + $0x20] ss:$2 sm:$0xff] %v9302_v0 }
  0x19   :  { %v75_v16 = vld.sshfl [vmem:[#allocation1] sm:$0xff pattern:$0x75316420]  ;;  %v76_v17 = vld.sshfl [vmem:[#allocation1 + $0x8] sm:$0xff pattern:$0x75316420] }
  0x1a   :  { %84 = vst [vmem:[#allocation1] ss:$2 sm:$0xff] %v9315_v2  ;;  %v7590_v18 = vpack.i.bf16 %v76_v17, %v75_v16 }
  0x1b   :  { %v128_v19 = vld.sshfl [vmem:[#allocation1 + $0x10] sm:$0xff pattern:$0x75316420]  ;;  %v9330_v20 = vld.sshfl [vmem:[#allocation1 + $0x18] sm:$0xff pattern:$0x75316420] }
  0x1c   :  { %7586 = vrot.lane.b32.xlu1 %v7585_v15, %s9258_s0  ;;  %160 = vst [vmem:[#allocation1 + $0x10] ss:$2 sm:$0xff] %v9307_v1  ;;  %v9334_v21 = vld.sshfl [vmem:[#allocation1 + $0x20] sm:$0xff pattern:$0x75316420]  ;;  %7591 = vrot.lane.b32.xlu2 %v7590_v18, %s9259_s22 }
  0x1d   :  { %162 = vst [vmem:[#allocation1 + $0x20] ss:$2 sm:$0xff] %v9302_v0 }
  0x21   :  { %v89_v22 = vld.sshfl [vmem:[#allocation1] sm:$0xff pattern:$0x75316420]  ;;  %v90_v23 = vld.sshfl [vmem:[#allocation1 + $0x8] sm:$0xff pattern:$0x75316420] }
  0x22   :  { %v7600_v24 = vpack.i.bf16 %v92_v13, %v89_v22  ;;  %111 = vst [vmem:[#allocation1] ss:$2 sm:$0xff] %v9302_v0  ;;  %v7595_v25 = vpack.i.bf16 %v91_v12, %v90_v23 }
  0x23   :  { %v9339_v26 = vld.sshfl [vmem:[#allocation1 + $0x10] sm:$0xff pattern:$0x75316420]  ;;  %v9341_v27 = vld.sshfl [vmem:[#allocation1 + $0x18] sm:$0xff pattern:$0x75316420] }
  0x24   :  { %7601 = vrot.lane.b32.xlu0 %v7600_v24, %s9260_s23  ;;  %191 = vst [vmem:[#allocation1 + $0x10] ss:$2 sm:$0xff] %v9307_v1  ;;  %v9345_v28 = vld.sshfl [vmem:[#allocation1 + $0x20] sm:$0xff pattern:$0x75316420]  ;;  %7596 = vrot.lane.b32.xlu2 %v7595_v25, %s9260_s23 }
  0x25   :  { %v9348_v29 = vld.sshfl [vmem:[#allocation1 + $0x28] sm:$0xff pattern:$0x75316420] }
  0x26   :  { %193 = vst [vmem:[#allocation1 + $0x20] ss:$2 sm:$0xff] %v9302_v0 }
  0x29   :  { %v112_v30 = vld.sshfl [vmem:[#allocation1] sm:$0xff pattern:$0x75316420]  ;;  %v113_v31 = vld.sshfl [vmem:[#allocation1 + $0x8] sm:$0xff pattern:$0x75316420] }
  0x2a   :  { %121 = vst [vmem:[#allocation1] ss:$2 sm:$0xff] %v9315_v2  ;;  %v7615_v40 = vpack.i.bf16 %v113_v31, %v112_v30 }
  0x2b   :  { %v196_v32 = vld.sshfl [vmem:[#allocation1 + $0x10] sm:$0xff pattern:$0x75316420]  ;;  %v197_v33 = vld.sshfl [vmem:[#allocation1 + $0x18] sm:$0xff pattern:$0x75316420] }
  0x2c   :  { %v7605_v34 = vpack.i.bf16 %v197_v33, %v196_v32  ;;  %228 = vst [vmem:[#allocation1 + $0x10] ss:$2 sm:$0xff] %v9307_v1 }
  0x2d   :  { %v198_v35 = vld.sshfl [vmem:[#allocation1 + $0x20] sm:$0xff pattern:$0x75316420]  ;;  %v199_v36 = vld.sshfl [vmem:[#allocation1 + $0x28] sm:$0xff pattern:$0x75316420] }
  0x2e   :  { %7606 = vrot.lane.b32.xlu1 %v7605_v34, %s9261_s24  ;;  %v7610_v37 = vpack.i.bf16 %v199_v36, %v198_v35  ;;  %230 = vst [vmem:[#allocation1 + $0x20] ss:$2 sm:$0xff] %v9302_v0 }
  0x30   :  { %7611 = vrot.lane.b32.xlu0 %v7610_v37, %s9261_s24 }
  0x31   :  { %v127_v38 = vld.sshfl [vmem:[#allocation1 + $0x8] sm:$0xff pattern:$0x75316420]  ;;  %v126_v39 = vld.sshfl [vmem:[#allocation1] sm:$0xff pattern:$0x75316420] }
  0x32   :  { %153 = vst [vmem:[#allocation1] ss:$2 sm:$0xff] %v9302_v0  ;;  %v7625_v43 = vpack.i.bf16 %v128_v19, %v127_v38  ;;  %v7635_v49 = vpack.i.bf16 %v9330_v20, %v126_v39  ;;  %v7675_v20 = vpack.i.bf16 %v9348_v29, %v9345_v28 }
  0x33   :  { %v233_v41 = vld.sshfl [vmem:[#allocation1 + $0x10] sm:$0xff pattern:$0x75316420]  ;;  %v234_v42 = vld.sshfl [vmem:[#allocation1 + $0x18] sm:$0xff pattern:$0x75316420] }
  0x34   :  { %269 = vst [vmem:[#allocation1 + $0x10] ss:$2 sm:$0xff] %v9307_v1  ;;  %v7620_v44 = vpack.i.bf16 %v234_v42, %v233_v41 }
  0x35   :  { %v235_v45 = vld.sshfl [vmem:[#allocation1 + $0x20] sm:$0xff pattern:$0x75316420]  ;;  %v236_v46 = vld.sshfl [vmem:[#allocation1 + $0x28] sm:$0xff pattern:$0x75316420] }
  0x36   :  { %7616 = vrot.lane.b32.xlu1 %v7615_v40, %s9262_s25  ;;  %271 = vst [vmem:[#allocation1 + $0x20] ss:$2 sm:$0xff] %v9302_v0  ;;  %7621 = vrot.lane.b32.xlu2 %v7620_v44, %s9263_s26  ;;  %v7630_v48 = vpack.i.bf16 %v236_v46, %v235_v45 }
  0x38   :  { %7626 = vrot.lane.b32.xlu0 %v7625_v43, %s9264_s27 }
  0x39   :  { %v154_v47 = vld.sshfl [vmem:[#allocation1 + $0x8] sm:$0xff pattern:$0x75316420] }
  0x3a   :  { %158 = vst [vmem:[#allocation1] ss:$2 sm:$0xff] %v9315_v2 }
  0x3b   :  { %v274_v50 = vld.sshfl [vmem:[#allocation1 + $0x10] sm:$0xff pattern:$0x75316420]  ;;  %v275_v51 = vld.sshfl [vmem:[#allocation1 + $0x18] sm:$0xff pattern:$0x75316420] }
  0x3c   :  { %v7640_v52 = vpack.i.bf16 %v275_v51, %v274_v50  ;;  %306 = vst [vmem:[#allocation1 + $0x10] ss:$2 sm:$0xff] %v9307_v1 }
  0x3d   :  { %v276_v53 = vld.sshfl [vmem:[#allocation1 + $0x20] sm:$0xff pattern:$0x75316420]  ;;  %v277_v54 = vld.sshfl [vmem:[#allocation1 + $0x28] sm:$0xff pattern:$0x75316420] }
  0x3e   :  { %7631 = vrot.lane.b32.xlu1 %v7630_v48, %s9263_s26  ;;  %308 = vst [vmem:[#allocation1 + $0x20] ss:$2 sm:$0xff] %v9302_v0  ;;  %7636 = vrot.lane.b32.xlu2 %v7635_v49, %s9264_s27  ;;  %v7645_v57 = vpack.i.bf16 %v277_v54, %v276_v53 }
  0x40   :  { %7641 = vrot.lane.b32.xlu0 %v7640_v52, %s9265_s28 }
  0x41   :  { %v164_v55 = vld.sshfl [vmem:[#allocation1 + $0x8] sm:$0xff pattern:$0x75316420]  ;;  %v163_v56 = vld.sshfl [vmem:[#allocation1] sm:$0xff pattern:$0x75316420] }
  0x42   :  { %189 = vst [vmem:[#allocation1] ss:$2 sm:$0xff] %v9315_v2  ;;  %v7655_v3 = vpack.i.bf16 %v9341_v27, %v163_v56  ;;  %v7650_v4 = vpack.i.bf16 %v9339_v26, %v164_v55 }
  0x43   :  { %v311_v58 = vld.sshfl [vmem:[#allocation1 + $0x10] sm:$0xff pattern:$0x75316420]  ;;  %v312_v59 = vld.sshfl [vmem:[#allocation1 + $0x18] sm:$0xff pattern:$0x75316420] }
  0x44   :  { %369 = vst [vmem:[#allocation1 + $0x10] ss:$2 sm:$0xff] %v9307_v1 }
  0x45   :  { %v313_v60 = vld.sshfl [vmem:[#allocation1 + $0x20] sm:$0xff pattern:$0x75316420]  ;;  %v314_v61 = vld.sshfl [vmem:[#allocation1 + $0x28] sm:$0xff pattern:$0x75316420] }
  0x46   :  { %7646 = vrot.lane.b32.xlu1 %v7645_v57, %s9265_s28  ;;  %155 = vrot.lane.b32.xlu2 %v154_v47, %s9266_s29  ;;  %371 = vst [vmem:[#allocation1 + $0x20] ss:$2 sm:$0xff] %v9302_v0 }
  0x48   :  { %319 = vrot.lane.b32.xlu0 %v311_v58, %s9267_s30 }
  0x49   :  { %v194_v62 = vld.sshfl [vmem:[#allocation1] sm:$0xff pattern:$0x75316420]  ;;  %v195_v63 = vld.sshfl [vmem:[#allocation1 + $0x8] sm:$0xff pattern:$0x75316420] }
  0x4a   :  { %219 = vst [vmem:[#allocation1] ss:$2 sm:$0xff] %v9315_v2  ;;  %v7660_v7 = vpack.i.bf16 %v194_v62, %v195_v63 }
  0x4b   :  { %v374_v52 = vld.sshfl [vmem:[#allocation1 + $0x10] sm:$0xff pattern:$0x75316420] }
  0x4e   :  { %321 = vrot.lane.b32.xlu1 %v312_v59, %s9267_s30  ;;  %7656 = vrot.lane.b32.xlu2 %v7655_v3, %s9268_s5 }
  0x50   :  { %7651 = vrot.lane.b32.xlu0 %v7650_v4, %s9268_s5 }
  0x51   :  { %v220_v5 = vld.sshfl [vmem:[#allocation1] sm:$0xff pattern:$0x75316420] }
  0x52   :  { %226 = vst [vmem:[#allocation1] ss:$2 sm:$0xff] %v9315_v2 }
  0x56   :  { %221 = vrot.lane.b32.xlu1 %v220_v5, %s9269_s6  ;;  %7661 = vrot.lane.b32.xlu2 %v7660_v7, %s9261_s24 }
  0x58   :  { %323 = vrot.lane.b32.xlu0 %v313_v60, %s9267_s30 }
  0x59   :  { %v231_v8 = vld.sshfl [vmem:[#allocation1] sm:$0xff pattern:$0x75316420]  ;;  %v232_v9 = vld.sshfl [vmem:[#allocation1 + $0x8] sm:$0xff pattern:$0x75316420] }
  0x5a   :  { %260 = vst [vmem:[#allocation1] ss:$2 sm:$0xff] %v9315_v2  ;;  %v7665_v11 = vpack.i.bf16 %v231_v8, %v232_v9 }
  0x60   :  { %325 = vrot.lane.b32.xlu0 %v314_v61, %s9267_s30 }
  0x61   :  { %v261_v10 = vld.sshfl [vmem:[#allocation1] sm:$0xff pattern:$0x75316420] }
  0x62   :  { %267 = vst [vmem:[#allocation1] ss:$2 sm:$0xff] %v9315_v2 }
  0x68   :  { %7666 = vrot.lane.b32.xlu0 %v7665_v11, %s9263_s26 }
  0x69   :  { %v272_v12 = vld.sshfl [vmem:[#allocation1] sm:$0xff pattern:$0x75316420]  ;;  %v273_v13 = vld.sshfl [vmem:[#allocation1 + $0x8] sm:$0xff pattern:$0x75316420] }
  0x6a   :  { %v7670_v15 = vpack.i.bf16 %v272_v12, %v273_v13  ;;  %297 = vst [vmem:[#allocation1] ss:$2 sm:$0xff] %v9315_v2 }
  0x6c   :  { %7671 = vrot.lane.b32.xlu2 %v7670_v15, %s9265_s28 }
  0x70   :  { %262 = vrot.lane.b32.xlu0 %v261_v10, %s9270_s7 }
  0x71   :  { %v298_v16 = vld.sshfl [vmem:[#allocation1] sm:$0xff pattern:$0x75316420] }
  0x72   :  { %304 = vst [vmem:[#allocation1] ss:$2 sm:$0xff] %v9315_v2 }
  0x74   :  { %299 = vrot.lane.b32.xlu2 %v298_v16, %s9271_s8 }
  0x76   :  { %v9412_v23 = vpop.permute.xlu2 %7591 }
  0x78   :  { %139 = vrot.lane.b32.xlu0 %v9334_v21, %s9264_s27 }
  0x79   :  { %v310_v17 = vld.sshfl [vmem:[#allocation1 + $0x8] sm:$0xff pattern:$0x75316420]  ;;  %v309_v18 = vld.sshfl [vmem:[#allocation1] sm:$0xff pattern:$0x75316420] }
  0x7a   :  { %317 = vrot.lane.b32.xlu1 %v310_v17, %s9267_s30  ;;  %334 = vst [vmem:[#allocation1] ss:$2 sm:$0xff] %v9315_v2 }
  0x7e   :  { %v9408_v22 = vpop.permute.xlu0 %7576  ;;  %v9418_v26 = vpop.permute.xlu2 %7596 }
  0x7f   :  { %v7599_v46 = vunpack.i.h.bf16 %v9418_v26  ;;  %v7598_v47 = vunpack.i.l.bf16 %v9418_v26 }
  0x81   :  { %v335_v19 = vld.sshfl [vmem:[#allocation1] sm:$0xff pattern:$0x75316420]  ;;  %v106_v62 = vsel %vm104_vm7, %v7598_v47, %v7599_v46 }
  0x82   :  { %315 = vrot.lane.b32.xlu1 %v309_v18, %s9267_s30  ;;  %336 = vrot.lane.b32.xlu2 %v335_v19, %s9272_s9  ;;  %367 = vst [vmem:[#allocation1] ss:$2 sm:$0xff] %v9315_v2  ;;  %v344_v11 = vrot.slane %v106_v62, 4  ;;  %v9504_v19 = vld [vmem:[%s14021_s2] sm:$0xf] }
  0x86   :  { %v9406_v21 = vpop.permute.xlu1 %7581 }
  0x87   :  { %v7584_v49 = vunpack.i.h.bf16 %v9406_v21  ;;  %v7583_v57 = vunpack.i.l.bf16 %v9406_v21 }
  0x89   :  { %v64_v12 = vsel %vm62_vm8, %v7583_v57, %v7584_v49 }
  0x8a   :  { %7676 = vrot.lane.b32.xlu1 %v7675_v20, %s9268_s5  ;;  %102 = vrot.lane.b32.xlu2 %v9326_v14, %s9260_s23 }
  0x8e   :  { %v9414_v24 = vpop.permute.xlu1 %7586 }
  0x90   :  { %v9424_v14 = vpop.permute.xlu2 %7621 }
  0x91   :  { %v7624_v37 = vunpack.i.h.bf16 %v9424_v14  ;;  %v7623_v38 = vunpack.i.l.bf16 %v9424_v14  ;;  %v373_v14 = vld.sshfl [vmem:[#allocation1 + $0x8] sm:$0xff pattern:$0x75316420] }
  0x92   :  { %60 = vrot.lane.b32.xlu1 %v9318_v6, %s9258_s0 }
  0x93   :  { %v252_v45 = vsel %vm249_vm1, %v7623_v38, %v7624_v37 }
  0x96   :  { %v9416_v25 = vpop.permute.xlu0 %7601 }
  0x97   :  { %v7604_v15 = vunpack.i.h.bf16 %v9416_v25 }
  0x98   :  { %v9432_v6 = vpop.permute.xlu2 %7636 }
  0x99   :  { %v7639_v20 = vunpack.i.h.bf16 %v9432_v6 }
  0xa0   :  { %v9420_v27 = vpop.permute.xlu1 %7606  ;;  %v9449_v42 = vpop.permute.xlu2 %155 }
  0xa1   :  { %v7608_v35 = vunpack.i.l.bf16 %v9420_v27  ;;  %v7609_v39 = vunpack.i.h.bf16 %v9420_v27 }
  0xa2   :  { %v9422_v28 = vpop.permute.xlu0 %7611 }
  0xa3   :  { %v215_v43 = vsel %vm212_vm2, %v7608_v35, %v7609_v39  ;;  %v7613_v63 = vunpack.i.l.bf16 %v9422_v28 }
  0xa4   :  { %v387_v48 = vrot.slane %v215_v43, 4 }
  0xa5   :  { %v216_v18 = vsel %vm212_vm2, %v7609_v39, %v7613_v63 }
  0xa6   :  { %v425_v61 = vsel %vm410_vm4, %v374_v52, %v387_v48  ;;  %v375_v48 = vld.sshfl [vmem:[#allocation1 + $0x18] sm:$0xff pattern:$0x75316420]  ;;  %v107_v52 = vsel %vm104_vm7, %v7599_v46, %v7604_v15  ;;  %v9273_v46 = vmov 0  }
  0xa7   :  { %7680 = vset.pattern.permute.xlu2 %v9273_v46  ;;  %9256 = vset.pattern.permute.xlu0 %v9273_v46 }
  0xa8   :  { %v9426_v29 = vpop.permute.xlu1 %7616  ;;  %v9481_v5 = vpop.permute.xlu2 %7656 }
  0xa9   :  { %v7659_v9 = vunpack.i.h.bf16 %v9481_v5 }
  0xaa   :  { %v9428_v30 = vpop.permute.xlu0 %7626 }
  0xab   :  { %v7629_v53 = vunpack.i.h.bf16 %v9428_v30  ;;  %v7628_v54 = vunpack.i.l.bf16 %v9428_v30 }
  0xad   :  { %v143_v7 = vsel %vm141_vm5, %v7628_v54, %v7629_v53 }
  0xb0   :  { %v9430_v31 = vpop.permute.xlu1 %7631 }
  0xb1   :  { %v7633_v3 = vunpack.i.l.bf16 %v9430_v31 }
  0xb2   :  { %v9434_v32 = vpop.permute.xlu0 %7641 }
  0xb3   :  { %v7644_v33 = vunpack.i.h.bf16 %v9434_v32  ;;  %v7643_v34 = vunpack.i.l.bf16 %v9434_v32  ;;  %v253_v17 = vsel %vm249_vm1, %v7624_v37, %v7633_v3 }
  0xb5   :  { %v293_v41 = vsel %vm290_vm0, %v7643_v34, %v7644_v33 }
  0xb6   :  { %v400_v44 = vrot.slane %v293_v41, 4  ;;  %v413_v41 = vsel %vm410_vm4, %v64_v12, %v344_v11 }
  0xb8   :  { %v9439_v36 = vpop.permute.xlu1 %7646  ;;  %v431_v56 = vsel %vm410_vm4, %v252_v45, %v400_v44  ;;  %v388_v44 = vrot.slane %v216_v18, 4  ;;  %v7589_v45 = vunpack.i.h.bf16 %v9414_v24 }
  0xb9   :  { %v7648_v50 = vunpack.i.l.bf16 %v9439_v36 }
  0xba   :  { %v9444_v40 = vpop.permute.xlu0 %319 }
  0xbb   :  { %v294_v4 = vsel %vm290_vm0, %v7644_v33, %v7648_v50 }
  0xbc   :  { %v401_v13 = vrot.slane %v294_v4, 4 }
  0xbe   :  { %v432_v43 = vsel %vm410_vm4, %v253_v17, %v401_v13 }
  0xc0   :  { %v322_v51 = vpop.permute.xlu1 %321 }
  0xc1   :  { %v330_v55 = vsel %vm327_vm3, %v9444_v40, %v322_v51 }
  0xc2   :  { %v9467_v58 = vpop.permute.xlu0 %7651  ;;  %7342 = vmatpush.msk.msra.mxu2 %vm410_vm4, %v330_v55 }
  0xc3   :  { %v7654_v59 = vunpack.i.h.bf16 %v9467_v58  ;;  %v7653_v60 = vunpack.i.l.bf16 %v9467_v58 }
  0xc4   :  { %509 = vmatpush.msra.mxu2 %v431_v56  ;;  %v426_v56 = vsel %vm410_vm4, %v375_v48, %v388_v44  ;;  %v7593_v44 = vunpack.i.l.bf16 %v9412_v23  ;;  %v7603_v48 = vunpack.i.l.bf16 %v9416_v25 }
  0xc5   :  { %v183_v8 = vsel %vm181_vm6, %v7653_v60, %v7654_v59  ;;  %v184_v37 = vsel %vm181_vm6, %v7654_v59, %v7659_v9  ;;  %v345_v59 = vrot.slane %v107_v52, 4  ;;  %v7588_v52 = vunpack.i.l.bf16 %v9414_v24 }
  0xc6   :  { %510 = vmatpush.msra.mxu2 %v425_v61  ;;  %v357_v10 = vrot.slane %v183_v8, 4  ;;  %v358_v55 = vrot.slane %v184_v37, 4  ;;  %v65_v61 = vsel %vm62_vm8, %v7584_v49, %v7589_v45 }
  0xc7   :  { %v414_v4 = vsel %vm410_vm4, %v65_v61, %v345_v59  ;;  %v7579_v59 = vunpack.i.h.bf16 %v9408_v22  ;;  %v63_v26 = vsel %vm62_vm8, %v7588_v52, %v7583_v57  ;;  %v7614_v57 = vunpack.i.h.bf16 %v9422_v28 }
  0xc8   :  { %v419_v16 = vsel %vm410_vm4, %v143_v7, %v357_v10  ;;  %v7662_v7 = vpop.permute.xlu2 %7661  ;;  %v222_v10 = vpop.permute.xlu1 %221 }
  0xc9   :  { %511 = vmatpush.msra.mxu2 %v419_v16  ;;  %v7663_v12 = vunpack.i.l.bf16 %v7662_v7  ;;  %v7658_v16 = vunpack.i.l.bf16 %v9481_v5  ;;  %v7664_v61 = vunpack.i.h.bf16 %v7662_v7 }
  0xca   :  { %v9507_v33 = vpop.permute.xlu0 %323 }
  0xcb   :  { %512 = vmatpush.msra.mxu2 %v413_v41  ;;  %v331_v39 = vsel %vm327_vm3, %v322_v51, %v9507_v33  ;;  %v144_v51 = vsel %vm141_vm5, %v7629_v53, %v7639_v20  ;;  %v26_v53 = vld [vmem:[%s14022_s3] sm:$0xf]  ;;  %v182_v27 = vsel %vm181_vm6, %v7658_v16, %v7653_v60 }
  0xcc   :  { %7344 = vmatpush.msk.msra.mxu3 %vm410_vm4, %v331_v39  ;;  %7343 = vmatmul.msk.f32.vlgmr.msra.gmra.mxu2 %vm440_vm9, %v9504_v19  ;;  %v420_v62 = vsel %vm410_vm4, %v144_v51, %v358_v55  ;;  %v214_v39 = vsel %vm212_vm2, %v7663_v12, %v7608_v35  ;;  %v7638_v55 = vunpack.i.l.bf16 %v9432_v6  ;;  %v356_v60 = vrot.slane %v182_v27, 4  ;;  %v9655_v6 = vld [vmem:[%s14023_s1 + $0x8] sm:$0xff] }
  0xcd   :  { %437 = vperm.xlu2 %7680, %v26_v53   ;;  %v386_v35 = vrot.slane %v214_v39, 4  ;;  %588 = vst [vmem:[#allocation1 + $0x10] ss:$2 sm:$0xff] %v9655_v6 }
  0xce   :  { %529 = vmatpush.msra.mxu3 %v432_v43  ;;  %v7594_v43 = vunpack.i.h.bf16 %v9412_v23  ;;  %v142_v46 = vsel %vm141_vm5, %v7638_v55, %v7628_v54 }
  0xcf   :  { %v424_v7 = vsel %vm410_vm4, %v373_v14, %v386_v35  ;;  %v418_v30 = vsel %vm410_vm4, %v142_v46, %v356_v60 }
  0xd0   :  { %530 = vmatpush.msra.mxu3 %v426_v56  ;;  %v7672_v49 = vpop.permute.xlu2 %7671  ;;  %v105_v56 = vsel %vm104_vm7, %v7603_v48, %v7598_v47  ;;  %v7619_v47 = vunpack.i.h.bf16 %v9426_v29 }
  0xd1   :  { %v7673_v13 = vunpack.i.l.bf16 %v7672_v49  ;;  %v7674_v18 = vunpack.i.h.bf16 %v7672_v49  ;;  %v343_v53 = vrot.slane %v105_v56, 4  ;;  %v7578_v49 = vunpack.i.l.bf16 %v9408_v22 }
  0xd2   :  { %531 = vmatpush.msra.mxu3 %v420_v62  ;;  %v9537_v8 = vpop.permute.xlu0 %325 }
  0xd3   :  { %v292_v37 = vsel %vm290_vm0, %v7673_v13, %v7643_v34  ;;  %v412_v22 = vsel %vm410_vm4, %v63_v26, %v343_v53 }
  0xd4   :  { %532 = vmatpush.msra.mxu3 %v414_v4  ;;  %v399_v23 = vrot.slane %v292_v37, 4  ;;  %v7618_v4 = vunpack.i.l.bf16 %v9426_v29  ;;  %v213_v29 = vsel %vm212_vm2, %v7664_v61, %v7663_v12  ;;  %v7649_v12 = vunpack.i.h.bf16 %v9439_v36  ;;  %v593_v24 = vld.sshfl [vmem:[#allocation1 + $0x10] sm:$0xff pattern:$0x75316420] }
  0xd5   :  { %7345 = vmatmul.msk.f32.vlgmr.msra.gmra.mxu3 %vm440_vm9, %v9504_v19  ;;  %v385_v27 = vrot.slane %v213_v29, 4  ;;  %v7634_v61 = vunpack.i.h.bf16 %v9430_v31  ;;  %v217_v36 = vsel %vm212_vm2, %v7613_v63, %v7614_v57  ;;  %v376_v31 = vld.sshfl [vmem:[#allocation1 + $0x20] sm:$0xff pattern:$0x75316420] }
  0xd7   :  { %v254_v28 = vsel %vm249_vm1, %v7633_v3, %v7634_v61 }
  0xd8   :  { %v9540_v41 = vpop.permute.xlu2 %299 }
  0xda   :  { %v7667_v11 = vpop.permute.xlu0 %7666 }
  0xdb   :  { %v7668_v17 = vunpack.i.l.bf16 %v7667_v11  ;;  %v7669_v62 = vunpack.i.h.bf16 %v7667_v11 }
  0xdd   :  { %v251_v32 = vsel %vm249_vm1, %v7668_v17, %v7623_v38  ;;  %v291_v38 = vsel %vm290_vm0, %v7674_v18, %v7673_v13  ;;  %v250_v11 = vsel %vm249_vm1, %v7669_v62, %v7668_v17  ;;  %v403_v13 = vrot.slane %v9540_v41, 4 }
  0xde   :  { %v430_v58 = vsel %vm410_vm4, %v251_v32, %v399_v23  ;;  %v398_v21 = vrot.slane %v291_v38, 4  ;;  %v225_v18 = vsel %vm14026_vm11, %v7614_v57, %v222_v10  ;;  %v188_v17 = vsel %vm181_vm6, %v9449_v42, %v7658_v16  ;;  %v372_v10 = vld.sshfl [vmem:[#allocation1] sm:$0xff pattern:$0x75316420] }
  0xdf   :  { %v355_v35 = vrot.slane %v188_v17, 4  ;;  %v38_v42 = vsel %vm37_vm13, %v7578_v49, %v7579_v59  ;;  %v377_v16 = vld.sshfl [vmem:[#allocation1 + $0x28] sm:$0xff pattern:$0x75316420]  ;;  %v295_v62 = vsel %vm290_vm0, %v7648_v50, %v7649_v12  ;;  %v423_v14 = vsel %vm410_vm4, %v372_v10, %v385_v27  ;;  %v9681_v10 = vld [vmem:[%s14023_s1 + $0x10] sm:$0xff] }
  0xe0   :  { %v337_v37 = vpop.permute.xlu2 %336  ;;  %v429_v32 = vsel %vm410_vm4, %v250_v11, %v398_v21  ;;  %v73_v59 = vsel %vm62_vm8, %v38_v42, %v7588_v52  ;;  %v332_v50 = vsel %vm327_vm3, %v9507_v33, %v9537_v8  ;;  %v389_v33 = vrot.slane %v217_v36, 4  ;;  %590 = vst [vmem:[#allocation1 + $0x20] ss:$2 sm:$0xff] %v9681_v10 }
  0xe2   :  { %v427_v5 = vsel %vm410_vm4, %v376_v31, %v389_v33 }
  0xe8   :  { %v103_v63 = vpop.permute.xlu2 %102 }
  0xe9   :  { %v108_v53 = vsel %vm104_vm7, %v7604_v15, %v103_v63 }
  0xec   :  { %v318_v51 = vpop.permute.xlu1 %317 }
  0xed   :  { %v329_v34 = vsel %vm327_vm3, %v318_v51, %v9444_v40  ;;  %v82_v40 = vsel %vm81_vm10, %v7593_v44, %v7594_v43  ;;  %v119_v43 = vsel %vm14025_vm12, %v7618_v4, %v7619_v47  ;;  %vm339_vm12 = vcmask 957440  }
  0xee   :  { %7340 = vmatpush.msk.msra.mxu1 %vm410_vm4, %v329_v34  ;;  %v110_v54 = vsel %vm104_vm7, %v82_v40, %v7603_v48  ;;  %v263_v48 = vpop.permute.xlu0 %262  ;;  %v390_v34 = vrot.slane %v225_v18, 4 }
  0xef   :  { %v434_v23 = vsel %vm410_vm4, %v263_v48, %v403_v13  ;;  %v342_v56 = vrot.slane %v110_v54, 4  ;;  %v266_v47 = vsel %vm265_vm15, %v254_v28, %v263_v48 }
  0xf0   :  { %489 = vmatpush.msra.mxu1 %v430_v58  ;;  %v428_v38 = vsel %vm410_vm4, %v377_v16, %v390_v34  ;;  %v303_v58 = vsel %vm302_vm14, %v295_v62, %v9540_v41  ;;  %v340_v41 = vsel %vm339_vm12, %v332_v50, %v337_v37  ;;  %v596_v34 = vld.sshfl [vmem:[#allocation1 + $0x28] sm:$0xff pattern:$0x75316420] }
  0xf1   :  { %v411_v40 = vsel %vm410_vm4, %v73_v59, %v342_v56  ;;  %v402_v8 = vrot.slane %v303_v58, 4 }
  0xf2   :  { %490 = vmatpush.msra.mxu1 %v424_v7  ;;  %v347_v7 = vrot.slane %v103_v63, 4 }
  0xf3   :  { %v433_v49 = vsel %vm410_vm4, %v266_v47, %v402_v8  ;;  %v7337_v47 = vld [vmem:[%s14022_s3 + $0x4] sm:$0xf] }
  0xf4   :  { %v316_v39 = vpop.permute.xlu1 %315  ;;  %491 = vmatpush.msra.mxu1 %v418_v30 }
  0xf5   :  { %v328_v44 = vsel %vm327_vm3, %v316_v39, %v318_v51  ;;  %v152_v51 = vsel %vm141_vm5, %v119_v43, %v7638_v55 }
  0xf6   :  { %7338 = vmatpush.msk.msra.mxu0 %vm410_vm4, %v328_v44  ;;  %492 = vmatpush.msra.mxu1 %v412_v22  ;;  %v417_v55 = vsel %vm410_vm4, %v152_v51, %v355_v35  ;;  %v140_v21 = vpop.permute.xlu0 %139 }
  0xf7   :  { %7341 = vmatmul.msk.f32.vlgmr.msra.gmra.mxu1 %vm440_vm9, %v9504_v19  ;;  %v145_v25 = vsel %vm141_vm5, %v7639_v20, %v140_v21  ;;  %v594_v20 = vld.sshfl [vmem:[#allocation1 + $0x18] sm:$0xff pattern:$0x75316420] }
  0xf8   :  { %7348 = vmatpush.msk.msrb.mxu1 %vm410_vm4, %v337_v37  ;;  %469 = vmatpush.msra.mxu0 %v429_v32  ;;  %1024 = vst [vmem:[#allocation1 + $0x10] ss:$2 sm:$0xff] %v9655_v6 }
  0xfa   :  { %569 = vmatpush.msrb.mxu1 %v434_v23  ;;  %470 = vmatpush.msra.mxu0 %v423_v14  ;;  %v595_v23 = vld.sshfl [vmem:[#allocation1 + $0x20] sm:$0xff pattern:$0x75316420] }
  0xfb   :  { %1026 = vst [vmem:[#allocation1 + $0x20] ss:$2 sm:$0xff] %v9681_v10 }
  0xfc   :  { %570 = vmatpush.msrb.mxu1 %v428_v38  ;;  %v7677_v60 = vpop.permute.xlu1 %7676  ;;  %471 = vmatpush.msra.mxu0 %v417_v55 }
  0xfd   :  { %v7679_v52 = vunpack.i.h.bf16 %v7677_v60  ;;  %v7678_v26 = vunpack.i.l.bf16 %v7677_v60 }
  0xfe   :  { %472 = vmatpush.msra.mxu0 %v411_v40 }
  0xff   :  { %7339 = vmatmul.msk.f32.vlgmr.msra.gmra.mxu0 %vm440_vm9, %v9504_v19  ;;  %v186_v4 = vsel %vm181_vm6, %v7678_v26, %v7679_v52  ;;  %v185_v46 = vsel %vm181_vm6, %v7659_v9, %v7678_v26  ;;  %v346_v9 = vrot.slane %v108_v53, 4 }
 0x100   :  { %7346 = vmatpush.msk.msrb.mxu0 %vm410_vm4, %v340_v41  ;;  %v360_v3 = vrot.slane %v186_v4, 4  ;;  %v359_v57 = vrot.slane %v185_v46, 4 }
 0x102   :  { %549 = vmatpush.msrb.mxu0 %v433_v49  ;;  %v422_v11 = vsel %vm410_vm4, %v140_v21, %v360_v3  ;;  %v421_v15 = vsel %vm410_vm4, %v145_v25, %v359_v57 }
 0x103   :  { %571 = vmatpush.msrb.mxu1 %v422_v11 }
 0x104   :  { %550 = vmatpush.msrb.mxu0 %v427_v5  ;;  %v61_v29 = vpop.permute.xlu1 %60 }
 0x105   :  { %v416_v13 = vsel %vm410_vm4, %v61_v29, %v347_v7  ;;  %v66_v30 = vsel %vm62_vm8, %v7589_v45, %v61_v29  ;;  %v9662_v45 = vld [vmem:[%s14023_s1] sm:$0xff] }
 0x106   :  { %551 = vmatpush.msrb.mxu0 %v421_v15  ;;  %572 = vmatpush.msrb.mxu1 %v416_v13  ;;  %v415_v54 = vsel %vm410_vm4, %v66_v30, %v346_v9  ;;  %586 = vst [vmem:[#allocation1] ss:$2 sm:$0xff] %v9662_v45 }
 0x107   :  { %7349 = vmatmul.msk.f32.vlgmr.msrb.gmra.mxu1 %vm440_vm9, %v9504_v19 }
 0x108   :  { %552 = vmatpush.msrb.mxu0 %v415_v54 }
 0x109   :  { %7347 = vmatmul.msk.f32.vlgmr.msrb.gmra.mxu0 %vm440_vm9, %v9504_v19 }
 0x10d   :  { %v592_v27 = vld.sshfl [vmem:[#allocation1 + $0x8] sm:$0xff pattern:$0x75316420]  ;;  %v591_v48 = vld.sshfl [vmem:[#allocation1] sm:$0xff pattern:$0x75316420] }
 0x10e   :  { %1022 = vst [vmem:[#allocation1] ss:$2 sm:$0xff] %v9662_v45 }
 0x127   :  { %v438_v18 = vpop.permute.xlu2 %437 }
 0x14f   :  { %v514_v19 = vpop.f32.mrf.mxu2 }
 0x150   :  { %v515_v37 = vadd.f32 %v514_v19, %v438_v18 }
 0x152   :  { %v579_v39 = vmax.f32 %v515_v37, 0.0 }
 0x154   :  { %v9665_v22 = vmul.f32 %v593_v24, %v579_v39 }
 0x156   :  { %787 = vrot.lane.b32.xlu0 %v9665_v22, %s9267_s30 }
 0x158   :  { %v534_v43 = vpop.f32.mrf.mxu3 }
 0x159   :  { %v535_v17 = vadd.f32 %v534_v43, %v438_v18 }
 0x15b   :  { %v580_v12 = vmax.f32 %v535_v17, 0.0 }
 0x15d   :  { %v9669_v44 = vmul.f32 %v594_v20, %v580_v12 }
 0x15f   :  { %v7681_v32 = vpack.i.bf16 %v9669_v44, %v9665_v22  ;;  %789 = vrot.lane.b32.xlu1 %v9669_v44, %s9267_s30 }
 0x161   :  { %7682 = vrot.lane.b32.xlu0 %v7681_v32, %s9268_s5  ;;  %7692 = vrot.lane.b32.xlu2 %v7681_v32, %s9264_s27 }
 0x167   :  { %7687 = vrot.lane.b32.xlu1 %v7681_v32, %s9260_s23 }
 0x174   :  { %v494_v35 = vpop.f32.mrf.mxu1 }
 0x175   :  { %v495_v42 = vadd.f32 %v494_v35, %v438_v18 }
 0x177   :  { %v578_v16 = vmax.f32 %v495_v42, 0.0 }
 0x179   :  { %v9686_v51 = vmul.f32 %v592_v27, %v578_v16 }
 0x17b   :  { %785 = vrot.lane.b32.xlu2 %v9686_v51, %s9267_s30  ;;  %v7696_v56 = vpack.i.bf16 %v9665_v22, %v9686_v51 }
 0x17c   :  { %v474_v61 = vpop.f32.mrf.mxu0 }
 0x17d   :  { %v475_v62 = vadd.f32 %v474_v61, %v438_v18  ;;  %7697 = vrot.lane.b32.xlu0 %v7696_v56, %s9265_s28 }
 0x17f   :  { %v577_v14 = vmax.f32 %v475_v62, 0.0 }
 0x181   :  { %v9693_v59 = vmul.f32 %v591_v48, %v577_v14 }
 0x183   :  { %7712 = vrot.lane.b32.xlu2 %v7696_v56, %s9263_s26  ;;  %v7701_v38 = vpack.i.bf16 %v9669_v44, %v9693_v59  ;;  %v7726_v55 = vpack.i.bf16 %v9686_v51, %v9693_v59 }
 0x184   :  { %v574_v36 = vpop.f32.mrf.mxu1 }
 0x185   :  { %783 = vrot.lane.b32.xlu0 %v9693_v59, %s9267_s30  ;;  %7702 = vrot.lane.b32.xlu1 %v7701_v38, %s9265_s28  ;;  %v575_v58 = vadd.f32 %v574_v36, %v438_v18 }
 0x186   :  { %v554_v50 = vpop.f32.mrf.mxu0 }
 0x187   :  { %v555_v60 = vadd.f32 %v554_v50, %v438_v18  ;;  %v582_v52 = vmax.f32 %v575_v58, 0.0 }
 0x189   :  { %v581_v26 = vmax.f32 %v555_v60, 0.0  ;;  %v9711_v40 = vmul.f32 %v596_v34, %v582_v52 }
 0x18b   :  { %7722 = vrot.lane.b32.xlu2 %v7701_v38, %s9263_s26  ;;  %v9713_v28 = vmul.f32 %v595_v23, %v581_v26 }
 0x18d   :  { %7727 = vrot.lane.b32.xlu0 %v7726_v55, %s9268_s5  ;;  %7707 = vrot.lane.b32.xlu1 %v7696_v56, %s9261_s24  ;;  %v7746_v63 = vpack.i.bf16 %v9711_v40, %v9713_v28 }
 0x193   :  { %7737 = vrot.lane.b32.xlu2 %v7726_v55, %s9264_s27 }
 0x195   :  { %7732 = vrot.lane.b32.xlu0 %v7726_v55, %s9260_s23  ;;  %7717 = vrot.lane.b32.xlu1 %v7701_v38, %s9261_s24 }
 0x19b   :  { %801 = vrot.lane.b32.xlu2 %v9693_v59, %s9272_s9 }
 0x19d   :  { %757 = vrot.lane.b32.xlu0 %v9693_v59, %s9270_s7  ;;  %7742 = vrot.lane.b32.xlu1 %v7726_v55, %s9258_s0 }
 0x1a3   :  { %7747 = vrot.lane.b32.xlu2 %v7746_v63, %s9259_s22 }
 0x1a5   :  { %7762 = vrot.lane.b32.xlu0 %v7746_v63, %s9265_s28  ;;  %779 = vrot.lane.b32.xlu1 %v9693_v59, %s9271_s8 }
 0x1ab   :  { %791 = vrot.lane.b32.xlu2 %v9713_v28, %s9267_s30 }
 0x1ad   :  { %7767 = vrot.lane.b32.xlu0 %v7746_v63, %s9257_s21  ;;  %731 = vrot.lane.b32.xlu1 %v9693_v59, %s9269_s6 }
 0x1b3   :  { %7772 = vrot.lane.b32.xlu2 %v7746_v63, %s9261_s24 }
 0x1b5   :  { %7777 = vrot.lane.b32.xlu0 %v7746_v63, %s9263_s26  ;;  %691 = vrot.lane.b32.xlu1 %v9711_v40, %s9266_s29 }
 0x1bb   :  { %793 = vrot.lane.b32.xlu2 %v9711_v40, %s9267_s30  ;;  %v9745_v33 = vpop.permute.xlu2 %7692 }
 0x1bd   :  { %7782 = vrot.lane.b32.xlu0 %v7746_v63, %s9268_s5  ;;  %7752 = vrot.lane.b32.xlu1 %v7746_v63, %s9262_s25 }
 0x1c3   :  { %656 = vrot.lane.b32.xlu2 %v9713_v28, %s9260_s23 }
 0x1c5   :  { %678 = vrot.lane.b32.xlu0 %v9713_v28, %s9264_s27  ;;  %7757 = vrot.lane.b32.xlu1 %v7681_v32, %s9258_s0 }
 0x1c8   :  { %v788_v8 = vpop.permute.xlu0 %787 }
 0x1cb   :  { %883 = vperm.xlu2 %7680, %v7337_v47  }
 0x1cd   :  { %629 = vrot.lane.b32.xlu1 %v9713_v28, %s9258_s0 }
 0x1d1   :  { %v790_v41 = vpop.permute.xlu1 %789 }
 0x1d2   :  { %v797_v4 = vsel %vm327_vm3, %v788_v8, %v790_v41 }
 0x1d3   :  { %7354 = vmatpush.msk.msra.mxu0 %vm410_vm4, %v797_v4  ;;  %v9755_v7 = vpop.permute.xlu0 %7682 }
 0x1d4   :  { %v7684_v47 = vunpack.i.l.bf16 %v9755_v7 }
 0x1d5   :  { %v786_v46 = vpop.permute.xlu2 %785 }
 0x1d6   :  { %v796_v31 = vsel %vm327_vm3, %v786_v46, %v788_v8 }
 0x1d7   :  { %7352 = vmatpush.msk.msrb.mxu3 %vm410_vm4, %v796_v31 }
 0x1d9   :  { %v9759_v49 = vpop.permute.xlu1 %7687 }
 0x1dd   :  { %v7713_v3 = vpop.permute.xlu2 %7712 }
 0x1de   :  { %v7715_v11 = vunpack.i.h.bf16 %v7713_v3  ;;  %v7714_v5 = vunpack.i.l.bf16 %v7713_v3 }
 0x1e0   :  { %v748_v13 = vsel %vm249_vm1, %v7714_v5, %v7715_v11 }
 0x1e5   :  { %v9753_v53 = vpop.permute.xlu2 %7722 }
 0x1e6   :  { %v7725_v24 = vunpack.i.h.bf16 %v9753_v53  ;;  %v7724_v19 = vunpack.i.l.bf16 %v9753_v53 }
 0x1e8   :  { %v747_v48 = vsel %vm249_vm1, %v7724_v19, %v7714_v5  ;;  %v749_v34 = vsel %vm249_vm1, %v7715_v11, %v7725_v24 }
 0x1ed   :  { %v9757_v21 = vpop.permute.xlu2 %7737 }
 0x1ee   :  { %v7740_v55 = vunpack.i.h.bf16 %v9757_v21  ;;  %v7739_v36 = vunpack.i.l.bf16 %v9757_v21 }
 0x1ef   :  { %v7698_v57 = vpop.permute.xlu0 %7697 }
 0x1f0   :  { %v7700_v9 = vunpack.i.h.bf16 %v7698_v57  ;;  %v7699_v29 = vunpack.i.l.bf16 %v7698_v57  ;;  %v680_v4 = vsel %vm141_vm5, %v7739_v36, %v7740_v55 }
 0x1f2   :  { %v774_v25 = vsel %vm290_vm0, %v7699_v29, %v7700_v9 }
 0x1f3   :  { %v846_v15 = vrot.slane %v774_v25, 4 }
 0x1f5   :  { %v9763_v30 = vpop.permute.xlu2 %801  ;;  %v876_v54 = vsel %vm410_vm4, %v748_v13, %v846_v15 }
 0x1f6   :  { %934 = vmatpush.msrb.mxu3 %v876_v54  ;;  %v7694_v54 = vunpack.i.l.bf16 %v9745_v33 }
 0x1f7   :  { %v784_v20 = vpop.permute.xlu0 %783  ;;  %v9767_v18 = vpop.permute.xlu1 %7702 }
 0x1f8   :  { %v7705_v37 = vunpack.i.h.bf16 %v9767_v18  ;;  %v7704_v39 = vunpack.i.l.bf16 %v9767_v18  ;;  %v795_v43 = vsel %vm327_vm3, %v784_v20, %v786_v46 }
 0x1f9   :  { %7350 = vmatpush.msk.msrb.mxu2 %vm410_vm4, %v795_v43 }
 0x1fa   :  { %v773_v17 = vsel %vm290_vm0, %v7704_v39, %v7699_v29  ;;  %v775_v12 = vsel %vm290_vm0, %v7700_v9, %v7705_v37  ;;  %v681_v39 = vsel %vm141_vm5, %v7740_v55, %v7694_v54 }
 0x1fb   :  { %v845_v32 = vrot.slane %v773_v17, 4  ;;  %v847_v27 = vrot.slane %v775_v12, 4 }
 0x1fd   :  { %v9782_v23 = vpop.permute.xlu2 %7747  ;;  %v875_v35 = vsel %vm410_vm4, %v747_v48, %v845_v32  ;;  %v877_v42 = vsel %vm410_vm4, %v749_v34, %v847_v27  ;;  %v9841_v34 = vld [vmem:[%s14021_s2 + $0x4] sm:$0xf] }
 0x1fe   :  { %914 = vmatpush.msrb.mxu2 %v875_v35  ;;  %954 = vmatpush.msra.mxu0 %v877_v42 }
 0x1ff   :  { %v9786_v16 = vpop.permute.xlu0 %7727  ;;  %v7708_v56 = vpop.permute.xlu1 %7707 }
 0x200   :  { %v7730_v61 = vunpack.i.h.bf16 %v9786_v16  ;;  %v7729_v62 = vunpack.i.l.bf16 %v9786_v16  ;;  %v7710_v14 = vunpack.i.h.bf16 %v7708_v56  ;;  %v7709_v38 = vunpack.i.l.bf16 %v7708_v56 }
 0x202   :  { %v726_v50 = vsel %vm212_vm2, %v7709_v38, %v7710_v14  ;;  %v706_v58 = vsel %vm181_vm6, %v7729_v62, %v7730_v61 }
 0x203   :  { %v833_v60 = vrot.slane %v726_v50, 4  ;;  %v820_v52 = vrot.slane %v706_v58, 4 }
 0x205   :  { %v9796_v26 = vpop.permute.xlu2 %791  ;;  %v870_v63 = vsel %vm410_vm4, %v9686_v51, %v833_v60  ;;  %v864_v3 = vsel %vm410_vm4, %v680_v4, %v820_v52  ;;  %v707_v51 = vsel %vm181_vm6, %v7730_v61, %v7684_v47  ;;  %v7685_v4 = vunpack.i.h.bf16 %v9755_v7 }
 0x206   :  { %v798_v8 = vsel %vm327_vm3, %v790_v41, %v9796_v26  ;;  %935 = vmatpush.msrb.mxu3 %v870_v63  ;;  %v821_v13 = vrot.slane %v707_v51, 4  ;;  %v7695_v51 = vunpack.i.h.bf16 %v9745_v33 }
 0x207   :  { %7356 = vmatpush.msk.msra.mxu1 %vm410_vm4, %v798_v8  ;;  %v9807_v46 = vpop.permute.xlu0 %7732  ;;  %v7718_v31 = vpop.permute.xlu1 %7717 }
 0x208   :  { %v7720_v57 = vunpack.i.h.bf16 %v7718_v31  ;;  %v7719_v11 = vunpack.i.l.bf16 %v7718_v31  ;;  %936 = vmatpush.msrb.mxu3 %v864_v3  ;;  %v7735_v5 = vunpack.i.h.bf16 %v9807_v46  ;;  %v7734_v41 = vunpack.i.l.bf16 %v9807_v46 }
 0x209   :  { %v865_v32 = vsel %vm410_vm4, %v681_v39, %v821_v13 }
 0x20a   :  { %v725_v9 = vsel %vm212_vm2, %v7719_v11, %v7709_v38  ;;  %v727_v29 = vsel %vm212_vm2, %v7710_v14, %v7720_v57  ;;  %v658_v43 = vsel %vm104_vm7, %v7734_v41, %v7735_v5 }
 0x20b   :  { %v832_v25 = vrot.slane %v725_v9, 4  ;;  %v834_v15 = vrot.slane %v727_v29, 4  ;;  %v807_v27 = vrot.slane %v658_v43, 4 }
 0x20d   :  { %v869_v20 = vsel %vm410_vm4, %v9693_v59, %v832_v25  ;;  %v871_v19 = vsel %vm410_vm4, %v9665_v22, %v834_v15  ;;  %v7773_v38 = vpop.permute.xlu2 %7772  ;;  %v708_v25 = vsel %vm181_vm6, %v7684_v47, %v7685_v4  ;;  %v682_v47 = vsel %vm141_vm5, %v7694_v54, %v7695_v51 }
 0x20e   :  { %915 = vmatpush.msrb.mxu2 %v869_v20  ;;  %955 = vmatpush.msra.mxu0 %v871_v19  ;;  %v7775_v55 = vunpack.i.h.bf16 %v7773_v38  ;;  %v7774_v63 = vunpack.i.l.bf16 %v7773_v38  ;;  %v7749_v19 = vunpack.i.l.bf16 %v9782_v23 }
 0x20f   :  { %v9826_v17 = vpop.permute.xlu0 %757  ;;  %v9828_v12 = vpop.permute.xlu1 %7742 }
 0x210   :  { %v7745_v59 = vunpack.i.h.bf16 %v9828_v12  ;;  %v7744_v22 = vunpack.i.l.bf16 %v9828_v12  ;;  %956 = vmatpush.msra.mxu0 %v865_v32  ;;  %v728_v11 = vsel %vm212_vm2, %v7720_v57, %v7774_v63 }
 0x211   :  { %v835_v20 = vrot.slane %v728_v11, 4 }
 0x212   :  { %v631_v48 = vsel %vm62_vm8, %v7744_v22, %v7745_v59 }
 0x213   :  { %v858_v35 = vsel %vm410_vm4, %v631_v48, %v807_v27  ;;  %v872_v32 = vsel %vm410_vm4, %v9669_v44, %v835_v20 }
 0x214   :  { %937 = vmatpush.msrb.mxu3 %v858_v35 }
 0x215   :  { %7353 = vmatmul.msk.f32.vlgmr.msrb.gmra.mxu3 %vm440_vm9, %v9841_v34  ;;  %v794_v27 = vpop.permute.xlu2 %793 }
 0x216   :  { %7360 = vmatpush.msk.msra.mxu3 %vm410_vm4, %v9763_v30 }
 0x217   :  { %v7763_v42 = vpop.permute.xlu0 %7762  ;;  %v9848_v56 = vpop.permute.xlu1 %779 }
 0x218   :  { %v850_v61 = vrot.slane %v9848_v56, 4  ;;  %v7764_v8 = vunpack.i.l.bf16 %v7763_v42  ;;  %v7765_v48 = vunpack.i.h.bf16 %v7763_v42 }
 0x21a   :  { %v880_v14 = vsel %vm410_vm4, %v9826_v17, %v850_v61  ;;  %v776_v3 = vsel %vm290_vm0, %v7705_v37, %v7764_v8  ;;  %v822_v37 = vrot.slane %v708_v25, 4  ;;  %v777_v16 = vsel %vm290_vm0, %v7764_v8, %v7765_v48 }
 0x21b   :  { %1014 = vmatpush.msra.mxu3 %v880_v14  ;;  %v848_v13 = vrot.slane %v776_v3, 4  ;;  %v729_v25 = vsel %vm212_vm2, %v7774_v63, %v7775_v55  ;;  %v782_v21 = vsel %vm302_vm14, %v777_v16, %v9848_v56 }
 0x21c   :  { %v866_v53 = vsel %vm410_vm4, %v682_v47, %v822_v37  ;;  %v836_v56 = vrot.slane %v729_v25, 4  ;;  %v849_v63 = vrot.slane %v782_v21, 4 }
 0x21e   :  { %v873_v12 = vsel %vm410_vm4, %v9713_v28, %v836_v56 }
 0x21f   :  { %v7768_v50 = vpop.permute.xlu0 %7767  ;;  %v732_v58 = vpop.permute.xlu1 %731 }
 0x220   :  { %v734_v60 = vsel %vm14026_vm11, %v7775_v55, %v732_v58  ;;  %v7770_v57 = vunpack.i.h.bf16 %v7768_v50  ;;  %v7769_v39 = vunpack.i.l.bf16 %v7768_v50  ;;  %vm14030_vm11 = vcmask 72704  }
 0x221   :  { %v837_v52 = vrot.slane %v734_v60, 4  ;;  %v7690_v60 = vunpack.i.h.bf16 %v9759_v49 }
 0x222   :  { %v615_v54 = vsel %vm37_vm13, %v7769_v39, %v7770_v57 }
 0x223   :  { %v874_v31 = vsel %vm410_vm4, %v9711_v40, %v837_v52  ;;  %v7750_v40 = vunpack.i.h.bf16 %v9782_v23  ;;  %v7689_v52 = vunpack.i.l.bf16 %v9759_v49 }
 0x224   :  { %1015 = vmatpush.msra.mxu3 %v874_v31 }
 0x225   :  { %v660_v20 = vsel %vm104_vm7, %v7689_v52, %v7690_v60 }
 0x226   :  { %v809_v37 = vrot.slane %v660_v20, 4 }
 0x227   :  { %v7778_v9 = vpop.permute.xlu0 %7777  ;;  %v692_v29 = vpop.permute.xlu1 %691 }
 0x228   :  { %v7779_v15 = vunpack.i.l.bf16 %v7778_v9  ;;  %v7780_v23 = vunpack.i.h.bf16 %v7778_v9  ;;  %v712_v35 = vsel %vm181_vm6, %v692_v29, %v7729_v62  ;;  %v799_v29 = vsel %vm327_vm3, %v9796_v26, %v794_v27 }
 0x229   :  { %v819_v62 = vrot.slane %v712_v35, 4  ;;  %v804_v26 = vsel %vm339_vm12, %v799_v29, %v9763_v30  ;;  %v1028_v35 = vld.sshfl [vmem:[#allocation1 + $0x8] sm:$0xff pattern:$0x75316420] }
 0x22a   :  { %v750_v18 = vsel %vm249_vm1, %v7725_v24, %v7779_v15  ;;  %v646_v24 = vsel %vm81_vm10, %v7749_v19, %v7750_v40  ;;  %v751_v8 = vsel %vm249_vm1, %v7779_v15, %v7780_v23  ;;  %v1027_v23 = vld.sshfl [vmem:[#allocation1] sm:$0xff pattern:$0x75316420] }
 0x22b   :  { %v878_v43 = vsel %vm410_vm4, %v750_v18, %v848_v13  ;;  %v663_v44 = vsel %vm104_vm7, %v646_v24, %v7734_v41  ;;  %v641_v41 = vsel %vm62_vm8, %v615_v54, %v7744_v22  ;;  %v659_v22 = vsel %vm104_vm7, %v7735_v5, %v7689_v52  ;;  %v657_v5 = vpop.permute.xlu2 %656  ;;  %1045 = vst [vmem:[#allocation1] ss:$2 sm:$0xff] %v9315_v2 }
 0x22c   :  { %974 = vmatpush.msra.mxu1 %v878_v43  ;;  %v806_v11 = vrot.slane %v663_v44, 4  ;;  %v760_v55 = vsel %vm265_vm15, %v751_v8, %v9826_v17  ;;  %v808_v30 = vrot.slane %v659_v22, 4  ;;  %v661_v7 = vsel %vm104_vm7, %v7690_v60, %v657_v5 }
 0x22d   :  { %v879_v17 = vsel %vm410_vm4, %v760_v55, %v849_v63  ;;  %v811_v33 = vrot.slane %v657_v5, 4 }
 0x22e   :  { %975 = vmatpush.msra.mxu1 %v872_v32 }
 0x22f   :  { %v7783_v61 = vpop.permute.xlu0 %7782  ;;  %v7753_v14 = vpop.permute.xlu1 %7752 }
 0x230   :  { %v7785_v38 = vunpack.i.h.bf16 %v7783_v61  ;;  %v7784_v42 = vunpack.i.l.bf16 %v7783_v61  ;;  %v7755_v50 = vunpack.i.h.bf16 %v7753_v14  ;;  %v7754_v58 = vunpack.i.l.bf16 %v7753_v14  ;;  %976 = vmatpush.msra.mxu1 %v866_v53  ;;  %v1029_v61 = vld.sshfl [vmem:[#allocation1 + $0x10] sm:$0xff pattern:$0x75316420]  ;;  %v1030_v14 = vld.sshfl [vmem:[#allocation1 + $0x18] sm:$0xff pattern:$0x75316420] }
 0x231   :  { %1047 = vst [vmem:[#allocation1 + $0x10] ss:$2 sm:$0xff] %v9307_v1 }
 0x232   :  { %v668_v31 = vsel %vm14030_vm11, %v7754_v58, %v7755_v50  ;;  %v710_v9 = vsel %vm181_vm6, %v7784_v42, %v7785_v38  ;;  %v709_v57 = vsel %vm181_vm6, %v7685_v4, %v7784_v42  ;;  %v1051_v54 = vld.sshfl [vmem:[#allocation1 + $0x8] sm:$0xff pattern:$0x75316420]  ;;  %v1050_v44 = vld.sshfl [vmem:[#allocation1] sm:$0xff pattern:$0x75316420] }
 0x233   :  { %v690_v3 = vsel %vm141_vm5, %v668_v31, %v7739_v36  ;;  %v857_v36 = vsel %vm410_vm4, %v641_v41, %v806_v11  ;;  %v824_v13 = vrot.slane %v710_v9, 4  ;;  %v823_v4 = vrot.slane %v709_v57, 4  ;;  %1495 = vst [vmem:[#allocation1] ss:$2 sm:$0xff] %v9662_v45  ;;  %v884_v52 = vpop.permute.xlu2 %883 }
 0x234   :  { %v863_v49 = vsel %vm410_vm4, %v690_v3, %v819_v62  ;;  %v1031_v50 = vld.sshfl [vmem:[#allocation1 + $0x20] sm:$0xff pattern:$0x75316420]  ;;  %v1032_v58 = vld.sshfl [vmem:[#allocation1 + $0x28] sm:$0xff pattern:$0x75316420] }
 0x235   :  { %916 = vmatpush.msrb.mxu2 %v863_v49  ;;  %1049 = vst [vmem:[#allocation1 + $0x20] ss:$2 sm:$0xff] %v9302_v0 }
 0x237   :  { %v679_v40 = vpop.permute.xlu0 %678  ;;  %v7758_v15 = vpop.permute.xlu1 %7757  ;;  %917 = vmatpush.msrb.mxu2 %v857_v36 }
 0x238   :  { %v7760_v19 = vunpack.i.h.bf16 %v7758_v15  ;;  %v7759_v18 = vunpack.i.l.bf16 %v7758_v15  ;;  %7351 = vmatmul.msk.f32.vlgmr.msrb.gmra.mxu2 %vm440_vm9, %v9841_v34  ;;  %v868_v46 = vsel %vm410_vm4, %v679_v40, %v824_v13  ;;  %v683_v47 = vsel %vm141_vm5, %v7695_v51, %v679_v40  ;;  %v1052_v38 = vld.sshfl [vmem:[#allocation1 + $0x10] sm:$0xff pattern:$0x75316420]  ;;  %v1053_v42 = vld.sshfl [vmem:[#allocation1 + $0x18] sm:$0xff pattern:$0x75316420] }
 0x239   :  { %7358 = vmatpush.msk.msra.mxu2 %vm410_vm4, %v804_v26  ;;  %1016 = vmatpush.msra.mxu3 %v868_v46  ;;  %v810_v51 = vrot.slane %v661_v7, 4  ;;  %1497 = vst [vmem:[#allocation1 + $0x10] ss:$2 sm:$0xff] %v9655_v6 }
 0x23a   :  { %v632_v39 = vsel %vm62_vm8, %v7745_v59, %v7759_v18  ;;  %v633_v43 = vsel %vm62_vm8, %v7759_v18, %v7760_v19  ;;  %v867_v59 = vsel %vm410_vm4, %v683_v47, %v823_v4 }
 0x23b   :  { %994 = vmatpush.msra.mxu2 %v879_v17  ;;  %v859_v32 = vsel %vm410_vm4, %v632_v39, %v808_v30  ;;  %v860_v27 = vsel %vm410_vm4, %v633_v43, %v809_v37  ;;  %v7364_v30 = vld [vmem:[%s14022_s3 + $0x8] sm:$0xf] }
 0x23c   :  { %957 = vmatpush.msra.mxu0 %v859_v32  ;;  %977 = vmatpush.msra.mxu1 %v860_v27  ;;  %v1054_v60 = vld.sshfl [vmem:[#allocation1 + $0x20] sm:$0xff pattern:$0x75316420] }
 0x23d   :  { %995 = vmatpush.msra.mxu2 %v873_v12  ;;  %7355 = vmatmul.msk.f32.vlgmr.msra.gmra.mxu0 %vm440_vm9, %v9841_v34 }
 0x23e   :  { %7357 = vmatmul.msk.f32.vlgmr.msra.gmra.mxu1 %vm440_vm9, %v9841_v34 }
 0x23f   :  { %996 = vmatpush.msra.mxu2 %v867_v59  ;;  %v630_v48 = vpop.permute.xlu1 %629 }
 0x240   :  { %v634_v53 = vsel %vm62_vm8, %v7760_v19, %v630_v48  ;;  %v862_v24 = vsel %vm410_vm4, %v630_v48, %v811_v33 }
 0x241   :  { %1017 = vmatpush.msra.mxu3 %v862_v24  ;;  %v861_v28 = vsel %vm410_vm4, %v634_v53, %v810_v51 }
 0x242   :  { %997 = vmatpush.msra.mxu2 %v861_v28  ;;  %7361 = vmatmul.msk.f32.vlgmr.msra.gmra.mxu3 %vm440_vm9, %v9841_v34 }
 0x243   :  { %7359 = vmatmul.msk.f32.vlgmr.msra.gmra.mxu2 %vm440_vm9, %v9841_v34  ;;  %v1055_v34 = vld.sshfl [vmem:[#allocation1 + $0x28] sm:$0xff pattern:$0x75316420] }
 0x244   :  { %1499 = vst [vmem:[#allocation1 + $0x20] ss:$2 sm:$0xff] %v9681_v10 }
 0x298   :  { %v939_v2 = vpop.f32.mrf.mxu3 }
 0x299   :  { %v940_v16 = vadd.f32 %v939_v2, %v884_v52 }
 0x29b   :  { %v1040_v62 = vmul.f32 %v1028_v35, %v940_v16 }
 0x29d   :  { %v9950_v41 = vadd.f32 %v1051_v54, %v1040_v62 }
 0x2ba   :  { %v959_v1 = vpop.f32.mrf.mxu0 }
 0x2bb   :  { %v960_v31 = vadd.f32 %v959_v1, %v884_v52  ;;  %v979_v9 = vpop.f32.mrf.mxu1  ;;  %v919_v8 = vpop.f32.mrf.mxu2 }
 0x2bc   :  { %v980_v29 = vadd.f32 %v979_v9, %v884_v52  ;;  %v920_v21 = vadd.f32 %v919_v8, %v884_v52 }
 0x2bd   :  { %v1041_v3 = vmul.f32 %v1029_v61, %v960_v31 }
 0x2be   :  { %v1042_v49 = vmul.f32 %v1030_v14, %v980_v29  ;;  %v1039_v13 = vmul.f32 %v1027_v23, %v920_v21 }
 0x2bf   :  { %v9952_v11 = vadd.f32 %v1052_v38, %v1041_v3 }
 0x2c0   :  { %v9962_v25 = vadd.f32 %v1053_v42, %v1042_v49  ;;  %v9972_v22 = vadd.f32 %v1050_v44, %v1039_v13 }
 0x2c1   :  { %1254 = vrot.lane.b32.xlu1 %v9952_v11, %s9267_s30  ;;  %v7791_v0 = vpack.i.bf16 %v9952_v11, %v9950_v41 }
 0x2c2   :  { %v7816_v36 = vpack.i.bf16 %v9962_v25, %v9952_v11  ;;  %v7821_v20 = vpack.i.bf16 %v9972_v22, %v9950_v41  ;;  %v7836_v40 = vpack.i.bf16 %v9962_v25, %v9972_v22 }
 0x2c3   :  { %7792 = vrot.lane.b32.xlu2 %v7791_v0, %s9260_s23  ;;  %7787 = vrot.lane.b32.xlu0 %v7791_v0, %s9268_s5 }
 0x2c5   :  { %v1019_v26 = vpop.f32.mrf.mxu3 }
 0x2c6   :  { %v1020_v15 = vadd.f32 %v1019_v26, %v884_v52  ;;  %v999_v56 = vpop.f32.mrf.mxu2 }
 0x2c7   :  { %v1000_v19 = vadd.f32 %v999_v56, %v884_v52 }
 0x2c8   :  { %v1044_v55 = vmul.f32 %v1032_v58, %v1020_v15 }
 0x2c9   :  { %1252 = vrot.lane.b32.xlu1 %v9950_v41, %s9267_s30  ;;  %v1043_v18 = vmul.f32 %v1031_v50, %v1000_v19 }
 0x2ca   :  { %v9985_v63 = vadd.f32 %v1055_v34, %v1044_v55 }
 0x2cb   :  { %7802 = vrot.lane.b32.xlu2 %v7791_v0, %s9258_s0  ;;  %7797 = vrot.lane.b32.xlu0 %v7791_v0, %s9264_s27  ;;  %v9993_v46 = vadd.f32 %v1054_v60, %v1043_v18 }
 0x2cd   :  { %v7856_v5 = vpack.i.bf16 %v9985_v63, %v9993_v46 }
 0x2d1   :  { %7817 = vrot.lane.b32.xlu1 %v7816_v36, %s9263_s26 }
 0x2d3   :  { %1256 = vrot.lane.b32.xlu2 %v9962_v25, %s9267_s30  ;;  %7807 = vrot.lane.b32.xlu0 %v7816_v36, %s9265_s28 }
 0x2d9   :  { %1250 = vrot.lane.b32.xlu1 %v9972_v22, %s9267_s30 }
 0x2db   :  { %7812 = vrot.lane.b32.xlu0 %v7816_v36, %s9261_s24  ;;  %7822 = vrot.lane.b32.xlu2 %v7821_v20, %s9265_s28 }
 0x2e1   :  { %7837 = vrot.lane.b32.xlu1 %v7836_v40, %s9268_s5 }
 0x2e3   :  { %7832 = vrot.lane.b32.xlu0 %v7821_v20, %s9263_s26  ;;  %7827 = vrot.lane.b32.xlu2 %v7821_v20, %s9261_s24 }
 0x2e9   :  { %7847 = vrot.lane.b32.xlu1 %v7836_v40, %s9264_s27 }
 0x2eb   :  { %1158 = vrot.lane.b32.xlu0 %v9985_v63, %s9266_s29  ;;  %7842 = vrot.lane.b32.xlu2 %v7836_v40, %s9260_s23 }
 0x2f1   :  { %1198 = vrot.lane.b32.xlu1 %v9972_v22, %s9269_s6 }
 0x2f3   :  { %1260 = vrot.lane.b32.xlu0 %v9985_v63, %s9267_s30  ;;  %7852 = vrot.lane.b32.xlu2 %v7836_v40, %s9258_s0 }
 0x2f9   :  { %7857 = vrot.lane.b32.xlu1 %v7856_v5, %s9259_s22 }
 0x2fb   :  { %7862 = vrot.lane.b32.xlu0 %v7856_v5, %s9262_s25  ;;  %1246 = vrot.lane.b32.xlu2 %v9972_v22, %s9271_s8 }
 0x301   :  { %7872 = vrot.lane.b32.xlu1 %v7856_v5, %s9257_s21 }
 0x303   :  { %1224 = vrot.lane.b32.xlu0 %v9972_v22, %s9270_s7  ;;  %7867 = vrot.lane.b32.xlu2 %v7856_v5, %s9265_s28 }
 0x309   :  { %7882 = vrot.lane.b32.xlu1 %v7856_v5, %s9263_s26 }
 0x30b   :  { %1258 = vrot.lane.b32.xlu0 %v9993_v46, %s9267_s30  ;;  %1268 = vrot.lane.b32.xlu2 %v9972_v22, %s9272_s9 }
 0x311   :  { %7887 = vrot.lane.b32.xlu1 %v7856_v5, %s9268_s5 }
 0x313   :  { %7877 = vrot.lane.b32.xlu0 %v7856_v5, %s9261_s24  ;;  %1123 = vrot.lane.b32.xlu2 %v9993_v46, %s9260_s23 }
 0x319   :  { %1096 = vrot.lane.b32.xlu1 %v9993_v46, %s9258_s0 }
 0x31b   :  { %1145 = vrot.lane.b32.xlu0 %v9993_v46, %s9264_s27  ;;  %1350 = vperm.xlu2 %7680, %v7364_v30  }
 0x31d   :  { %v10024_v37 = vpop.permute.xlu2 %7792 }
 0x31e   :  { %v7795_v35 = vunpack.i.h.bf16 %v10024_v37  ;;  %v7794_v61 = vunpack.i.l.bf16 %v10024_v37 }
 0x320   :  { %v1126_v2 = vsel %vm104_vm7, %v7794_v61, %v7795_v35 }
 0x321   :  { %v1275_v55 = vrot.slane %v1126_v2, 4 }
 0x325   :  { %v10026_v57 = vpop.permute.xlu2 %7802 }
 0x326   :  { %v7805_v31 = vunpack.i.h.bf16 %v10026_v57  ;;  %v7804_v3 = vunpack.i.l.bf16 %v10026_v57 }
 0x328   :  { %v1099_v15 = vsel %vm62_vm8, %v7804_v3, %v7805_v31 }
 0x32d   :  { %v10028_v17 = vpop.permute.xlu2 %1256 }
 0x333   :  { %v1255_v39 = vpop.permute.xlu1 %1254 }
 0x334   :  { %v1264_v43 = vsel %vm327_vm3, %v1255_v39, %v10028_v17 }
 0x335   :  { %v10032_v47 = vpop.permute.xlu0 %7787  ;;  %7370 = vmatpush.msk.msrb.mxu2 %vm410_vm4, %v1264_v43  ;;  %v7823_v32 = vpop.permute.xlu2 %7822 }
 0x336   :  { %v7790_v42 = vunpack.i.h.bf16 %v10032_v47  ;;  %v7789_v50 = vunpack.i.l.bf16 %v10032_v47  ;;  %v7825_v9 = vunpack.i.h.bf16 %v7823_v32  ;;  %v7824_v0 = vunpack.i.l.bf16 %v7823_v32 }
 0x338   :  { %v1174_v21 = vsel %vm181_vm6, %v7789_v50, %v7790_v42  ;;  %v1240_v56 = vsel %vm290_vm0, %v7825_v9, %v7824_v0 }
 0x339   :  { %v1288_v40 = vrot.slane %v1174_v21, 4 }
 0x33b   :  { %v1253_v27 = vpop.permute.xlu1 %1252 }
 0x33c   :  { %v1263_v7 = vsel %vm327_vm3, %v1253_v27, %v1255_v39 }
 0x33d   :  { %v10036_v12 = vpop.permute.xlu0 %7797  ;;  %7368 = vmatpush.msk.msrb.mxu1 %vm410_vm4, %v1263_v7  ;;  %v7828_v4 = vpop.permute.xlu2 %7827 }
 0x33e   :  { %v7800_v52 = vunpack.i.h.bf16 %v10036_v12  ;;  %v7799_v16 = vunpack.i.l.bf16 %v10036_v12  ;;  %v7830_v29 = vunpack.i.h.bf16 %v7828_v4  ;;  %v7829_v49 = vunpack.i.l.bf16 %v7828_v4 }
 0x33f   :  { %v1326_v4 = vsel %vm410_vm4, %v1099_v15, %v1275_v55 }
 0x340   :  { %v1148_v13 = vsel %vm141_vm5, %v7799_v16, %v7800_v52  ;;  %v1192_v18 = vsel %vm212_vm2, %v7830_v29, %v7829_v49 }
 0x341   :  { %v1332_v43 = vsel %vm410_vm4, %v1148_v13, %v1288_v40 }
 0x343   :  { %v10039_v33 = vpop.permute.xlu1 %7817 }
 0x344   :  { %v7820_v48 = vunpack.i.h.bf16 %v10039_v33  ;;  %v7819_v53 = vunpack.i.l.bf16 %v10039_v33 }
 0x345   :  { %v10041_v59 = vpop.permute.xlu0 %7807  ;;  %v10043_v51 = vpop.permute.xlu2 %7842 }
 0x346   :  { %v7810_v24 = vunpack.i.h.bf16 %v10041_v59  ;;  %v7809_v28 = vunpack.i.l.bf16 %v10041_v59  ;;  %v1216_v54 = vsel %vm249_vm1, %v7819_v53, %v7820_v48 }
 0x348   :  { %v1242_v23 = vsel %vm290_vm0, %v7809_v28, %v7810_v24  ;;  %v1241_v19 = vsel %vm290_vm0, %v7824_v0, %v7809_v28  ;;  %v10105_v28 = vld [vmem:[%s14021_s2 + $0x8] sm:$0xf] }
 0x349   :  { %v1314_v14 = vrot.slane %v1242_v23, 4  ;;  %v1312_v23 = vrot.slane %v1240_v56, 4 }
 0x34b   :  { %v1251_v44 = vpop.permute.xlu1 %1250  ;;  %v1344_v38 = vsel %vm410_vm4, %v1216_v54, %v1314_v14  ;;  %v1313_v14 = vrot.slane %v1241_v19, 4  ;;  %v1299_v54 = vrot.slane %v1192_v18, 4 }
 0x34c   :  { %v1262_v58 = vsel %vm327_vm3, %v1251_v44, %v1253_v27  ;;  %1421 = vmatpush.msrb.mxu2 %v1344_v38  ;;  %v7844_v38 = vunpack.i.l.bf16 %v10043_v51 }
 0x34d   :  { %v10061_v34 = vpop.permute.xlu0 %7812  ;;  %7366 = vmatpush.msk.msrb.mxu0 %vm410_vm4, %v1262_v58  ;;  %v10064_v60 = vpop.permute.xlu2 %7852 }
 0x34e   :  { %v7815_v1 = vunpack.i.h.bf16 %v10061_v34  ;;  %v7814_v62 = vunpack.i.l.bf16 %v10061_v34  ;;  %v7854_v0 = vunpack.i.l.bf16 %v10064_v60 }
 0x350   :  { %v1194_v8 = vsel %vm212_vm2, %v7814_v62, %v7815_v1  ;;  %v1193_v5 = vsel %vm212_vm2, %v7829_v49, %v7814_v62  ;;  %v1098_v15 = vsel %vm62_vm8, %v7854_v0, %v7804_v3 }
 0x351   :  { %v1301_v36 = vrot.slane %v1194_v8, 4  ;;  %v1300_v44 = vrot.slane %v1193_v5, 4  ;;  %v1336_v8 = vsel %vm410_vm4, %v9972_v22, %v1299_v54 }
 0x353   :  { %v10086_v20 = vpop.permute.xlu1 %7837  ;;  %v1338_v26 = vsel %vm410_vm4, %v9952_v11, %v1301_v36  ;;  %v1125_v36 = vsel %vm104_vm7, %v7844_v38, %v7794_v61 }
 0x354   :  { %1422 = vmatpush.msrb.mxu2 %v1338_v26  ;;  %v7839_v32 = vunpack.i.l.bf16 %v10086_v20  ;;  %v1274_v56 = vrot.slane %v1125_v36, 4  ;;  %v7840_v33 = vunpack.i.h.bf16 %v10086_v20 }
 0x355   :  { %v7833_v30 = vpop.permute.xlu0 %7832  ;;  %v10097_v39 = vpop.permute.xlu2 %1246 }
 0x356   :  { %v7835_v27 = vunpack.i.h.bf16 %v7833_v30  ;;  %v7834_v7 = vunpack.i.l.bf16 %v7833_v30  ;;  %1423 = vmatpush.msrb.mxu2 %v1332_v43  ;;  %v1173_v29 = vsel %vm181_vm6, %v7839_v32, %v7789_v50  ;;  %v1325_v19 = vsel %vm410_vm4, %v1098_v15, %v1274_v56 }
 0x357   :  { %v1287_v40 = vrot.slane %v1173_v29, 4 }
 0x358   :  { %1424 = vmatpush.msrb.mxu2 %v1326_v4  ;;  %v1214_v58 = vsel %vm249_vm1, %v7835_v27, %v7834_v7  ;;  %v1215_v2 = vsel %vm249_vm1, %v7834_v7, %v7819_v53  ;;  %v1337_v53 = vsel %vm410_vm4, %v9950_v41, %v1300_v44 }
 0x359   :  { %7371 = vmatmul.msk.f32.vlgmr.msrb.gmra.mxu2 %vm440_vm9, %v10105_v28  ;;  %v1342_v62 = vsel %vm410_vm4, %v1214_v58, %v1312_v23  ;;  %v1343_v9 = vsel %vm410_vm4, %v1215_v2, %v1313_v14 }
 0x35a   :  { %1381 = vmatpush.msrb.mxu0 %v1342_v62  ;;  %1401 = vmatpush.msrb.mxu1 %v1343_v9 }
 0x35b   :  { %v10116_v49 = vpop.permute.xlu1 %7847 }
 0x35c   :  { %v7849_v21 = vunpack.i.l.bf16 %v10116_v49  ;;  %1382 = vmatpush.msrb.mxu0 %v1336_v8  ;;  %1402 = vmatpush.msrb.mxu1 %v1337_v53 }
 0x35d   :  { %v1159_v13 = vpop.permute.xlu0 %1158  ;;  %v7868_v26 = vpop.permute.xlu2 %7867 }
 0x35e   :  { %v1147_v50 = vsel %vm141_vm5, %v7849_v21, %v7799_v16  ;;  %v1179_v3 = vsel %vm181_vm6, %v1159_v13, %v7839_v32  ;;  %v7870_v2 = vunpack.i.h.bf16 %v7868_v26  ;;  %v7869_v62 = vunpack.i.l.bf16 %v7868_v26 }
 0x35f   :  { %v1331_v55 = vsel %vm410_vm4, %v1147_v50, %v1287_v40  ;;  %v1286_v23 = vrot.slane %v1179_v3, 4  ;;  %v1317_v32 = vrot.slane %v10097_v39, 4 }
 0x360   :  { %1403 = vmatpush.msrb.mxu1 %v1331_v55 }
 0x362   :  { %1404 = vmatpush.msrb.mxu1 %v1325_v19 }
 0x363   :  { %v10130_v18 = vpop.permute.xlu1 %1198  ;;  %7369 = vmatmul.msk.f32.vlgmr.msrb.gmra.mxu1 %vm440_vm9, %v10105_v28 }
 0x365   :  { %v1261_v61 = vpop.permute.xlu0 %1260  ;;  %v1269_v5 = vpop.permute.xlu2 %1268 }
 0x366   :  { %7376 = vmatpush.msk.msra.mxu1 %vm410_vm4, %v1269_v5 }
 0x36b   :  { %v7858_v30 = vpop.permute.xlu1 %7857 }
 0x36c   :  { %v7860_v16 = vunpack.i.h.bf16 %v7858_v30  ;;  %v7859_v43 = vunpack.i.l.bf16 %v7858_v30 }
 0x36d   :  { %v7863_v27 = vpop.permute.xlu0 %7862 }
 0x36e   :  { %v7865_v7 = vunpack.i.h.bf16 %v7863_v27  ;;  %v7864_v4 = vunpack.i.l.bf16 %v7863_v27  ;;  %v1113_v14 = vsel %vm81_vm10, %v7859_v43, %v7860_v16 }
 0x36f   :  { %v1130_v29 = vsel %vm104_vm7, %v1113_v14, %v7844_v38  ;;  %v1243_v38 = vsel %vm290_vm0, %v7810_v24, %v7869_v62 }
 0x370   :  { %v1135_v54 = vsel %vm14030_vm11, %v7864_v4, %v7865_v7  ;;  %v1273_v50 = vrot.slane %v1130_v29, 4  ;;  %v1315_v43 = vrot.slane %v1243_v38, 4  ;;  %vm14031_vm11 = vcmask 56320  }
 0x371   :  { %v1157_v44 = vsel %vm141_vm5, %v1135_v54, %v7849_v21  ;;  %v1244_v21 = vsel %vm290_vm0, %v7869_v62, %v7870_v2  ;;  %v7845_v54 = vunpack.i.h.bf16 %v10043_v51  ;;  %v7855_v2 = vunpack.i.h.bf16 %v10064_v60  ;;  %v1124_v51 = vpop.permute.xlu2 %1123 }
 0x372   :  { %v1330_v58 = vsel %vm410_vm4, %v1157_v44, %v1286_v23  ;;  %v1249_v55 = vsel %vm302_vm14, %v1244_v21, %v10097_v39  ;;  %v1175_v29 = vsel %vm181_vm6, %v7790_v42, %v7840_v33 }
 0x373   :  { %v7873_v9 = vpop.permute.xlu1 %7872  ;;  %1383 = vmatpush.msrb.mxu0 %v1330_v58  ;;  %v1316_v3 = vrot.slane %v1249_v55, 4  ;;  %v1127_v60 = vsel %vm104_vm7, %v7795_v35, %v7845_v54  ;;  %v1128_v12 = vsel %vm104_vm7, %v7845_v54, %v1124_v51  ;;  %v1100_v35 = vsel %vm62_vm8, %v7805_v31, %v7855_v2 }
 0x374   :  { %v7875_v8 = vunpack.i.h.bf16 %v7873_v9  ;;  %v7874_v53 = vunpack.i.l.bf16 %v7873_v9 }
 0x375   :  { %v1225_v36 = vpop.permute.xlu0 %1224 }
 0x376   :  { %v1347_v13 = vsel %vm410_vm4, %v1225_v36, %v1317_v32  ;;  %v1082_v40 = vsel %vm37_vm13, %v7874_v53, %v7875_v8 }
 0x377   :  { %1481 = vmatpush.msra.mxu1 %v1347_v13  ;;  %v1108_v15 = vsel %vm62_vm8, %v1082_v40, %v7854_v0  ;;  %v1289_v13 = vrot.slane %v1175_v29, 4 }
 0x378   :  { %v1324_v26 = vsel %vm410_vm4, %v1108_v15, %v1273_v50  ;;  %v1276_v50 = vrot.slane %v1127_v60, 4  ;;  %v1278_v15 = vrot.slane %v1124_v51, 4 }
 0x379   :  { %1384 = vmatpush.msrb.mxu0 %v1324_v26 }
 0x37a   :  { %7367 = vmatmul.msk.f32.vlgmr.msrb.gmra.mxu0 %vm440_vm9, %v10105_v28  ;;  %v1327_v57 = vsel %vm410_vm4, %v1100_v35, %v1276_v50 }
 0x37b   :  { %v7883_v56 = vpop.permute.xlu1 %7882 }
 0x37c   :  { %v7885_v19 = vunpack.i.h.bf16 %v7883_v56  ;;  %v7884_v30 = vunpack.i.l.bf16 %v7883_v56  ;;  %v1277_v56 = vrot.slane %v1128_v12, 4  ;;  %v7365_v12 = vld [vmem:[%s14022_s3 + $0xc] sm:$0xf] }
 0x37d   :  { %v1259_v16 = vpop.permute.xlu0 %1258 }
 0x37e   :  { %v1265_v0 = vsel %vm327_vm3, %v10028_v17, %v1259_v16  ;;  %v1266_v27 = vsel %vm327_vm3, %v1259_v16, %v1261_v61  ;;  %v1217_v59 = vsel %vm249_vm1, %v7820_v48, %v7884_v30  ;;  %v1218_v24 = vsel %vm249_vm1, %v7884_v30, %v7885_v19  ;;  %v1501_v16 = vld.sshfl [vmem:[#allocation1 + $0x8] sm:$0xff pattern:$0x75316420] }
 0x37f   :  { %7372 = vmatpush.msk.msrb.mxu3 %vm410_vm4, %v1265_v0  ;;  %v1271_v39 = vsel %vm339_vm12, %v1266_v27, %v1269_v5  ;;  %v1345_v7 = vsel %vm410_vm4, %v1217_v59, %v1315_v43  ;;  %v1227_v4 = vsel %vm265_vm15, %v1218_v24, %v1225_v36  ;;  %v7850_v5 = vunpack.i.h.bf16 %v10116_v49  ;;  %v1500_v43 = vld.sshfl [vmem:[#allocation1] sm:$0xff pattern:$0x75316420] }
 0x380   :  { %7374 = vmatpush.msk.msra.mxu0 %vm410_vm4, %v1271_v39  ;;  %v1346_v17 = vsel %vm410_vm4, %v1227_v4, %v1316_v3  ;;  %1931 = vst [vmem:[#allocation1] ss:$2 sm:$0xff] %v9662_v45  ;;  %v1351_v3 = vpop.permute.xlu2 %1350  ;;  %v1505_v39 = vld.sshfl [vmem:[#allocation1 + $0x28] sm:$0xff pattern:$0x75316420] }
 0x381   :  { %1441 = vmatpush.msrb.mxu3 %v1345_v7  ;;  %v1149_v34 = vsel %vm141_vm5, %v7800_v52, %v7850_v5  ;;  %v1504_v7 = vld.sshfl [vmem:[#allocation1 + $0x20] sm:$0xff pattern:$0x75316420]  ;;  %v1502_v4 = vld.sshfl [vmem:[#allocation1 + $0x10] sm:$0xff pattern:$0x75316420] }
 0x382   :  { %1461 = vmatpush.msra.mxu0 %v1346_v17  ;;  %v1333_v40 = vsel %vm410_vm4, %v1149_v34, %v1289_v13  ;;  %1935 = vst [vmem:[#allocation1 + $0x20] ss:$2 sm:$0xff] %v9681_v10 }
 0x383   :  { %v7888_v61 = vpop.permute.xlu1 %7887 }
 0x384   :  { %v7890_v48 = vunpack.i.h.bf16 %v7888_v61  ;;  %v7889_v23 = vunpack.i.l.bf16 %v7888_v61 }
 0x385   :  { %v7878_v14 = vpop.permute.xlu0 %7877 }
 0x386   :  { %v7880_v44 = vunpack.i.h.bf16 %v7878_v14  ;;  %v7879_v58 = vunpack.i.l.bf16 %v7878_v14  ;;  %v1177_v53 = vsel %vm181_vm6, %v7889_v23, %v7890_v48 }
 0x387   :  { %v1291_v37 = vrot.slane %v1177_v53, 4 }
 0x388   :  { %v1195_v62 = vsel %vm212_vm2, %v7815_v1, %v7879_v58  ;;  %v1196_v9 = vsel %vm212_vm2, %v7879_v58, %v7880_v44  ;;  %v1201_v20 = vsel %vm14031_vm11, %v7880_v44, %v10130_v18  ;;  %v1176_v1 = vsel %vm181_vm6, %v7840_v33, %v7889_v23 }
 0x389   :  { %v1302_v32 = vrot.slane %v1195_v62, 4  ;;  %v1303_v49 = vrot.slane %v1196_v9, 4  ;;  %v1304_v8 = vrot.slane %v1201_v20, 4  ;;  %v1290_v21 = vrot.slane %v1176_v1, 4 }
 0x38a   :  { %vm14032_vm11 = vcmask 72704  }
 0x38b   :  { %v1097_v18 = vpop.permute.xlu1 %1096  ;;  %v1339_v47 = vsel %vm410_vm4, %v9962_v25, %v1302_v32  ;;  %v1340_v42 = vsel %vm410_vm4, %v9993_v46, %v1303_v49  ;;  %v1341_v36 = vsel %vm410_vm4, %v9985_v63, %v1304_v8 }
 0x38c   :  { %1442 = vmatpush.msrb.mxu3 %v1339_v47  ;;  %1462 = vmatpush.msra.mxu0 %v1340_v42  ;;  %v1101_v26 = vsel %vm62_vm8, %v7855_v2, %v1097_v18  ;;  %v1329_v19 = vsel %vm410_vm4, %v1097_v18, %v1278_v15 }
 0x38d   :  { %1482 = vmatpush.msra.mxu1 %v1341_v36  ;;  %v1146_v52 = vpop.permute.xlu0 %1145  ;;  %v1328_v30 = vsel %vm410_vm4, %v1101_v26, %v1277_v56 }
 0x38e   :  { %v1150_v38 = vsel %vm141_vm5, %v7850_v5, %v1146_v52  ;;  %1443 = vmatpush.msrb.mxu3 %v1333_v40  ;;  %v1335_v55 = vsel %vm410_vm4, %v1146_v52, %v1291_v37 }
 0x38f   :  { %1483 = vmatpush.msra.mxu1 %v1335_v55  ;;  %v1334_v31 = vsel %vm410_vm4, %v1150_v38, %v1290_v21 }
 0x390   :  { %1444 = vmatpush.msrb.mxu3 %v1327_v57  ;;  %1463 = vmatpush.msra.mxu0 %v1334_v31 }
 0x391   :  { %7373 = vmatmul.msk.f32.vlgmr.msrb.gmra.mxu3 %vm440_vm9, %v10105_v28  ;;  %1484 = vmatpush.msra.mxu1 %v1329_v19 }
 0x392   :  { %1464 = vmatpush.msra.mxu0 %v1328_v30  ;;  %7377 = vmatmul.msk.f32.vlgmr.msra.gmra.mxu1 %vm440_vm9, %v10105_v28 }
 0x393   :  { %7375 = vmatmul.msk.f32.vlgmr.msra.gmra.mxu0 %vm440_vm9, %v10105_v28  ;;  %v1503_v28 = vld.sshfl [vmem:[#allocation1 + $0x18] sm:$0xff pattern:$0x75316420] }
 0x394   :  { %1933 = vst [vmem:[#allocation1 + $0x10] ss:$2 sm:$0xff] %v9655_v6 }
 0x3dc   :  { %v1426_v33 = vpop.f32.mrf.mxu2 }
 0x3dd   :  { %v1427_v23 = vadd.f32 %v1426_v33, %v1351_v3 }
 0x3df   :  { %v1491_v5 = vmax.f32 %v1427_v23, 0.0 }
 0x3e0   :  { %v1406_v0 = vpop.f32.mrf.mxu1 }
 0x3e1   :  { %v1407_v27 = vadd.f32 %v1406_v0, %v1351_v3  ;;  %v10227_v44 = vmul.f32 %v1502_v4, %v1491_v5 }
 0x3e3   :  { %v1490_v59 = vmax.f32 %v1407_v27, 0.0 }
 0x3e5   :  { %v10213_v24 = vmul.f32 %v1501_v16, %v1490_v59 }
 0x3e7   :  { %1694 = vrot.lane.b32.xlu2 %v10213_v24, %s9267_s30  ;;  %v7916_v58 = vpack.i.bf16 %v10227_v44, %v10213_v24 }
 0x3f7   :  { %v1386_v17 = vpop.f32.mrf.mxu0 }
 0x3f8   :  { %v1387_v61 = vadd.f32 %v1386_v17, %v1351_v3 }
 0x3fa   :  { %v1489_v48 = vmax.f32 %v1387_v61, 0.0 }
 0x3fc   :  { %v10219_v14 = vmul.f32 %v1500_v43, %v1489_v48 }
 0x3fe   :  { %1692 = vrot.lane.b32.xlu0 %v10219_v14, %s9267_s30  ;;  %v7906_v54 = vpack.i.bf16 %v10213_v24, %v10219_v14 }
 0x400   :  { %7907 = vrot.lane.b32.xlu1 %v7906_v54, %s9258_s0  ;;  %7902 = vrot.lane.b32.xlu2 %v7906_v54, %s9264_s27 }
 0x406   :  { %7892 = vrot.lane.b32.xlu0 %v7906_v54, %s9268_s5 }
 0x408   :  { %7917 = vrot.lane.b32.xlu1 %v7916_v58, %s9261_s24  ;;  %1666 = vrot.lane.b32.xlu2 %v10219_v14, %s9270_s7 }
 0x40e   :  { %7897 = vrot.lane.b32.xlu0 %v7906_v54, %s9260_s23 }
 0x40f   :  { %v1486_v2 = vpop.f32.mrf.mxu1 }
 0x410   :  { %v1487_v62 = vadd.f32 %v1486_v2, %v1351_v3  ;;  %v1466_v9 = vpop.f32.mrf.mxu0  ;;  %7922 = vrot.lane.b32.xlu2 %v7916_v58, %s9263_s26 }
 0x411   :  { %v1467_v29 = vadd.f32 %v1466_v9, %v1351_v3 }
 0x412   :  { %v1494_v20 = vmax.f32 %v1487_v62, 0.0 }
 0x413   :  { %v1493_v32 = vmax.f32 %v1467_v29, 0.0 }
 0x414   :  { %v10237_v51 = vmul.f32 %v1505_v39, %v1494_v20  ;;  %v1446_v34 = vpop.f32.mrf.mxu3 }
 0x415   :  { %v10246_v8 = vmul.f32 %v1504_v7, %v1493_v32  ;;  %v1447_v60 = vadd.f32 %v1446_v34, %v1351_v3 }
 0x416   :  { %1688 = vrot.lane.b32.xlu0 %v10219_v14, %s9271_s8  ;;  %v7926_v49 = vpack.i.bf16 %v10237_v51, %v10219_v14 }
 0x417   :  { %v7936_v53 = vpack.i.bf16 %v10246_v8, %v10219_v14  ;;  %v1492_v1 = vmax.f32 %v1447_v60, 0.0  ;;  %v7941_v18 = vpack.i.bf16 %v10237_v51, %v10246_v8 }
 0x418   :  { %7927 = vrot.lane.b32.xlu1 %v7926_v49, %s9261_s24  ;;  %1702 = vrot.lane.b32.xlu2 %v10237_v51, %s9267_s30 }
 0x419   :  { %v10261_v47 = vmul.f32 %v1503_v28, %v1492_v1 }
 0x41b   :  { %v7961_v42 = vpack.i.bf16 %v10261_v47, %v10237_v51  ;;  %v7981_v36 = vpack.i.bf16 %v10261_v47, %v10227_v44  ;;  %v7971_v13 = vpack.i.bf16 %v10246_v8, %v10261_v47 }
 0x41e   :  { %1640 = vrot.lane.b32.xlu0 %v10219_v14, %s9269_s6 }
 0x420   :  { %1600 = vrot.lane.b32.xlu1 %v10237_v51, %s9266_s29  ;;  %7937 = vrot.lane.b32.xlu2 %v7936_v53, %s9263_s26 }
 0x426   :  { %1710 = vrot.lane.b32.xlu0 %v10219_v14, %s9272_s9 }
 0x428   :  { %7932 = vrot.lane.b32.xlu1 %v7936_v53, %s9265_s28  ;;  %7942 = vrot.lane.b32.xlu2 %v7941_v18, %s9259_s22 }
 0x42e   :  { %7912 = vrot.lane.b32.xlu0 %v7916_v58, %s9265_s28 }
 0x430   :  { %7947 = vrot.lane.b32.xlu1 %v7941_v18, %s9262_s25  ;;  %7962 = vrot.lane.b32.xlu2 %v7961_v42, %s9265_s28 }
 0x436   :  { %1696 = vrot.lane.b32.xlu0 %v10227_v44, %s9267_s30 }
 0x438   :  { %1700 = vrot.lane.b32.xlu1 %v10246_v8, %s9267_s30  ;;  %1698 = vrot.lane.b32.xlu2 %v10261_v47, %s9267_s30 }
 0x43e   :  { %7952 = vrot.lane.b32.xlu0 %v7941_v18, %s9257_s21 }
 0x440   :  { %7967 = vrot.lane.b32.xlu1 %v7961_v42, %s9263_s26  ;;  %7982 = vrot.lane.b32.xlu2 %v7981_v36, %s9260_s23 }
 0x441   :  { %v1695_v37 = vpop.permute.xlu2 %1694 }
 0x446   :  { %7957 = vrot.lane.b32.xlu0 %v7941_v18, %s9268_s5 }
 0x448   :  { %7972 = vrot.lane.b32.xlu1 %v7971_v13, %s9261_s24  ;;  %1587 = vrot.lane.b32.xlu2 %v10246_v8, %s9264_s27 }
 0x44e   :  { %1565 = vrot.lane.b32.xlu0 %v10246_v8, %s9260_s23 }
 0x450   :  { %7977 = vrot.lane.b32.xlu1 %v7981_v36, %s9268_s5  ;;  %1792 = vperm.xlu2 %7680, %v7365_v12  }
 0x456   :  { %7992 = vrot.lane.b32.xlu0 %v7981_v36, %s9258_s0 }
 0x458   :  { %7987 = vrot.lane.b32.xlu1 %v7981_v36, %s9264_s27 }
 0x45a   :  { %v10295_v35 = vpop.permute.xlu2 %7902 }
 0x45b   :  { %v7904_v48 = vunpack.i.l.bf16 %v10295_v35  ;;  %v7905_v12 = vunpack.i.h.bf16 %v10295_v35 }
 0x460   :  { %1538 = vrot.lane.b32.xlu1 %v10246_v8, %s9258_s0 }
 0x462   :  { %v10297_v52 = vpop.permute.xlu2 %1666 }
 0x46a   :  { %v10301_v21 = vpop.permute.xlu2 %7922 }
 0x46b   :  { %v7924_v23 = vunpack.i.l.bf16 %v10301_v21  ;;  %v7925_v42 = vunpack.i.h.bf16 %v10301_v21 }
 0x470   :  { %v1693_v40 = vpop.permute.xlu0 %1692 }
 0x471   :  { %v1704_v50 = vsel %vm327_vm3, %v1693_v40, %v1695_v37 }
 0x472   :  { %7378 = vmatpush.msk.msra.mxu2 %vm410_vm4, %v1704_v50  ;;  %v10303_v15 = vpop.permute.xlu1 %7907  ;;  %v10307_v38 = vpop.permute.xlu2 %1702 }
 0x478   :  { %v10305_v26 = vpop.permute.xlu0 %7892 }
 0x479   :  { %v7895_v54 = vunpack.i.h.bf16 %v10305_v26  ;;  %v7894_v2 = vunpack.i.l.bf16 %v10305_v26 }
 0x47a   :  { %v10311_v56 = vpop.permute.xlu1 %7917  ;;  %v10315_v31 = vpop.permute.xlu2 %7937 }
 0x47b   :  { %v7919_v39 = vunpack.i.l.bf16 %v10311_v56  ;;  %v7939_v7 = vunpack.i.l.bf16 %v10315_v31  ;;  %v7920_v5 = vunpack.i.h.bf16 %v10311_v56 }
 0x47d   :  { %v1656_v29 = vsel %vm249_vm1, %v7939_v7, %v7924_v23  ;;  %v1635_v13 = vsel %vm212_vm2, %v7919_v39, %v7920_v5 }
 0x480   :  { %v10309_v55 = vpop.permute.xlu0 %7897 }
 0x481   :  { %v7900_v34 = vunpack.i.h.bf16 %v10309_v55  ;;  %v7899_v60 = vunpack.i.l.bf16 %v10309_v55 }
 0x482   :  { %v7943_v43 = vpop.permute.xlu2 %7942 }
 0x483   :  { %v7944_v7 = vunpack.i.l.bf16 %v7943_v43 }
 0x488   :  { %v10313_v57 = vpop.permute.xlu0 %1688 }
 0x48a   :  { %v10317_v19 = vpop.permute.xlu1 %7927  ;;  %v10326_v59 = vpop.permute.xlu2 %7962 }
 0x48b   :  { %v7929_v27 = vunpack.i.l.bf16 %v10317_v19 }
 0x48d   :  { %v1634_v33 = vsel %vm212_vm2, %v7929_v27, %v7919_v39  ;;  %v7945_v27 = vunpack.i.h.bf16 %v7943_v43 }
 0x48e   :  { %v1741_v49 = vrot.slane %v1634_v33, 4 }
 0x490   :  { %v10319_v30 = vpop.permute.xlu0 %1640 }
 0x492   :  { %v1601_v16 = vpop.permute.xlu1 %1600 }
 0x493   :  { %v1621_v1 = vsel %vm181_vm6, %v1601_v16, %v7894_v2  ;;  %v1615_v16 = vsel %vm181_vm6, %v7894_v2, %v7895_v54  ;;  %v7910_v2 = vunpack.i.h.bf16 %v10303_v15 }
 0x498   :  { %v10321_v3 = vpop.permute.xlu0 %1710 }
 0x49a   :  { %v10323_v0 = vpop.permute.xlu1 %7932 }
 0x49b   :  { %v7934_v17 = vunpack.i.l.bf16 %v10323_v0  ;;  %v7935_v43 = vunpack.i.h.bf16 %v10323_v0  ;;  %v1555_v0 = vsel %vm81_vm10, %v7944_v7, %v7945_v27 }
 0x4a0   :  { %v10330_v4 = vpop.permute.xlu0 %7912 }
 0x4a1   :  { %v7915_v28 = vunpack.i.h.bf16 %v10330_v4  ;;  %v7914_v61 = vunpack.i.l.bf16 %v10330_v4 }
 0x4a2   :  { %v7948_v58 = vpop.permute.xlu1 %7947 }
 0x4a3   :  { %v7950_v62 = vunpack.i.h.bf16 %v7948_v58  ;;  %v7949_v9 = vunpack.i.l.bf16 %v7948_v58  ;;  %v1682_v20 = vsel %vm290_vm0, %v7934_v17, %v7914_v61  ;;  %v1683_v53 = vsel %vm290_vm0, %v7914_v61, %v7915_v28  ;;  %v1699_v61 = vpop.permute.xlu2 %1698 }
 0x4a4   :  { %v1754_v32 = vrot.slane %v1682_v20, 4  ;;  %v1755_v50 = vrot.slane %v1683_v53, 4  ;;  %v1728_v17 = vrot.slane %v1621_v1, 4  ;;  %v1778_v58 = vsel %vm410_vm4, %v10219_v14, %v1741_v49 }
 0x4a5   :  { %v1577_v18 = vsel %vm14032_vm11, %v7949_v9, %v7950_v62  ;;  %v1742_v9 = vrot.slane %v1635_v13, 4  ;;  %v1567_v20 = vsel %vm104_vm7, %v7899_v60, %v7900_v34  ;;  %v1729_v1 = vrot.slane %v1615_v16, 4 }
 0x4a6   :  { %v1784_v36 = vsel %vm410_vm4, %v1656_v29, %v1754_v32  ;;  %v1599_v40 = vsel %vm141_vm5, %v1577_v18, %v7904_v48  ;;  %v7909_v32 = vunpack.i.l.bf16 %v10303_v15  ;;  %v7964_v18 = vunpack.i.l.bf16 %v10326_v59 }
 0x4a7   :  { %1823 = vmatpush.msra.mxu2 %v1784_v36  ;;  %v1772_v14 = vsel %vm410_vm4, %v1599_v40, %v1728_v17  ;;  %v1716_v36 = vrot.slane %v1567_v20, 4  ;;  %v7930_v13 = vunpack.i.h.bf16 %v10317_v19  ;;  %v1759_v40 = vrot.slane %v10313_v57, 4 }
 0x4a8   :  { %v1697_v33 = vpop.permute.xlu0 %1696  ;;  %v7965_v17 = vunpack.i.h.bf16 %v10326_v59  ;;  %v1589_v16 = vsel %vm141_vm5, %v7904_v48, %v7905_v12  ;;  %vm14033_vm11 = vcmask 56320   ;;  %v1572_v59 = vsel %vm104_vm7, %v1555_v0, %v7899_v60  ;;  %v10403_v48 = vld [vmem:[%s14021_s2 + $0xc] sm:$0xf] }
 0x4a9   :  { %v1705_v39 = vsel %vm327_vm3, %v1695_v37, %v1697_v33  ;;  %v1706_v62 = vsel %vm327_vm3, %v1697_v33, %v1699_v61  ;;  %1824 = vmatpush.msra.mxu2 %v1778_v58  ;;  %v1657_v37 = vsel %vm249_vm1, %v7924_v23, %v7925_v42  ;;  %v1779_v23 = vsel %vm410_vm4, %v10213_v24, %v1742_v9 }
 0x4aa   :  { %v1701_v29 = vpop.permute.xlu1 %1700  ;;  %7380 = vmatpush.msk.msra.mxu3 %vm410_vm4, %v1705_v39  ;;  %7382 = vmatpush.msk.msrb.mxu0 %vm410_vm4, %v1706_v62  ;;  %v1785_v53 = vsel %vm410_vm4, %v1657_v37, %v1755_v50  ;;  %v1686_v50 = vsel %vm290_vm0, %v7935_v43, %v7964_v18  ;;  %v1643_v27 = vsel %vm14033_vm11, %v7930_v13, %v10319_v30  ;;  %v7940_v9 = vunpack.i.h.bf16 %v10315_v31 }
 0x4ab   :  { %v1707_v49 = vsel %vm327_vm3, %v1699_v61, %v1701_v29  ;;  %1825 = vmatpush.msra.mxu2 %v1772_v14  ;;  %v1773_v7 = vsel %vm410_vm4, %v1589_v16, %v1729_v1  ;;  %v1540_v24 = vsel %vm62_vm8, %v7909_v32, %v7910_v2  ;;  %v1685_v58 = vsel %vm290_vm0, %v7965_v17, %v7935_v43 }
 0x4ac   :  { %1843 = vmatpush.msra.mxu3 %v1785_v53  ;;  %7384 = vmatpush.msk.msrb.mxu1 %vm410_vm4, %v1707_v49  ;;  %v1767_v33 = vsel %vm410_vm4, %v1540_v24, %v1716_v36  ;;  %v1684_v62 = vsel %vm290_vm0, %v7915_v28, %v7965_v17  ;;  %v1691_v60 = vsel %vm302_vm14, %v1686_v50, %v10313_v57  ;;  %v1746_v20 = vrot.slane %v1643_v27, 4  ;;  %v10414_v53 = vpop.permute.xlu2 %7982 }
 0x4ad   :  { %v1789_v37 = vsel %vm410_vm4, %v10297_v52, %v1759_v40  ;;  %v1715_v49 = vrot.slane %v1572_v59, 4  ;;  %v1757_v28 = vrot.slane %v1685_v58, 4  ;;  %v1708_v57 = vsel %vm327_vm3, %v1701_v29, %v10307_v38 }
 0x4ae   :  { %1844 = vmatpush.msra.mxu3 %v1779_v23  ;;  %v1756_v0 = vrot.slane %v1684_v62, 4  ;;  %v1758_v18 = vrot.slane %v1691_v60, 4  ;;  %v1713_v21 = vsel %vm339_vm12, %v1708_v57, %v10321_v3  ;;  %v1783_v50 = vsel %vm410_vm4, %v10237_v51, %v1746_v20 }
 0x4af   :  { %vm14034_vm11 = vcmask 72704  }
 0x4b0   :  { %v7953_v61 = vpop.permute.xlu0 %7952  ;;  %1845 = vmatpush.msra.mxu3 %v1773_v7 }
 0x4b1   :  { %v7955_v30 = vunpack.i.h.bf16 %v7953_v61  ;;  %v7954_v39 = vunpack.i.l.bf16 %v7953_v61 }
 0x4b2   :  { %v7968_v14 = vpop.permute.xlu1 %7967  ;;  %1846 = vmatpush.msra.mxu3 %v1767_v33 }
 0x4b3   :  { %v7970_v43 = vunpack.i.h.bf16 %v7968_v14  ;;  %v7969_v1 = vunpack.i.l.bf16 %v7968_v14  ;;  %7381 = vmatmul.msk.f32.vlgmr.msra.gmra.mxu3 %vm440_vm9, %v10403_v48  ;;  %v1524_v4 = vsel %vm37_vm13, %v7954_v39, %v7955_v30 }
 0x4b4   :  { %7388 = vmatpush.msk.msrb.mxu3 %vm410_vm4, %v10321_v3  ;;  %v1550_v31 = vsel %vm62_vm8, %v1524_v4, %v7909_v32  ;;  %v1588_v3 = vpop.permute.xlu2 %1587 }
 0x4b5   :  { %v1766_v36 = vsel %vm410_vm4, %v1550_v31, %v1715_v49  ;;  %v1658_v23 = vsel %vm249_vm1, %v7925_v42, %v7970_v43  ;;  %v1659_v40 = vsel %vm249_vm1, %v7970_v43, %v7940_v9  ;;  %v1660_v17 = vsel %vm249_vm1, %v7940_v9, %v7969_v1 }
 0x4b6   :  { %1923 = vmatpush.msrb.mxu3 %v1789_v37  ;;  %1826 = vmatpush.msra.mxu2 %v1766_v36  ;;  %v1786_v38 = vsel %vm410_vm4, %v1658_v23, %v1756_v0  ;;  %v1787_v29 = vsel %vm410_vm4, %v1659_v40, %v1757_v28  ;;  %v1669_v32 = vsel %vm265_vm15, %v1660_v17, %v10297_v52  ;;  %v7985_v43 = vunpack.i.h.bf16 %v10414_v53 }
 0x4b7   :  { %7379 = vmatmul.msk.f32.vlgmr.msra.gmra.mxu2 %vm440_vm9, %v10403_v48  ;;  %1863 = vmatpush.msrb.mxu0 %v1786_v38  ;;  %v1788_v42 = vsel %vm410_vm4, %v1669_v32, %v1758_v18 }
 0x4b8   :  { %1883 = vmatpush.msrb.mxu1 %v1787_v29  ;;  %7386 = vmatpush.msk.msrb.mxu2 %vm410_vm4, %v1713_v21  ;;  %v7958_v16 = vpop.permute.xlu0 %7957 }
 0x4b9   :  { %1924 = vmatpush.msrb.mxu3 %v1783_v50  ;;  %v7960_v27 = vunpack.i.h.bf16 %v7958_v16  ;;  %v7959_v7 = vunpack.i.l.bf16 %v7958_v16 }
 0x4ba   :  { %1903 = vmatpush.msrb.mxu2 %v1788_v42  ;;  %v7973_v52 = vpop.permute.xlu1 %7972 }
 0x4bb   :  { %v7975_v24 = vunpack.i.h.bf16 %v7973_v52  ;;  %v7974_v59 = vunpack.i.l.bf16 %v7973_v52  ;;  %v1619_v61 = vsel %vm181_vm6, %v7959_v7, %v7960_v27 }
 0x4bc   :  { %v1733_v33 = vrot.slane %v1619_v61, 4  ;;  %v1938_v61 = vld.sshfl [vmem:[#allocation1 + $0x10] sm:$0xff pattern:$0x75316420] }
 0x4bd   :  { %v1636_v58 = vsel %vm212_vm2, %v7920_v5, %v7974_v59  ;;  %v1637_v30 = vsel %vm212_vm2, %v7974_v59, %v7975_v24  ;;  %v1638_v51 = vsel %vm212_vm2, %v7975_v24, %v7930_v13  ;;  %v7984_v13 = vunpack.i.l.bf16 %v10414_v53  ;;  %v1937_v24 = vld.sshfl [vmem:[#allocation1 + $0x8] sm:$0xff pattern:$0x75316420]  ;;  %v1936_v59 = vld.sshfl [vmem:[#allocation1] sm:$0xff pattern:$0x75316420] }
 0x4be   :  { %v1777_v39 = vsel %vm410_vm4, %v1588_v3, %v1733_v33  ;;  %v1743_v62 = vrot.slane %v1636_v58, 4  ;;  %v1744_v60 = vrot.slane %v1637_v30, 4  ;;  %v1745_v9 = vrot.slane %v1638_v51, 4  ;;  %2387 = vst [vmem:[#allocation1] ss:$2 sm:$0xff] %v9662_v45 }
 0x4bf   :  { %1925 = vmatpush.msrb.mxu3 %v1777_v39  ;;  %v1569_v53 = vsel %vm104_vm7, %v7984_v13, %v7985_v43  ;;  %v1939_v33 = vld.sshfl [vmem:[#allocation1 + $0x18] sm:$0xff pattern:$0x75316420] }
 0x4c0   :  { %v1566_v20 = vpop.permute.xlu0 %1565  ;;  %v1780_v14 = vsel %vm410_vm4, %v10227_v44, %v1743_v62  ;;  %v1781_v56 = vsel %vm410_vm4, %v10261_v47, %v1744_v60  ;;  %v1782_v5 = vsel %vm410_vm4, %v10246_v8, %v1745_v9  ;;  %v1568_v47 = vsel %vm104_vm7, %v7900_v34, %v7984_v13  ;;  %2389 = vst [vmem:[#allocation1 + $0x10] ss:$2 sm:$0xff] %v9655_v6 }
 0x4c1   :  { %1864 = vmatpush.msrb.mxu0 %v1780_v14  ;;  %1884 = vmatpush.msrb.mxu1 %v1781_v56  ;;  %v1717_v36 = vrot.slane %v1568_v47, 4  ;;  %v1718_v42 = vrot.slane %v1569_v53, 4  ;;  %v1570_v15 = vsel %vm104_vm7, %v7985_v43, %v1566_v20 }
 0x4c2   :  { %1904 = vmatpush.msrb.mxu2 %v1782_v5  ;;  %v7978_v19 = vpop.permute.xlu1 %7977  ;;  %v1719_v50 = vrot.slane %v1570_v15, 4 }
 0x4c3   :  { %v7979_v37 = vunpack.i.l.bf16 %v7978_v19  ;;  %v7980_v49 = vunpack.i.h.bf16 %v7978_v19 }
 0x4c5   :  { %v1616_v44 = vsel %vm181_vm6, %v7895_v54, %v7979_v37  ;;  %v1617_v28 = vsel %vm181_vm6, %v7979_v37, %v7980_v49  ;;  %v1618_v57 = vsel %vm181_vm6, %v7980_v49, %v7959_v7 }
 0x4c6   :  { %v1730_v23 = vrot.slane %v1616_v44, 4  ;;  %v1731_v26 = vrot.slane %v1617_v28, 4  ;;  %v1732_v40 = vrot.slane %v1618_v57, 4 }
 0x4c8   :  { %v7993_v1 = vpop.permute.xlu0 %7992 }
 0x4c9   :  { %v7995_v8 = vunpack.i.h.bf16 %v7993_v1  ;;  %v7994_v4 = vunpack.i.l.bf16 %v7993_v1 }
 0x4ca   :  { %v7988_v31 = vpop.permute.xlu1 %7987 }
 0x4cb   :  { %v7990_v0 = vunpack.i.h.bf16 %v7988_v31  ;;  %v7989_v18 = vunpack.i.l.bf16 %v7988_v31  ;;  %v1541_v55 = vsel %vm62_vm8, %v7910_v2, %v7994_v4  ;;  %v1542_v38 = vsel %vm62_vm8, %v7994_v4, %v7995_v8 }
 0x4cc   :  { %v1768_v35 = vsel %vm410_vm4, %v1541_v55, %v1717_v36  ;;  %v1720_v2 = vrot.slane %v1566_v20, 4  ;;  %v1940_v20 = vld.sshfl [vmem:[#allocation1 + $0x20] sm:$0xff pattern:$0x75316420] }
 0x4cd   :  { %v1590_v54 = vsel %vm141_vm5, %v7905_v12, %v7989_v18  ;;  %v1591_v34 = vsel %vm141_vm5, %v7989_v18, %v7990_v0  ;;  %v1592_v17 = vsel %vm141_vm5, %v7990_v0, %v1588_v3  ;;  %v1769_v12 = vsel %vm410_vm4, %v1542_v38, %v1718_v42  ;;  %v1793_v3 = vpop.permute.xlu2 %1792 }
 0x4ce   :  { %v1774_v29 = vsel %vm410_vm4, %v1590_v54, %v1730_v23  ;;  %v1775_v32 = vsel %vm410_vm4, %v1591_v34, %v1731_v26  ;;  %v1776_v21 = vsel %vm410_vm4, %v1592_v17, %v1732_v40 }
 0x4cf   :  { %1865 = vmatpush.msrb.mxu0 %v1774_v29  ;;  %1885 = vmatpush.msrb.mxu1 %v1775_v32 }
 0x4d0   :  { %1905 = vmatpush.msrb.mxu2 %v1776_v21 }
 0x4d1   :  { %1866 = vmatpush.msrb.mxu0 %v1768_v35  ;;  %1886 = vmatpush.msrb.mxu1 %v1769_v12 }
 0x4d2   :  { %v1539_v16 = vpop.permute.xlu1 %1538  ;;  %7383 = vmatmul.msk.f32.vlgmr.msrb.gmra.mxu0 %vm440_vm9, %v10403_v48  ;;  %7385 = vmatmul.msk.f32.vlgmr.msrb.gmra.mxu1 %vm440_vm9, %v10403_v48 }
 0x4d3   :  { %v1543_v27 = vsel %vm62_vm8, %v7995_v8, %v1539_v16  ;;  %v1771_v7 = vsel %vm410_vm4, %v1539_v16, %v1720_v2 }
 0x4d4   :  { %1926 = vmatpush.msrb.mxu3 %v1771_v7  ;;  %v1770_v52 = vsel %vm410_vm4, %v1543_v27, %v1719_v50 }
 0x4d5   :  { %1906 = vmatpush.msrb.mxu2 %v1770_v52  ;;  %7389 = vmatmul.msk.f32.vlgmr.msrb.gmra.mxu3 %vm440_vm9, %v10403_v48 }
 0x4d6   :  { %7387 = vmatmul.msk.f32.vlgmr.msrb.gmra.mxu2 %vm440_vm9, %v10403_v48  ;;  %v1941_v48 = vld.sshfl [vmem:[#allocation1 + $0x28] sm:$0xff pattern:$0x75316420] }
 0x4d7   :  { %2391 = vst [vmem:[#allocation1 + $0x20] ss:$2 sm:$0xff] %v9681_v10 }
 0x536   :  { %v1848_v58 = vpop.f32.mrf.mxu3 }
 0x537   :  { %v1849_v30 = vadd.f32 %v1848_v58, %v1793_v3 }
 0x539   :  { %v1949_v51 = vmul.f32 %v1937_v24, %v1849_v30 }
 0x53a   :  { %v1828_v39 = vpop.f32.mrf.mxu2 }
 0x53b   :  { %v10497_v62 = vadd.f32 %v1949_v51, %v9950_v41  ;;  %v1829_v60 = vadd.f32 %v1828_v39, %v1793_v3 }
 0x53d   :  { %v1948_v9 = vmul.f32 %v1936_v59, %v1829_v60  ;;  %2144 = vrot.lane.b32.xlu2 %v10497_v62, %s9267_s30 }
 0x53f   :  { %v10503_v14 = vadd.f32 %v1948_v9, %v9972_v22 }
 0x541   :  { %2142 = vrot.lane.b32.xlu0 %v10503_v14, %s9267_s30  ;;  %v7996_v56 = vpack.i.bf16 %v10497_v62, %v10503_v14 }
 0x543   :  { %7997 = vrot.lane.b32.xlu1 %v7996_v56, %s9268_s5 }
 0x545   :  { %8002 = vrot.lane.b32.xlu2 %v7996_v56, %s9260_s23 }
 0x549   :  { %2116 = vrot.lane.b32.xlu0 %v10503_v14, %s9270_s7 }
 0x54b   :  { %8012 = vrot.lane.b32.xlu1 %v7996_v56, %s9258_s0 }
 0x54d   :  { %8007 = vrot.lane.b32.xlu2 %v7996_v56, %s9264_s27 }
 0x54f   :  { %v1868_v41 = vpop.f32.mrf.mxu0  ;;  %v1888_v22 = vpop.f32.mrf.mxu1 }
 0x550   :  { %v1869_v5 = vadd.f32 %v1868_v41, %v1793_v3  ;;  %v1889_v19 = vadd.f32 %v1888_v22, %v1793_v3 }
 0x552   :  { %v1950_v13 = vmul.f32 %v1938_v61, %v1869_v5  ;;  %v1951_v37 = vmul.f32 %v1939_v33, %v1889_v19 }
 0x553   :  { %2090 = vrot.lane.b32.xlu1 %v10503_v14, %s9269_s6 }
 0x554   :  { %v10518_v49 = vadd.f32 %v1950_v13, %v9952_v11  ;;  %v10521_v43 = vadd.f32 %v1951_v37, %v9962_v25 }
 0x555   :  { %2138 = vrot.lane.b32.xlu2 %v10503_v14, %s9271_s8 }
 0x556   :  { %v8016_v1 = vpack.i.bf16 %v10518_v49, %v10497_v62  ;;  %v8021_v44 = vpack.i.bf16 %v10503_v14, %v10521_v43  ;;  %v8051_v0 = vpack.i.bf16 %v10521_v43, %v10518_v49 }
 0x558   :  { %8017 = vrot.lane.b32.xlu0 %v8016_v1, %s9265_s28  ;;  %v1928_v11 = vpop.f32.mrf.mxu3 }
 0x559   :  { %v1908_v25 = vpop.f32.mrf.mxu2  ;;  %v1929_v47 = vadd.f32 %v1928_v11, %v1793_v3 }
 0x55a   :  { %v1909_v8 = vadd.f32 %v1908_v25, %v1793_v3 }
 0x55b   :  { %8022 = vrot.lane.b32.xlu1 %v8021_v44, %s9265_s28  ;;  %v1953_v4 = vmul.f32 %v1941_v48, %v1929_v47 }
 0x55c   :  { %v1952_v28 = vmul.f32 %v1940_v20, %v1909_v8 }
 0x55d   :  { %2160 = vrot.lane.b32.xlu2 %v10503_v14, %s9272_s9  ;;  %v10541_v57 = vadd.f32 %v1953_v4, %v9985_v63  ;;  %v7392_v63 = vld [vmem:[%s14022_s3 + $0x10] sm:$0xf] }
 0x55e   :  { %v10544_v31 = vadd.f32 %v1952_v28, %v9993_v46 }
 0x560   :  { %2146 = vrot.lane.b32.xlu0 %v10518_v49, %s9267_s30  ;;  %v8066_v18 = vpack.i.bf16 %v10541_v57, %v10544_v31 }
 0x563   :  { %2148 = vrot.lane.b32.xlu1 %v10521_v43, %s9267_s30 }
 0x565   :  { %8027 = vrot.lane.b32.xlu2 %v8016_v1, %s9261_s24 }
 0x568   :  { %8032 = vrot.lane.b32.xlu0 %v8021_v44, %s9261_s24 }
 0x56b   :  { %8037 = vrot.lane.b32.xlu1 %v8016_v1, %s9263_s26 }
 0x56d   :  { %8042 = vrot.lane.b32.xlu2 %v8021_v44, %s9263_s26 }
 0x570   :  { %8052 = vrot.lane.b32.xlu0 %v8051_v0, %s9260_s23 }
 0x573   :  { %8067 = vrot.lane.b32.xlu1 %v8066_v18, %s9259_s22 }
 0x575   :  { %8047 = vrot.lane.b32.xlu2 %v8051_v0, %s9268_s5 }
 0x578   :  { %8057 = vrot.lane.b32.xlu0 %v8051_v0, %s9264_s27 }
 0x57b   :  { %8072 = vrot.lane.b32.xlu1 %v8066_v18, %s9262_s25 }
 0x57d   :  { %8062 = vrot.lane.b32.xlu2 %v8051_v0, %s9258_s0 }
 0x580   :  { %2050 = vrot.lane.b32.xlu0 %v10541_v57, %s9266_s29 }
 0x583   :  { %8077 = vrot.lane.b32.xlu1 %v8066_v18, %s9265_s28 }
 0x585   :  { %2150 = vrot.lane.b32.xlu2 %v10544_v31, %s9267_s30 }
 0x588   :  { %2152 = vrot.lane.b32.xlu0 %v10541_v57, %s9267_s30 }
 0x58b   :  { %8092 = vrot.lane.b32.xlu1 %v8066_v18, %s9263_s26 }
 0x58d   :  { %2015 = vrot.lane.b32.xlu2 %v10544_v31, %s9260_s23 }
 0x590   :  { %8082 = vrot.lane.b32.xlu0 %v8066_v18, %s9257_s21 }
 0x593   :  { %8097 = vrot.lane.b32.xlu1 %v8066_v18, %s9268_s5 }
 0x595   :  { %2242 = vperm.xlu2 %7680, %v7392_v63  }
 0x597   :  { %v2145_v46 = vpop.permute.xlu2 %2144 }
 0x598   :  { %8087 = vrot.lane.b32.xlu0 %v8066_v18, %s9261_s24 }
 0x59b   :  { %1988 = vrot.lane.b32.xlu1 %v10544_v31, %s9258_s0 }
 0x59f   :  { %v10575_v36 = vpop.permute.xlu2 %8002 }
 0x5a0   :  { %2037 = vrot.lane.b32.xlu0 %v10544_v31, %s9264_s27  ;;  %v8005_v58 = vunpack.i.h.bf16 %v10575_v36  ;;  %v8004_v30 = vunpack.i.l.bf16 %v10575_v36 }
 0x5a7   :  { %v10579_v53 = vpop.permute.xlu2 %8007 }
 0x5a8   :  { %v8010_v51 = vunpack.i.h.bf16 %v10579_v53  ;;  %v8009_v39 = vunpack.i.l.bf16 %v10579_v53 }
 0x5af   :  { %v10581_v23 = vpop.permute.xlu2 %2138 }
 0x5b3   :  { %v2143_v26 = vpop.permute.xlu0 %2142 }
 0x5b4   :  { %v2154_v40 = vsel %vm327_vm3, %v2143_v26, %v2145_v46 }
 0x5b5   :  { %v10584_v55 = vpop.permute.xlu1 %7997  ;;  %7394 = vmatpush.msk.msra.mxu0 %vm410_vm4, %v2154_v40 }
 0x5b6   :  { %v8000_v7 = vunpack.i.h.bf16 %v10584_v55  ;;  %v7999_v52 = vunpack.i.l.bf16 %v10584_v55 }
 0x5b7   :  { %v10587_v54 = vpop.permute.xlu2 %2160 }
 0x5b8   :  { %v2065_v41 = vsel %vm181_vm6, %v7999_v52, %v8000_v7 }
 0x5bb   :  { %v10591_v38 = vpop.permute.xlu0 %2116 }
 0x5bd   :  { %v10589_v34 = vpop.permute.xlu1 %8012 }
 0x5be   :  { %v8015_v22 = vunpack.i.h.bf16 %v10589_v34  ;;  %v8014_v5 = vunpack.i.l.bf16 %v10589_v34 }
 0x5bf   :  { %v8028_v17 = vpop.permute.xlu2 %8027 }
 0x5c0   :  { %v8030_v50 = vunpack.i.h.bf16 %v8028_v17  ;;  %v8029_v16 = vunpack.i.l.bf16 %v8028_v17 }
 0x5c2   :  { %v2085_v9 = vsel %vm212_vm2, %v8029_v16, %v8030_v50 }
 0x5c3   :  { %v2192_v11 = vrot.slane %v2085_v9, 4 }
 0x5c5   :  { %v10593_v29 = vpop.permute.xlu1 %2090 }
 0x5c7   :  { %v10595_v32 = vpop.permute.xlu2 %8042 }
 0x5c8   :  { %v8045_v37 = vunpack.i.h.bf16 %v10595_v32  ;;  %v8044_v47 = vunpack.i.l.bf16 %v10595_v32 }
 0x5ca   :  { %v8018_v21 = vpop.permute.xlu0 %8017 }
 0x5cb   :  { %v8020_v24 = vunpack.i.h.bf16 %v8018_v21  ;;  %v8019_v59 = vunpack.i.l.bf16 %v8018_v21 }
 0x5cd   :  { %v10597_v42 = vpop.permute.xlu1 %8022  ;;  %v2133_v56 = vsel %vm290_vm0, %v8019_v59, %v8020_v24 }
 0x5ce   :  { %v8025_v33 = vunpack.i.h.bf16 %v10597_v42  ;;  %v8024_v3 = vunpack.i.l.bf16 %v10597_v42  ;;  %v2205_v28 = vrot.slane %v2133_v56, 4  ;;  %v1990_v56 = vsel %vm62_vm8, %v8014_v5, %v8015_v22 }
 0x5cf   :  { %v10599_v15 = vpop.permute.xlu2 %8047 }
 0x5d0   :  { %v2132_v19 = vsel %vm290_vm0, %v8025_v33, %v8019_v59  ;;  %v2134_v13 = vsel %vm290_vm0, %v8020_v24, %v8024_v3  ;;  %v2229_v33 = vsel %vm410_vm4, %v10497_v62, %v2192_v11 }
 0x5d1   :  { %v2204_v18 = vrot.slane %v2132_v19, 4  ;;  %v2206_v63 = vrot.slane %v2134_v13, 4 }
 0x5d2   :  { %v2147_v35 = vpop.permute.xlu0 %2146 }
 0x5d3   :  { %v2155_v12 = vsel %vm327_vm3, %v2145_v46, %v2147_v35 }
 0x5d4   :  { %7396 = vmatpush.msk.msra.mxu1 %vm410_vm4, %v2155_v12 }
 0x5d5   :  { %v2149_v2 = vpop.permute.xlu1 %2148 }
 0x5d6   :  { %v2156_v27 = vsel %vm327_vm3, %v2147_v35, %v2149_v2 }
 0x5d7   :  { %7398 = vmatpush.msk.msra.mxu2 %vm410_vm4, %v2156_v27  ;;  %v10607_v61 = vpop.permute.xlu2 %8062  ;;  %v2179_v27 = vrot.slane %v2065_v41, 4  ;;  %v8049_v41 = vunpack.i.l.bf16 %v10599_v15 }
 0x5da   :  { %v10615_v60 = vpop.permute.xlu0 %8032 }
 0x5db   :  { %v8035_v48 = vunpack.i.h.bf16 %v10615_v60  ;;  %v8034_v20 = vunpack.i.l.bf16 %v10615_v60 }
 0x5dd   :  { %v8038_v1 = vpop.permute.xlu1 %8037  ;;  %v2084_v44 = vsel %vm212_vm2, %v8035_v48, %v8029_v16  ;;  %v2086_v25 = vsel %vm212_vm2, %v8030_v50, %v8034_v20  ;;  %v2039_v48 = vsel %vm141_vm5, %v8009_v39, %v8010_v51 }
 0x5de   :  { %v8040_v8 = vunpack.i.h.bf16 %v8038_v1  ;;  %v8039_v4 = vunpack.i.l.bf16 %v8038_v1  ;;  %v2191_v46 = vrot.slane %v2084_v44, 4  ;;  %v2193_v26 = vrot.slane %v2086_v25, 4  ;;  %v10680_v44 = vld [vmem:[%s14021_s2 + $0x10] sm:$0xf] }
 0x5df   :  { %v10638_v0 = vpop.permute.xlu2 %2150  ;;  %v2209_v25 = vrot.slane %v10581_v23, 4 }
 0x5e0   :  { %v2157_v40 = vsel %vm327_vm3, %v2149_v2, %v10638_v0  ;;  %v2106_v17 = vsel %vm249_vm1, %v8045_v37, %v8039_v4  ;;  %v2107_v21 = vsel %vm249_vm1, %v8039_v4, %v8040_v8  ;;  %v2108_v35 = vsel %vm249_vm1, %v8040_v8, %v8044_v47 }
 0x5e1   :  { %7400 = vmatpush.msk.msra.mxu3 %vm410_vm4, %v2157_v40  ;;  %v2234_v12 = vsel %vm410_vm4, %v2106_v17, %v2204_v18  ;;  %v2235_v50 = vsel %vm410_vm4, %v2107_v21, %v2205_v28  ;;  %v2236_v16 = vsel %vm410_vm4, %v2108_v35, %v2206_v63  ;;  %v2017_v2 = vsel %vm104_vm7, %v8004_v30, %v8005_v58 }
 0x5e2   :  { %v10651_v24 = vpop.permute.xlu0 %8052  ;;  %2273 = vmatpush.msra.mxu0 %v2234_v12  ;;  %2293 = vmatpush.msra.mxu1 %v2235_v50  ;;  %v2228_v59 = vsel %vm410_vm4, %v10503_v14, %v2191_v46  ;;  %v2230_v9 = vsel %vm410_vm4, %v10518_v49, %v2193_v26  ;;  %v2223_v37 = vsel %vm410_vm4, %v2039_v48, %v2179_v27  ;;  %v2166_v1 = vrot.slane %v2017_v2, 4 }
 0x5e3   :  { %2313 = vmatpush.msra.mxu2 %v2236_v16  ;;  %v8054_v19 = vunpack.i.l.bf16 %v10651_v24  ;;  %v2066_v8 = vsel %vm181_vm6, %v8000_v7, %v8049_v41  ;;  %v8064_v18 = vunpack.i.l.bf16 %v10607_v61  ;;  %v2239_v46 = vsel %vm410_vm4, %v10591_v38, %v2209_v25 }
 0x5e4   :  { %2274 = vmatpush.msra.mxu0 %v2228_v59  ;;  %2294 = vmatpush.msra.mxu1 %v2229_v33  ;;  %v2217_v11 = vsel %vm410_vm4, %v1990_v56, %v2166_v1  ;;  %v2180_v7 = vrot.slane %v2066_v8, 4 }
 0x5e5   :  { %2314 = vmatpush.msra.mxu2 %v2230_v9  ;;  %v8068_v13 = vpop.permute.xlu1 %8067  ;;  %v2018_v4 = vsel %vm104_vm7, %v8005_v58, %v8054_v19  ;;  %v1991_v12 = vsel %vm62_vm8, %v8015_v22, %v8064_v18 }
 0x5e6   :  { %2295 = vmatpush.msra.mxu1 %v2223_v37  ;;  %v2167_v26 = vrot.slane %v2018_v4, 4  ;;  %v8070_v56 = vunpack.i.h.bf16 %v8068_v13  ;;  %v8069_v37 = vunpack.i.l.bf16 %v8068_v13 }
 0x5e8   :  { %2296 = vmatpush.msra.mxu1 %v2217_v11  ;;  %v2218_v50 = vsel %vm410_vm4, %v1991_v12, %v2167_v26  ;;  %v8055_v12 = vunpack.i.h.bf16 %v10651_v24 }
 0x5e9   :  { %7397 = vmatmul.msk.f32.vlgmr.msra.gmra.mxu1 %vm440_vm9, %v10680_v44 }
 0x5ea   :  { %7404 = vmatpush.msk.msrb.mxu1 %vm410_vm4, %v10587_v54  ;;  %v10698_v28 = vpop.permute.xlu0 %8057 }
 0x5eb   :  { %v8059_v63 = vunpack.i.l.bf16 %v10698_v28 }
 0x5ec   :  { %2373 = vmatpush.msrb.mxu1 %v2239_v46 }
 0x5ed   :  { %v8073_v40 = vpop.permute.xlu1 %8072  ;;  %v2040_v58 = vsel %vm141_vm5, %v8010_v51, %v8059_v63 }
 0x5ee   :  { %v8075_v17 = vunpack.i.h.bf16 %v8073_v40  ;;  %v8074_v21 = vunpack.i.l.bf16 %v8073_v40  ;;  %v2224_v35 = vsel %vm410_vm4, %v2040_v58, %v2180_v7 }
 0x5ef   :  { %2315 = vmatpush.msra.mxu2 %v2224_v35 }
 0x5f0   :  { %v2027_v51 = vsel %vm14034_vm11, %v8074_v21, %v8075_v17  ;;  %v8050_v21 = vunpack.i.h.bf16 %v10599_v15  ;;  %vm14035_vm11 = vcmask 56320  }
 0x5f1   :  { %2316 = vmatpush.msra.mxu2 %v2218_v50  ;;  %v2049_v33 = vsel %vm141_vm5, %v2027_v51, %v8009_v39 }
 0x5f2   :  { %v2051_v16 = vpop.permute.xlu0 %2050  ;;  %7399 = vmatmul.msk.f32.vlgmr.msra.gmra.mxu2 %vm440_vm9, %v10680_v44 }
 0x5f3   :  { %v2071_v27 = vsel %vm181_vm6, %v2051_v16, %v7999_v52  ;;  %v2005_v52 = vsel %vm81_vm10, %v8069_v37, %v8070_v56  ;;  %v8060_v16 = vunpack.i.h.bf16 %v10698_v28 }
 0x5f4   :  { %v2178_v2 = vrot.slane %v2071_v27, 4  ;;  %v2022_v42 = vsel %vm104_vm7, %v2005_v52, %v8004_v30 }
 0x5f5   :  { %v8078_v59 = vpop.permute.xlu1 %8077  ;;  %v2165_v40 = vrot.slane %v2022_v42, 4  ;;  %v2041_v60 = vsel %vm141_vm5, %v8059_v63, %v8060_v16 }
 0x5f6   :  { %v2222_v22 = vsel %vm410_vm4, %v2049_v33, %v2178_v2  ;;  %v8079_v9 = vunpack.i.l.bf16 %v8078_v59  ;;  %v8080_v25 = vunpack.i.h.bf16 %v8078_v59  ;;  %v8065_v2 = vunpack.i.h.bf16 %v10607_v61 }
 0x5f7   :  { %2275 = vmatpush.msra.mxu0 %v2222_v22 }
 0x5f8   :  { %v2135_v1 = vsel %vm290_vm0, %v8024_v3, %v8079_v9  ;;  %v2136_v3 = vsel %vm290_vm0, %v8079_v9, %v8080_v25  ;;  %v2019_v9 = vsel %vm104_vm7, %v8054_v19, %v8055_v12 }
 0x5f9   :  { %v2207_v8 = vrot.slane %v2135_v1, 4  ;;  %v2141_v36 = vsel %vm302_vm14, %v2136_v3, %v10581_v23 }
 0x5fa   :  { %v2153_v48 = vpop.permute.xlu0 %2152  ;;  %v2208_v34 = vrot.slane %v2141_v36, 4 }
 0x5fd   :  { %v8093_v55 = vpop.permute.xlu1 %8092 }
 0x5fe   :  { %v8094_v11 = vunpack.i.l.bf16 %v8093_v55  ;;  %v8095_v39 = vunpack.i.h.bf16 %v8093_v55 }
 0x600   :  { %v2109_v53 = vsel %vm249_vm1, %v8044_v47, %v8094_v11  ;;  %v2110_v32 = vsel %vm249_vm1, %v8094_v11, %v8095_v39  ;;  %v2158_v47 = vsel %vm327_vm3, %v10638_v0, %v2153_v48  ;;  %v2016_v48 = vpop.permute.xlu2 %2015  ;;  %v2168_v11 = vrot.slane %v2019_v9, 4 }
 0x601   :  { %v2237_v4 = vsel %vm410_vm4, %v2109_v53, %v2207_v8  ;;  %v2119_v35 = vsel %vm265_vm15, %v2110_v32, %v10591_v38  ;;  %v2163_v0 = vsel %vm339_vm12, %v2158_v47, %v10587_v54  ;;  %v2067_v54 = vsel %vm181_vm6, %v8049_v41, %v8050_v21  ;;  %v2393_v47 = vld.sshfl [vmem:[#allocation1 + $0x8] sm:$0xff pattern:$0x75316420] }
 0x602   :  { %v8083_v46 = vpop.permute.xlu0 %8082  ;;  %2333 = vmatpush.msra.mxu3 %v2237_v4  ;;  %v2238_v38 = vsel %vm410_vm4, %v2119_v35, %v2208_v34  ;;  %v2020_v52 = vsel %vm104_vm7, %v8055_v12, %v2016_v48  ;;  %v1992_v8 = vsel %vm62_vm8, %v8064_v18, %v8065_v2  ;;  %v2170_v39 = vrot.slane %v2016_v48, 4  ;;  %v2394_v35 = vld.sshfl [vmem:[#allocation1 + $0x10] sm:$0xff pattern:$0x75316420] }
 0x603   :  { %v8085_v13 = vunpack.i.h.bf16 %v8083_v46  ;;  %v8084_v7 = vunpack.i.l.bf16 %v8083_v46  ;;  %v2169_v3 = vrot.slane %v2020_v52, 4  ;;  %v2395_v12 = vld.sshfl [vmem:[#allocation1 + $0x18] sm:$0xff pattern:$0x75316420] }
 0x604   :  { %2825 = vst [vmem:[#allocation1 + $0x10] ss:$2 sm:$0xff] %v9655_v6 }
 0x605   :  { %v1974_v26 = vsel %vm37_vm13, %v8084_v7, %v8085_v13  ;;  %v8098_v58 = vpop.permute.xlu1 %8097  ;;  %v2219_v13 = vsel %vm410_vm4, %v1992_v8, %v2168_v11 }
 0x606   :  { %v2000_v17 = vsel %vm62_vm8, %v1974_v26, %v8014_v5  ;;  %v8100_v5 = vunpack.i.h.bf16 %v8098_v58  ;;  %v8099_v50 = vunpack.i.l.bf16 %v8098_v58 }
 0x607   :  { %v2216_v30 = vsel %vm410_vm4, %v2000_v17, %v2165_v40  ;;  %v2392_v17 = vld.sshfl [vmem:[#allocation1] sm:$0xff pattern:$0x75316420] }
 0x608   :  { %2276 = vmatpush.msra.mxu0 %v2216_v30  ;;  %v2069_v15 = vsel %vm181_vm6, %v8099_v50, %v8100_v5  ;;  %v2068_v41 = vsel %vm181_vm6, %v8050_v21, %v8099_v50  ;;  %v2243_v26 = vpop.permute.xlu2 %2242  ;;  %2823 = vst [vmem:[#allocation1] ss:$2 sm:$0xff] %v9662_v45  ;;  %v2397_v30 = vld.sshfl [vmem:[#allocation1 + $0x28] sm:$0xff pattern:$0x75316420] }
 0x609   :  { %7395 = vmatmul.msk.f32.vlgmr.msra.gmra.mxu0 %vm440_vm9, %v10680_v44  ;;  %v2183_v28 = vrot.slane %v2069_v15, 4  ;;  %v2182_v53 = vrot.slane %v2068_v41, 4  ;;  %v2396_v21 = vld.sshfl [vmem:[#allocation1 + $0x20] sm:$0xff pattern:$0x75316420] }
 0x60a   :  { %7402 = vmatpush.msk.msrb.mxu0 %vm410_vm4, %v2163_v0  ;;  %v8088_v23 = vpop.permute.xlu0 %8087  ;;  %2827 = vst [vmem:[#allocation1 + $0x20] ss:$2 sm:$0xff] %v9681_v10 }
 0x60b   :  { %v8090_v51 = vunpack.i.h.bf16 %v8088_v23  ;;  %v8089_v27 = vunpack.i.l.bf16 %v8088_v23 }
 0x60c   :  { %2353 = vmatpush.msrb.mxu0 %v2238_v38 }
 0x60d   :  { %v2087_v59 = vsel %vm212_vm2, %v8034_v20, %v8089_v27  ;;  %v2088_v33 = vsel %vm212_vm2, %v8089_v27, %v8090_v51  ;;  %v2093_v22 = vsel %vm14035_vm11, %v8090_v51, %v10593_v29  ;;  %v2181_v20 = vrot.slane %v2067_v54, 4  ;;  %v1989_v55 = vpop.permute.xlu1 %1988 }
 0x60e   :  { %v2194_v56 = vrot.slane %v2087_v59, 4  ;;  %v2195_v37 = vrot.slane %v2088_v33, 4  ;;  %v2196_v1 = vrot.slane %v2093_v22, 4  ;;  %v1993_v4 = vsel %vm62_vm8, %v8065_v2, %v1989_v55 }
 0x60f   :  { %v2225_v25 = vsel %vm410_vm4, %v2041_v60, %v2181_v20  ;;  %v2221_v61 = vsel %vm410_vm4, %v1989_v55, %v2170_v39  ;;  %v2220_v18 = vsel %vm410_vm4, %v1993_v4, %v2169_v3  ;;  %vm14036_vm11 = vcmask 72704  }
 0x610   :  { %v2231_v29 = vsel %vm410_vm4, %v10521_v43, %v2194_v56  ;;  %v2232_v24 = vsel %vm410_vm4, %v10544_v31, %v2195_v37  ;;  %v2233_v19 = vsel %vm410_vm4, %v10541_v57, %v2196_v1 }
 0x611   :  { %2334 = vmatpush.msra.mxu3 %v2231_v29  ;;  %2354 = vmatpush.msrb.mxu0 %v2232_v24  ;;  %v7393_v29 = vld [vmem:[%s14022_s3 + $0x14] sm:$0xf] }
 0x612   :  { %2374 = vmatpush.msrb.mxu1 %v2233_v19  ;;  %v2038_v63 = vpop.permute.xlu0 %2037 }
 0x613   :  { %v2042_v46 = vsel %vm141_vm5, %v8060_v16, %v2038_v63  ;;  %2335 = vmatpush.msra.mxu3 %v2225_v25  ;;  %v2227_v42 = vsel %vm410_vm4, %v2038_v63, %v2183_v28 }
 0x614   :  { %2375 = vmatpush.msrb.mxu1 %v2227_v42  ;;  %v2226_v7 = vsel %vm410_vm4, %v2042_v46, %v2182_v53 }
 0x615   :  { %2336 = vmatpush.msra.mxu3 %v2219_v13  ;;  %2355 = vmatpush.msrb.mxu0 %v2226_v7 }
 0x616   :  { %7401 = vmatmul.msk.f32.vlgmr.msra.gmra.mxu3 %vm440_vm9, %v10680_v44  ;;  %2376 = vmatpush.msrb.mxu1 %v2221_v61 }
 0x617   :  { %2356 = vmatpush.msrb.mxu0 %v2220_v18  ;;  %7405 = vmatmul.msk.f32.vlgmr.msrb.gmra.mxu1 %vm440_vm9, %v10680_v44 }
 0x618   :  { %7403 = vmatmul.msk.f32.vlgmr.msrb.gmra.mxu0 %vm440_vm9, %v10680_v44 }
 0x666   :  { %v2298_v40 = vpop.f32.mrf.mxu1 }
 0x667   :  { %v2299_v32 = vadd.f32 %v2298_v40, %v2243_v26 }
 0x669   :  { %v2382_v58 = vmax.f32 %v2299_v32, 0.0 }
 0x66b   :  { %v10802_v36 = vmul.f32 %v2393_v47, %v2382_v58 }
 0x66d   :  { %2586 = vrot.lane.b32.xlu2 %v10802_v36, %s9267_s30 }
 0x675   :  { %v2318_v23 = vpop.f32.mrf.mxu2 }
 0x676   :  { %v2319_v16 = vadd.f32 %v2318_v23, %v2243_v26 }
 0x678   :  { %v2383_v38 = vmax.f32 %v2319_v16, 0.0 }
 0x67a   :  { %v10823_v59 = vmul.f32 %v2394_v35, %v2383_v38 }
 0x686   :  { %v2278_v44 = vpop.f32.mrf.mxu0 }
 0x687   :  { %v2279_v0 = vadd.f32 %v2278_v44, %v2243_v26 }
 0x689   :  { %v2381_v34 = vmax.f32 %v2279_v0, 0.0 }
 0x68b   :  { %v10808_v5 = vmul.f32 %v2392_v17, %v2381_v34 }
 0x68d   :  { %2584 = vrot.lane.b32.xlu1 %v10808_v5, %s9267_s30  ;;  %v8101_v50 = vpack.i.bf16 %v10802_v36, %v10808_v5 }
 0x68f   :  { %8102 = vrot.lane.b32.xlu0 %v8101_v50, %s9265_s28  ;;  %8117 = vrot.lane.b32.xlu2 %v8101_v50, %s9268_s5 }
 0x694   :  { %v2378_v51 = vpop.f32.mrf.mxu1 }
 0x695   :  { %8112 = vrot.lane.b32.xlu1 %v8101_v50, %s9263_s26  ;;  %v2358_v27 = vpop.f32.mrf.mxu0  ;;  %v2379_v2 = vadd.f32 %v2378_v51, %v2243_v26 }
 0x696   :  { %v2359_v54 = vadd.f32 %v2358_v27, %v2243_v26 }
 0x697   :  { %8107 = vrot.lane.b32.xlu0 %v8101_v50, %s9261_s24  ;;  %8127 = vrot.lane.b32.xlu2 %v8101_v50, %s9264_s27  ;;  %v2386_v33 = vmax.f32 %v2379_v2, 0.0 }
 0x698   :  { %v2385_v22 = vmax.f32 %v2359_v54, 0.0 }
 0x699   :  { %v10831_v9 = vmul.f32 %v2397_v30, %v2386_v33  ;;  %v2338_v1 = vpop.f32.mrf.mxu3 }
 0x69a   :  { %v10833_v48 = vmul.f32 %v2396_v21, %v2385_v22  ;;  %v2339_v15 = vadd.f32 %v2338_v1, %v2243_v26 }
 0x69c   :  { %v8151_v56 = vpack.i.bf16 %v10831_v9, %v10833_v48  ;;  %v8136_v37 = vpack.i.bf16 %v10833_v48, %v10823_v59  ;;  %v2384_v60 = vmax.f32 %v2339_v15, 0.0 }
 0x69d   :  { %8122 = vrot.lane.b32.xlu1 %v8101_v50, %s9260_s23 }
 0x69e   :  { %v10851_v20 = vmul.f32 %v2395_v12, %v2384_v60 }
 0x69f   :  { %2580 = vrot.lane.b32.xlu0 %v10808_v5, %s9271_s8  ;;  %8132 = vrot.lane.b32.xlu2 %v8101_v50, %s9258_s0 }
 0x6a0   :  { %v8186_v41 = vpack.i.bf16 %v10851_v20, %v10823_v59  ;;  %v8176_v55 = vpack.i.bf16 %v10851_v20, %v10831_v9 }
 0x6a5   :  { %2558 = vrot.lane.b32.xlu1 %v10808_v5, %s9270_s7 }
 0x6a7   :  { %2588 = vrot.lane.b32.xlu0 %v10823_v59, %s9267_s30  ;;  %2602 = vrot.lane.b32.xlu2 %v10808_v5, %s9272_s9 }
 0x6ad   :  { %2532 = vrot.lane.b32.xlu1 %v10808_v5, %s9269_s6 }
 0x6af   :  { %8152 = vrot.lane.b32.xlu0 %v8151_v56, %s9262_s25  ;;  %2594 = vrot.lane.b32.xlu2 %v10831_v9, %s9267_s30 }
 0x6b5   :  { %2492 = vrot.lane.b32.xlu1 %v10831_v9, %s9266_s29 }
 0x6b7   :  { %8157 = vrot.lane.b32.xlu0 %v8151_v56, %s9257_s21  ;;  %8137 = vrot.lane.b32.xlu2 %v8136_v37, %s9265_s28 }
 0x6bd   :  { %8142 = vrot.lane.b32.xlu1 %v8136_v37, %s9263_s26 }
 0x6bf   :  { %8162 = vrot.lane.b32.xlu0 %v8151_v56, %s9261_s24  ;;  %8147 = vrot.lane.b32.xlu2 %v8151_v56, %s9259_s22 }
 0x6c5   :  { %2592 = vrot.lane.b32.xlu1 %v10833_v48, %s9267_s30 }
 0x6c7   :  { %8167 = vrot.lane.b32.xlu0 %v8151_v56, %s9268_s5  ;;  %8187 = vrot.lane.b32.xlu2 %v8186_v41, %s9268_s5  ;;  %v2587_v24 = vpop.permute.xlu2 %2586 }
 0x6cd   :  { %8177 = vrot.lane.b32.xlu1 %v8176_v55, %s9265_s28 }
 0x6cf   :  { %2457 = vrot.lane.b32.xlu0 %v10833_v48, %s9260_s23  ;;  %8192 = vrot.lane.b32.xlu2 %v8186_v41, %s9260_s23 }
 0x6d5   :  { %2590 = vrot.lane.b32.xlu1 %v10851_v20, %s9267_s30 }
 0x6d7   :  { %8172 = vrot.lane.b32.xlu0 %v8186_v41, %s9261_s24  ;;  %2479 = vrot.lane.b32.xlu2 %v10833_v48, %s9264_s27 }
 0x6dd   :  { %8197 = vrot.lane.b32.xlu1 %v8186_v41, %s9264_s27 }
 0x6df   :  { %8182 = vrot.lane.b32.xlu0 %v8176_v55, %s9263_s26  ;;  %2684 = vperm.xlu2 %7680, %v7393_v29  }
 0x6e5   :  { %2430 = vrot.lane.b32.xlu1 %v10833_v48, %s9258_s0 }
 0x6e7   :  { %8202 = vrot.lane.b32.xlu0 %v8186_v41, %s9258_s0 }
 0x6e9   :  { %v10878_v19 = vpop.permute.xlu2 %8117 }
 0x6ea   :  { %v8119_v38 = vunpack.i.l.bf16 %v10878_v19 }
 0x6f1   :  { %v10880_v11 = vpop.permute.xlu2 %8127 }
 0x6f2   :  { %v8129_v56 = vunpack.i.l.bf16 %v10880_v11 }
 0x6f9   :  { %v10882_v52 = vpop.permute.xlu2 %8132 }
 0x6ff   :  { %v2585_v28 = vpop.permute.xlu1 %2584 }
 0x700   :  { %v2596_v63 = vsel %vm327_vm3, %v2585_v28, %v2587_v24  ;;  %v8134_v28 = vunpack.i.l.bf16 %v10882_v52 }
 0x701   :  { %v8103_v25 = vpop.permute.xlu0 %8102  ;;  %7406 = vmatpush.msk.msrb.mxu2 %vm410_vm4, %v2596_v63  ;;  %v10886_v8 = vpop.permute.xlu2 %2602 }
 0x702   :  { %v8105_v53 = vunpack.i.h.bf16 %v8103_v25  ;;  %v8104_v39 = vunpack.i.l.bf16 %v8103_v25 }
 0x704   :  { %v2574_v4 = vsel %vm290_vm0, %v8104_v39, %v8105_v53 }
 0x705   :  { %v2646_v7 = vrot.slane %v2574_v4, 4 }
 0x707   :  { %v8113_v46 = vpop.permute.xlu1 %8112 }
 0x708   :  { %v8115_v42 = vunpack.i.h.bf16 %v8113_v46  ;;  %v8114_v3 = vunpack.i.l.bf16 %v8113_v46  ;;  %v10928_v46 = vld [vmem:[%s14021_s2 + $0x14] sm:$0xf] }
 0x709   :  { %v10889_v13 = vpop.permute.xlu0 %8107  ;;  %v2595_v40 = vpop.permute.xlu2 %2594 }
 0x70a   :  { %v8110_v61 = vunpack.i.h.bf16 %v10889_v13  ;;  %v8109_v18 = vunpack.i.l.bf16 %v10889_v13  ;;  %v2548_v26 = vsel %vm249_vm1, %v8114_v3, %v8115_v42 }
 0x70b   :  { %v2676_v32 = vsel %vm410_vm4, %v2548_v26, %v2646_v7 }
 0x70c   :  { %2715 = vmatpush.msrb.mxu2 %v2676_v32  ;;  %v2526_v47 = vsel %vm212_vm2, %v8109_v18, %v8110_v61 }
 0x70d   :  { %v2633_v58 = vrot.slane %v2526_v47, 4 }
 0x70f   :  { %v10898_v17 = vpop.permute.xlu1 %8122  ;;  %v2670_v30 = vsel %vm410_vm4, %v10808_v5, %v2633_v58 }
 0x710   :  { %2716 = vmatpush.msrb.mxu2 %v2670_v30  ;;  %v8124_v54 = vunpack.i.l.bf16 %v10898_v17 }
 0x711   :  { %v10902_v21 = vpop.permute.xlu0 %2580  ;;  %v10904_v35 = vpop.permute.xlu2 %8137 }
 0x712   :  { %v8139_v41 = vunpack.i.l.bf16 %v10904_v35 }
 0x714   :  { %v2575_v7 = vsel %vm290_vm0, %v8105_v53, %v8139_v41 }
 0x715   :  { %v2647_v47 = vrot.slane %v2575_v7, 4 }
 0x717   :  { %v10906_v12 = vpop.permute.xlu1 %2558 }
 0x719   :  { %v2589_v44 = vpop.permute.xlu0 %2588  ;;  %v8148_v34 = vpop.permute.xlu2 %8147 }
 0x71a   :  { %v2597_v0 = vsel %vm327_vm3, %v2587_v24, %v2589_v44  ;;  %v8150_v16 = vunpack.i.h.bf16 %v8148_v34  ;;  %v8149_v51 = vunpack.i.l.bf16 %v8148_v34 }
 0x71b   :  { %7408 = vmatpush.msk.msrb.mxu3 %vm410_vm4, %v2597_v0 }
 0x71c   :  { %v2447_v2 = vsel %vm81_vm10, %v8149_v51, %v8150_v16 }
 0x71d   :  { %v2464_v60 = vsel %vm104_vm7, %v2447_v2, %v8124_v54  ;;  %v8130_v2 = vunpack.i.h.bf16 %v10880_v11 }
 0x71e   :  { %v2607_v39 = vrot.slane %v2464_v60, 4 }
 0x71f   :  { %v10910_v50 = vpop.permute.xlu1 %2532 }
 0x721   :  { %v8153_v23 = vpop.permute.xlu0 %8152  ;;  %v10951_v16 = vpop.permute.xlu2 %8187 }
 0x722   :  { %v8155_v27 = vunpack.i.h.bf16 %v8153_v23  ;;  %v8154_v5 = vunpack.i.l.bf16 %v8153_v23 }
 0x724   :  { %v2469_v22 = vsel %vm14036_vm11, %v8154_v5, %v8155_v27  ;;  %v8120_v27 = vunpack.i.h.bf16 %v10878_v19  ;;  %vm14037_vm11 = vcmask 56320  }
 0x725   :  { %v2491_v24 = vsel %vm141_vm5, %v2469_v22, %v8129_v56 }
 0x727   :  { %v2493_v33 = vpop.permute.xlu1 %2492 }
 0x728   :  { %v2513_v37 = vsel %vm181_vm6, %v2493_v33, %v8119_v38  ;;  %v8135_v33 = vunpack.i.h.bf16 %v10882_v52 }
 0x729   :  { %v2620_v1 = vrot.slane %v2513_v37, 4  ;;  %v8158_v15 = vpop.permute.xlu0 %8157  ;;  %v2481_v37 = vsel %vm141_vm5, %v8129_v56, %v8130_v2  ;;  %v10965_v60 = vpop.permute.xlu2 %8192 }
 0x72a   :  { %v8160_v55 = vunpack.i.h.bf16 %v8158_v15  ;;  %v8159_v29 = vunpack.i.l.bf16 %v8158_v15  ;;  %v8194_v7 = vunpack.i.l.bf16 %v10965_v60 }
 0x72b   :  { %v2664_v63 = vsel %vm410_vm4, %v2491_v24, %v2620_v1  ;;  %v8189_v1 = vunpack.i.l.bf16 %v10951_v16 }
 0x72c   :  { %2717 = vmatpush.msrb.mxu2 %v2664_v63  ;;  %v2416_v25 = vsel %vm37_vm13, %v8159_v29, %v8160_v55  ;;  %v2432_v63 = vsel %vm62_vm8, %v8134_v28, %v8135_v33 }
 0x72d   :  { %v2442_v4 = vsel %vm62_vm8, %v2416_v25, %v8134_v28  ;;  %v8190_v25 = vunpack.i.h.bf16 %v10951_v16 }
 0x72e   :  { %v2658_v3 = vsel %vm410_vm4, %v2442_v4, %v2607_v39 }
 0x72f   :  { %v10934_v18 = vpop.permute.xlu1 %8142  ;;  %2718 = vmatpush.msrb.mxu2 %v2658_v3  ;;  %v8140_v3 = vunpack.i.h.bf16 %v10904_v35 }
 0x730   :  { %v8144_v26 = vunpack.i.l.bf16 %v10934_v18  ;;  %7407 = vmatmul.msk.f32.vlgmr.msrb.gmra.mxu2 %vm440_vm9, %v10928_v46 }
 0x731   :  { %v10939_v32 = vpop.permute.xlu0 %8162 }
 0x732   :  { %v2549_v58 = vsel %vm249_vm1, %v8115_v42, %v8144_v26  ;;  %v8125_v42 = vunpack.i.h.bf16 %v10898_v17  ;;  %v8164_v39 = vunpack.i.l.bf16 %v10939_v32 }
 0x733   :  { %v2677_v30 = vsel %vm410_vm4, %v2549_v58, %v2647_v47  ;;  %v10982_v58 = vsel %vm181_vm6, %v8120_v27, %v8189_v1 }
 0x734   :  { %2735 = vmatpush.msrb.mxu3 %v2677_v30  ;;  %v2459_v22 = vsel %vm104_vm7, %v8124_v54, %v8125_v42  ;;  %v2622_v13 = vrot.slane %v10982_v58, 4 }
 0x735   :  { %v2608_v29 = vrot.slane %v2459_v22, 4  ;;  %v8195_v22 = vunpack.i.h.bf16 %v10965_v60 }
 0x737   :  { %v2593_v0 = vpop.permute.xlu1 %2592 }
 0x738   :  { %v2600_v53 = vsel %vm327_vm3, %v2593_v0, %v2595_v40  ;;  %v2507_v40 = vsel %vm181_vm6, %v8119_v38, %v8120_v27  ;;  %v2651_v38 = vrot.slane %v10902_v21, 4 }
 0x739   :  { %v10946_v34 = vpop.permute.xlu0 %8167  ;;  %v2605_v23 = vsel %vm339_vm12, %v2600_v53, %v10886_v8  ;;  %v2621_v19 = vrot.slane %v2507_v40, 4 }
 0x73a   :  { %7414 = vmatpush.msk.msra.mxu2 %vm410_vm4, %v2605_v23  ;;  %v2681_v53 = vsel %vm410_vm4, %v10906_v12, %v2651_v38  ;;  %v8169_v23 = vunpack.i.l.bf16 %v10946_v34 }
 0x73b   :  { %v2665_v56 = vsel %vm410_vm4, %v2481_v37, %v2621_v19  ;;  %v11007_v19 = vsel %vm104_vm7, %v8125_v42, %v8194_v7 }
 0x73f   :  { %v8178_v51 = vpop.permute.xlu1 %8177 }
 0x740   :  { %v8179_v24 = vunpack.i.l.bf16 %v8178_v51  ;;  %v8180_v47 = vunpack.i.h.bf16 %v8178_v51 }
 0x741   :  { %v10955_v5 = vpop.permute.xlu0 %2457 }
 0x742   :  { %v2578_v16 = vsel %vm290_vm0, %v8140_v3, %v8179_v24 }
 0x747   :  { %v2591_v15 = vpop.permute.xlu1 %2590 }
 0x748   :  { %v2598_v17 = vsel %vm327_vm3, %v2589_v44, %v2591_v15  ;;  %v2599_v55 = vsel %vm327_vm3, %v2591_v15, %v2593_v0  ;;  %v8165_v44 = vunpack.i.h.bf16 %v10939_v32  ;;  %v2659_v0 = vsel %vm410_vm4, %v2432_v63, %v2608_v29 }
 0x749   :  { %7410 = vmatpush.msk.msra.mxu0 %vm410_vm4, %v2598_v17  ;;  %7412 = vmatpush.msk.msra.mxu1 %vm410_vm4, %v2599_v55  ;;  %v8173_v54 = vpop.permute.xlu0 %8172  ;;  %v8170_v32 = vunpack.i.h.bf16 %v10946_v34  ;;  %v2576_v34 = vsel %vm290_vm0, %v8139_v41, %v8180_v47  ;;  %v2577_v17 = vsel %vm290_vm0, %v8180_v47, %v8140_v3 }
 0x74a   :  { %v8174_v4 = vunpack.i.l.bf16 %v8173_v54  ;;  %v8175_v30 = vunpack.i.h.bf16 %v8173_v54  ;;  %v2530_v27 = vsel %vm212_vm2, %v8164_v39, %v8165_v44  ;;  %v2535_v40 = vsel %vm14037_vm11, %v8165_v44, %v10910_v50 }
 0x74b   :  { %v8145_v50 = vunpack.i.h.bf16 %v10934_v18  ;;  %v2637_v29 = vrot.slane %v2530_v27, 4  ;;  %v2638_v35 = vrot.slane %v2535_v40, 4  ;;  %v2511_v41 = vsel %vm181_vm6, %v8169_v23, %v8170_v32  ;;  %v2480_v18 = vpop.permute.xlu2 %2479 }
 0x74c   :  { %v2527_v28 = vsel %vm212_vm2, %v8110_v61, %v8174_v4  ;;  %v10998_v61 = vsel %vm181_vm6, %v8189_v1, %v8190_v25  ;;  %v2583_v1 = vsel %vm302_vm14, %v2578_v16, %v10902_v21  ;;  %v2528_v60 = vsel %vm212_vm2, %v8174_v4, %v8175_v30 }
 0x74d   :  { %v2634_v51 = vrot.slane %v2527_v28, 4  ;;  %v2648_v54 = vrot.slane %v2576_v34, 4  ;;  %v2649_v44 = vrot.slane %v2577_v17, 4  ;;  %v2650_v3 = vrot.slane %v2583_v1, 4 }
 0x74e   :  { %v2635_v47 = vrot.slane %v2528_v60, 4  ;;  %v2623_v16 = vrot.slane %v10998_v61, 4  ;;  %v2462_v27 = vsel %vm104_vm7, %v8195_v22, %v10955_v5  ;;  %vm14038_vm11 = vcmask 72704  }
 0x74f   :  { %v8198_v37 = vpop.permute.xlu1 %8197  ;;  %v2671_v15 = vsel %vm410_vm4, %v10802_v36, %v2634_v51  ;;  %v2529_v36 = vsel %vm212_vm2, %v8175_v30, %v8164_v39  ;;  %v2461_v51 = vsel %vm104_vm7, %v8194_v7, %v8195_v22  ;;  %v2611_v34 = vrot.slane %v2462_v27, 4 }
 0x750   :  { %2736 = vmatpush.msrb.mxu3 %v2671_v15  ;;  %v8199_v38 = vunpack.i.l.bf16 %v8198_v37  ;;  %v8200_v63 = vunpack.i.h.bf16 %v8198_v37  ;;  %v2636_v58 = vrot.slane %v2529_v36, 4  ;;  %v2609_v37 = vrot.slane %v11007_v19, 4 }
 0x751   :  { %v8183_v55 = vpop.permute.xlu0 %8182  ;;  %v2610_v17 = vrot.slane %v2461_v51, 4 }
 0x752   :  { %v8185_v42 = vunpack.i.h.bf16 %v8183_v55  ;;  %v8184_v24 = vunpack.i.l.bf16 %v8183_v55  ;;  %2737 = vmatpush.msrb.mxu3 %v2665_v56  ;;  %v2482_v32 = vsel %vm141_vm5, %v8130_v2, %v8199_v38  ;;  %v2673_v11 = vsel %vm410_vm4, %v10851_v20, %v2636_v58 }
 0x753   :  { %v2674_v2 = vsel %vm410_vm4, %v10833_v48, %v2637_v29  ;;  %v2666_v61 = vsel %vm410_vm4, %v2482_v32, %v2622_v13  ;;  %v2685_v52 = vpop.permute.xlu2 %2684  ;;  %v2828_v29 = vld.sshfl [vmem:[#allocation1] sm:$0xff pattern:$0x75316420] }
 0x754   :  { %2738 = vmatpush.msrb.mxu3 %v2659_v0  ;;  %v2550_v21 = vsel %vm249_vm1, %v8144_v26, %v8185_v42  ;;  %v2551_v39 = vsel %vm249_vm1, %v8185_v42, %v8145_v50  ;;  %v2552_v4 = vsel %vm249_vm1, %v8145_v50, %v8184_v24  ;;  %v2510_v0 = vsel %vm181_vm6, %v8190_v25, %v8169_v23  ;;  %v2829_v42 = vld.sshfl [vmem:[#allocation1 + $0x8] sm:$0xff pattern:$0x75316420]  ;;  %v2831_v24 = vld.sshfl [vmem:[#allocation1 + $0x18] sm:$0xff pattern:$0x75316420] }
 0x755   :  { %7409 = vmatmul.msk.f32.vlgmr.msrb.gmra.mxu3 %vm440_vm9, %v10928_v46  ;;  %v2678_v56 = vsel %vm410_vm4, %v2550_v21, %v2648_v54  ;;  %v2679_v30 = vsel %vm410_vm4, %v2551_v39, %v2649_v44  ;;  %v2561_v28 = vsel %vm265_vm15, %v2552_v4, %v10906_v12  ;;  %v2672_v12 = vsel %vm410_vm4, %v10823_v59, %v2635_v47  ;;  %v2833_v54 = vld.sshfl [vmem:[#allocation1 + $0x28] sm:$0xff pattern:$0x75316420] }
 0x756   :  { %7416 = vmatpush.msk.msra.mxu3 %vm410_vm4, %v10886_v8  ;;  %2755 = vmatpush.msra.mxu0 %v2678_v56  ;;  %v2680_v26 = vsel %vm410_vm4, %v2561_v28, %v2650_v3  ;;  %v2483_v25 = vsel %vm141_vm5, %v8199_v38, %v8200_v63  ;;  %v2484_v8 = vsel %vm141_vm5, %v8200_v63, %v2480_v18  ;;  %v2625_v23 = vrot.slane %v2511_v41, 4  ;;  %v2832_v63 = vld.sshfl [vmem:[#allocation1 + $0x20] sm:$0xff pattern:$0x75316420] }
 0x757   :  { %2775 = vmatpush.msra.mxu1 %v2679_v30  ;;  %2795 = vmatpush.msra.mxu2 %v2680_v26  ;;  %v2624_v7 = vrot.slane %v2510_v0, 4  ;;  %v2675_v59 = vsel %vm410_vm4, %v10831_v9, %v2638_v35  ;;  %v2431_v22 = vpop.permute.xlu1 %2430  ;;  %v2667_v20 = vsel %vm410_vm4, %v2483_v25, %v2623_v16  ;;  %v2612_v50 = vrot.slane %v10955_v5, 4  ;;  %3279 = vst [vmem:[#allocation1] ss:$2 sm:$0xff] %v9662_v45 }
 0x758   :  { %2815 = vmatpush.msra.mxu3 %v2681_v53  ;;  %2756 = vmatpush.msra.mxu0 %v2672_v12  ;;  %v2669_v9 = vsel %vm410_vm4, %v2480_v18, %v2625_v23  ;;  %3283 = vst [vmem:[#allocation1 + $0x20] ss:$2 sm:$0xff] %v9681_v10 }
 0x759   :  { %2776 = vmatpush.msra.mxu1 %v2673_v11  ;;  %v8203_v40 = vpop.permute.xlu0 %8202  ;;  %2796 = vmatpush.msra.mxu2 %v2674_v2  ;;  %v2668_v48 = vsel %vm410_vm4, %v2484_v8, %v2624_v7  ;;  %v2663_v60 = vsel %vm410_vm4, %v2431_v22, %v2612_v50 }
 0x75a   :  { %v8205_v53 = vunpack.i.h.bf16 %v8203_v40  ;;  %v8204_v15 = vunpack.i.l.bf16 %v8203_v40  ;;  %2816 = vmatpush.msra.mxu3 %v2675_v59  ;;  %2757 = vmatpush.msra.mxu0 %v2666_v61 }
 0x75b   :  { %2777 = vmatpush.msra.mxu1 %v2667_v20  ;;  %2797 = vmatpush.msra.mxu2 %v2668_v48 }
 0x75c   :  { %2817 = vmatpush.msra.mxu3 %v2669_v9  ;;  %v2433_v13 = vsel %vm62_vm8, %v8135_v33, %v8204_v15  ;;  %v2434_v19 = vsel %vm62_vm8, %v8204_v15, %v8205_v53  ;;  %v2435_v1 = vsel %vm62_vm8, %v8205_v53, %v2431_v22 }
 0x75d   :  { %v2660_v55 = vsel %vm410_vm4, %v2433_v13, %v2609_v37  ;;  %v2661_v5 = vsel %vm410_vm4, %v2434_v19, %v2610_v17  ;;  %v2662_v36 = vsel %vm410_vm4, %v2435_v1, %v2611_v34 }
 0x75e   :  { %2818 = vmatpush.msra.mxu3 %v2663_v60  ;;  %2758 = vmatpush.msra.mxu0 %v2660_v55 }
 0x75f   :  { %2778 = vmatpush.msra.mxu1 %v2661_v5  ;;  %2798 = vmatpush.msra.mxu2 %v2662_v36 }
 0x760   :  { %7417 = vmatmul.msk.f32.vlgmr.msra.gmra.mxu3 %vm440_vm9, %v10928_v46  ;;  %7411 = vmatmul.msk.f32.vlgmr.msra.gmra.mxu0 %vm440_vm9, %v10928_v46 }
 0x761   :  { %7413 = vmatmul.msk.f32.vlgmr.msra.gmra.mxu1 %vm440_vm9, %v10928_v46  ;;  %7415 = vmatmul.msk.f32.vlgmr.msra.gmra.mxu2 %vm440_vm9, %v10928_v46  ;;  %v2830_v46 = vld.sshfl [vmem:[#allocation1 + $0x10] sm:$0xff pattern:$0x75316420] }
 0x762   :  { %3281 = vst [vmem:[#allocation1 + $0x10] ss:$2 sm:$0xff] %v9655_v6 }
 0x7b3   :  { %v2720_v33 = vpop.f32.mrf.mxu2 }
 0x7b4   :  { %v2721_v35 = vadd.f32 %v2720_v33, %v2685_v52 }
 0x7b6   :  { %v2840_v41 = vmul.f32 %v2828_v29, %v2721_v35 }
 0x7b8   :  { %v11072_v38 = vadd.f32 %v2840_v41, %v10503_v14 }
 0x7ba   :  { %3030 = vrot.lane.b32.xlu2 %v11072_v38, %s9271_s8  ;;  %3034 = vrot.lane.b32.xlu1 %v11072_v38, %s9267_s30 }
 0x7c2   :  { %2982 = vrot.lane.b32.xlu1 %v11072_v38, %s9269_s6 }
 0x7d8   :  { %v2740_v14 = vpop.f32.mrf.mxu3 }
 0x7d9   :  { %v2741_v21 = vadd.f32 %v2740_v14, %v2685_v52 }
 0x7db   :  { %v2841_v30 = vmul.f32 %v2829_v42, %v2741_v21 }
 0x7dd   :  { %v2760_v44 = vpop.f32.mrf.mxu0  ;;  %v11096_v18 = vadd.f32 %v2841_v30, %v10497_v62 }
 0x7de   :  { %v2761_v3 = vadd.f32 %v2760_v44, %v2685_v52  ;;  %v2780_v47 = vpop.f32.mrf.mxu1 }
 0x7df   :  { %v2781_v39 = vadd.f32 %v2780_v47, %v2685_v52 }
 0x7e0   :  { %v2842_v4 = vmul.f32 %v2830_v46, %v2761_v3 }
 0x7e1   :  { %v2843_v58 = vmul.f32 %v2831_v24, %v2781_v39 }
 0x7e2   :  { %v11084_v56 = vadd.f32 %v2842_v4, %v10518_v49  ;;  %v8221_v49 = vpack.i.bf16 %v11072_v38, %v11096_v18 }
 0x7e3   :  { %v11087_v28 = vadd.f32 %v2843_v58, %v10521_v43  ;;  %v2820_v43 = vpop.f32.mrf.mxu3 }
 0x7e4   :  { %3038 = vrot.lane.b32.xlu1 %v11084_v56, %s9267_s30  ;;  %v8226_v62 = vpack.i.bf16 %v11084_v56, %v11096_v18  ;;  %v2800_v26 = vpop.f32.mrf.mxu2  ;;  %v2821_v32 = vadd.f32 %v2820_v43, %v2685_v52 }
 0x7e5   :  { %3040 = vrot.lane.b32.xlu2 %v11087_v28, %s9267_s30  ;;  %v8206_v0 = vpack.i.bf16 %v11087_v28, %v11084_v56  ;;  %v2801_v16 = vadd.f32 %v2800_v26, %v2685_v52  ;;  %v8271_v25 = vpack.i.bf16 %v11087_v28, %v11072_v38 }
 0x7e6   :  { %v2845_v51 = vmul.f32 %v2833_v54, %v2821_v32 }
 0x7e7   :  { %8207 = vrot.lane.b32.xlu0 %v8206_v0, %s9265_s28  ;;  %v2844_v12 = vmul.f32 %v2832_v63, %v2801_v16 }
 0x7e8   :  { %v11118_v8 = vadd.f32 %v2845_v51, %v10541_v57  ;;  %v7420_v57 = vld [vmem:[%s14022_s3 + $0x18] sm:$0xf] }
 0x7e9   :  { %v11121_v23 = vadd.f32 %v2844_v12, %v10544_v31 }
 0x7eb   :  { %v8276_v27 = vpack.i.bf16 %v11118_v8, %v11121_v23 }
 0x7ec   :  { %8217 = vrot.lane.b32.xlu1 %v8206_v0, %s9263_s26 }
 0x7ed   :  { %8222 = vrot.lane.b32.xlu2 %v8221_v49, %s9265_s28 }
 0x7ef   :  { %8212 = vrot.lane.b32.xlu0 %v8206_v0, %s9261_s24 }
 0x7f4   :  { %3036 = vrot.lane.b32.xlu1 %v11096_v18, %s9267_s30 }
 0x7f5   :  { %8232 = vrot.lane.b32.xlu2 %v8221_v49, %s9261_s24 }
 0x7f7   :  { %8227 = vrot.lane.b32.xlu0 %v8226_v62, %s9268_s5 }
 0x7fc   :  { %8257 = vrot.lane.b32.xlu1 %v8226_v62, %s9258_s0 }
 0x7fd   :  { %8242 = vrot.lane.b32.xlu2 %v8226_v62, %s9260_s23 }
 0x7ff   :  { %8237 = vrot.lane.b32.xlu0 %v8221_v49, %s9263_s26 }
 0x804   :  { %8272 = vrot.lane.b32.xlu1 %v8271_v25, %s9258_s0 }
 0x805   :  { %8252 = vrot.lane.b32.xlu2 %v8271_v25, %s9268_s5 }
 0x807   :  { %8247 = vrot.lane.b32.xlu0 %v8226_v62, %s9264_s27 }
 0x80c   :  { %8277 = vrot.lane.b32.xlu1 %v8276_v27, %s9265_s28 }
 0x80d   :  { %8267 = vrot.lane.b32.xlu2 %v8271_v25, %s9264_s27 }
 0x80f   :  { %8262 = vrot.lane.b32.xlu0 %v8271_v25, %s9260_s23 }
 0x814   :  { %8287 = vrot.lane.b32.xlu1 %v8276_v27, %s9263_s26  ;;  %v11150_v31 = vpop.permute.xlu2 %3030 }
 0x815   :  { %2942 = vrot.lane.b32.xlu2 %v11118_v8, %s9266_s29 }
 0x817   :  { %3042 = vrot.lane.b32.xlu0 %v11121_v23, %s9267_s30 }
 0x81c   :  { %8297 = vrot.lane.b32.xlu1 %v8276_v27, %s9262_s25 }
 0x81d   :  { %8292 = vrot.lane.b32.xlu2 %v8276_v27, %s9259_s22 }
 0x81f   :  { %8282 = vrot.lane.b32.xlu0 %v8276_v27, %s9261_s24 }
 0x824   :  { %8307 = vrot.lane.b32.xlu1 %v8276_v27, %s9268_s5 }
 0x825   :  { %3052 = vrot.lane.b32.xlu2 %v11072_v38, %s9272_s9 }
 0x827   :  { %3008 = vrot.lane.b32.xlu0 %v11072_v38, %s9270_s7 }
 0x82c   :  { %2880 = vrot.lane.b32.xlu1 %v11121_v23, %s9258_s0  ;;  %v3035_v2 = vpop.permute.xlu1 %3034 }
 0x82d   :  { %2907 = vrot.lane.b32.xlu2 %v11121_v23, %s9260_s23 }
 0x82f   :  { %8302 = vrot.lane.b32.xlu0 %v8276_v27, %s9257_s21 }
 0x834   :  { %v11158_v40 = vpop.permute.xlu1 %2982 }
 0x835   :  { %3134 = vperm.xlu2 %7680, %v7420_v57  }
 0x837   :  { %3044 = vrot.lane.b32.xlu0 %v11118_v8, %s9267_s30 }
 0x83f   :  { %v11154_v11 = vpop.permute.xlu2 %3040  ;;  %2929 = vrot.lane.b32.xlu0 %v11121_v23, %s9264_s27 }
 0x847   :  { %v8223_v7 = vpop.permute.xlu2 %8222 }
 0x848   :  { %v8225_v24 = vunpack.i.h.bf16 %v8223_v7  ;;  %v8224_v54 = vunpack.i.l.bf16 %v8223_v7 }
 0x84a   :  { %v3024_v3 = vsel %vm290_vm0, %v8225_v24, %v8224_v54 }
 0x84b   :  { %v3096_v0 = vrot.slane %v3024_v3, 4 }
 0x84f   :  { %v8233_v59 = vpop.permute.xlu2 %8232 }
 0x850   :  { %v8235_v63 = vunpack.i.h.bf16 %v8233_v59  ;;  %v8234_v14 = vunpack.i.l.bf16 %v8233_v59 }
 0x852   :  { %v2976_v21 = vsel %vm212_vm2, %v8235_v63, %v8234_v14 }
 0x853   :  { %v3083_v62 = vrot.slane %v2976_v21, 4 }
 0x856   :  { %v3039_v61 = vpop.permute.xlu1 %3038 }
 0x857   :  { %v3048_v37 = vsel %vm327_vm3, %v3039_v61, %v11154_v11  ;;  %v11162_v22 = vpop.permute.xlu2 %8242 }
 0x858   :  { %7426 = vmatpush.msk.msrb.mxu2 %vm410_vm4, %v3048_v37  ;;  %v8245_v57 = vunpack.i.h.bf16 %v11162_v22 }
 0x859   :  { %v11165_v53 = vpop.permute.xlu0 %8207 }
 0x85a   :  { %v8210_v15 = vunpack.i.h.bf16 %v11165_v53  ;;  %v8209_v20 = vunpack.i.l.bf16 %v11165_v53 }
 0x85c   :  { %v3026_v48 = vsel %vm290_vm0, %v8209_v20, %v8210_v15  ;;  %v3025_v47 = vsel %vm290_vm0, %v8224_v54, %v8209_v20 }
 0x85d   :  { %v3098_v17 = vrot.slane %v3026_v48, 4  ;;  %v3097_v49 = vrot.slane %v3025_v47, 4  ;;  %v11248_v47 = vld [vmem:[%s14021_s2 + $0x18] sm:$0xf] }
 0x85e   :  { %v11172_v34 = vpop.permute.xlu1 %8217 }
 0x85f   :  { %v8220_v50 = vunpack.i.h.bf16 %v11172_v34  ;;  %v8219_v9 = vunpack.i.l.bf16 %v11172_v34  ;;  %v11176_v13 = vpop.permute.xlu2 %8252 }
 0x860   :  { %v8254_v7 = vunpack.i.l.bf16 %v11176_v13 }
 0x861   :  { %v11178_v19 = vpop.permute.xlu0 %8212  ;;  %v3000_v1 = vsel %vm249_vm1, %v8219_v9, %v8220_v50 }
 0x862   :  { %v8215_v60 = vunpack.i.h.bf16 %v11178_v19  ;;  %v8214_v55 = vunpack.i.l.bf16 %v11178_v19  ;;  %v3128_v5 = vsel %vm410_vm4, %v3000_v1, %v3098_v17 }
 0x863   :  { %3205 = vmatpush.msrb.mxu2 %v3128_v5 }
 0x864   :  { %v2978_v36 = vsel %vm212_vm2, %v8214_v55, %v8215_v60  ;;  %v2977_v39 = vsel %vm212_vm2, %v8234_v14, %v8214_v55 }
 0x865   :  { %v3085_v52 = vrot.slane %v2978_v36, 4  ;;  %v3084_v43 = vrot.slane %v2977_v39, 4 }
 0x866   :  { %v3037_v33 = vpop.permute.xlu1 %3036 }
 0x867   :  { %v3046_v29 = vsel %vm327_vm3, %v3035_v2, %v3037_v33  ;;  %v3047_v35 = vsel %vm327_vm3, %v3037_v33, %v3039_v61  ;;  %v3122_v41 = vsel %vm410_vm4, %v11084_v56, %v3085_v52  ;;  %v11197_v46 = vpop.permute.xlu2 %8267  ;;  %v8244_v2 = vunpack.i.l.bf16 %v11162_v22 }
 0x868   :  { %3206 = vmatpush.msrb.mxu2 %v3122_v41  ;;  %7422 = vmatpush.msk.msrb.mxu0 %vm410_vm4, %v3046_v29  ;;  %v3120_v61 = vsel %vm410_vm4, %v11072_v38, %v3083_v62  ;;  %v3121_v37 = vsel %vm410_vm4, %v11096_v18, %v3084_v43  ;;  %v8269_v55 = vunpack.i.l.bf16 %v11197_v46  ;;  %v3101_v22 = vrot.slane %v11150_v31, 4 }
 0x869   :  { %7424 = vmatpush.msk.msrb.mxu1 %vm410_vm4, %v3047_v35  ;;  %v11195_v42 = vpop.permute.xlu0 %8227  ;;  %v2910_v52 = vsel %vm104_vm7, %v8244_v2, %v8245_v57 }
 0x86a   :  { %v8230_v26 = vunpack.i.h.bf16 %v11195_v42  ;;  %v8229_v32 = vunpack.i.l.bf16 %v11195_v42  ;;  %v3059_v14 = vrot.slane %v2910_v52, 4 }
 0x86c   :  { %v2958_v17 = vsel %vm181_vm6, %v8229_v32, %v8230_v26 }
 0x86d   :  { %v3072_v29 = vrot.slane %v2958_v17, 4 }
 0x86e   :  { %v11199_v44 = vpop.permute.xlu1 %8257 }
 0x86f   :  { %v2943_v12 = vpop.permute.xlu2 %2942  ;;  %v8260_v20 = vunpack.i.h.bf16 %v11199_v44  ;;  %v8259_v48 = vunpack.i.l.bf16 %v11199_v44 }
 0x871   :  { %v8238_v4 = vpop.permute.xlu0 %8237  ;;  %v2883_v24 = vsel %vm62_vm8, %v8259_v48, %v8260_v20 }
 0x872   :  { %v8240_v58 = vunpack.i.h.bf16 %v8238_v4  ;;  %v8239_v30 = vunpack.i.l.bf16 %v8238_v4  ;;  %v3110_v39 = vsel %vm410_vm4, %v2883_v24, %v3059_v14 }
 0x874   :  { %v2998_v16 = vsel %vm249_vm1, %v8240_v58, %v8239_v30  ;;  %v2999_v51 = vsel %vm249_vm1, %v8239_v30, %v8219_v9  ;;  %v2957_v9 = vsel %vm181_vm6, %v8254_v7, %v8229_v32 }
 0x875   :  { %v3126_v25 = vsel %vm410_vm4, %v2998_v16, %v3096_v0  ;;  %v3127_v27 = vsel %vm410_vm4, %v2999_v51, %v3097_v49  ;;  %v3071_v33 = vrot.slane %v2957_v9, 4 }
 0x876   :  { %3165 = vmatpush.msrb.mxu0 %v3126_v25  ;;  %3185 = vmatpush.msrb.mxu1 %v3127_v27  ;;  %v11214_v59 = vpop.permute.xlu1 %8272 }
 0x877   :  { %v11250_v21 = vpop.permute.xlu2 %8292  ;;  %v8274_v30 = vunpack.i.l.bf16 %v11214_v59  ;;  %v8275_v19 = vunpack.i.h.bf16 %v11214_v59 }
 0x878   :  { %3166 = vmatpush.msrb.mxu0 %v3120_v61  ;;  %3186 = vmatpush.msrb.mxu1 %v3121_v37 }
 0x879   :  { %v11226_v1 = vpop.permute.xlu0 %8247  ;;  %v2882_v16 = vsel %vm62_vm8, %v8274_v30, %v8259_v48  ;;  %v2963_v48 = vsel %vm181_vm6, %v2943_v12, %v8254_v7 }
 0x87a   :  { %v8250_v5 = vunpack.i.h.bf16 %v11226_v1  ;;  %v8249_v36 = vunpack.i.l.bf16 %v11226_v1  ;;  %v2884_v1 = vsel %vm62_vm8, %v8260_v20, %v8275_v19 }
 0x87c   :  { %v2931_v35 = vsel %vm141_vm5, %v8269_v55, %v8249_v36  ;;  %v2932_v41 = vsel %vm141_vm5, %v8249_v36, %v8250_v5 }
 0x87d   :  { %v3115_v54 = vsel %vm410_vm4, %v2931_v35, %v3071_v33  ;;  %v3116_v63 = vsel %vm410_vm4, %v2932_v41, %v3072_v29 }
 0x87e   :  { %3187 = vmatpush.msrb.mxu1 %v3115_v54  ;;  %3207 = vmatpush.msrb.mxu2 %v3116_v63  ;;  %v11243_v3 = vpop.permute.xlu1 %8277  ;;  %v8270_v54 = vunpack.i.h.bf16 %v11197_v46  ;;  %v3286_v46 = vld.sshfl [vmem:[#allocation1 + $0x10] sm:$0xff pattern:$0x75316420] }
 0x87f   :  { %v8279_v4 = vunpack.i.l.bf16 %v11243_v3  ;;  %v8280_v44 = vunpack.i.h.bf16 %v11243_v3 }
 0x880   :  { %3208 = vmatpush.msrb.mxu2 %v3110_v39 }
 0x881   :  { %v11254_v58 = vpop.permute.xlu0 %8262  ;;  %7427 = vmatmul.msk.f32.vlgmr.msrb.gmra.mxu2 %vm440_vm9, %v11248_v47  ;;  %v3027_v43 = vsel %vm290_vm0, %v8210_v15, %v8279_v4 }
 0x882   :  { %v8264_v0 = vunpack.i.l.bf16 %v11254_v58  ;;  %v3099_v27 = vrot.slane %v3027_v43, 4  ;;  %v8265_v34 = vunpack.i.h.bf16 %v11254_v58  ;;  %v8295_v43 = vunpack.i.h.bf16 %v11250_v21 }
 0x884   :  { %v2909_v49 = vsel %vm104_vm7, %v8264_v0, %v8244_v2  ;;  %v11275_v2 = vpop.permute.xlu2 %3052 }
 0x885   :  { %v3058_v62 = vrot.slane %v2909_v49, 4 }
 0x886   :  { %v11268_v32 = vpop.permute.xlu1 %8287 }
 0x887   :  { %v8289_v51 = vunpack.i.l.bf16 %v11268_v32  ;;  %v3109_v25 = vsel %vm410_vm4, %v2882_v16, %v3058_v62  ;;  %v8294_v16 = vunpack.i.l.bf16 %v11250_v21 }
 0x888   :  { %3188 = vmatpush.msrb.mxu1 %v3109_v25 }
 0x889   :  { %v11277_v61 = vpop.permute.xlu0 %3042  ;;  %7425 = vmatmul.msk.f32.vlgmr.msrb.gmra.mxu1 %vm440_vm9, %v11248_v47  ;;  %v3001_v53 = vsel %vm249_vm1, %v8220_v50, %v8289_v51  ;;  %v3070_v50 = vrot.slane %v2963_v48, 4 }
 0x88a   :  { %v3049_v15 = vsel %vm327_vm3, %v11154_v11, %v11277_v61  ;;  %7432 = vmatpush.msk.msra.mxu1 %vm410_vm4, %v11275_v2  ;;  %v3129_v37 = vsel %vm410_vm4, %v3001_v53, %v3099_v27  ;;  %v8255_v11 = vunpack.i.h.bf16 %v11176_v13  ;;  %v2897_v27 = vsel %vm81_vm10, %v8294_v16, %v8295_v43  ;;  %v3289_v43 = vld.sshfl [vmem:[#allocation1 + $0x28] sm:$0xff pattern:$0x75316420]  ;;  %v3288_v16 = vld.sshfl [vmem:[#allocation1 + $0x20] sm:$0xff pattern:$0x75316420] }
 0x88b   :  { %7428 = vmatpush.msk.msrb.mxu3 %vm410_vm4, %v3049_v15  ;;  %v2914_v53 = vsel %vm104_vm7, %v2897_v27, %v8264_v0  ;;  %3719 = vst [vmem:[#allocation1 + $0x20] ss:$2 sm:$0xff] %v9681_v10 }
 0x88c   :  { %v2959_v7 = vsel %vm181_vm6, %v8230_v26, %v8255_v11  ;;  %v3057_v48 = vrot.slane %v2914_v53, 4 }
 0x88d   :  { %3225 = vmatpush.msrb.mxu3 %v3129_v37  ;;  %v3073_v26 = vrot.slane %v2959_v7, 4 }
 0x88e   :  { %v8298_v9 = vpop.permute.xlu1 %8297 }
 0x88f   :  { %v8300_v17 = vunpack.i.h.bf16 %v8298_v9  ;;  %v8299_v36 = vunpack.i.l.bf16 %v8298_v9  ;;  %v3028_v9 = vsel %vm290_vm0, %v8279_v4, %v8280_v44 }
 0x890   :  { %v3033_v0 = vsel %vm302_vm14, %v3028_v9, %v11150_v31  ;;  %v2908_v31 = vpop.permute.xlu2 %2907 }
 0x891   :  { %v8283_v52 = vpop.permute.xlu0 %8282  ;;  %v2919_v33 = vsel %vm14038_vm11, %v8299_v36, %v8300_v17  ;;  %vm14039_vm11 = vcmask 56320   ;;  %v8290_v17 = vunpack.i.h.bf16 %v11268_v32  ;;  %v3100_v7 = vrot.slane %v3033_v0, 4 }
 0x892   :  { %v8285_v29 = vunpack.i.h.bf16 %v8283_v52  ;;  %v8284_v35 = vunpack.i.l.bf16 %v8283_v52  ;;  %v2941_v41 = vsel %vm141_vm5, %v2919_v33, %v8269_v55  ;;  %v2911_v55 = vsel %vm104_vm7, %v8245_v57, %v8265_v34 }
 0x893   :  { %v3114_v24 = vsel %vm410_vm4, %v2941_v41, %v3070_v50  ;;  %v3060_v39 = vrot.slane %v2911_v55, 4  ;;  %v3002_v41 = vsel %vm249_vm1, %v8289_v51, %v8290_v17 }
 0x894   :  { %3167 = vmatpush.msrb.mxu0 %v3114_v24  ;;  %v2979_v12 = vsel %vm212_vm2, %v8215_v60, %v8284_v35  ;;  %v2985_v14 = vsel %vm14039_vm11, %v8285_v29, %v11158_v40  ;;  %v2933_v60 = vsel %vm141_vm5, %v8250_v5, %v8270_v54  ;;  %v2980_v3 = vsel %vm212_vm2, %v8284_v35, %v8285_v29 }
 0x895   :  { %v3086_v63 = vrot.slane %v2979_v12, 4  ;;  %v3088_v57 = vrot.slane %v2985_v14, 4  ;;  %v3117_v40 = vsel %vm410_vm4, %v2933_v60, %v3073_v26  ;;  %v3111_v5 = vsel %vm410_vm4, %v2884_v1, %v3060_v39 }
 0x896   :  { %v8308_v36 = vpop.permute.xlu1 %8307  ;;  %v3087_v55 = vrot.slane %v2980_v3, 4 }
 0x897   :  { %v3123_v42 = vsel %vm410_vm4, %v11087_v28, %v3086_v63  ;;  %v3125_v25 = vsel %vm410_vm4, %v11118_v8, %v3088_v57  ;;  %v8310_v33 = vunpack.i.h.bf16 %v8308_v36  ;;  %v8309_v4 = vunpack.i.l.bf16 %v8308_v36 }
 0x898   :  { %3226 = vmatpush.msrb.mxu3 %v3123_v42  ;;  %v3062_v42 = vrot.slane %v2908_v31, 4 }
 0x899   :  { %v3009_v49 = vpop.permute.xlu0 %3008  ;;  %v2961_v32 = vsel %vm181_vm6, %v8309_v4, %v8310_v33  ;;  %v2960_v51 = vsel %vm181_vm6, %v8255_v11, %v8309_v4 }
 0x89a   :  { %3227 = vmatpush.msrb.mxu3 %v3117_v40  ;;  %v3131_v62 = vsel %vm410_vm4, %v3009_v49, %v3101_v22  ;;  %v3075_v63 = vrot.slane %v2961_v32, 4  ;;  %v3074_v60 = vrot.slane %v2960_v51, 4  ;;  %v3285_v40 = vld.sshfl [vmem:[#allocation1 + $0x8] sm:$0xff pattern:$0x75316420] }
 0x89b   :  { %3265 = vmatpush.msra.mxu1 %v3131_v62  ;;  %v3284_v62 = vld.sshfl [vmem:[#allocation1] sm:$0xff pattern:$0x75316420] }
 0x89c   :  { %3228 = vmatpush.msrb.mxu3 %v3111_v5  ;;  %3715 = vst [vmem:[#allocation1] ss:$2 sm:$0xff] %v9662_v45 }
 0x89d   :  { %7429 = vmatmul.msk.f32.vlgmr.msrb.gmra.mxu3 %vm440_vm9, %v11248_v47  ;;  %3266 = vmatpush.msra.mxu1 %v3125_v25 }
 0x89e   :  { %v2881_v35 = vpop.permute.xlu1 %2880 }
 0x89f   :  { %v2885_v26 = vsel %vm62_vm8, %v8275_v19, %v2881_v35  ;;  %v3113_v58 = vsel %vm410_vm4, %v2881_v35, %v3062_v42  ;;  %v3135_v19 = vpop.permute.xlu2 %3134 }
 0x8a1   :  { %v8303_v20 = vpop.permute.xlu0 %8302 }
 0x8a2   :  { %v8305_v15 = vunpack.i.h.bf16 %v8303_v20  ;;  %v8304_v37 = vunpack.i.l.bf16 %v8303_v20 }
 0x8a4   :  { %v2866_v21 = vsel %vm37_vm13, %v8304_v37, %v8305_v15 }
 0x8a5   :  { %v2892_v50 = vsel %vm62_vm8, %v2866_v21, %v8274_v30  ;;  %v3011_v30 = vsel %vm265_vm15, %v3002_v41, %v3009_v49 }
 0x8a6   :  { %v3108_v52 = vsel %vm410_vm4, %v2892_v50, %v3057_v48  ;;  %v3130_v29 = vsel %vm410_vm4, %v3011_v30, %v3100_v7 }
 0x8a7   :  { %3168 = vmatpush.msrb.mxu0 %v3108_v52 }
 0x8a8   :  { %7423 = vmatmul.msk.f32.vlgmr.msrb.gmra.mxu0 %vm440_vm9, %v11248_v47 }
 0x8a9   :  { %v3045_v59 = vpop.permute.xlu0 %3044 }
 0x8aa   :  { %v3050_v24 = vsel %vm327_vm3, %v11277_v61, %v3045_v59  ;;  %v3124_v61 = vsel %vm410_vm4, %v11121_v23, %v3087_v55  ;;  %v7421_v55 = vld [vmem:[%s14022_s3 + $0x1c] sm:$0xf] }
 0x8ab   :  { %v3055_v12 = vsel %vm339_vm12, %v3050_v24, %v11275_v2  ;;  %v2912_v2 = vsel %vm104_vm7, %v8265_v34, %v2908_v31 }
 0x8ac   :  { %7430 = vmatpush.msk.msra.mxu0 %vm410_vm4, %v3055_v12  ;;  %v3061_v39 = vrot.slane %v2912_v2, 4 }
 0x8ae   :  { %3245 = vmatpush.msra.mxu0 %v3130_v29  ;;  %v3112_v34 = vsel %vm410_vm4, %v2885_v26, %v3061_v39 }
 0x8b0   :  { %3246 = vmatpush.msra.mxu0 %v3124_v61 }
 0x8b1   :  { %v2930_v14 = vpop.permute.xlu0 %2929 }
 0x8b2   :  { %v2934_v13 = vsel %vm141_vm5, %v8270_v54, %v2930_v14  ;;  %v3119_v11 = vsel %vm410_vm4, %v2930_v14, %v3075_v63  ;;  %v3287_v54 = vld.sshfl [vmem:[#allocation1 + $0x18] sm:$0xff pattern:$0x75316420] }
 0x8b3   :  { %3267 = vmatpush.msra.mxu1 %v3119_v11  ;;  %v3118_v22 = vsel %vm410_vm4, %v2934_v13, %v3074_v60  ;;  %3717 = vst [vmem:[#allocation1 + $0x10] ss:$2 sm:$0xff] %v9655_v6 }
 0x8b4   :  { %3247 = vmatpush.msra.mxu0 %v3118_v22 }
 0x8b5   :  { %3268 = vmatpush.msra.mxu1 %v3113_v58 }
 0x8b6   :  { %3248 = vmatpush.msra.mxu0 %v3112_v34  ;;  %7433 = vmatmul.msk.f32.vlgmr.msra.gmra.mxu1 %vm440_vm9, %v11248_v47 }
 0x8b7   :  { %7431 = vmatmul.msk.f32.vlgmr.msra.gmra.mxu0 %vm440_vm9, %v11248_v47 }
 0x904   :  { %v3210_v53 = vpop.f32.mrf.mxu2 }
 0x905   :  { %v3211_v15 = vadd.f32 %v3210_v53, %v3135_v19 }
 0x906   :  { %v3190_v57 = vpop.f32.mrf.mxu1 }
 0x907   :  { %v3191_v49 = vadd.f32 %v3190_v57, %v3135_v19  ;;  %v3275_v37 = vmax.f32 %v3211_v15, 0.0 }
 0x909   :  { %v3274_v1 = vmax.f32 %v3191_v49, 0.0  ;;  %v11406_v48 = vmul.f32 %v3286_v46, %v3275_v37 }
 0x90b   :  { %v11388_v5 = vmul.f32 %v3285_v40, %v3274_v1 }
 0x90d   :  { %3478 = vrot.lane.b32.xlu2 %v11388_v5, %s9267_s30  ;;  %v8341_v17 = vpack.i.bf16 %v11406_v48, %v11388_v5 }
 0x920   :  { %v3230_v36 = vpop.f32.mrf.mxu3 }
 0x921   :  { %v3231_v52 = vadd.f32 %v3230_v36, %v3135_v19 }
 0x923   :  { %v3276_v33 = vmax.f32 %v3231_v52, 0.0 }
 0x925   :  { %v3170_v47 = vpop.f32.mrf.mxu0  ;;  %v11421_v41 = vmul.f32 %v3287_v54, %v3276_v33 }
 0x926   :  { %v3171_v25 = vadd.f32 %v3170_v47, %v3135_v19 }
 0x927   :  { %v8401_v7 = vpack.i.bf16 %v11421_v41, %v11406_v48 }
 0x928   :  { %v3273_v27 = vmax.f32 %v3171_v25, 0.0 }
 0x92a   :  { %v11393_v44 = vmul.f32 %v3284_v62, %v3273_v27 }
 0x92c   :  { %3476 = vrot.lane.b32.xlu0 %v11393_v44, %s9267_s30  ;;  %v8326_v20 = vpack.i.bf16 %v11388_v5, %v11393_v44  ;;  %v8356_v30 = vpack.i.bf16 %v11421_v41, %v11393_v44 }
 0x92e   :  { %8327 = vrot.lane.b32.xlu1 %v8326_v20, %s9258_s0  ;;  %8322 = vrot.lane.b32.xlu2 %v8326_v20, %s9264_s27 }
 0x933   :  { %v3270_v21 = vpop.f32.mrf.mxu1 }
 0x934   :  { %8312 = vrot.lane.b32.xlu0 %v8326_v20, %s9268_s5  ;;  %v3271_v9 = vadd.f32 %v3270_v21, %v3135_v19  ;;  %v3250_v3 = vpop.f32.mrf.mxu0 }
 0x935   :  { %v3251_v4 = vadd.f32 %v3250_v3, %v3135_v19 }
 0x936   :  { %3472 = vrot.lane.b32.xlu1 %v11393_v44, %s9271_s8  ;;  %3494 = vrot.lane.b32.xlu2 %v11393_v44, %s9272_s9  ;;  %v3278_v50 = vmax.f32 %v3271_v9, 0.0 }
 0x937   :  { %v3277_v59 = vmax.f32 %v3251_v4, 0.0 }
 0x938   :  { %v11414_v0 = vmul.f32 %v3289_v43, %v3278_v50 }
 0x939   :  { %v11429_v24 = vmul.f32 %v3288_v16, %v3277_v59 }
 0x93b   :  { %v8361_v12 = vpack.i.bf16 %v11414_v0, %v11429_v24 }
 0x93c   :  { %8317 = vrot.lane.b32.xlu0 %v8326_v20, %s9260_s23 }
 0x93e   :  { %3424 = vrot.lane.b32.xlu1 %v11393_v44, %s9269_s6  ;;  %8342 = vrot.lane.b32.xlu2 %v8341_v17, %s9263_s26 }
 0x944   :  { %3450 = vrot.lane.b32.xlu0 %v11393_v44, %s9270_s7 }
 0x946   :  { %8337 = vrot.lane.b32.xlu1 %v8341_v17, %s9261_s24  ;;  %3486 = vrot.lane.b32.xlu2 %v11414_v0, %s9267_s30 }
 0x94c   :  { %8332 = vrot.lane.b32.xlu0 %v8341_v17, %s9265_s28 }
 0x94e   :  { %3384 = vrot.lane.b32.xlu1 %v11414_v0, %s9266_s29  ;;  %8357 = vrot.lane.b32.xlu2 %v8356_v30, %s9263_s26 }
 0x954   :  { %3480 = vrot.lane.b32.xlu0 %v11406_v48, %s9267_s30 }
 0x956   :  { %8347 = vrot.lane.b32.xlu1 %v8356_v30, %s9265_s28  ;;  %8362 = vrot.lane.b32.xlu2 %v8361_v12, %s9259_s22 }
 0x95c   :  { %8372 = vrot.lane.b32.xlu0 %v8361_v12, %s9265_s28 }
 0x95e   :  { %8352 = vrot.lane.b32.xlu1 %v8356_v30, %s9261_s24  ;;  %3484 = vrot.lane.b32.xlu2 %v11429_v24, %s9267_s30 }
 0x964   :  { %8377 = vrot.lane.b32.xlu0 %v8361_v12, %s9257_s21 }
 0x966   :  { %8367 = vrot.lane.b32.xlu1 %v8361_v12, %s9262_s25  ;;  %8382 = vrot.lane.b32.xlu2 %v8361_v12, %s9261_s24 }
 0x967   :  { %v3479_v31 = vpop.permute.xlu2 %3478 }
 0x96c   :  { %8387 = vrot.lane.b32.xlu0 %v8361_v12, %s9263_s26 }
 0x96e   :  { %3482 = vrot.lane.b32.xlu1 %v11421_v41, %s9267_s30  ;;  %8402 = vrot.lane.b32.xlu2 %v8401_v7, %s9264_s27 }
 0x974   :  { %8392 = vrot.lane.b32.xlu0 %v8401_v7, %s9268_s5 }
 0x976   :  { %8397 = vrot.lane.b32.xlu1 %v8401_v7, %s9260_s23  ;;  %3349 = vrot.lane.b32.xlu2 %v11429_v24, %s9260_s23 }
 0x97c   :  { %8407 = vrot.lane.b32.xlu0 %v8361_v12, %s9268_s5 }
 0x97e   :  { %8412 = vrot.lane.b32.xlu1 %v8401_v7, %s9258_s0  ;;  %3576 = vperm.xlu2 %7680, %v7421_v55  }
 0x984   :  { %3371 = vrot.lane.b32.xlu0 %v11429_v24, %s9264_s27 }
 0x986   :  { %3322 = vrot.lane.b32.xlu1 %v11429_v24, %s9258_s0 }
 0x988   :  { %v11463_v29 = vpop.permute.xlu2 %8322 }
 0x989   :  { %v8325_v17 = vunpack.i.h.bf16 %v11463_v29  ;;  %v8324_v36 = vunpack.i.l.bf16 %v11463_v29 }
 0x990   :  { %v11465_v32 = vpop.permute.xlu2 %3494 }
 0x998   :  { %v11467_v51 = vpop.permute.xlu2 %8342 }
 0x999   :  { %v8345_v43 = vunpack.i.h.bf16 %v11467_v51  ;;  %v8344_v16 = vunpack.i.l.bf16 %v11467_v51 }
 0x99b   :  { %v3441_v52 = vsel %vm249_vm1, %v8344_v16, %v8345_v43 }
 0x99e   :  { %v3477_v35 = vpop.permute.xlu0 %3476 }
 0x99f   :  { %v3488_v61 = vsel %vm327_vm3, %v3477_v35, %v3479_v31 }
 0x9a0   :  { %v11470_v2 = vpop.permute.xlu1 %8327  ;;  %v11472_v63 = vpop.permute.xlu2 %3486  ;;  %7434 = vmatpush.msk.msra.mxu2 %vm410_vm4, %v3488_v61 }
 0x9a1   :  { %v8330_v12 = vunpack.i.h.bf16 %v11470_v2  ;;  %v8329_v7 = vunpack.i.l.bf16 %v11470_v2 }
 0x9a6   :  { %v11475_v14 = vpop.permute.xlu0 %8312 }
 0x9a7   :  { %v8315_v40 = vunpack.i.h.bf16 %v11475_v14  ;;  %v8314_v62 = vunpack.i.l.bf16 %v11475_v14 }
 0x9a8   :  { %v11477_v60 = vpop.permute.xlu1 %3472  ;;  %v11479_v42 = vpop.permute.xlu2 %8357 }
 0x9a9   :  { %v3399_v15 = vsel %vm181_vm6, %v8314_v62, %v8315_v40  ;;  %v8359_v33 = vunpack.i.l.bf16 %v11479_v42 }
 0x9aa   :  { %v3513_v30 = vrot.slane %v3399_v15, 4 }
 0x9ab   :  { %v3440_v15 = vsel %vm249_vm1, %v8359_v33, %v8344_v16  ;;  %v3543_v16 = vrot.slane %v11477_v60, 4 }
 0x9ae   :  { %v11481_v26 = vpop.permute.xlu0 %8317 }
 0x9af   :  { %v8320_v47 = vunpack.i.h.bf16 %v11481_v26  ;;  %v8319_v25 = vunpack.i.l.bf16 %v11481_v26 }
 0x9b0   :  { %v3425_v13 = vpop.permute.xlu1 %3424  ;;  %v11483_v11 = vpop.permute.xlu2 %8362 }
 0x9b1   :  { %v3351_v3 = vsel %vm104_vm7, %v8319_v25, %v8320_v47 }
 0x9b2   :  { %v3500_v61 = vrot.slane %v3351_v3, 4 }
 0x9b6   :  { %v11485_v39 = vpop.permute.xlu0 %3450 }
 0x9b8   :  { %v11487_v22 = vpop.permute.xlu1 %8337  ;;  %v11489_v58 = vpop.permute.xlu2 %3484 }
 0x9b9   :  { %v8340_v19 = vunpack.i.h.bf16 %v11487_v22  ;;  %v8339_v57 = vunpack.i.l.bf16 %v11487_v22 }
 0x9bb   :  { %v3419_v27 = vsel %vm212_vm2, %v8339_v57, %v8340_v19 }
 0x9bc   :  { %v3526_v9 = vrot.slane %v3419_v27, 4 }
 0x9be   :  { %v11491_v34 = vpop.permute.xlu0 %8332 }
 0x9bf   :  { %v8335_v46 = vunpack.i.h.bf16 %v11491_v34  ;;  %v8334_v54 = vunpack.i.l.bf16 %v11491_v34 }
 0x9c0   :  { %v11497_v49 = vpop.permute.xlu1 %3384  ;;  %v11518_v37 = vpop.permute.xlu2 %8382 }
 0x9c1   :  { %v3467_v1 = vsel %vm290_vm0, %v8334_v54, %v8335_v46  ;;  %v8385_v55 = vunpack.i.h.bf16 %v11518_v37 }
 0x9c2   :  { %v3539_v20 = vrot.slane %v3467_v1, 4  ;;  %v3373_v1 = vsel %vm141_vm5, %v8324_v36, %v8325_v17 }
 0x9c4   :  { %v3569_v59 = vsel %vm410_vm4, %v3441_v52, %v3539_v20  ;;  %v3557_v20 = vsel %vm410_vm4, %v3373_v1, %v3513_v30 }
 0x9c6   :  { %v11511_v53 = vpop.permute.xlu0 %3480 }
 0x9c7   :  { %v3489_v21 = vsel %vm327_vm3, %v3479_v31, %v11511_v53  ;;  %v3563_v31 = vsel %vm410_vm4, %v11388_v5, %v3526_v9  ;;  %v3324_v5 = vsel %vm62_vm8, %v8329_v7, %v8330_v12  ;;  %v3427_v9 = vsel %vm14039_vm11, %v8385_v55, %v3425_v13 }
 0x9c8   :  { %v11524_v50 = vpop.permute.xlu1 %8347  ;;  %7436 = vmatpush.msk.msra.mxu3 %vm410_vm4, %v3489_v21  ;;  %v3551_v3 = vsel %vm410_vm4, %v3324_v5, %v3500_v61  ;;  %v3573_v13 = vsel %vm410_vm4, %v11485_v39, %v3543_v16  ;;  %v8384_v16 = vunpack.i.l.bf16 %v11518_v37  ;;  %vm14040_vm11 = vcmask 72704  }
 0x9c9   :  { %v8349_v4 = vunpack.i.l.bf16 %v11524_v50  ;;  %v8350_v5 = vunpack.i.h.bf16 %v11524_v50 }
 0x9ca   :  { %3627 = vmatpush.msra.mxu3 %v3569_v59  ;;  %v8364_v59 = vunpack.i.l.bf16 %v11483_v11 }
 0x9cb   :  { %v3466_v35 = vsel %vm290_vm0, %v8349_v4, %v8334_v54  ;;  %v11558_v54 = vld [vmem:[%s14021_s2 + $0x1c] sm:$0xf]  ;;  %v8365_v4 = vunpack.i.h.bf16 %v11483_v11 }
 0x9cc   :  { %3628 = vmatpush.msra.mxu3 %v3563_v31  ;;  %v3538_v27 = vrot.slane %v3466_v35, 4  ;;  %v3530_v31 = vrot.slane %v3427_v9, 4 }
 0x9cd   :  { %v3339_v1 = vsel %vm81_vm10, %v8364_v59, %v8365_v4 }
 0x9ce   :  { %v8373_v21 = vpop.permute.xlu0 %8372  ;;  %3629 = vmatpush.msra.mxu3 %v3557_v20  ;;  %v3568_v52 = vsel %vm410_vm4, %v3440_v15, %v3538_v27  ;;  %v3567_v11 = vsel %vm410_vm4, %v11414_v0, %v3530_v31  ;;  %v3492_v31 = vsel %vm327_vm3, %v11489_v58, %v11472_v63 }
 0x9cf   :  { %3607 = vmatpush.msra.mxu2 %v3568_v52  ;;  %v8375_v27 = vunpack.i.h.bf16 %v8373_v21  ;;  %v8374_v20 = vunpack.i.l.bf16 %v8373_v21  ;;  %v3356_v21 = vsel %vm104_vm7, %v3339_v1, %v8319_v25 }
 0x9d0   :  { %v8353_v33 = vpop.permute.xlu1 %8352  ;;  %3630 = vmatpush.msra.mxu3 %v3551_v3 }
 0x9d1   :  { %v8354_v30 = vunpack.i.l.bf16 %v8353_v33  ;;  %7437 = vmatmul.msk.f32.vlgmr.msra.gmra.mxu3 %vm440_vm9, %v11558_v54  ;;  %v8355_v4 = vunpack.i.h.bf16 %v8353_v33  ;;  %v3499_v33 = vrot.slane %v3356_v21, 4  ;;  %v3469_v63 = vsel %vm290_vm0, %v8350_v5, %v8374_v20 }
 0x9d2   :  { %7444 = vmatpush.msk.msrb.mxu3 %vm410_vm4, %v11465_v32 }
 0x9d3   :  { %v3418_v35 = vsel %vm212_vm2, %v8354_v30, %v8339_v57  ;;  %v3405_v57 = vsel %vm181_vm6, %v11497_v49, %v8314_v62  ;;  %v3470_v30 = vsel %vm290_vm0, %v8374_v20, %v8375_v27  ;;  %v3468_v62 = vsel %vm290_vm0, %v8335_v46, %v8350_v5 }
 0x9d4   :  { %3707 = vmatpush.msrb.mxu3 %v3573_v13  ;;  %v3525_v61 = vrot.slane %v3418_v35, 4  ;;  %v3512_v13 = vrot.slane %v3405_v57, 4  ;;  %v3422_v35 = vsel %vm212_vm2, %v8384_v16, %v8385_v55  ;;  %v3475_v1 = vsel %vm302_vm14, %v3470_v30, %v11477_v60 }
 0x9d5   :  { %v3420_v34 = vsel %vm212_vm2, %v8340_v19, %v8355_v4  ;;  %v8360_v46 = vunpack.i.h.bf16 %v11479_v42  ;;  %v3421_v20 = vsel %vm212_vm2, %v8355_v4, %v8384_v16  ;;  %v3541_v60 = vrot.slane %v3469_v63, 4  ;;  %v8403_v4 = vpop.permute.xlu2 %8402 }
 0x9d6   :  { %3708 = vmatpush.msrb.mxu3 %v3567_v11  ;;  %v8378_v15 = vpop.permute.xlu0 %8377  ;;  %v3562_v52 = vsel %vm410_vm4, %v11393_v44, %v3525_v61  ;;  %v3542_v22 = vrot.slane %v3475_v1, 4  ;;  %v3527_v5 = vrot.slane %v3420_v34, 4  ;;  %v3529_v19 = vrot.slane %v3422_v35, 4 }
 0x9d7   :  { %v8380_v9 = vunpack.i.h.bf16 %v8378_v15  ;;  %v8379_v3 = vunpack.i.l.bf16 %v8378_v15  ;;  %3608 = vmatpush.msra.mxu2 %v3562_v52  ;;  %v3442_v57 = vsel %vm249_vm1, %v8345_v43, %v8360_v46  ;;  %v3528_v16 = vrot.slane %v3421_v20, 4 }
 0x9d8   :  { %v8368_v0 = vpop.permute.xlu1 %8367  ;;  %v3564_v51 = vsel %vm410_vm4, %v11406_v48, %v3527_v5  ;;  %v3566_v43 = vsel %vm410_vm4, %v11429_v24, %v3529_v19 }
 0x9d9   :  { %v8370_v59 = vunpack.i.h.bf16 %v8368_v0  ;;  %v8369_v44 = vunpack.i.l.bf16 %v8368_v0  ;;  %v3308_v50 = vsel %vm37_vm13, %v8379_v3, %v8380_v9 }
 0x9da   :  { %v3334_v37 = vsel %vm62_vm8, %v3308_v50, %v8329_v7  ;;  %v3540_v7 = vrot.slane %v3468_v62, 4  ;;  %v8404_v50 = vunpack.i.l.bf16 %v8403_v4 }
 0x9db   :  { %v3361_v49 = vsel %vm14040_vm11, %v8369_v44, %v8370_v59  ;;  %v3550_v15 = vsel %vm410_vm4, %v3334_v37, %v3499_v33  ;;  %v8405_v44 = vunpack.i.h.bf16 %v8403_v4  ;;  %v3725_v4 = vld.sshfl [vmem:[#allocation1 + $0x28] sm:$0xff pattern:$0x75316420] }
 0x9dc   :  { %v3383_v25 = vsel %vm141_vm5, %v3361_v49, %v8324_v36  ;;  %v3497_v36 = vsel %vm339_vm12, %v3492_v31, %v11465_v32  ;;  %v3570_v0 = vsel %vm410_vm4, %v3442_v57, %v3540_v7 }
 0x9dd   :  { %v3556_v61 = vsel %vm410_vm4, %v3383_v25, %v3512_v13  ;;  %v3375_v33 = vsel %vm141_vm5, %v8404_v50, %v8405_v44  ;;  %v3350_v26 = vpop.permute.xlu2 %3349 }
 0x9de   :  { %v8388_v11 = vpop.permute.xlu0 %8387  ;;  %3609 = vmatpush.msra.mxu2 %v3556_v61 }
 0x9df   :  { %v8390_v55 = vunpack.i.h.bf16 %v8388_v11  ;;  %v8389_v27 = vunpack.i.l.bf16 %v8388_v11 }
 0x9e0   :  { %v3483_v52 = vpop.permute.xlu1 %3482  ;;  %3610 = vmatpush.msra.mxu2 %v3550_v15 }
 0x9e1   :  { %v3490_v42 = vsel %vm327_vm3, %v11511_v53, %v3483_v52  ;;  %v3491_v9 = vsel %vm327_vm3, %v3483_v52, %v11489_v58  ;;  %7435 = vmatmul.msk.f32.vlgmr.msra.gmra.mxu2 %vm440_vm9, %v11558_v54  ;;  %v3443_v32 = vsel %vm249_vm1, %v8360_v46, %v8389_v27  ;;  %v3444_v3 = vsel %vm249_vm1, %v8389_v27, %v8390_v55 }
 0x9e2   :  { %7442 = vmatpush.msk.msrb.mxu2 %vm410_vm4, %v3497_v36  ;;  %7438 = vmatpush.msk.msrb.mxu0 %vm410_vm4, %v3490_v42  ;;  %v3571_v53 = vsel %vm410_vm4, %v3443_v32, %v3541_v60  ;;  %v3453_v58 = vsel %vm265_vm15, %v3444_v3, %v11485_v39  ;;  %v3565_v39 = vsel %vm410_vm4, %v11421_v41, %v3528_v16  ;;  %v3720_v16 = vld.sshfl [vmem:[#allocation1] sm:$0xff pattern:$0x75316420] }
 0x9e3   :  { %7440 = vmatpush.msk.msrb.mxu1 %vm410_vm4, %v3491_v9  ;;  %v3572_v21 = vsel %vm410_vm4, %v3453_v58, %v3542_v22  ;;  %v3374_v41 = vsel %vm141_vm5, %v8325_v17, %v8404_v50  ;;  %v3721_v58 = vld.sshfl [vmem:[#allocation1 + $0x8] sm:$0xff pattern:$0x75316420] }
 0x9e4   :  { %3647 = vmatpush.msrb.mxu0 %v3570_v0  ;;  %3687 = vmatpush.msrb.mxu2 %v3572_v21  ;;  %4171 = vst [vmem:[#allocation1] ss:$2 sm:$0xff] %v9662_v45  ;;  %v3722_v0 = vld.sshfl [vmem:[#allocation1 + $0x10] sm:$0xff pattern:$0x75316420] }
 0x9e5   :  { %3667 = vmatpush.msrb.mxu1 %v3571_v53  ;;  %v3723_v21 = vld.sshfl [vmem:[#allocation1 + $0x18] sm:$0xff pattern:$0x75316420] }
 0x9e6   :  { %v8393_v59 = vpop.permute.xlu0 %8392  ;;  %3648 = vmatpush.msrb.mxu0 %v3564_v51  ;;  %3688 = vmatpush.msrb.mxu2 %v3566_v43  ;;  %4173 = vst [vmem:[#allocation1 + $0x10] ss:$2 sm:$0xff] %v9655_v6  ;;  %v3724_v51 = vld.sshfl [vmem:[#allocation1 + $0x20] sm:$0xff pattern:$0x75316420]  ;;  %v3577_v43 = vpop.permute.xlu2 %3576 }
 0x9e7   :  { %v8395_v30 = vunpack.i.h.bf16 %v8393_v59  ;;  %v8394_v31 = vunpack.i.l.bf16 %v8393_v59  ;;  %3668 = vmatpush.msrb.mxu1 %v3565_v39  ;;  %4175 = vst [vmem:[#allocation1 + $0x20] ss:$2 sm:$0xff] %v9681_v10 }
 0x9e8   :  { %v8398_v13 = vpop.permute.xlu1 %8397 }
 0x9e9   :  { %v3400_v49 = vsel %vm181_vm6, %v8315_v40, %v8394_v31  ;;  %v3401_v48 = vsel %vm181_vm6, %v8394_v31, %v8395_v30  ;;  %v8400_v25 = vunpack.i.h.bf16 %v8398_v13  ;;  %v8399_v37 = vunpack.i.l.bf16 %v8398_v13 }
 0x9ea   :  { %v3514_v62 = vrot.slane %v3400_v49, 4  ;;  %v3515_v24 = vrot.slane %v3401_v48, 4 }
 0x9eb   :  { %v3352_v1 = vsel %vm104_vm7, %v8320_v47, %v8399_v37  ;;  %v3353_v34 = vsel %vm104_vm7, %v8399_v37, %v8400_v25  ;;  %v3354_v60 = vsel %vm104_vm7, %v8400_v25, %v3350_v26 }
 0x9ec   :  { %v3558_v35 = vsel %vm410_vm4, %v3374_v41, %v3514_v62  ;;  %v3559_v61 = vsel %vm410_vm4, %v3375_v33, %v3515_v24  ;;  %v3501_v11 = vrot.slane %v3352_v1, 4  ;;  %v3502_v36 = vrot.slane %v3353_v34, 4 }
 0x9ed   :  { %3649 = vmatpush.msrb.mxu0 %v3558_v35  ;;  %3669 = vmatpush.msrb.mxu1 %v3559_v61  ;;  %v3503_v32 = vrot.slane %v3354_v60, 4 }
 0x9ee   :  { %v8408_v14 = vpop.permute.xlu0 %8407 }
 0x9ef   :  { %v8410_v40 = vunpack.i.h.bf16 %v8408_v14  ;;  %v8409_v63 = vunpack.i.l.bf16 %v8408_v14 }
 0x9f0   :  { %v8413_v29 = vpop.permute.xlu1 %8412 }
 0x9f1   :  { %v8415_v46 = vunpack.i.h.bf16 %v8413_v29  ;;  %v8414_v17 = vunpack.i.l.bf16 %v8413_v29  ;;  %v3403_v7 = vsel %vm181_vm6, %v8409_v63, %v8410_v40  ;;  %v3402_v15 = vsel %vm181_vm6, %v8395_v30, %v8409_v63 }
 0x9f2   :  { %v3517_v52 = vrot.slane %v3403_v7, 4  ;;  %v3516_v2 = vrot.slane %v3402_v15, 4 }
 0x9f3   :  { %v3325_v55 = vsel %vm62_vm8, %v8330_v12, %v8414_v17  ;;  %v3326_v27 = vsel %vm62_vm8, %v8414_v17, %v8415_v46  ;;  %v3504_v12 = vrot.slane %v3350_v26, 4 }
 0x9f4   :  { %v3552_v47 = vsel %vm410_vm4, %v3325_v55, %v3501_v11  ;;  %v3553_v20 = vsel %vm410_vm4, %v3326_v27, %v3502_v36 }
 0x9f5   :  { %3650 = vmatpush.msrb.mxu0 %v3552_v47  ;;  %3670 = vmatpush.msrb.mxu1 %v3553_v20 }
 0x9f6   :  { %v3372_v22 = vpop.permute.xlu0 %3371  ;;  %7439 = vmatmul.msk.f32.vlgmr.msrb.gmra.mxu0 %vm440_vm9, %v11558_v54  ;;  %7441 = vmatmul.msk.f32.vlgmr.msrb.gmra.mxu1 %vm440_vm9, %v11558_v54 }
 0x9f7   :  { %v3376_v5 = vsel %vm141_vm5, %v8405_v44, %v3372_v22  ;;  %v3561_v19 = vsel %vm410_vm4, %v3372_v22, %v3517_v52 }
 0x9f8   :  { %v3323_v42 = vpop.permute.xlu1 %3322  ;;  %3709 = vmatpush.msrb.mxu3 %v3561_v19  ;;  %v3560_v9 = vsel %vm410_vm4, %v3376_v5, %v3516_v2 }
 0x9f9   :  { %v3327_v3 = vsel %vm62_vm8, %v8415_v46, %v3323_v42  ;;  %3689 = vmatpush.msrb.mxu2 %v3560_v9  ;;  %v3555_v57 = vsel %vm410_vm4, %v3323_v42, %v3504_v12 }
 0x9fa   :  { %3710 = vmatpush.msrb.mxu3 %v3555_v57  ;;  %v3554_v53 = vsel %vm410_vm4, %v3327_v3, %v3503_v32 }
 0x9fb   :  { %3690 = vmatpush.msrb.mxu2 %v3554_v53  ;;  %7445 = vmatmul.msk.f32.vlgmr.msrb.gmra.mxu3 %vm440_vm9, %v11558_v54 }
 0x9fc   :  { %7443 = vmatmul.msk.f32.vlgmr.msrb.gmra.mxu2 %vm440_vm9, %v11558_v54 }
 0xa54   :  { %v3632_v59 = vpop.f32.mrf.mxu3 }
 0xa55   :  { %v3633_v31 = vadd.f32 %v3632_v59, %v3577_v43 }
 0xa57   :  { %v3733_v62 = vmul.f32 %v3721_v58, %v3633_v31 }
 0xa59   :  { %v11691_v25 = vadd.f32 %v3733_v62, %v11096_v18 }
 0xa73   :  { %v3652_v39 = vpop.f32.mrf.mxu0  ;;  %v3672_v44 = vpop.f32.mrf.mxu1 }
 0xa74   :  { %v3653_v50 = vadd.f32 %v3652_v39, %v3577_v43  ;;  %v3673_v30 = vadd.f32 %v3672_v44, %v3577_v43 }
 0xa76   :  { %v3734_v54 = vmul.f32 %v3722_v0, %v3653_v50  ;;  %v3735_v13 = vmul.f32 %v3723_v21, %v3673_v30 }
 0xa78   :  { %v11678_v49 = vadd.f32 %v3734_v54, %v11084_v56  ;;  %v11681_v48 = vadd.f32 %v3735_v13, %v11087_v28  ;;  %v3612_v28 = vpop.f32.mrf.mxu2 }
 0xa79   :  { %v3613_v37 = vadd.f32 %v3612_v28, %v3577_v43 }
 0xa7a   :  { %3932 = vrot.lane.b32.xlu2 %v11681_v48, %s9267_s30  ;;  %3930 = vrot.lane.b32.xlu1 %v11678_v49, %s9267_s30  ;;  %v8416_v24 = vpack.i.bf16 %v11681_v48, %v11678_v49  ;;  %v8436_v56 = vpack.i.bf16 %v11678_v49, %v11691_v25 }
 0xa7b   :  { %v3732_v41 = vmul.f32 %v3720_v16, %v3613_v37 }
 0xa7c   :  { %8417 = vrot.lane.b32.xlu0 %v8416_v24, %s9265_s28 }
 0xa7d   :  { %v11702_v18 = vadd.f32 %v3732_v41, %v11072_v38 }
 0xa7e   :  { %v3712_v35 = vpop.f32.mrf.mxu3 }
 0xa7f   :  { %v8451_v33 = vpack.i.bf16 %v11702_v18, %v11691_v25  ;;  %v8466_v61 = vpack.i.bf16 %v11681_v48, %v11702_v18  ;;  %v3713_v14 = vadd.f32 %v3712_v35, %v3577_v43 }
 0xa80   :  { %v3692_v40 = vpop.f32.mrf.mxu2 }
 0xa81   :  { %v3737_v38 = vmul.f32 %v3725_v4, %v3713_v14  ;;  %v3693_v1 = vadd.f32 %v3692_v40, %v3577_v43  ;;  %v11828_v40 = vld [vmem:[%s14021_s2 + $0x20] sm:$0xf] }
 0xa82   :  { %8427 = vrot.lane.b32.xlu1 %v8416_v24, %s9263_s26  ;;  %8437 = vrot.lane.b32.xlu2 %v8436_v56, %s9260_s23 }
 0xa83   :  { %v11717_v63 = vadd.f32 %v3737_v38, %v11118_v8  ;;  %v3736_v34 = vmul.f32 %v3724_v51, %v3693_v1 }
 0xa84   :  { %8422 = vrot.lane.b32.xlu0 %v8416_v24, %s9261_s24 }
 0xa85   :  { %v11727_v29 = vadd.f32 %v3736_v34, %v11121_v23  ;;  %v7448_v23 = vld [vmem:[%s14022_s3 + $0x20] sm:$0xf] }
 0xa87   :  { %v8486_v8 = vpack.i.bf16 %v11717_v63, %v11727_v29 }
 0xa8a   :  { %8447 = vrot.lane.b32.xlu2 %v8436_v56, %s9258_s0  ;;  %3928 = vrot.lane.b32.xlu1 %v11691_v25, %s9267_s30 }
 0xa8c   :  { %8432 = vrot.lane.b32.xlu0 %v8436_v56, %s9268_s5 }
 0xa92   :  { %8452 = vrot.lane.b32.xlu2 %v8451_v33, %s9265_s28  ;;  %3926 = vrot.lane.b32.xlu1 %v11702_v18, %s9267_s30 }
 0xa94   :  { %8442 = vrot.lane.b32.xlu0 %v8436_v56, %s9264_s27 }
 0xa9a   :  { %8457 = vrot.lane.b32.xlu2 %v8451_v33, %s9261_s24  ;;  %8467 = vrot.lane.b32.xlu1 %v8466_v61, %s9268_s5 }
 0xa9c   :  { %8462 = vrot.lane.b32.xlu0 %v8451_v33, %s9263_s26 }
 0xaa2   :  { %8472 = vrot.lane.b32.xlu2 %v8466_v61, %s9260_s23  ;;  %8477 = vrot.lane.b32.xlu1 %v8466_v61, %s9264_s27 }
 0xaa4   :  { %3834 = vrot.lane.b32.xlu0 %v11717_v63, %s9266_s29 }
 0xaaa   :  { %8482 = vrot.lane.b32.xlu2 %v8466_v61, %s9258_s0  ;;  %3874 = vrot.lane.b32.xlu1 %v11702_v18, %s9269_s6 }
 0xaac   :  { %3936 = vrot.lane.b32.xlu0 %v11717_v63, %s9267_s30 }
 0xab2   :  { %3922 = vrot.lane.b32.xlu2 %v11702_v18, %s9271_s8  ;;  %8487 = vrot.lane.b32.xlu1 %v8486_v8, %s9259_s22 }
 0xab4   :  { %8492 = vrot.lane.b32.xlu0 %v8486_v8, %s9262_s25 }
 0xaba   :  { %8497 = vrot.lane.b32.xlu2 %v8486_v8, %s9265_s28  ;;  %8502 = vrot.lane.b32.xlu1 %v8486_v8, %s9257_s21 }
 0xabc   :  { %3900 = vrot.lane.b32.xlu0 %v11702_v18, %s9270_s7 }
 0xac2   :  { %3944 = vrot.lane.b32.xlu2 %v11702_v18, %s9272_s9  ;;  %8512 = vrot.lane.b32.xlu1 %v8486_v8, %s9263_s26 }
 0xac4   :  { %3934 = vrot.lane.b32.xlu0 %v11727_v29, %s9267_s30 }
 0xaca   :  { %3799 = vrot.lane.b32.xlu2 %v11727_v29, %s9260_s23  ;;  %8517 = vrot.lane.b32.xlu1 %v8486_v8, %s9268_s5 }
 0xacc   :  { %8507 = vrot.lane.b32.xlu0 %v8486_v8, %s9261_s24 }
 0xad2   :  { %4026 = vperm.xlu2 %7680, %v7448_v23   ;;  %3772 = vrot.lane.b32.xlu1 %v11727_v29, %s9258_s0 }
 0xad4   :  { %v11755_v46 = vpop.permute.xlu2 %3932  ;;  %3821 = vrot.lane.b32.xlu0 %v11727_v29, %s9264_s27 }
 0xadc   :  { %v11759_v17 = vpop.permute.xlu2 %8437 }
 0xadd   :  { %v8440_v51 = vunpack.i.h.bf16 %v11759_v17  ;;  %v8439_v43 = vunpack.i.l.bf16 %v11759_v17 }
 0xadf   :  { %v3802_v24 = vsel %vm104_vm7, %v8439_v43, %v8440_v51 }
 0xae0   :  { %v3951_v38 = vrot.slane %v3802_v24, 4 }
 0xae4   :  { %v11761_v11 = vpop.permute.xlu2 %8447 }
 0xae5   :  { %v8450_v59 = vunpack.i.h.bf16 %v11761_v11  ;;  %v8449_v39 = vunpack.i.l.bf16 %v11761_v11 }
 0xae7   :  { %v3775_v37 = vsel %vm62_vm8, %v8449_v39, %v8450_v59 }
 0xae8   :  { %v4002_v8 = vsel %vm410_vm4, %v3775_v37, %v3951_v38 }
 0xaec   :  { %v3931_v36 = vpop.permute.xlu1 %3930  ;;  %v8453_v7 = vpop.permute.xlu2 %8452 }
 0xaed   :  { %v3940_v55 = vsel %vm327_vm3, %v3931_v36, %v11755_v46  ;;  %v8455_v56 = vunpack.i.h.bf16 %v8453_v7  ;;  %v8454_v41 = vunpack.i.l.bf16 %v8453_v7 }
 0xaee   :  { %v11765_v27 = vpop.permute.xlu0 %8417  ;;  %7454 = vmatpush.msk.msra.mxu2 %vm410_vm4, %v3940_v55 }
 0xaef   :  { %v8420_v15 = vunpack.i.h.bf16 %v11765_v27  ;;  %v8419_v26 = vunpack.i.l.bf16 %v11765_v27  ;;  %v3916_v23 = vsel %vm290_vm0, %v8455_v56, %v8454_v41 }
 0xaf1   :  { %v3918_v47 = vsel %vm290_vm0, %v8419_v26, %v8420_v15 }
 0xaf2   :  { %v3990_v12 = vrot.slane %v3918_v47, 4 }
 0xaf4   :  { %v11773_v20 = vpop.permute.xlu1 %8427  ;;  %v8458_v52 = vpop.permute.xlu2 %8457 }
 0xaf5   :  { %v8430_v60 = vunpack.i.h.bf16 %v11773_v20  ;;  %v8429_v22 = vunpack.i.l.bf16 %v11773_v20  ;;  %v8460_v33 = vunpack.i.h.bf16 %v8458_v52  ;;  %v8459_v35 = vunpack.i.l.bf16 %v8458_v52 }
 0xaf6   :  { %v11777_v2 = vpop.permute.xlu0 %8422 }
 0xaf7   :  { %v8425_v5 = vunpack.i.h.bf16 %v11777_v2  ;;  %v8424_v19 = vunpack.i.l.bf16 %v11777_v2  ;;  %v3892_v42 = vsel %vm249_vm1, %v8429_v22, %v8430_v60  ;;  %v3868_v7 = vsel %vm212_vm2, %v8460_v33, %v8459_v35 }
 0xaf8   :  { %v4020_v9 = vsel %vm410_vm4, %v3892_v42, %v3990_v12 }
 0xaf9   :  { %4097 = vmatpush.msra.mxu2 %v4020_v9  ;;  %v3870_v32 = vsel %vm212_vm2, %v8424_v19, %v8425_v5  ;;  %v3869_v55 = vsel %vm212_vm2, %v8459_v35, %v8424_v19  ;;  %v3988_v9 = vrot.slane %v3916_v23, 4 }
 0xafa   :  { %v3977_v3 = vrot.slane %v3870_v32, 4 }
 0xafc   :  { %v11790_v57 = vpop.permute.xlu2 %8472  ;;  %v3929_v53 = vpop.permute.xlu1 %3928  ;;  %v4014_v58 = vsel %vm410_vm4, %v11678_v49, %v3977_v3  ;;  %v3975_v3 = vrot.slane %v3868_v7, 4 }
 0xafd   :  { %v3939_v16 = vsel %vm327_vm3, %v3929_v53, %v3931_v36  ;;  %4098 = vmatpush.msra.mxu2 %v4014_v58  ;;  %v3917_v36 = vsel %vm290_vm0, %v8454_v41, %v8419_v26  ;;  %v8474_v58 = vunpack.i.l.bf16 %v11790_v57 }
 0xafe   :  { %7452 = vmatpush.msk.msra.mxu1 %vm410_vm4, %v3939_v16  ;;  %v11796_v0 = vpop.permute.xlu0 %8432  ;;  %v3989_v32 = vrot.slane %v3917_v36, 4 }
 0xaff   :  { %v8435_v21 = vunpack.i.h.bf16 %v11796_v0  ;;  %v8434_v4 = vunpack.i.l.bf16 %v11796_v0  ;;  %v3801_v41 = vsel %vm104_vm7, %v8474_v58, %v8439_v43 }
 0xb00   :  { %v3950_v38 = vrot.slane %v3801_v41, 4 }
 0xb01   :  { %v3850_v31 = vsel %vm181_vm6, %v8434_v4, %v8435_v21 }
 0xb02   :  { %v3964_v28 = vrot.slane %v3850_v31, 4 }
 0xb04   :  { %v11804_v44 = vpop.permute.xlu2 %8482  ;;  %v3927_v50 = vpop.permute.xlu1 %3926 }
 0xb05   :  { %v3938_v30 = vsel %vm327_vm3, %v3927_v50, %v3929_v53  ;;  %v3976_v53 = vrot.slane %v3869_v55, 4 }
 0xb06   :  { %7450 = vmatpush.msk.msra.mxu0 %vm410_vm4, %v3938_v30  ;;  %v11811_v54 = vpop.permute.xlu0 %8442  ;;  %v8484_v30 = vunpack.i.l.bf16 %v11804_v44 }
 0xb07   :  { %v8445_v13 = vunpack.i.h.bf16 %v11811_v54  ;;  %v8444_v62 = vunpack.i.l.bf16 %v11811_v54  ;;  %v4013_v37 = vsel %vm410_vm4, %v11691_v25, %v3976_v53 }
 0xb09   :  { %v3824_v61 = vsel %vm141_vm5, %v8444_v62, %v8445_v13 }
 0xb0a   :  { %v4008_v14 = vsel %vm410_vm4, %v3824_v61, %v3964_v28  ;;  %v4012_v28 = vsel %vm410_vm4, %v11702_v18, %v3975_v3 }
 0xb0b   :  { %4099 = vmatpush.msra.mxu2 %v4008_v14 }
 0xb0c   :  { %v11830_v1 = vpop.permute.xlu2 %3922  ;;  %v11832_v34 = vpop.permute.xlu1 %8467 }
 0xb0d   :  { %4100 = vmatpush.msra.mxu2 %v4002_v8  ;;  %v8469_v52 = vunpack.i.l.bf16 %v11832_v34  ;;  %v8470_v20 = vunpack.i.h.bf16 %v11832_v34 }
 0xb0e   :  { %v8463_v47 = vpop.permute.xlu0 %8462  ;;  %7455 = vmatmul.msk.f32.vlgmr.msra.gmra.mxu2 %vm440_vm9, %v11828_v40 }
 0xb0f   :  { %v8465_v12 = vunpack.i.h.bf16 %v8463_v47  ;;  %v8464_v42 = vunpack.i.l.bf16 %v8463_v47  ;;  %v3849_v31 = vsel %vm181_vm6, %v8469_v52, %v8434_v4  ;;  %v3774_v4 = vsel %vm62_vm8, %v8484_v30, %v8449_v39 }
 0xb10   :  { %v3963_v35 = vrot.slane %v3849_v31, 4  ;;  %v4001_v8 = vsel %vm410_vm4, %v3774_v4, %v3950_v38 }
 0xb11   :  { %v3890_v26 = vsel %vm249_vm1, %v8465_v12, %v8464_v42  ;;  %v3891_v19 = vsel %vm249_vm1, %v8464_v42, %v8429_v22 }
 0xb12   :  { %v4018_v16 = vsel %vm410_vm4, %v3890_v26, %v3988_v9  ;;  %v4019_v50 = vsel %vm410_vm4, %v3891_v19, %v3989_v32 }
 0xb13   :  { %4057 = vmatpush.msra.mxu0 %v4018_v16  ;;  %4077 = vmatpush.msra.mxu1 %v4019_v50 }
 0xb14   :  { %v8498_v24 = vpop.permute.xlu2 %8497  ;;  %v11851_v56 = vpop.permute.xlu1 %8477 }
 0xb15   :  { %v8479_v22 = vunpack.i.l.bf16 %v11851_v56  ;;  %4058 = vmatpush.msra.mxu0 %v4012_v28  ;;  %4078 = vmatpush.msra.mxu1 %v4013_v37  ;;  %v8500_v19 = vunpack.i.h.bf16 %v8498_v24  ;;  %v8499_v16 = vunpack.i.l.bf16 %v8498_v24 }
 0xb16   :  { %v3835_v33 = vpop.permute.xlu0 %3834 }
 0xb17   :  { %v3823_v61 = vsel %vm141_vm5, %v8479_v22, %v8444_v62  ;;  %v3855_v39 = vsel %vm181_vm6, %v3835_v33, %v8469_v52  ;;  %v3993_v52 = vrot.slane %v11830_v1, 4 }
 0xb18   :  { %v4007_v14 = vsel %vm410_vm4, %v3823_v61, %v3963_v35  ;;  %v3962_v9 = vrot.slane %v3855_v39, 4 }
 0xb19   :  { %4079 = vmatpush.msra.mxu1 %v4007_v14 }
 0xb1b   :  { %4080 = vmatpush.msra.mxu1 %v4001_v8 }
 0xb1c   :  { %v3945_v23 = vpop.permute.xlu2 %3944  ;;  %v11863_v36 = vpop.permute.xlu1 %3874  ;;  %7453 = vmatmul.msk.f32.vlgmr.msra.gmra.mxu1 %vm440_vm9, %v11828_v40 }
 0xb1d   :  { %7460 = vmatpush.msk.msrb.mxu1 %vm410_vm4, %v3945_v23 }
 0xb1e   :  { %v3937_v43 = vpop.permute.xlu0 %3936 }
 0xb24   :  { %v8488_v7 = vpop.permute.xlu1 %8487 }
 0xb25   :  { %v8490_v62 = vunpack.i.h.bf16 %v8488_v7  ;;  %v8489_v55 = vunpack.i.l.bf16 %v8488_v7 }
 0xb26   :  { %v8493_v47 = vpop.permute.xlu0 %8492 }
 0xb27   :  { %v8495_v12 = vunpack.i.h.bf16 %v8493_v47  ;;  %v8494_v42 = vunpack.i.l.bf16 %v8493_v47  ;;  %v3789_v32 = vsel %vm81_vm10, %v8489_v55, %v8490_v62 }
 0xb28   :  { %v3806_v31 = vsel %vm104_vm7, %v3789_v32, %v8474_v58  ;;  %v3919_v58 = vsel %vm290_vm0, %v8420_v15, %v8499_v16 }
 0xb29   :  { %v3811_v3 = vsel %vm14040_vm11, %v8494_v42, %v8495_v12  ;;  %v3949_v61 = vrot.slane %v3806_v31, 4  ;;  %v3991_v55 = vrot.slane %v3919_v58, 4  ;;  %vm14041_vm11 = vcmask 56320  }
 0xb2a   :  { %v3833_v53 = vsel %vm141_vm5, %v3811_v3, %v8479_v22  ;;  %v3920_v22 = vsel %vm290_vm0, %v8499_v16, %v8500_v19  ;;  %v8475_v3 = vunpack.i.h.bf16 %v11790_v57  ;;  %v8485_v19 = vunpack.i.h.bf16 %v11804_v44  ;;  %v3800_v57 = vpop.permute.xlu2 %3799 }
 0xb2b   :  { %v4006_v26 = vsel %vm410_vm4, %v3833_v53, %v3962_v9  ;;  %v3925_v14 = vsel %vm302_vm14, %v3920_v22, %v11830_v1  ;;  %v3851_v31 = vsel %vm181_vm6, %v8435_v21, %v8470_v20 }
 0xb2c   :  { %v8503_v50 = vpop.permute.xlu1 %8502  ;;  %4059 = vmatpush.msra.mxu0 %v4006_v26  ;;  %v3992_v39 = vrot.slane %v3925_v14, 4  ;;  %v3804_v54 = vsel %vm104_vm7, %v8475_v3, %v3800_v57 }
 0xb2d   :  { %v8505_v28 = vunpack.i.h.bf16 %v8503_v50  ;;  %v8504_v37 = vunpack.i.l.bf16 %v8503_v50 }
 0xb2e   :  { %v3901_v41 = vpop.permute.xlu0 %3900 }
 0xb2f   :  { %v4023_v33 = vsel %vm410_vm4, %v3901_v41, %v3993_v52  ;;  %v3758_v35 = vsel %vm37_vm13, %v8504_v37, %v8505_v28 }
 0xb30   :  { %4157 = vmatpush.msrb.mxu1 %v4023_v33  ;;  %v3784_v4 = vsel %vm62_vm8, %v3758_v35, %v8484_v30  ;;  %v3965_v33 = vrot.slane %v3851_v31, 4 }
 0xb31   :  { %v4000_v24 = vsel %vm410_vm4, %v3784_v4, %v3949_v61  ;;  %v3954_v4 = vrot.slane %v3800_v57, 4 }
 0xb32   :  { %4060 = vmatpush.msra.mxu0 %v4000_v24 }
 0xb33   :  { %7451 = vmatmul.msk.f32.vlgmr.msra.gmra.mxu0 %vm440_vm9, %v11828_v40 }
 0xb34   :  { %v8513_v38 = vpop.permute.xlu1 %8512 }
 0xb35   :  { %v8515_v8 = vunpack.i.h.bf16 %v8513_v38  ;;  %v8514_v7 = vunpack.i.l.bf16 %v8513_v38  ;;  %v3953_v38 = vrot.slane %v3804_v54, 4  ;;  %v7449_v54 = vld [vmem:[%s14022_s3 + $0x24] sm:$0xf] }
 0xb36   :  { %v3935_v62 = vpop.permute.xlu0 %3934 }
 0xb37   :  { %v3941_v30 = vsel %vm327_vm3, %v11755_v46, %v3935_v62  ;;  %v3942_v47 = vsel %vm327_vm3, %v3935_v62, %v3937_v43  ;;  %v3893_v27 = vsel %vm249_vm1, %v8430_v60, %v8514_v7  ;;  %v3894_v15 = vsel %vm249_vm1, %v8514_v7, %v8515_v8  ;;  %v4177_v62 = vld.sshfl [vmem:[#allocation1 + $0x8] sm:$0xff pattern:$0x75316420] }
 0xb38   :  { %7456 = vmatpush.msk.msra.mxu3 %vm410_vm4, %v3941_v30  ;;  %v3947_v1 = vsel %vm339_vm12, %v3942_v47, %v3945_v23  ;;  %v4021_v12 = vsel %vm410_vm4, %v3893_v27, %v3991_v55  ;;  %v3903_v42 = vsel %vm265_vm15, %v3894_v15, %v3901_v41  ;;  %v8480_v23 = vunpack.i.h.bf16 %v11851_v56  ;;  %v4176_v55 = vld.sshfl [vmem:[#allocation1] sm:$0xff pattern:$0x75316420] }
 0xb39   :  { %7458 = vmatpush.msk.msrb.mxu0 %vm410_vm4, %v3947_v1  ;;  %v4022_v46 = vsel %vm410_vm4, %v3903_v42, %v3992_v39  ;;  %4607 = vst [vmem:[#allocation1] ss:$2 sm:$0xff] %v9662_v45  ;;  %v4027_v39 = vpop.permute.xlu2 %4026  ;;  %v4181_v1 = vld.sshfl [vmem:[#allocation1 + $0x28] sm:$0xff pattern:$0x75316420] }
 0xb3a   :  { %4117 = vmatpush.msra.mxu3 %v4021_v12  ;;  %v3825_v2 = vsel %vm141_vm5, %v8445_v13, %v8480_v23  ;;  %v4180_v12 = vld.sshfl [vmem:[#allocation1 + $0x20] sm:$0xff pattern:$0x75316420]  ;;  %v4178_v42 = vld.sshfl [vmem:[#allocation1 + $0x10] sm:$0xff pattern:$0x75316420] }
 0xb3b   :  { %4137 = vmatpush.msrb.mxu0 %v4022_v46  ;;  %v4009_v35 = vsel %vm410_vm4, %v3825_v2, %v3965_v33  ;;  %4611 = vst [vmem:[#allocation1 + $0x20] ss:$2 sm:$0xff] %v9681_v10 }
 0xb3c   :  { %v8518_v43 = vpop.permute.xlu1 %8517 }
 0xb3d   :  { %v8520_v60 = vunpack.i.h.bf16 %v8518_v43  ;;  %v8519_v9 = vunpack.i.l.bf16 %v8518_v43 }
 0xb3e   :  { %v8508_v32 = vpop.permute.xlu0 %8507 }
 0xb3f   :  { %v8510_v53 = vunpack.i.h.bf16 %v8508_v32  ;;  %v8509_v26 = vunpack.i.l.bf16 %v8508_v32  ;;  %v3853_v37 = vsel %vm181_vm6, %v8519_v9, %v8520_v60  ;;  %v3852_v44 = vsel %vm181_vm6, %v8470_v20, %v8519_v9 }
 0xb40   :  { %v3967_v17 = vrot.slane %v3853_v37, 4  ;;  %v3966_v22 = vrot.slane %v3852_v44, 4 }
 0xb41   :  { %v3871_v16 = vsel %vm212_vm2, %v8425_v5, %v8509_v26  ;;  %v3872_v50 = vsel %vm212_vm2, %v8509_v26, %v8510_v53  ;;  %v3877_v34 = vsel %vm14041_vm11, %v8510_v53, %v11863_v36  ;;  %v3803_v5 = vsel %vm104_vm7, %v8440_v51, %v8475_v3 }
 0xb42   :  { %v3978_v52 = vrot.slane %v3871_v16, 4  ;;  %v3979_v56 = vrot.slane %v3872_v50, 4  ;;  %v3980_v28 = vrot.slane %v3877_v34, 4  ;;  %v3776_v51 = vsel %vm62_vm8, %v8450_v59, %v8485_v19 }
 0xb43   :  { %v3952_v61 = vrot.slane %v3803_v5, 4  ;;  %vm14042_vm11 = vcmask 72704  }
 0xb44   :  { %v3773_v36 = vpop.permute.xlu1 %3772  ;;  %v4015_v0 = vsel %vm410_vm4, %v11681_v48, %v3978_v52  ;;  %v4016_v21 = vsel %vm410_vm4, %v11727_v29, %v3979_v56  ;;  %v4017_v41 = vsel %vm410_vm4, %v11717_v63, %v3980_v28 }
 0xb45   :  { %4118 = vmatpush.msra.mxu3 %v4015_v0  ;;  %4138 = vmatpush.msrb.mxu0 %v4016_v21  ;;  %v3777_v24 = vsel %vm62_vm8, %v8485_v19, %v3773_v36  ;;  %v4003_v11 = vsel %vm410_vm4, %v3776_v51, %v3952_v61  ;;  %v4005_v8 = vsel %vm410_vm4, %v3773_v36, %v3954_v4 }
 0xb46   :  { %4158 = vmatpush.msrb.mxu1 %v4017_v41  ;;  %v3822_v13 = vpop.permute.xlu0 %3821  ;;  %v4004_v7 = vsel %vm410_vm4, %v3777_v24, %v3953_v38 }
 0xb47   :  { %v3826_v58 = vsel %vm141_vm5, %v8480_v23, %v3822_v13  ;;  %4119 = vmatpush.msra.mxu3 %v4009_v35  ;;  %v4011_v14 = vsel %vm410_vm4, %v3822_v13, %v3967_v17 }
 0xb48   :  { %4159 = vmatpush.msrb.mxu1 %v4011_v14  ;;  %v4010_v59 = vsel %vm410_vm4, %v3826_v58, %v3966_v22 }
 0xb49   :  { %4120 = vmatpush.msra.mxu3 %v4003_v11  ;;  %4139 = vmatpush.msrb.mxu0 %v4010_v59 }
 0xb4a   :  { %7457 = vmatmul.msk.f32.vlgmr.msra.gmra.mxu3 %vm440_vm9, %v11828_v40  ;;  %4160 = vmatpush.msrb.mxu1 %v4005_v8 }
 0xb4b   :  { %4140 = vmatpush.msrb.mxu0 %v4004_v7  ;;  %7461 = vmatmul.msk.f32.vlgmr.msrb.gmra.mxu1 %vm440_vm9, %v11828_v40 }
 0xb4c   :  { %7459 = vmatmul.msk.f32.vlgmr.msrb.gmra.mxu0 %vm440_vm9, %v11828_v40  ;;  %v4179_v40 = vld.sshfl [vmem:[#allocation1 + $0x18] sm:$0xff pattern:$0x75316420] }
 0xb4d   :  { %4609 = vst [vmem:[#allocation1 + $0x10] ss:$2 sm:$0xff] %v9655_v6 }
 0xb91   :  { %v4102_v20 = vpop.f32.mrf.mxu2 }
 0xb92   :  { %v4103_v9 = vadd.f32 %v4102_v20, %v4027_v39 }
 0xb94   :  { %v4167_v23 = vmax.f32 %v4103_v9, 0.0 }
 0xb96   :  { %v11960_v53 = vmul.f32 %v4178_v42, %v4167_v23 }
 0xb99   :  { %v4082_v30 = vpop.f32.mrf.mxu1 }
 0xb9a   :  { %v4083_v47 = vadd.f32 %v4082_v30, %v4027_v39 }
 0xb9c   :  { %v4166_v27 = vmax.f32 %v4083_v47, 0.0 }
 0xb9e   :  { %v11946_v15 = vmul.f32 %v4177_v62, %v4166_v27 }
 0xba0   :  { %4370 = vrot.lane.b32.xlu2 %v11946_v15, %s9267_s30  ;;  %v8546_v26 = vpack.i.bf16 %v11960_v53, %v11946_v15 }
 0xbb0   :  { %v4062_v46 = vpop.f32.mrf.mxu0 }
 0xbb1   :  { %v4063_v43 = vadd.f32 %v4062_v46, %v4027_v39 }
 0xbb3   :  { %v4165_v60 = vmax.f32 %v4063_v43, 0.0 }
 0xbb5   :  { %v11952_v32 = vmul.f32 %v4176_v55, %v4165_v60 }
 0xbb7   :  { %4368 = vrot.lane.b32.xlu0 %v11952_v32, %s9267_s30  ;;  %v8536_v3 = vpack.i.bf16 %v11946_v15, %v11952_v32 }
 0xbb9   :  { %8537 = vrot.lane.b32.xlu1 %v8536_v3, %s9258_s0  ;;  %8532 = vrot.lane.b32.xlu2 %v8536_v3, %s9264_s27 }
 0xbbf   :  { %8522 = vrot.lane.b32.xlu0 %v8536_v3, %s9268_s5 }
 0xbc1   :  { %8547 = vrot.lane.b32.xlu1 %v8546_v26, %s9261_s24  ;;  %4342 = vrot.lane.b32.xlu2 %v11952_v32, %s9270_s7 }
 0xbc7   :  { %8527 = vrot.lane.b32.xlu0 %v8536_v3, %s9260_s23 }
 0xbc8   :  { %v4162_v19 = vpop.f32.mrf.mxu1 }
 0xbc9   :  { %v4163_v16 = vadd.f32 %v4162_v19, %v4027_v39  ;;  %v4142_v50 = vpop.f32.mrf.mxu0  ;;  %8552 = vrot.lane.b32.xlu2 %v8546_v26, %s9263_s26 }
 0xbca   :  { %v4143_v31 = vadd.f32 %v4142_v50, %v4027_v39 }
 0xbcb   :  { %v4170_v34 = vmax.f32 %v4163_v16, 0.0 }
 0xbcc   :  { %v4169_v52 = vmax.f32 %v4143_v31, 0.0 }
 0xbcd   :  { %v11970_v57 = vmul.f32 %v4181_v1, %v4170_v34  ;;  %v4122_v2 = vpop.f32.mrf.mxu3 }
 0xbce   :  { %v11979_v28 = vmul.f32 %v4180_v12, %v4169_v52  ;;  %v4123_v5 = vadd.f32 %v4122_v2, %v4027_v39 }
 0xbcf   :  { %4364 = vrot.lane.b32.xlu0 %v11952_v32, %s9271_s8  ;;  %v8556_v56 = vpack.i.bf16 %v11970_v57, %v11952_v32 }
 0xbd0   :  { %v8566_v37 = vpack.i.bf16 %v11979_v28, %v11952_v32  ;;  %v4168_v44 = vmax.f32 %v4123_v5, 0.0  ;;  %v8571_v36 = vpack.i.bf16 %v11970_v57, %v11979_v28 }
 0xbd1   :  { %8557 = vrot.lane.b32.xlu1 %v8556_v56, %s9261_s24  ;;  %4378 = vrot.lane.b32.xlu2 %v11970_v57, %s9267_s30 }
 0xbd2   :  { %v11994_v0 = vmul.f32 %v4179_v40, %v4168_v44 }
 0xbd4   :  { %v8591_v21 = vpack.i.bf16 %v11994_v0, %v11970_v57  ;;  %v8611_v41 = vpack.i.bf16 %v11994_v0, %v11960_v53  ;;  %v8601_v33 = vpack.i.bf16 %v11979_v28, %v11994_v0 }
 0xbd7   :  { %4316 = vrot.lane.b32.xlu0 %v11952_v32, %s9269_s6 }
 0xbd9   :  { %4276 = vrot.lane.b32.xlu1 %v11970_v57, %s9266_s29  ;;  %8567 = vrot.lane.b32.xlu2 %v8566_v37, %s9263_s26 }
 0xbdf   :  { %4386 = vrot.lane.b32.xlu0 %v11952_v32, %s9272_s9 }
 0xbe1   :  { %8562 = vrot.lane.b32.xlu1 %v8566_v37, %s9265_s28  ;;  %8572 = vrot.lane.b32.xlu2 %v8571_v36, %s9259_s22 }
 0xbe7   :  { %8542 = vrot.lane.b32.xlu0 %v8546_v26, %s9265_s28 }
 0xbe9   :  { %8577 = vrot.lane.b32.xlu1 %v8571_v36, %s9262_s25  ;;  %8592 = vrot.lane.b32.xlu2 %v8591_v21, %s9265_s28 }
 0xbef   :  { %4372 = vrot.lane.b32.xlu0 %v11960_v53, %s9267_s30 }
 0xbf1   :  { %4376 = vrot.lane.b32.xlu1 %v11979_v28, %s9267_s30  ;;  %4374 = vrot.lane.b32.xlu2 %v11994_v0, %s9267_s30 }
 0xbf7   :  { %8582 = vrot.lane.b32.xlu0 %v8571_v36, %s9257_s21 }
 0xbf9   :  { %8597 = vrot.lane.b32.xlu1 %v8591_v21, %s9263_s26  ;;  %8612 = vrot.lane.b32.xlu2 %v8611_v41, %s9260_s23 }
 0xbfa   :  { %v4371_v17 = vpop.permute.xlu2 %4370 }
 0xbff   :  { %8587 = vrot.lane.b32.xlu0 %v8571_v36, %s9268_s5 }
 0xc01   :  { %8602 = vrot.lane.b32.xlu1 %v8601_v33, %s9261_s24  ;;  %4263 = vrot.lane.b32.xlu2 %v11979_v28, %s9264_s27 }
 0xc07   :  { %4241 = vrot.lane.b32.xlu0 %v11979_v28, %s9260_s23 }
 0xc09   :  { %8607 = vrot.lane.b32.xlu1 %v8611_v41, %s9268_s5  ;;  %4468 = vperm.xlu2 %7680, %v7449_v54  }
 0xc0f   :  { %8622 = vrot.lane.b32.xlu0 %v8611_v41, %s9258_s0 }
 0xc11   :  { %8617 = vrot.lane.b32.xlu1 %v8611_v41, %s9264_s27 }
 0xc13   :  { %v12028_v51 = vpop.permute.xlu2 %8532 }
 0xc14   :  { %v8534_v60 = vunpack.i.l.bf16 %v12028_v51  ;;  %v8535_v54 = vunpack.i.h.bf16 %v12028_v51 }
 0xc19   :  { %4214 = vrot.lane.b32.xlu1 %v11979_v28, %s9258_s0 }
 0xc1b   :  { %v12030_v13 = vpop.permute.xlu2 %4342 }
 0xc23   :  { %v12034_v22 = vpop.permute.xlu2 %8552 }
 0xc24   :  { %v8554_v9 = vunpack.i.l.bf16 %v12034_v22  ;;  %v8555_v21 = vunpack.i.h.bf16 %v12034_v22 }
 0xc29   :  { %v4369_v35 = vpop.permute.xlu0 %4368 }
 0xc2a   :  { %v4380_v61 = vsel %vm327_vm3, %v4369_v35, %v4371_v17 }
 0xc2b   :  { %7462 = vmatpush.msk.msrb.mxu2 %vm410_vm4, %v4380_v61  ;;  %v12036_v4 = vpop.permute.xlu1 %8537  ;;  %v12040_v58 = vpop.permute.xlu2 %4378 }
 0xc31   :  { %v12038_v24 = vpop.permute.xlu0 %8522 }
 0xc32   :  { %v8525_v3 = vunpack.i.h.bf16 %v12038_v24  ;;  %v8524_v19 = vunpack.i.l.bf16 %v12038_v24 }
 0xc33   :  { %v12044_v38 = vpop.permute.xlu1 %8547  ;;  %v12048_v59 = vpop.permute.xlu2 %8567 }
 0xc34   :  { %v8549_v1 = vunpack.i.l.bf16 %v12044_v38  ;;  %v8569_v12 = vunpack.i.l.bf16 %v12048_v59  ;;  %v8550_v23 = vunpack.i.h.bf16 %v12044_v38 }
 0xc36   :  { %v4332_v31 = vsel %vm249_vm1, %v8569_v12, %v8554_v9  ;;  %v4311_v33 = vsel %vm212_vm2, %v8549_v1, %v8550_v23 }
 0xc39   :  { %v12042_v14 = vpop.permute.xlu0 %8527 }
 0xc3a   :  { %v8530_v2 = vunpack.i.h.bf16 %v12042_v14  ;;  %v8529_v5 = vunpack.i.l.bf16 %v12042_v14 }
 0xc3b   :  { %v8573_v55 = vpop.permute.xlu2 %8572 }
 0xc3c   :  { %v8574_v12 = vunpack.i.l.bf16 %v8573_v55 }
 0xc41   :  { %v12046_v11 = vpop.permute.xlu0 %4364 }
 0xc43   :  { %v12050_v8 = vpop.permute.xlu1 %8557  ;;  %v12059_v27 = vpop.permute.xlu2 %8592 }
 0xc44   :  { %v8559_v47 = vunpack.i.l.bf16 %v12050_v8 }
 0xc46   :  { %v4310_v20 = vsel %vm212_vm2, %v8559_v47, %v8549_v1  ;;  %v8575_v47 = vunpack.i.h.bf16 %v8573_v55 }
 0xc47   :  { %v4417_v56 = vrot.slane %v4310_v20, 4 }
 0xc49   :  { %v12052_v7 = vpop.permute.xlu0 %4316 }
 0xc4b   :  { %v4277_v62 = vpop.permute.xlu1 %4276 }
 0xc4c   :  { %v4297_v44 = vsel %vm181_vm6, %v4277_v62, %v8524_v19  ;;  %v4291_v62 = vsel %vm181_vm6, %v8524_v19, %v8525_v3  ;;  %v8540_v19 = vunpack.i.h.bf16 %v12036_v4 }
 0xc51   :  { %v12054_v39 = vpop.permute.xlu0 %4386 }
 0xc53   :  { %v12056_v30 = vpop.permute.xlu1 %8562 }
 0xc54   :  { %v8564_v46 = vunpack.i.l.bf16 %v12056_v30  ;;  %v8565_v55 = vunpack.i.h.bf16 %v12056_v30  ;;  %v4231_v30 = vsel %vm81_vm10, %v8574_v12, %v8575_v47 }
 0xc59   :  { %v12063_v42 = vpop.permute.xlu0 %8542 }
 0xc5a   :  { %v8545_v40 = vunpack.i.h.bf16 %v12063_v42  ;;  %v8544_v43 = vunpack.i.l.bf16 %v12063_v42 }
 0xc5b   :  { %v8578_v26 = vpop.permute.xlu1 %8577 }
 0xc5c   :  { %v8580_v16 = vunpack.i.h.bf16 %v8578_v26  ;;  %v8579_v50 = vunpack.i.l.bf16 %v8578_v26  ;;  %v4358_v34 = vsel %vm290_vm0, %v8564_v46, %v8544_v43  ;;  %v4359_v37 = vsel %vm290_vm0, %v8544_v43, %v8545_v40  ;;  %v4375_v43 = vpop.permute.xlu2 %4374 }
 0xc5d   :  { %v4430_v52 = vrot.slane %v4358_v34, 4  ;;  %v4431_v61 = vrot.slane %v4359_v37, 4  ;;  %v4404_v46 = vrot.slane %v4297_v44, 4  ;;  %v4454_v26 = vsel %vm410_vm4, %v11952_v32, %v4417_v56 }
 0xc5e   :  { %v4253_v36 = vsel %vm14042_vm11, %v8579_v50, %v8580_v16  ;;  %v4418_v50 = vrot.slane %v4311_v33, 4  ;;  %v4243_v34 = vsel %vm104_vm7, %v8529_v5, %v8530_v2  ;;  %v4405_v44 = vrot.slane %v4291_v62, 4 }
 0xc5f   :  { %v4460_v41 = vsel %vm410_vm4, %v4332_v31, %v4430_v52  ;;  %v4275_v35 = vsel %vm141_vm5, %v4253_v36, %v8534_v60  ;;  %v8539_v52 = vunpack.i.l.bf16 %v12036_v4  ;;  %v8594_v36 = vunpack.i.l.bf16 %v12059_v27 }
 0xc60   :  { %4499 = vmatpush.msrb.mxu2 %v4460_v41  ;;  %v4448_v32 = vsel %vm410_vm4, %v4275_v35, %v4404_v46  ;;  %v4392_v41 = vrot.slane %v4243_v34, 4  ;;  %v8560_v33 = vunpack.i.h.bf16 %v12050_v8  ;;  %v4435_v35 = vrot.slane %v12046_v11, 4 }
 0xc61   :  { %v4373_v20 = vpop.permute.xlu0 %4372  ;;  %v8595_v46 = vunpack.i.h.bf16 %v12059_v27  ;;  %v4265_v62 = vsel %vm141_vm5, %v8534_v60, %v8535_v54  ;;  %vm14043_vm11 = vcmask 56320   ;;  %v4248_v27 = vsel %vm104_vm7, %v4231_v30, %v8529_v5  ;;  %v12136_v60 = vld [vmem:[%s14021_s2 + $0x24] sm:$0xf] }
 0xc62   :  { %v4381_v1 = vsel %vm327_vm3, %v4371_v17, %v4373_v20  ;;  %v4382_v16 = vsel %vm327_vm3, %v4373_v20, %v4375_v43  ;;  %4500 = vmatpush.msrb.mxu2 %v4454_v26  ;;  %v4333_v17 = vsel %vm249_vm1, %v8554_v9, %v8555_v21  ;;  %v4455_v9 = vsel %vm410_vm4, %v11946_v15, %v4418_v50 }
 0xc63   :  { %v4377_v31 = vpop.permute.xlu1 %4376  ;;  %7464 = vmatpush.msk.msrb.mxu3 %vm410_vm4, %v4381_v1  ;;  %7466 = vmatpush.msk.msra.mxu0 %vm410_vm4, %v4382_v16  ;;  %v4461_v37 = vsel %vm410_vm4, %v4333_v17, %v4431_v61  ;;  %v4362_v61 = vsel %vm290_vm0, %v8565_v55, %v8594_v36  ;;  %v4319_v47 = vsel %vm14043_vm11, %v8560_v33, %v12052_v7  ;;  %v8570_v50 = vunpack.i.h.bf16 %v12048_v59 }
 0xc64   :  { %v4383_v56 = vsel %vm327_vm3, %v4375_v43, %v4377_v31  ;;  %4501 = vmatpush.msrb.mxu2 %v4448_v32  ;;  %v4449_v12 = vsel %vm410_vm4, %v4265_v62, %v4405_v44  ;;  %v4216_v15 = vsel %vm62_vm8, %v8539_v52, %v8540_v19  ;;  %v4361_v26 = vsel %vm290_vm0, %v8595_v46, %v8565_v55 }
 0xc65   :  { %4519 = vmatpush.msrb.mxu3 %v4461_v37  ;;  %7468 = vmatpush.msk.msra.mxu1 %vm410_vm4, %v4383_v56  ;;  %v4443_v20 = vsel %vm410_vm4, %v4216_v15, %v4392_v41  ;;  %v4360_v16 = vsel %vm290_vm0, %v8545_v40, %v8595_v46  ;;  %v4367_v5 = vsel %vm302_vm14, %v4362_v61, %v12046_v11  ;;  %v4422_v34 = vrot.slane %v4319_v47, 4  ;;  %v12147_v37 = vpop.permute.xlu2 %8612 }
 0xc66   :  { %v4465_v17 = vsel %vm410_vm4, %v12030_v13, %v4435_v35  ;;  %v4391_v56 = vrot.slane %v4248_v27, 4  ;;  %v4433_v40 = vrot.slane %v4361_v26, 4  ;;  %v4384_v11 = vsel %vm327_vm3, %v4377_v31, %v12040_v58 }
 0xc67   :  { %4520 = vmatpush.msrb.mxu3 %v4455_v9  ;;  %v4432_v30 = vrot.slane %v4360_v16, 4  ;;  %v4434_v36 = vrot.slane %v4367_v5, 4  ;;  %v4389_v22 = vsel %vm339_vm12, %v4384_v11, %v12054_v39  ;;  %v4459_v61 = vsel %vm410_vm4, %v11970_v57, %v4422_v34 }
 0xc68   :  { %vm14044_vm11 = vcmask 72704  }
 0xc69   :  { %v8583_v43 = vpop.permute.xlu0 %8582  ;;  %4521 = vmatpush.msrb.mxu3 %v4449_v12 }
 0xc6a   :  { %v8585_v7 = vunpack.i.h.bf16 %v8583_v43  ;;  %v8584_v1 = vunpack.i.l.bf16 %v8583_v43 }
 0xc6b   :  { %v8598_v32 = vpop.permute.xlu1 %8597  ;;  %4522 = vmatpush.msrb.mxu3 %v4443_v20 }
 0xc6c   :  { %v8600_v55 = vunpack.i.h.bf16 %v8598_v32  ;;  %v8599_v44 = vunpack.i.l.bf16 %v8598_v32  ;;  %7465 = vmatmul.msk.f32.vlgmr.msrb.gmra.mxu3 %vm440_vm9, %v12136_v60  ;;  %v4200_v42 = vsel %vm37_vm13, %v8584_v1, %v8585_v7 }
 0xc6d   :  { %7472 = vmatpush.msk.msra.mxu3 %vm410_vm4, %v12054_v39  ;;  %v4226_v59 = vsel %vm62_vm8, %v4200_v42, %v8539_v52  ;;  %v4264_v39 = vpop.permute.xlu2 %4263 }
 0xc6e   :  { %v4442_v41 = vsel %vm410_vm4, %v4226_v59, %v4391_v56  ;;  %v4334_v9 = vsel %vm249_vm1, %v8555_v21, %v8600_v55  ;;  %v4335_v35 = vsel %vm249_vm1, %v8600_v55, %v8570_v50  ;;  %v4336_v46 = vsel %vm249_vm1, %v8570_v50, %v8599_v44 }
 0xc6f   :  { %4599 = vmatpush.msra.mxu3 %v4465_v17  ;;  %4502 = vmatpush.msrb.mxu2 %v4442_v41  ;;  %v4462_v58 = vsel %vm410_vm4, %v4334_v9, %v4432_v30  ;;  %v4463_v31 = vsel %vm410_vm4, %v4335_v35, %v4433_v40  ;;  %v4345_v52 = vsel %vm265_vm15, %v4336_v46, %v12030_v13  ;;  %v8615_v55 = vunpack.i.h.bf16 %v12147_v37 }
 0xc70   :  { %7463 = vmatmul.msk.f32.vlgmr.msrb.gmra.mxu2 %vm440_vm9, %v12136_v60  ;;  %4539 = vmatpush.msra.mxu0 %v4462_v58  ;;  %v4464_v21 = vsel %vm410_vm4, %v4345_v52, %v4434_v36 }
 0xc71   :  { %4559 = vmatpush.msra.mxu1 %v4463_v31  ;;  %7470 = vmatpush.msk.msra.mxu2 %vm410_vm4, %v4389_v22  ;;  %v8588_v62 = vpop.permute.xlu0 %8587 }
 0xc72   :  { %4600 = vmatpush.msra.mxu3 %v4459_v61  ;;  %v8590_v47 = vunpack.i.h.bf16 %v8588_v62  ;;  %v8589_v12 = vunpack.i.l.bf16 %v8588_v62 }
 0xc73   :  { %4579 = vmatpush.msra.mxu2 %v4464_v21  ;;  %v8603_v13 = vpop.permute.xlu1 %8602 }
 0xc74   :  { %v8605_v15 = vunpack.i.h.bf16 %v8603_v13  ;;  %v8604_v27 = vunpack.i.l.bf16 %v8603_v13  ;;  %v4295_v43 = vsel %vm181_vm6, %v8589_v12, %v8590_v47 }
 0xc75   :  { %v4409_v20 = vrot.slane %v4295_v43, 4  ;;  %v4614_v43 = vld.sshfl [vmem:[#allocation1 + $0x10] sm:$0xff pattern:$0x75316420] }
 0xc76   :  { %v4312_v26 = vsel %vm212_vm2, %v8550_v23, %v8604_v27  ;;  %v4313_v7 = vsel %vm212_vm2, %v8604_v27, %v8605_v15  ;;  %v4314_v57 = vsel %vm212_vm2, %v8605_v15, %v8560_v33  ;;  %v8614_v33 = vunpack.i.l.bf16 %v12147_v37  ;;  %v4613_v15 = vld.sshfl [vmem:[#allocation1 + $0x8] sm:$0xff pattern:$0x75316420]  ;;  %v4612_v27 = vld.sshfl [vmem:[#allocation1] sm:$0xff pattern:$0x75316420] }
 0xc77   :  { %v4453_v1 = vsel %vm410_vm4, %v4264_v39, %v4409_v20  ;;  %v4419_v16 = vrot.slane %v4312_v26, 4  ;;  %v4420_v5 = vrot.slane %v4313_v7, 4  ;;  %v4421_v50 = vrot.slane %v4314_v57, 4  ;;  %5063 = vst [vmem:[#allocation1] ss:$2 sm:$0xff] %v9662_v45 }
 0xc78   :  { %4601 = vmatpush.msra.mxu3 %v4453_v1  ;;  %v4245_v37 = vsel %vm104_vm7, %v8614_v33, %v8615_v55  ;;  %v4615_v20 = vld.sshfl [vmem:[#allocation1 + $0x18] sm:$0xff pattern:$0x75316420] }
 0xc79   :  { %v4242_v34 = vpop.permute.xlu0 %4241  ;;  %v4456_v32 = vsel %vm410_vm4, %v11960_v53, %v4419_v16  ;;  %v4457_v38 = vsel %vm410_vm4, %v11994_v0, %v4420_v5  ;;  %v4458_v23 = vsel %vm410_vm4, %v11979_v28, %v4421_v50  ;;  %v4244_v0 = vsel %vm104_vm7, %v8530_v2, %v8614_v33  ;;  %5065 = vst [vmem:[#allocation1 + $0x10] ss:$2 sm:$0xff] %v9655_v6 }
 0xc7a   :  { %4540 = vmatpush.msra.mxu0 %v4456_v32  ;;  %4560 = vmatpush.msra.mxu1 %v4457_v38  ;;  %v4393_v41 = vrot.slane %v4244_v0, 4  ;;  %v4394_v21 = vrot.slane %v4245_v37, 4  ;;  %v4246_v4 = vsel %vm104_vm7, %v8615_v55, %v4242_v34 }
 0xc7b   :  { %4580 = vmatpush.msra.mxu2 %v4458_v23  ;;  %v8608_v8 = vpop.permute.xlu1 %8607  ;;  %v4395_v61 = vrot.slane %v4246_v4, 4 }
 0xc7c   :  { %v8609_v17 = vunpack.i.l.bf16 %v8608_v8  ;;  %v8610_v56 = vunpack.i.h.bf16 %v8608_v8 }
 0xc7e   :  { %v4292_v53 = vsel %vm181_vm6, %v8525_v3, %v8609_v17  ;;  %v4293_v40 = vsel %vm181_vm6, %v8609_v17, %v8610_v56  ;;  %v4294_v11 = vsel %vm181_vm6, %v8610_v56, %v8589_v12 }
 0xc7f   :  { %v4406_v9 = vrot.slane %v4292_v53, 4  ;;  %v4407_v24 = vrot.slane %v4293_v40, 4  ;;  %v4408_v35 = vrot.slane %v4294_v11, 4 }
 0xc81   :  { %v8623_v44 = vpop.permute.xlu0 %8622 }
 0xc82   :  { %v8625_v28 = vunpack.i.h.bf16 %v8623_v44  ;;  %v8624_v42 = vunpack.i.l.bf16 %v8623_v44 }
 0xc83   :  { %v8618_v59 = vpop.permute.xlu1 %8617 }
 0xc84   :  { %v8620_v30 = vunpack.i.h.bf16 %v8618_v59  ;;  %v8619_v36 = vunpack.i.l.bf16 %v8618_v59  ;;  %v4217_v14 = vsel %vm62_vm8, %v8540_v19, %v8624_v42  ;;  %v4218_v58 = vsel %vm62_vm8, %v8624_v42, %v8625_v28 }
 0xc85   :  { %v4444_v51 = vsel %vm410_vm4, %v4217_v14, %v4393_v41  ;;  %v4396_v19 = vrot.slane %v4242_v34, 4  ;;  %v4616_v34 = vld.sshfl [vmem:[#allocation1 + $0x20] sm:$0xff pattern:$0x75316420] }
 0xc86   :  { %v4266_v3 = vsel %vm141_vm5, %v8535_v54, %v8619_v36  ;;  %v4267_v2 = vsel %vm141_vm5, %v8619_v36, %v8620_v30  ;;  %v4268_v46 = vsel %vm141_vm5, %v8620_v30, %v4264_v39  ;;  %v4445_v54 = vsel %vm410_vm4, %v4218_v58, %v4394_v21  ;;  %v4469_v39 = vpop.permute.xlu2 %4468 }
 0xc87   :  { %v4450_v31 = vsel %vm410_vm4, %v4266_v3, %v4406_v9  ;;  %v4451_v52 = vsel %vm410_vm4, %v4267_v2, %v4407_v24  ;;  %v4452_v22 = vsel %vm410_vm4, %v4268_v46, %v4408_v35 }
 0xc88   :  { %4541 = vmatpush.msra.mxu0 %v4450_v31  ;;  %4561 = vmatpush.msra.mxu1 %v4451_v52 }
 0xc89   :  { %4581 = vmatpush.msra.mxu2 %v4452_v22 }
 0xc8a   :  { %4542 = vmatpush.msra.mxu0 %v4444_v51  ;;  %4562 = vmatpush.msra.mxu1 %v4445_v54 }
 0xc8b   :  { %v4215_v62 = vpop.permute.xlu1 %4214  ;;  %7467 = vmatmul.msk.f32.vlgmr.msra.gmra.mxu0 %vm440_vm9, %v12136_v60  ;;  %7469 = vmatmul.msk.f32.vlgmr.msra.gmra.mxu1 %vm440_vm9, %v12136_v60 }
 0xc8c   :  { %v4219_v47 = vsel %vm62_vm8, %v8625_v28, %v4215_v62  ;;  %v4447_v12 = vsel %vm410_vm4, %v4215_v62, %v4396_v19 }
 0xc8d   :  { %4602 = vmatpush.msra.mxu3 %v4447_v12  ;;  %v4446_v13 = vsel %vm410_vm4, %v4219_v47, %v4395_v61 }
 0xc8e   :  { %4582 = vmatpush.msra.mxu2 %v4446_v13  ;;  %7473 = vmatmul.msk.f32.vlgmr.msra.gmra.mxu3 %vm440_vm9, %v12136_v60 }
 0xc8f   :  { %7471 = vmatmul.msk.f32.vlgmr.msra.gmra.mxu2 %vm440_vm9, %v12136_v60  ;;  %v4617_v60 = vld.sshfl [vmem:[#allocation1 + $0x28] sm:$0xff pattern:$0x75316420] }
 0xc90   :  { %5067 = vst [vmem:[#allocation1 + $0x20] ss:$2 sm:$0xff] %v9681_v10 }
 0xcef   :  { %v4524_v26 = vpop.f32.mrf.mxu3 }
 0xcf0   :  { %v4525_v7 = vadd.f32 %v4524_v26, %v4469_v39 }
 0xcf2   :  { %v4625_v57 = vmul.f32 %v4613_v15, %v4525_v7 }
 0xcf3   :  { %v4504_v1 = vpop.f32.mrf.mxu2 }
 0xcf4   :  { %v12230_v16 = vadd.f32 %v4625_v57, %v11691_v25  ;;  %v4505_v5 = vadd.f32 %v4504_v1, %v4469_v39 }
 0xcf6   :  { %v4624_v50 = vmul.f32 %v4612_v27, %v4505_v5  ;;  %4820 = vrot.lane.b32.xlu2 %v12230_v16, %s9267_s30 }
 0xcf8   :  { %v12236_v32 = vadd.f32 %v4624_v50, %v11702_v18 }
 0xcfa   :  { %4818 = vrot.lane.b32.xlu0 %v12236_v32, %s9267_s30  ;;  %v8626_v38 = vpack.i.bf16 %v12230_v16, %v12236_v32 }
 0xcfc   :  { %8627 = vrot.lane.b32.xlu1 %v8626_v38, %s9268_s5 }
 0xcfe   :  { %8632 = vrot.lane.b32.xlu2 %v8626_v38, %s9260_s23 }
 0xd02   :  { %8642 = vrot.lane.b32.xlu0 %v8626_v38, %s9258_s0 }
 0xd04   :  { %4766 = vrot.lane.b32.xlu1 %v12236_v32, %s9269_s6 }
 0xd06   :  { %8637 = vrot.lane.b32.xlu2 %v8626_v38, %s9264_s27 }
 0xd08   :  { %v4544_v25 = vpop.f32.mrf.mxu0  ;;  %v4564_v18 = vpop.f32.mrf.mxu1 }
 0xd09   :  { %v4545_v23 = vadd.f32 %v4544_v25, %v4469_v39  ;;  %v4565_v8 = vadd.f32 %v4564_v18, %v4469_v39 }
 0xd0a   :  { %4792 = vrot.lane.b32.xlu0 %v12236_v32, %s9270_s7 }
 0xd0b   :  { %v4626_v33 = vmul.f32 %v4614_v43, %v4545_v23  ;;  %v4627_v17 = vmul.f32 %v4615_v20, %v4565_v8 }
 0xd0d   :  { %v12251_v56 = vadd.f32 %v4626_v33, %v11678_v49  ;;  %v12254_v55 = vadd.f32 %v4627_v17, %v11681_v48 }
 0xd0e   :  { %4814 = vrot.lane.b32.xlu2 %v12236_v32, %s9271_s8 }
 0xd0f   :  { %v8651_v44 = vpack.i.bf16 %v12236_v32, %v12254_v55  ;;  %v8646_v53 = vpack.i.bf16 %v12251_v56, %v12230_v16  ;;  %v8691_v11 = vpack.i.bf16 %v12254_v55, %v12251_v56 }
 0xd11   :  { %8652 = vrot.lane.b32.xlu1 %v8651_v44, %s9265_s28  ;;  %v4604_v49 = vpop.f32.mrf.mxu3 }
 0xd12   :  { %8647 = vrot.lane.b32.xlu0 %v8646_v53, %s9265_s28  ;;  %v4584_v48 = vpop.f32.mrf.mxu2  ;;  %v4605_v0 = vadd.f32 %v4604_v49, %v4469_v39 }
 0xd13   :  { %v4585_v28 = vadd.f32 %v4584_v48, %v4469_v39 }
 0xd14   :  { %v4629_v42 = vmul.f32 %v4617_v60, %v4605_v0 }
 0xd15   :  { %v4628_v40 = vmul.f32 %v4616_v34, %v4585_v28 }
 0xd16   :  { %4836 = vrot.lane.b32.xlu2 %v12236_v32, %s9272_s9  ;;  %v12279_v59 = vadd.f32 %v4629_v42, %v11717_v63  ;;  %v7476_v63 = vld [vmem:[%s14022_s3 + $0x28] sm:$0xf] }
 0xd17   :  { %v12282_v30 = vadd.f32 %v4628_v40, %v11727_v29 }
 0xd19   :  { %4824 = vrot.lane.b32.xlu1 %v12254_v55, %s9267_s30  ;;  %v8696_v36 = vpack.i.bf16 %v12279_v59, %v12282_v30 }
 0xd1a   :  { %4822 = vrot.lane.b32.xlu0 %v12251_v56, %s9267_s30 }
 0xd1e   :  { %8657 = vrot.lane.b32.xlu2 %v8646_v53, %s9261_s24 }
 0xd21   :  { %8667 = vrot.lane.b32.xlu1 %v8646_v53, %s9263_s26 }
 0xd22   :  { %8662 = vrot.lane.b32.xlu0 %v8651_v44, %s9261_s24 }
 0xd26   :  { %8672 = vrot.lane.b32.xlu2 %v8651_v44, %s9263_s26 }
 0xd29   :  { %8692 = vrot.lane.b32.xlu1 %v8691_v11, %s9258_s0 }
 0xd2a   :  { %8682 = vrot.lane.b32.xlu0 %v8691_v11, %s9260_s23 }
 0xd2e   :  { %8677 = vrot.lane.b32.xlu2 %v8691_v11, %s9268_s5 }
 0xd31   :  { %8697 = vrot.lane.b32.xlu1 %v8696_v36, %s9259_s22 }
 0xd32   :  { %8687 = vrot.lane.b32.xlu0 %v8691_v11, %s9264_s27 }
 0xd36   :  { %8712 = vrot.lane.b32.xlu2 %v8696_v36, %s9257_s21 }
 0xd39   :  { %8702 = vrot.lane.b32.xlu1 %v8696_v36, %s9262_s25 }
 0xd3a   :  { %4726 = vrot.lane.b32.xlu0 %v12279_v59, %s9266_s29 }
 0xd3e   :  { %4826 = vrot.lane.b32.xlu2 %v12282_v30, %s9267_s30 }
 0xd41   :  { %8707 = vrot.lane.b32.xlu1 %v8696_v36, %s9265_s28 }
 0xd42   :  { %4828 = vrot.lane.b32.xlu0 %v12279_v59, %s9267_s30 }
 0xd46   :  { %4691 = vrot.lane.b32.xlu2 %v12282_v30, %s9260_s23 }
 0xd49   :  { %8722 = vrot.lane.b32.xlu1 %v8696_v36, %s9263_s26 }
 0xd4a   :  { %8717 = vrot.lane.b32.xlu0 %v8696_v36, %s9261_s24 }
 0xd4e   :  { %4918 = vperm.xlu2 %7680, %v7476_v63  }
 0xd50   :  { %v4821_v29 = vpop.permute.xlu2 %4820 }
 0xd51   :  { %8727 = vrot.lane.b32.xlu1 %v8696_v36, %s9268_s5 }
 0xd52   :  { %4713 = vrot.lane.b32.xlu0 %v12282_v30, %s9264_s27 }
 0xd58   :  { %v12308_v41 = vpop.permute.xlu2 %8632 }
 0xd59   :  { %4664 = vrot.lane.b32.xlu1 %v12282_v30, %s9258_s0  ;;  %v8635_v57 = vunpack.i.h.bf16 %v12308_v41  ;;  %v8634_v1 = vunpack.i.l.bf16 %v12308_v41 }
 0xd60   :  { %v12312_v37 = vpop.permute.xlu2 %8637 }
 0xd61   :  { %v8640_v50 = vunpack.i.h.bf16 %v12312_v37  ;;  %v8639_v60 = vunpack.i.l.bf16 %v12312_v37 }
 0xd68   :  { %v12314_v9 = vpop.permute.xlu2 %4814 }
 0xd6c   :  { %v4819_v24 = vpop.permute.xlu0 %4818 }
 0xd6d   :  { %v4830_v35 = vsel %vm327_vm3, %v4819_v24, %v4821_v29 }
 0xd6e   :  { %7478 = vmatpush.msk.msrb.mxu0 %vm410_vm4, %v4830_v35  ;;  %v12320_v3 = vpop.permute.xlu1 %8627 }
 0xd6f   :  { %v8630_v54 = vunpack.i.h.bf16 %v12320_v3  ;;  %v8629_v19 = vunpack.i.l.bf16 %v12320_v3 }
 0xd70   :  { %v12318_v14 = vpop.permute.xlu2 %4836 }
 0xd71   :  { %v4741_v7 = vsel %vm181_vm6, %v8629_v19, %v8630_v54 }
 0xd72   :  { %v4855_v33 = vrot.slane %v4741_v7, 4 }
 0xd74   :  { %v12322_v2 = vpop.permute.xlu0 %8642 }
 0xd75   :  { %v8645_v25 = vunpack.i.h.bf16 %v12322_v2  ;;  %v8644_v11 = vunpack.i.l.bf16 %v12322_v2 }
 0xd76   :  { %v12324_v58 = vpop.permute.xlu1 %4766 }
 0xd78   :  { %v8658_v46 = vpop.permute.xlu2 %8657 }
 0xd79   :  { %v8660_v61 = vunpack.i.h.bf16 %v8658_v46  ;;  %v8659_v62 = vunpack.i.l.bf16 %v8658_v46 }
 0xd7b   :  { %v4761_v26 = vsel %vm212_vm2, %v8659_v62, %v8660_v61 }
 0xd7c   :  { %v12326_v31 = vpop.permute.xlu0 %4792  ;;  %v4868_v8 = vrot.slane %v4761_v26, 4  ;;  %v4715_v26 = vsel %vm141_vm5, %v8639_v60, %v8640_v50 }
 0xd80   :  { %v12328_v52 = vpop.permute.xlu2 %8672 }
 0xd81   :  { %v8675_v18 = vunpack.i.h.bf16 %v12328_v52  ;;  %v8674_v17 = vunpack.i.l.bf16 %v12328_v52 }
 0xd83   :  { %v12330_v22 = vpop.permute.xlu1 %8652 }
 0xd84   :  { %v8648_v21 = vpop.permute.xlu0 %8647  ;;  %v8655_v43 = vunpack.i.h.bf16 %v12330_v22  ;;  %v8654_v20 = vunpack.i.l.bf16 %v12330_v22 }
 0xd85   :  { %v8650_v12 = vunpack.i.h.bf16 %v8648_v21  ;;  %v8649_v13 = vunpack.i.l.bf16 %v8648_v21 }
 0xd87   :  { %v4809_v5 = vsel %vm290_vm0, %v8649_v13, %v8650_v12  ;;  %v4808_v34 = vsel %vm290_vm0, %v8655_v43, %v8649_v13  ;;  %v4810_v38 = vsel %vm290_vm0, %v8650_v12, %v8654_v20 }
 0xd88   :  { %v12332_v4 = vpop.permute.xlu2 %8677  ;;  %v4881_v48 = vrot.slane %v4809_v5, 4  ;;  %v4880_v42 = vrot.slane %v4808_v34, 4  ;;  %v4882_v40 = vrot.slane %v4810_v38, 4  ;;  %v4899_v34 = vsel %vm410_vm4, %v4715_v26, %v4855_v33 }
 0xd89   :  { %v8680_v2 = vunpack.i.h.bf16 %v12332_v4 }
 0xd8b   :  { %v4825_v51 = vpop.permute.xlu1 %4824 }
 0xd8c   :  { %v4823_v47 = vpop.permute.xlu0 %4822 }
 0xd8d   :  { %v4831_v15 = vsel %vm327_vm3, %v4821_v29, %v4823_v47  ;;  %v4832_v27 = vsel %vm327_vm3, %v4823_v47, %v4825_v51 }
 0xd8e   :  { %7480 = vmatpush.msk.msrb.mxu1 %vm410_vm4, %v4831_v15  ;;  %7482 = vmatpush.msk.msrb.mxu2 %vm410_vm4, %v4832_v27  ;;  %v4693_v15 = vsel %vm104_vm7, %v8634_v1, %v8635_v57 }
 0xd8f   :  { %v4842_v38 = vrot.slane %v4693_v15, 4 }
 0xd90   :  { %v12342_v39 = vpop.permute.xlu2 %8712 }
 0xd91   :  { %v8715_v15 = vunpack.i.h.bf16 %v12342_v39 }
 0xd93   :  { %v8668_v23 = vpop.permute.xlu1 %8667 }
 0xd94   :  { %v8670_v44 = vunpack.i.h.bf16 %v8668_v23  ;;  %v8669_v53 = vunpack.i.l.bf16 %v8668_v23  ;;  %v12362_v49 = vpop.permute.xlu0 %8662  ;;  %v12413_v23 = vld [vmem:[%s14021_s2 + $0x28] sm:$0xf] }
 0xd95   :  { %v8665_v0 = vunpack.i.h.bf16 %v12362_v49  ;;  %v8664_v28 = vunpack.i.l.bf16 %v12362_v49 }
 0xd96   :  { %v4783_v36 = vsel %vm249_vm1, %v8669_v53, %v8670_v44  ;;  %v4782_v63 = vsel %vm249_vm1, %v8675_v18, %v8669_v53  ;;  %v4784_v29 = vsel %vm249_vm1, %v8670_v44, %v8674_v17  ;;  %v4885_v44 = vrot.slane %v12314_v9, 4 }
 0xd97   :  { %v4911_v24 = vsel %vm410_vm4, %v4783_v36, %v4881_v48  ;;  %v4910_v35 = vsel %vm410_vm4, %v4782_v63, %v4880_v42  ;;  %v4912_v46 = vsel %vm410_vm4, %v4784_v29, %v4882_v40  ;;  %v4760_v21 = vsel %vm212_vm2, %v8665_v0, %v8659_v62 }
 0xd98   :  { %4969 = vmatpush.msrb.mxu1 %v4911_v24  ;;  %v12376_v47 = vpop.permute.xlu2 %4826  ;;  %4949 = vmatpush.msrb.mxu0 %v4910_v35  ;;  %v4867_v12 = vrot.slane %v4760_v21, 4  ;;  %v4762_v13 = vsel %vm212_vm2, %v8660_v61, %v8664_v28  ;;  %v4905_v62 = vsel %vm410_vm4, %v12230_v16, %v4868_v8  ;;  %v8679_v53 = vunpack.i.l.bf16 %v12332_v4 }
 0xd99   :  { %v4833_v27 = vsel %vm327_vm3, %v4825_v51, %v12376_v47  ;;  %4989 = vmatpush.msrb.mxu2 %v4912_v46  ;;  %v4869_v43 = vrot.slane %v4762_v13, 4  ;;  %v4666_v51 = vsel %vm62_vm8, %v8644_v11, %v8645_v25  ;;  %v4915_v33 = vsel %vm410_vm4, %v12326_v31, %v4885_v44 }
 0xd9a   :  { %4970 = vmatpush.msrb.mxu1 %v4905_v62  ;;  %7484 = vmatpush.msk.msrb.mxu3 %vm410_vm4, %v4833_v27  ;;  %v4904_v61 = vsel %vm410_vm4, %v12236_v32, %v4867_v12  ;;  %v4893_v8 = vsel %vm410_vm4, %v4666_v51, %v4842_v38  ;;  %v4742_v42 = vsel %vm181_vm6, %v8630_v54, %v8679_v53  ;;  %v8714_v27 = vunpack.i.l.bf16 %v12342_v39 }
 0xd9b   :  { %v12403_v7 = vpop.permute.xlu1 %8692  ;;  %4950 = vmatpush.msrb.mxu0 %v4904_v61  ;;  %v4906_v5 = vsel %vm410_vm4, %v12251_v56, %v4869_v43  ;;  %v4856_v46 = vrot.slane %v4742_v42, 4 }
 0xd9c   :  { %4990 = vmatpush.msrb.mxu2 %v4906_v5  ;;  %v12408_v18 = vpop.permute.xlu0 %8682  ;;  %4971 = vmatpush.msrb.mxu1 %v4899_v34  ;;  %v8694_v24 = vunpack.i.l.bf16 %v12403_v7  ;;  %v4650_v34 = vsel %vm37_vm13, %v8714_v27, %v8715_v15 }
 0xd9d   :  { %v8684_v48 = vunpack.i.l.bf16 %v12408_v18  ;;  %v8685_v42 = vunpack.i.h.bf16 %v12408_v18 }
 0xd9e   :  { %4972 = vmatpush.msrb.mxu1 %v4893_v8  ;;  %v4667_v13 = vsel %vm62_vm8, %v8645_v25, %v8694_v24  ;;  %v4676_v8 = vsel %vm62_vm8, %v4650_v34, %v8644_v11 }
 0xd9f   :  { %7481 = vmatmul.msk.f32.vlgmr.msrb.gmra.mxu1 %vm440_vm9, %v12413_v23  ;;  %v4694_v40 = vsel %vm104_vm7, %v8635_v57, %v8684_v48 }
 0xda0   :  { %7488 = vmatpush.msk.msra.mxu1 %vm410_vm4, %v12318_v14  ;;  %v4843_v21 = vrot.slane %v4694_v40, 4 }
 0xda2   :  { %5049 = vmatpush.msra.mxu1 %v4915_v33  ;;  %v4894_v62 = vsel %vm410_vm4, %v4667_v13, %v4843_v21 }
 0xda3   :  { %v8698_v0 = vpop.permute.xlu1 %8697 }
 0xda4   :  { %v8700_v36 = vunpack.i.h.bf16 %v8698_v0  ;;  %v8699_v63 = vunpack.i.l.bf16 %v8698_v0  ;;  %v12433_v29 = vpop.permute.xlu0 %8687 }
 0xda5   :  { %v8689_v35 = vunpack.i.l.bf16 %v12433_v29 }
 0xda6   :  { %v4681_v12 = vsel %vm81_vm10, %v8699_v63, %v8700_v36 }
 0xda7   :  { %v4716_v54 = vsel %vm141_vm5, %v8640_v50, %v8689_v35  ;;  %v4698_v50 = vsel %vm104_vm7, %v4681_v12, %v8634_v1 }
 0xda8   :  { %v4900_v57 = vsel %vm410_vm4, %v4716_v54, %v4856_v46  ;;  %v4841_v38 = vrot.slane %v4698_v50, 4  ;;  %v8690_v54 = vunpack.i.h.bf16 %v12433_v29 }
 0xda9   :  { %4991 = vmatpush.msrb.mxu2 %v4900_v57 }
 0xdaa   :  { %v4892_v3 = vsel %vm410_vm4, %v4676_v8, %v4841_v38 }
 0xdab   :  { %v8703_v43 = vpop.permute.xlu1 %8702  ;;  %4992 = vmatpush.msrb.mxu2 %v4894_v62 }
 0xdac   :  { %v8705_v61 = vunpack.i.h.bf16 %v8703_v43  ;;  %v8704_v26 = vunpack.i.l.bf16 %v8703_v43  ;;  %v4727_v51 = vpop.permute.xlu0 %4726  ;;  %7483 = vmatmul.msk.f32.vlgmr.msrb.gmra.mxu2 %vm440_vm9, %v12413_v23 }
 0xdad   :  { %v4747_v25 = vsel %vm181_vm6, %v4727_v51, %v8629_v19 }
 0xdae   :  { %v4854_v5 = vrot.slane %v4747_v25, 4  ;;  %v4703_v39 = vsel %vm14044_vm11, %v8704_v26, %v8705_v61  ;;  %vm14045_vm11 = vcmask 56320  }
 0xdaf   :  { %v4725_v41 = vsel %vm141_vm5, %v4703_v39, %v8639_v60 }
 0xdb0   :  { %v4898_v1 = vsel %vm410_vm4, %v4725_v41, %v4854_v5 }
 0xdb1   :  { %4951 = vmatpush.msrb.mxu0 %v4898_v1 }
 0xdb3   :  { %v8708_v19 = vpop.permute.xlu1 %8707  ;;  %4952 = vmatpush.msrb.mxu0 %v4892_v3 }
 0xdb4   :  { %v8710_v44 = vunpack.i.h.bf16 %v8708_v19  ;;  %v8709_v33 = vunpack.i.l.bf16 %v8708_v19  ;;  %v4829_v0 = vpop.permute.xlu0 %4828  ;;  %7479 = vmatmul.msk.f32.vlgmr.msrb.gmra.mxu0 %vm440_vm9, %v12413_v23 }
 0xdb5   :  { %v4834_v37 = vsel %vm327_vm3, %v12376_v47, %v4829_v0 }
 0xdb6   :  { %v4839_v60 = vsel %vm339_vm12, %v4834_v37, %v12318_v14  ;;  %v4812_v11 = vsel %vm290_vm0, %v8709_v33, %v8710_v44  ;;  %v4811_v40 = vsel %vm290_vm0, %v8654_v20, %v8709_v33  ;;  %v4743_v14 = vsel %vm181_vm6, %v8679_v53, %v8680_v2 }
 0xdb7   :  { %7486 = vmatpush.msk.msra.mxu0 %vm410_vm4, %v4839_v60  ;;  %v4817_v63 = vsel %vm302_vm14, %v4812_v11, %v12314_v9  ;;  %v4883_v57 = vrot.slane %v4811_v40, 4  ;;  %v4695_v9 = vsel %vm104_vm7, %v8684_v48, %v8685_v42  ;;  %v8695_v48 = vunpack.i.h.bf16 %v12403_v7  ;;  %v5068_v40 = vld.sshfl [vmem:[#allocation1] sm:$0xff pattern:$0x75316420] }
 0xdb8   :  { %v4884_v13 = vrot.slane %v4817_v63, 4  ;;  %v4857_v61 = vrot.slane %v4743_v14, 4  ;;  %v4844_v26 = vrot.slane %v4695_v9, 4  ;;  %v5070_v14 = vld.sshfl [vmem:[#allocation1 + $0x10] sm:$0xff pattern:$0x75316420] }
 0xdb9   :  { %v4668_v34 = vsel %vm62_vm8, %v8694_v24, %v8695_v48 }
 0xdba   :  { %v4895_v38 = vsel %vm410_vm4, %v4668_v34, %v4844_v26 }
 0xdbb   :  { %v8723_v36 = vpop.permute.xlu1 %8722 }
 0xdbc   :  { %v8725_v47 = vunpack.i.h.bf16 %v8723_v36  ;;  %v8724_v46 = vunpack.i.l.bf16 %v8723_v36  ;;  %v8718_v21 = vpop.permute.xlu0 %8717 }
 0xdbd   :  { %v8720_v4 = vunpack.i.h.bf16 %v8718_v21  ;;  %v8719_v12 = vunpack.i.l.bf16 %v8718_v21 }
 0xdbe   :  { %v4785_v22 = vsel %vm249_vm1, %v8674_v17, %v8724_v46  ;;  %v4786_v20 = vsel %vm249_vm1, %v8724_v46, %v8725_v47 }
 0xdbf   :  { %v4913_v15 = vsel %vm410_vm4, %v4785_v22, %v4883_v57  ;;  %v4795_v53 = vsel %vm265_vm15, %v4786_v20, %v12326_v31  ;;  %v4763_v27 = vsel %vm212_vm2, %v8664_v28, %v8719_v12  ;;  %v4764_v52 = vsel %vm212_vm2, %v8719_v12, %v8720_v4  ;;  %v5072_v12 = vld.sshfl [vmem:[#allocation1 + $0x20] sm:$0xff pattern:$0x75316420] }
 0xdc0   :  { %5009 = vmatpush.msrb.mxu3 %v4913_v15  ;;  %v4914_v17 = vsel %vm410_vm4, %v4795_v53, %v4884_v13  ;;  %v4870_v62 = vrot.slane %v4763_v27, 4  ;;  %v4871_v43 = vrot.slane %v4764_v52, 4  ;;  %v4769_v18 = vsel %vm14045_vm11, %v8720_v4, %v12324_v58  ;;  %v5073_v4 = vld.sshfl [vmem:[#allocation1 + $0x28] sm:$0xff pattern:$0x75316420] }
 0xdc1   :  { %5029 = vmatpush.msra.mxu0 %v4914_v17  ;;  %v4872_v50 = vrot.slane %v4769_v18, 4  ;;  %v4717_v31 = vsel %vm141_vm5, %v8689_v35, %v8690_v54  ;;  %v4692_v35 = vpop.permute.xlu2 %4691  ;;  %5503 = vst [vmem:[#allocation1 + $0x20] ss:$2 sm:$0xff] %v9681_v10  ;;  %vm14046_vm11 = vcmask 72704  }
 0xdc2   :  { %v4907_v49 = vsel %vm410_vm4, %v12254_v55, %v4870_v62  ;;  %v4908_v28 = vsel %vm410_vm4, %v12282_v30, %v4871_v43  ;;  %v4901_v29 = vsel %vm410_vm4, %v4717_v31, %v4857_v61  ;;  %v4696_v19 = vsel %vm104_vm7, %v8685_v42, %v4692_v35  ;;  %v5069_v42 = vld.sshfl [vmem:[#allocation1 + $0x8] sm:$0xff pattern:$0x75316420] }
 0xdc3   :  { %v8728_v51 = vpop.permute.xlu1 %8727  ;;  %5010 = vmatpush.msrb.mxu3 %v4907_v49  ;;  %5030 = vmatpush.msra.mxu0 %v4908_v28  ;;  %v4909_v58 = vsel %vm410_vm4, %v12279_v59, %v4872_v50  ;;  %v4846_v33 = vrot.slane %v4692_v35, 4  ;;  %v4845_v0 = vrot.slane %v4696_v19, 4  ;;  %5499 = vst [vmem:[#allocation1] ss:$2 sm:$0xff] %v9662_v45  ;;  %v7477_v35 = vld [vmem:[%s14022_s3 + $0x2c] sm:$0xf] }
 0xdc4   :  { %v8730_v25 = vunpack.i.h.bf16 %v8728_v51  ;;  %v8729_v5 = vunpack.i.l.bf16 %v8728_v51  ;;  %5050 = vmatpush.msra.mxu1 %v4909_v58  ;;  %v4714_v39 = vpop.permute.xlu0 %4713 }
 0xdc5   :  { %5011 = vmatpush.msrb.mxu3 %v4901_v29  ;;  %v4718_v44 = vsel %vm141_vm5, %v8690_v54, %v4714_v39  ;;  %v5071_v54 = vld.sshfl [vmem:[#allocation1 + $0x18] sm:$0xff pattern:$0x75316420] }
 0xdc6   :  { %v4744_v41 = vsel %vm181_vm6, %v8680_v2, %v8729_v5  ;;  %v4745_v1 = vsel %vm181_vm6, %v8729_v5, %v8730_v25  ;;  %5501 = vst [vmem:[#allocation1 + $0x10] ss:$2 sm:$0xff] %v9655_v6 }
 0xdc7   :  { %5012 = vmatpush.msrb.mxu3 %v4895_v38  ;;  %v4858_v8 = vrot.slane %v4744_v41, 4  ;;  %v4859_v3 = vrot.slane %v4745_v1, 4 }
 0xdc8   :  { %7485 = vmatmul.msk.f32.vlgmr.msrb.gmra.mxu3 %vm440_vm9, %v12413_v23 }
 0xdc9   :  { %v4902_v7 = vsel %vm410_vm4, %v4718_v44, %v4858_v8  ;;  %v4903_v24 = vsel %vm410_vm4, %v4714_v39, %v4859_v3  ;;  %v4919_v36 = vpop.permute.xlu2 %4918 }
 0xdca   :  { %5031 = vmatpush.msra.mxu0 %v4902_v7  ;;  %5051 = vmatpush.msra.mxu1 %v4903_v24 }
 0xdcb   :  { %v4665_v37 = vpop.permute.xlu1 %4664 }
 0xdcc   :  { %v4669_v60 = vsel %vm62_vm8, %v8695_v48, %v4665_v37  ;;  %v4897_v2 = vsel %vm410_vm4, %v4665_v37, %v4846_v33 }
 0xdcd   :  { %5052 = vmatpush.msra.mxu1 %v4897_v2  ;;  %v4896_v11 = vsel %vm410_vm4, %v4669_v60, %v4845_v0 }
 0xdce   :  { %5032 = vmatpush.msra.mxu0 %v4896_v11  ;;  %7489 = vmatmul.msk.f32.vlgmr.msra.gmra.mxu1 %vm440_vm9, %v12413_v23 }
 0xdcf   :  { %7487 = vmatmul.msk.f32.vlgmr.msra.gmra.mxu0 %vm440_vm9, %v12413_v23 }
 0xe1c   :  { %v4974_v63 = vpop.f32.mrf.mxu1 }
 0xe1d   :  { %v4975_v47 = vadd.f32 %v4974_v63, %v4919_v36 }
 0xe1f   :  { %v5058_v46 = vmax.f32 %v4975_v47, 0.0 }
 0xe21   :  { %v12535_v21 = vmul.f32 %v5069_v42, %v5058_v46 }
 0xe23   :  { %5262 = vrot.lane.b32.xlu2 %v12535_v21, %s9267_s30 }
 0xe2f   :  { %v4994_v9 = vpop.f32.mrf.mxu2 }
 0xe30   :  { %v4995_v17 = vadd.f32 %v4994_v9, %v4919_v36 }
 0xe31   :  { %v4954_v23 = vpop.f32.mrf.mxu0 }
 0xe32   :  { %v4955_v57 = vadd.f32 %v4954_v23, %v4919_v36  ;;  %v5059_v48 = vmax.f32 %v4995_v17, 0.0 }
 0xe34   :  { %v5057_v22 = vmax.f32 %v4955_v57, 0.0  ;;  %v12566_v31 = vmul.f32 %v5070_v14, %v5059_v48 }
 0xe36   :  { %v12541_v20 = vmul.f32 %v5068_v40, %v5057_v22 }
 0xe38   :  { %5260 = vrot.lane.b32.xlu1 %v12541_v20, %s9267_s30  ;;  %v8731_v13 = vpack.i.bf16 %v12535_v21, %v12541_v20 }
 0xe3a   :  { %8732 = vrot.lane.b32.xlu0 %v8731_v13, %s9265_s28  ;;  %8747 = vrot.lane.b32.xlu2 %v8731_v13, %s9268_s5 }
 0xe40   :  { %8742 = vrot.lane.b32.xlu1 %v8731_v13, %s9263_s26 }
 0xe42   :  { %8737 = vrot.lane.b32.xlu0 %v8731_v13, %s9261_s24  ;;  %8757 = vrot.lane.b32.xlu2 %v8731_v13, %s9264_s27 }
 0xe48   :  { %8752 = vrot.lane.b32.xlu1 %v8731_v13, %s9260_s23 }
 0xe4a   :  { %5256 = vrot.lane.b32.xlu0 %v12541_v20, %s9271_s8  ;;  %8762 = vrot.lane.b32.xlu2 %v8731_v13, %s9258_s0 }
 0xe4b   :  { %v5054_v15 = vpop.f32.mrf.mxu1  ;;  %v5014_v28 = vpop.f32.mrf.mxu3 }
 0xe4c   :  { %v5055_v53 = vadd.f32 %v5054_v15, %v4919_v36  ;;  %v5034_v27 = vpop.f32.mrf.mxu0  ;;  %v5015_v61 = vadd.f32 %v5014_v28, %v4919_v36 }
 0xe4d   :  { %v5035_v52 = vadd.f32 %v5034_v27, %v4919_v36 }
 0xe4e   :  { %v5062_v62 = vmax.f32 %v5055_v53, 0.0  ;;  %v5060_v26 = vmax.f32 %v5015_v61, 0.0 }
 0xe4f   :  { %v5061_v18 = vmax.f32 %v5035_v52, 0.0 }
 0xe50   :  { %v12556_v43 = vmul.f32 %v5073_v4, %v5062_v62  ;;  %5278 = vrot.lane.b32.xlu1 %v12541_v20, %s9272_s9  ;;  %v12582_v58 = vmul.f32 %v5071_v54, %v5060_v26 }
 0xe51   :  { %v12564_v50 = vmul.f32 %v5072_v12, %v5061_v18 }
 0xe52   :  { %5234 = vrot.lane.b32.xlu0 %v12541_v20, %s9270_s7  ;;  %5270 = vrot.lane.b32.xlu2 %v12556_v43, %s9267_s30  ;;  %v8766_v25 = vpack.i.bf16 %v12556_v43, %v12566_v31  ;;  %v8811_v5 = vpack.i.bf16 %v12582_v58, %v12556_v43 }
 0xe53   :  { %v8771_v49 = vpack.i.bf16 %v12564_v50, %v12566_v31  ;;  %v8786_v51 = vpack.i.bf16 %v12556_v43, %v12564_v50  ;;  %v8816_v29 = vpack.i.bf16 %v12564_v50, %v12582_v58 }
 0xe58   :  { %5129 = vrot.lane.b32.xlu1 %v12566_v31, %s9260_s23 }
 0xe5a   :  { %5208 = vrot.lane.b32.xlu0 %v12541_v20, %s9269_s6  ;;  %8772 = vrot.lane.b32.xlu2 %v8771_v49, %s9265_s28 }
 0xe60   :  { %5168 = vrot.lane.b32.xlu1 %v12556_v43, %s9266_s29 }
 0xe62   :  { %5264 = vrot.lane.b32.xlu0 %v12566_v31, %s9267_s30  ;;  %8787 = vrot.lane.b32.xlu2 %v8786_v51, %s9259_s22 }
 0xe68   :  { %8767 = vrot.lane.b32.xlu1 %v8766_v25, %s9268_s5 }
 0xe6a   :  { %8777 = vrot.lane.b32.xlu0 %v8771_v49, %s9261_s24  ;;  %8812 = vrot.lane.b32.xlu2 %v8811_v5, %s9261_s24 }
 0xe70   :  { %8782 = vrot.lane.b32.xlu1 %v8771_v49, %s9263_s26 }
 0xe72   :  { %8792 = vrot.lane.b32.xlu0 %v8786_v51, %s9262_s25  ;;  %8817 = vrot.lane.b32.xlu2 %v8816_v29, %s9268_s5 }
 0xe78   :  { %5268 = vrot.lane.b32.xlu1 %v12564_v50, %s9267_s30 }
 0xe7a   :  { %8797 = vrot.lane.b32.xlu0 %v8786_v51, %s9257_s21  ;;  %8822 = vrot.lane.b32.xlu2 %v8816_v29, %s9260_s23 }
 0xe7d   :  { %v5263_v39 = vpop.permute.xlu2 %5262 }
 0xe80   :  { %8802 = vrot.lane.b32.xlu1 %v8811_v5, %s9265_s28 }
 0xe82   :  { %8807 = vrot.lane.b32.xlu0 %v8811_v5, %s9263_s26  ;;  %5151 = vrot.lane.b32.xlu2 %v12566_v31, %s9264_s27 }
 0xe88   :  { %5266 = vrot.lane.b32.xlu1 %v12582_v58, %s9267_s30 }
 0xe8a   :  { %8827 = vrot.lane.b32.xlu0 %v8816_v29, %s9264_s27  ;;  %5360 = vperm.xlu2 %7680, %v7477_v35  }
 0xe90   :  { %5102 = vrot.lane.b32.xlu1 %v12566_v31, %s9258_s0 }
 0xe92   :  { %8832 = vrot.lane.b32.xlu0 %v8816_v29, %s9258_s0 }
 0xe94   :  { %v12613_v34 = vpop.permute.xlu2 %8747 }
 0xe95   :  { %v8750_v62 = vunpack.i.h.bf16 %v12613_v34  ;;  %v8749_v18 = vunpack.i.l.bf16 %v12613_v34 }
 0xe9c   :  { %v12617_v8 = vpop.permute.xlu2 %8757 }
 0xe9d   :  { %v8760_v51 = vunpack.i.h.bf16 %v12617_v8  ;;  %v8759_v25 = vunpack.i.l.bf16 %v12617_v8 }
 0xea4   :  { %v12621_v42 = vpop.permute.xlu2 %8762 }
 0xeaa   :  { %v5261_v38 = vpop.permute.xlu1 %5260 }
 0xeab   :  { %v5272_v41 = vsel %vm327_vm3, %v5261_v38, %v5263_v39 }
 0xeac   :  { %v8733_v1 = vpop.permute.xlu0 %8732  ;;  %7490 = vmatpush.msk.msra.mxu2 %vm410_vm4, %v5272_v41  ;;  %v12631_v54 = vpop.permute.xlu2 %5270 }
 0xead   :  { %v8735_v3 = vunpack.i.h.bf16 %v8733_v1  ;;  %v8734_v19 = vunpack.i.l.bf16 %v8733_v1 }
 0xeaf   :  { %v5250_v7 = vsel %vm290_vm0, %v8734_v19, %v8735_v3 }
 0xeb0   :  { %v5322_v2 = vrot.slane %v5250_v7, 4 }
 0xeb2   :  { %v8743_v44 = vpop.permute.xlu1 %8742 }
 0xeb3   :  { %v8745_v24 = vunpack.i.h.bf16 %v8743_v44  ;;  %v8744_v33 = vunpack.i.l.bf16 %v8743_v44 }
 0xeb4   :  { %v8738_v0 = vpop.permute.xlu0 %8737  ;;  %v12639_v57 = vpop.permute.xlu2 %8772 }
 0xeb5   :  { %v8740_v37 = vunpack.i.h.bf16 %v8738_v0  ;;  %v8739_v60 = vunpack.i.l.bf16 %v8738_v0  ;;  %v5224_v11 = vsel %vm249_vm1, %v8744_v33, %v8745_v24  ;;  %v8774_v27 = vunpack.i.l.bf16 %v12639_v57 }
 0xeb6   :  { %v5352_v40 = vsel %vm410_vm4, %v5224_v11, %v5322_v2  ;;  %v8765_v2 = vunpack.i.h.bf16 %v12621_v42  ;;  %v8764_v11 = vunpack.i.l.bf16 %v12621_v42 }
 0xeb7   :  { %v5202_v36 = vsel %vm212_vm2, %v8739_v60, %v8740_v37  ;;  %5391 = vmatpush.msra.mxu2 %v5352_v40  ;;  %v5251_v49 = vsel %vm290_vm0, %v8735_v3, %v8774_v27  ;;  %v5157_v60 = vsel %vm141_vm5, %v8759_v25, %v8760_v51 }
 0xeb8   :  { %v5309_v63 = vrot.slane %v5202_v36, 4  ;;  %v5323_v35 = vrot.slane %v5251_v49, 4 }
 0xeba   :  { %v12625_v47 = vpop.permute.xlu1 %8752  ;;  %v5346_v46 = vsel %vm410_vm4, %v12541_v20, %v5309_v63 }
 0xebb   :  { %5392 = vmatpush.msra.mxu2 %v5346_v46  ;;  %v8755_v28 = vunpack.i.h.bf16 %v12625_v47  ;;  %v8754_v61 = vunpack.i.l.bf16 %v12625_v47 }
 0xebc   :  { %v12629_v14 = vpop.permute.xlu0 %5256  ;;  %v8788_v15 = vpop.permute.xlu2 %8787 }
 0xebd   :  { %v8790_v38 = vunpack.i.h.bf16 %v8788_v15  ;;  %v8789_v41 = vunpack.i.l.bf16 %v8788_v15  ;;  %v5135_v0 = vsel %vm104_vm7, %v8754_v61, %v8755_v28 }
 0xebf   :  { %v5123_v15 = vsel %vm81_vm10, %v8789_v41, %v8790_v38 }
 0xec2   :  { %v12633_v4 = vpop.permute.xlu1 %5278 }
 0xec4   :  { %v12635_v12 = vpop.permute.xlu0 %5234  ;;  %v12654_v48 = vpop.permute.xlu2 %8812 }
 0xeca   :  { %v12637_v23 = vpop.permute.xlu1 %5129 }
 0xecc   :  { %v5209_v22 = vpop.permute.xlu0 %5208 }
 0xed2   :  { %v5169_v13 = vpop.permute.xlu1 %5168 }
 0xed3   :  { %v5189_v1 = vsel %vm181_vm6, %v5169_v13, %v8749_v18  ;;  %v5284_v13 = vrot.slane %v5135_v0, 4 }
 0xed4   :  { %v12641_v9 = vpop.permute.xlu0 %5264  ;;  %v5296_v40 = vrot.slane %v5189_v1, 4  ;;  %v5140_v1 = vsel %vm104_vm7, %v5123_v15, %v8754_v61 }
 0xed5   :  { %v5273_v20 = vsel %vm327_vm3, %v5263_v39, %v12641_v9  ;;  %v5183_v39 = vsel %vm181_vm6, %v8749_v18, %v8750_v62  ;;  %v12691_v18 = vpop.permute.xlu2 %8817 }
 0xed6   :  { %7492 = vmatpush.msk.msra.mxu3 %vm410_vm4, %v5273_v20  ;;  %v5297_v46 = vrot.slane %v5183_v39, 4  ;;  %v8814_v20 = vunpack.i.l.bf16 %v12654_v48  ;;  %v12704_v39 = vld [vmem:[%s14021_s2 + $0x2c] sm:$0xf] }
 0xeda   :  { %v12646_v53 = vpop.permute.xlu1 %8767 }
 0xedc   :  { %v12649_v52 = vpop.permute.xlu0 %8777 }
 0xedd   :  { %v8779_v17 = vunpack.i.l.bf16 %v12649_v52 }
 0xedf   :  { %v5203_v26 = vsel %vm212_vm2, %v8740_v37, %v8779_v17 }
 0xee0   :  { %v5310_v19 = vrot.slane %v5203_v26, 4 }
 0xee2   :  { %v12666_v5 = vpop.permute.xlu1 %8782 }
 0xee3   :  { %v8784_v29 = vunpack.i.l.bf16 %v12666_v5 }
 0xee4   :  { %v8793_v3 = vpop.permute.xlu0 %8792 }
 0xee5   :  { %v8795_v44 = vunpack.i.h.bf16 %v8793_v3  ;;  %v8794_v7 = vunpack.i.l.bf16 %v8793_v3  ;;  %v5225_v33 = vsel %vm249_vm1, %v8745_v24, %v8784_v29  ;;  %v5347_v24 = vsel %vm410_vm4, %v12535_v21, %v5310_v19 }
 0xee6   :  { %v5353_v37 = vsel %vm410_vm4, %v5225_v33, %v5323_v35  ;;  %v5341_v35 = vsel %vm410_vm4, %v5157_v60, %v5297_v46  ;;  %v5283_v33 = vrot.slane %v5140_v1, 4  ;;  %v8780_v60 = vunpack.i.h.bf16 %v12649_v52 }
 0xee7   :  { %5411 = vmatpush.msra.mxu3 %v5353_v37  ;;  %v5145_v36 = vsel %vm14046_vm11, %v8794_v7, %v8795_v44  ;;  %vm14047_vm11 = vcmask 56320  }
 0xee8   :  { %v5167_v63 = vsel %vm141_vm5, %v5145_v36, %v8759_v25  ;;  %v5211_v21 = vsel %vm14047_vm11, %v8814_v20, %v5209_v22  ;;  %v5108_v25 = vsel %vm62_vm8, %v8764_v11, %v8765_v2  ;;  %v5327_v22 = vrot.slane %v12629_v14, 4 }
 0xee9   :  { %5412 = vmatpush.msra.mxu3 %v5347_v24  ;;  %v5340_v49 = vsel %vm410_vm4, %v5167_v63, %v5296_v40  ;;  %v5335_v41 = vsel %vm410_vm4, %v5108_v25, %v5284_v13  ;;  %v5314_v44 = vrot.slane %v5211_v21, 4  ;;  %v8775_v36 = vunpack.i.h.bf16 %v12639_v57  ;;  %v12727_v13 = vpop.permute.xlu2 %8822 }
 0xeea   :  { %v12694_v26 = vpop.permute.xlu1 %5268  ;;  %5393 = vmatpush.msra.mxu2 %v5340_v49  ;;  %v5357_v61 = vsel %vm410_vm4, %v12635_v12, %v5327_v22  ;;  %v8820_v24 = vunpack.i.h.bf16 %v12691_v18  ;;  %v8770_v21 = vunpack.i.h.bf16 %v12646_v53  ;;  %v8769_v25 = vunpack.i.l.bf16 %v12646_v53 }
 0xeeb   :  { %5413 = vmatpush.msra.mxu3 %v5341_v35  ;;  %v5276_v0 = vsel %vm327_vm3, %v12694_v26, %v12631_v54  ;;  %v5351_v46 = vsel %vm410_vm4, %v12556_v43, %v5314_v44  ;;  %v8819_v54 = vunpack.i.l.bf16 %v12691_v18  ;;  %v8815_v35 = vunpack.i.h.bf16 %v12654_v48 }
 0xeec   :  { %v8798_v38 = vpop.permute.xlu0 %8797  ;;  %v5281_v49 = vsel %vm339_vm12, %v5276_v0, %v12633_v4  ;;  %v8785_v18 = vunpack.i.h.bf16 %v12666_v5  ;;  %v5206_v1 = vsel %vm212_vm2, %v8780_v60, %v8814_v20  ;;  %v5187_v57 = vsel %vm181_vm6, %v8820_v24, %v8770_v21 }
 0xeed   :  { %v8800_v3 = vunpack.i.h.bf16 %v8798_v38  ;;  %v8799_v19 = vunpack.i.l.bf16 %v8798_v38  ;;  %5414 = vmatpush.msra.mxu3 %v5335_v41  ;;  %v5204_v44 = vsel %vm212_vm2, %v8779_v17, %v8815_v35  ;;  %v5184_v52 = vsel %vm181_vm6, %v8750_v62, %v8769_v25 }
 0xeee   :  { %7493 = vmatmul.msk.f32.vlgmr.msra.gmra.mxu3 %vm440_vm9, %v12704_v39  ;;  %v5136_v17 = vsel %vm104_vm7, %v8755_v28, %v12637_v23  ;;  %v5185_v47 = vsel %vm181_vm6, %v8769_v25, %v8819_v54 }
 0xeef   :  { %7500 = vmatpush.msk.msrb.mxu3 %vm410_vm4, %v12633_v4  ;;  %v5092_v7 = vsel %vm37_vm13, %v8799_v19, %v8800_v3 }
 0xef0   :  { %v5118_v37 = vsel %vm62_vm8, %v5092_v7, %v8764_v11  ;;  %v5186_v7 = vsel %vm181_vm6, %v8819_v54, %v8820_v24  ;;  %v8825_v54 = vunpack.i.h.bf16 %v12727_v13 }
 0xef1   :  { %5491 = vmatpush.msrb.mxu3 %v5357_v61  ;;  %v5334_v40 = vsel %vm410_vm4, %v5118_v37, %v5283_v33  ;;  %v5313_v33 = vrot.slane %v5206_v1, 4  ;;  %v5300_v24 = vrot.slane %v5186_v7, 4 }
 0xef2   :  { %v8803_v63 = vpop.permute.xlu1 %8802  ;;  %5394 = vmatpush.msra.mxu2 %v5334_v40  ;;  %v5311_v40 = vrot.slane %v5204_v44, 4 }
 0xef3   :  { %v8805_v15 = vunpack.i.h.bf16 %v8803_v63  ;;  %v8804_v11 = vunpack.i.l.bf16 %v8803_v63  ;;  %5492 = vmatpush.msrb.mxu3 %v5351_v46  ;;  %7491 = vmatmul.msk.f32.vlgmr.msra.gmra.mxu2 %vm440_vm9, %v12704_v39  ;;  %v5350_v5 = vsel %vm410_vm4, %v12564_v50, %v5313_v33  ;;  %v5298_v63 = vrot.slane %v5184_v52, 4  ;;  %v5152_v46 = vpop.permute.xlu2 %5151  ;;  %v5508_v52 = vld.sshfl [vmem:[#allocation1 + $0x20] sm:$0xff pattern:$0x75316420] }
 0xef4   :  { %7498 = vmatpush.msk.msrb.mxu2 %vm410_vm4, %v5281_v49  ;;  %v8808_v43 = vpop.permute.xlu0 %8807  ;;  %v8824_v49 = vunpack.i.l.bf16 %v12727_v13  ;;  %v5348_v50 = vsel %vm410_vm4, %v12566_v31, %v5311_v40 }
 0xef5   :  { %v5254_v38 = vsel %vm290_vm0, %v8775_v36, %v8804_v11  ;;  %v8809_v41 = vunpack.i.l.bf16 %v8808_v43  ;;  %v8810_v3 = vunpack.i.h.bf16 %v8808_v43  ;;  %v5252_v48 = vsel %vm290_vm0, %v8774_v27, %v8805_v15 }
 0xef6   :  { %v5259_v4 = vsel %vm302_vm14, %v5254_v38, %v12629_v14  ;;  %v5253_v53 = vsel %vm290_vm0, %v8805_v15, %v8775_v36  ;;  %v5205_v14 = vsel %vm212_vm2, %v8815_v35, %v8780_v60  ;;  %v5324_v0 = vrot.slane %v5252_v48, 4 }
 0xef7   :  { %v5228_v19 = vsel %vm249_vm1, %v8785_v18, %v8809_v41  ;;  %v5326_v22 = vrot.slane %v5259_v4, 4  ;;  %v5325_v61 = vrot.slane %v5253_v53, 4  ;;  %v5227_v60 = vsel %vm249_vm1, %v8810_v3, %v8785_v18 }
 0xef8   :  { %v5237_v20 = vsel %vm265_vm15, %v5228_v19, %v12635_v12  ;;  %v5226_v12 = vsel %vm249_vm1, %v8784_v29, %v8810_v3  ;;  %v5312_v62 = vrot.slane %v5205_v14, 4  ;;  %v5301_v29 = vrot.slane %v5187_v57, 4  ;;  %v5505_v14 = vld.sshfl [vmem:[#allocation1 + $0x8] sm:$0xff pattern:$0x75316420] }
 0xef9   :  { %v5356_v27 = vsel %vm410_vm4, %v5237_v20, %v5326_v22  ;;  %v5355_v11 = vsel %vm410_vm4, %v5227_v60, %v5325_v61  ;;  %v5299_v35 = vrot.slane %v5185_v47, 4  ;;  %v5158_v38 = vsel %vm141_vm5, %v8760_v51, %v5152_v46  ;;  %v5504_v57 = vld.sshfl [vmem:[#allocation1] sm:$0xff pattern:$0x75316420] }
 0xefa   :  { %v5267_v37 = vpop.permute.xlu1 %5266  ;;  %5471 = vmatpush.msrb.mxu2 %v5356_v27  ;;  %v5349_v21 = vsel %vm410_vm4, %v12582_v58, %v5312_v62  ;;  %v5342_v58 = vsel %vm410_vm4, %v5158_v38, %v5298_v63  ;;  %v5285_v41 = vrot.slane %v5136_v17, 4  ;;  %v5137_v51 = vsel %vm104_vm7, %v12637_v23, %v8824_v49  ;;  %5955 = vst [vmem:[#allocation1] ss:$2 sm:$0xff] %v9662_v45  ;;  %v5506_v27 = vld.sshfl [vmem:[#allocation1 + $0x10] sm:$0xff pattern:$0x75316420] }
 0xefb   :  { %v5274_v36 = vsel %vm327_vm3, %v12641_v9, %v5267_v37  ;;  %v5275_v34 = vsel %vm327_vm3, %v5267_v37, %v12694_v26  ;;  %v5354_v26 = vsel %vm410_vm4, %v5226_v12, %v5324_v0  ;;  %v5138_v3 = vsel %vm104_vm7, %v8824_v49, %v8825_v54  ;;  %v5507_v0 = vld.sshfl [vmem:[#allocation1 + $0x18] sm:$0xff pattern:$0x75316420]  ;;  %v5509_v61 = vld.sshfl [vmem:[#allocation1 + $0x28] sm:$0xff pattern:$0x75316420]  ;;  %v5361_v17 = vpop.permute.xlu2 %5360 }
 0xefc   :  { %7494 = vmatpush.msk.msrb.mxu0 %vm410_vm4, %v5274_v36  ;;  %7496 = vmatpush.msk.msrb.mxu1 %vm410_vm4, %v5275_v34  ;;  %v8828_v28 = vpop.permute.xlu0 %8827  ;;  %v5288_v53 = vrot.slane %v8825_v54, 4  ;;  %v5286_v44 = vrot.slane %v5137_v51, 4  ;;  %v5287_v7 = vrot.slane %v5138_v3, 4  ;;  %5957 = vst [vmem:[#allocation1 + $0x10] ss:$2 sm:$0xff] %v9655_v6 }
 0xefd   :  { %v8830_v15 = vunpack.i.h.bf16 %v8828_v28  ;;  %v8829_v9 = vunpack.i.l.bf16 %v8828_v28  ;;  %5472 = vmatpush.msrb.mxu2 %v5350_v5  ;;  %5959 = vst [vmem:[#allocation1 + $0x20] ss:$2 sm:$0xff] %v9681_v10 }
 0xefe   :  { %5431 = vmatpush.msrb.mxu0 %v5354_v26  ;;  %5451 = vmatpush.msrb.mxu1 %v5355_v11 }
 0xeff   :  { %v5345_v25 = vsel %vm410_vm4, %v8830_v15, %v5301_v29  ;;  %v5160_v43 = vsel %vm141_vm5, %v8829_v9, %v8830_v15  ;;  %v5159_v18 = vsel %vm141_vm5, %v5152_v46, %v8829_v9 }
 0xf00   :  { %5432 = vmatpush.msrb.mxu0 %v5348_v50  ;;  %5452 = vmatpush.msrb.mxu1 %v5349_v21  ;;  %v5344_v13 = vsel %vm410_vm4, %v5160_v43, %v5300_v24  ;;  %v5343_v31 = vsel %vm410_vm4, %v5159_v18, %v5299_v35 }
 0xf01   :  { %5493 = vmatpush.msrb.mxu3 %v5345_v25  ;;  %5473 = vmatpush.msrb.mxu2 %v5344_v13 }
 0xf02   :  { %v5103_v1 = vpop.permute.xlu1 %5102  ;;  %5433 = vmatpush.msrb.mxu0 %v5342_v58  ;;  %5453 = vmatpush.msrb.mxu1 %v5343_v31 }
 0xf03   :  { %v5109_v8 = vsel %vm62_vm8, %v8765_v2, %v5103_v1 }
 0xf04   :  { %v8833_v4 = vpop.permute.xlu0 %8832  ;;  %v5336_v48 = vsel %vm410_vm4, %v5109_v8, %v5285_v41 }
 0xf05   :  { %v8835_v19 = vunpack.i.h.bf16 %v8833_v4  ;;  %v8834_v22 = vunpack.i.l.bf16 %v8833_v4  ;;  %5434 = vmatpush.msrb.mxu0 %v5336_v48 }
 0xf06   :  { %7495 = vmatmul.msk.f32.vlgmr.msrb.gmra.mxu0 %vm440_vm9, %v12704_v39 }
 0xf07   :  { %v5339_v42 = vsel %vm410_vm4, %v8835_v19, %v5288_v53  ;;  %v5110_v2 = vsel %vm62_vm8, %v5103_v1, %v8834_v22  ;;  %v5111_v23 = vsel %vm62_vm8, %v8834_v22, %v8835_v19 }
 0xf08   :  { %5494 = vmatpush.msrb.mxu3 %v5339_v42  ;;  %v5337_v20 = vsel %vm410_vm4, %v5110_v2, %v5286_v44  ;;  %v5338_v33 = vsel %vm410_vm4, %v5111_v23, %v5287_v7 }
 0xf09   :  { %5454 = vmatpush.msrb.mxu1 %v5337_v20  ;;  %5474 = vmatpush.msrb.mxu2 %v5338_v33 }
 0xf0a   :  { %7501 = vmatmul.msk.f32.vlgmr.msrb.gmra.mxu3 %vm440_vm9, %v12704_v39  ;;  %7497 = vmatmul.msk.f32.vlgmr.msrb.gmra.mxu1 %vm440_vm9, %v12704_v39 }
 0xf0b   :  { %7499 = vmatmul.msk.f32.vlgmr.msrb.gmra.mxu2 %vm440_vm9, %v12704_v39 }
 0xf71   :  { %v5416_v34 = vpop.f32.mrf.mxu3 }
 0xf72   :  { %v5417_v5 = vadd.f32 %v5416_v34, %v5361_v17 }
 0xf74   :  { %v5517_v63 = vmul.f32 %v5505_v14, %v5417_v5 }
 0xf76   :  { %v5396_v37 = vpop.f32.mrf.mxu2  ;;  %v12839_v15 = vadd.f32 %v5517_v63, %v12230_v16 }
 0xf77   :  { %v5397_v12 = vadd.f32 %v5396_v37, %v5361_v17 }
 0xf79   :  { %v5516_v60 = vmul.f32 %v5504_v57, %v5397_v12 }
 0xf7b   :  { %v12817_v40 = vadd.f32 %v5516_v60, %v12236_v32 }
 0xf7d   :  { %5706 = vrot.lane.b32.xlu2 %v12817_v40, %s9271_s8  ;;  %5710 = vrot.lane.b32.xlu1 %v12817_v40, %s9267_s30 }
 0xf83   :  { %v5436_v39 = vpop.f32.mrf.mxu0 }
 0xf84   :  { %v5437_v36 = vadd.f32 %v5436_v39, %v5361_v17 }
 0xf85   :  { %5728 = vrot.lane.b32.xlu1 %v12817_v40, %s9272_s9 }
 0xf86   :  { %v5518_v62 = vmul.f32 %v5506_v27, %v5437_v36 }
 0xf87   :  { %v5456_v47 = vpop.f32.mrf.mxu1 }
 0xf88   :  { %v5457_v28 = vadd.f32 %v5456_v47, %v5361_v17  ;;  %v12826_v32 = vadd.f32 %v5518_v62, %v12251_v56  ;;  %v8851_v56 = vpack.i.bf16 %v12839_v15, %v12817_v40 }
 0xf8a   :  { %v5519_v29 = vmul.f32 %v5507_v0, %v5457_v28 }
 0xf8c   :  { %v12829_v24 = vadd.f32 %v5519_v29, %v12254_v55  ;;  %v8856_v55 = vpack.i.bf16 %v12826_v32, %v12839_v15 }
 0xf8d   :  { %5714 = vrot.lane.b32.xlu1 %v12826_v32, %s9267_s30  ;;  %v5496_v11 = vpop.f32.mrf.mxu3 }
 0xf8e   :  { %5716 = vrot.lane.b32.xlu2 %v12829_v24, %s9267_s30  ;;  %v8836_v46 = vpack.i.bf16 %v12829_v24, %v12826_v32  ;;  %v5476_v16 = vpop.f32.mrf.mxu2  ;;  %v8896_v26 = vpack.i.bf16 %v12829_v24, %v12817_v40  ;;  %v5497_v54 = vadd.f32 %v5496_v11, %v5361_v17 }
 0xf8f   :  { %v5477_v9 = vadd.f32 %v5476_v16, %v5361_v17 }
 0xf90   :  { %8837 = vrot.lane.b32.xlu0 %v8836_v46, %s9265_s28  ;;  %v5521_v50 = vmul.f32 %v5509_v61, %v5497_v54 }
 0xf91   :  { %v5520_v49 = vmul.f32 %v5508_v52, %v5477_v9 }
 0xf92   :  { %v12864_v21 = vadd.f32 %v5521_v50, %v12279_v59  ;;  %v7504_v59 = vld [vmem:[%s14022_s3 + $0x30] sm:$0xf] }
 0xf93   :  { %v12858_v35 = vadd.f32 %v5520_v49, %v12282_v30 }
 0xf95   :  { %8847 = vrot.lane.b32.xlu1 %v8836_v46, %s9263_s26  ;;  %v8906_v25 = vpack.i.bf16 %v12864_v21, %v12858_v35 }
 0xf96   :  { %8852 = vrot.lane.b32.xlu2 %v8851_v56, %s9265_s28 }
 0xf98   :  { %8842 = vrot.lane.b32.xlu0 %v8836_v46, %s9261_s24 }
 0xf9d   :  { %8867 = vrot.lane.b32.xlu1 %v8851_v56, %s9263_s26 }
 0xf9e   :  { %5712 = vrot.lane.b32.xlu2 %v12839_v15, %s9267_s30 }
 0xfa0   :  { %8857 = vrot.lane.b32.xlu0 %v8856_v55, %s9268_s5 }
 0xfa5   :  { %8877 = vrot.lane.b32.xlu1 %v8856_v55, %s9264_s27 }
 0xfa6   :  { %8897 = vrot.lane.b32.xlu2 %v8896_v26, %s9264_s27 }
 0xfa8   :  { %8862 = vrot.lane.b32.xlu0 %v8851_v56, %s9261_s24 }
 0xfad   :  { %8882 = vrot.lane.b32.xlu1 %v8896_v26, %s9268_s5 }
 0xfae   :  { %5718 = vrot.lane.b32.xlu2 %v12858_v35, %s9267_s30 }
 0xfb0   :  { %8872 = vrot.lane.b32.xlu0 %v8856_v55, %s9260_s23 }
 0xfb5   :  { %8887 = vrot.lane.b32.xlu1 %v8856_v55, %s9258_s0 }
 0xfb6   :  { %8907 = vrot.lane.b32.xlu2 %v8906_v25, %s9265_s28 }
 0xfb8   :  { %5618 = vrot.lane.b32.xlu0 %v12864_v21, %s9266_s29 }
 0xfbd   :  { %8892 = vrot.lane.b32.xlu1 %v8896_v26, %s9260_s23 }
 0xfbe   :  { %8912 = vrot.lane.b32.xlu2 %v8906_v25, %s9261_s24 }
 0xfc0   :  { %8917 = vrot.lane.b32.xlu0 %v8906_v25, %s9263_s26 }
 0xfc5   :  { %8902 = vrot.lane.b32.xlu1 %v8896_v26, %s9258_s0 }
 0xfc6   :  { %8922 = vrot.lane.b32.xlu2 %v8906_v25, %s9259_s22 }
 0xfc8   :  { %5684 = vrot.lane.b32.xlu0 %v12817_v40, %s9270_s7 }
 0xfcd   :  { %8937 = vrot.lane.b32.xlu1 %v8906_v25, %s9268_s5 }
 0xfce   :  { %5658 = vrot.lane.b32.xlu2 %v12817_v40, %s9269_s6 }
 0xfd0   :  { %8927 = vrot.lane.b32.xlu0 %v8906_v25, %s9262_s25 }
 0xfd5   :  { %5556 = vrot.lane.b32.xlu1 %v12858_v35, %s9258_s0 }
 0xfd6   :  { %5583 = vrot.lane.b32.xlu2 %v12858_v35, %s9260_s23 }
 0xfd7   :  { %v12892_v30 = vpop.permute.xlu2 %5706 }
 0xfd8   :  { %8932 = vrot.lane.b32.xlu0 %v8906_v25, %s9257_s21 }
 0xfde   :  { %5810 = vperm.xlu2 %7680, %v7504_v59  }
 0xfe0   :  { %5720 = vrot.lane.b32.xlu0 %v12864_v21, %s9267_s30 }
 0xfe8   :  { %v5717_v43 = vpop.permute.xlu2 %5716  ;;  %5605 = vrot.lane.b32.xlu0 %v12858_v35, %s9264_s27 }
 0xfef   :  { %v5711_v18 = vpop.permute.xlu1 %5710 }
 0xff0   :  { %v8853_v38 = vpop.permute.xlu2 %8852 }
 0xff1   :  { %v8855_v23 = vunpack.i.h.bf16 %v8853_v38  ;;  %v8854_v14 = vunpack.i.l.bf16 %v8853_v38 }
 0xff3   :  { %v5700_v17 = vsel %vm290_vm0, %v8854_v14, %v8855_v23 }
 0xff4   :  { %v5772_v47 = vrot.slane %v5700_v17, 4 }
 0xff7   :  { %v12898_v13 = vpop.permute.xlu1 %5728 }
 0xff8   :  { %v5713_v31 = vpop.permute.xlu2 %5712 }
 0xff9   :  { %v5722_v58 = vsel %vm327_vm3, %v5711_v18, %v5713_v31 }
 0xffa   :  { %7506 = vmatpush.msk.msra.mxu0 %vm410_vm4, %v5722_v58 }
 0xfff   :  { %v5715_v41 = vpop.permute.xlu1 %5714 }
0x1000   :  { %v5723_v1 = vsel %vm327_vm3, %v5713_v31, %v5715_v41  ;;  %v5724_v8 = vsel %vm327_vm3, %v5715_v41, %v5717_v43  ;;  %v12904_v51 = vpop.permute.xlu2 %8897 }
0x1001   :  { %7508 = vmatpush.msk.msra.mxu1 %vm410_vm4, %v5723_v1  ;;  %7510 = vmatpush.msk.msra.mxu2 %vm410_vm4, %v5724_v8 }
0x1002   :  { %v12908_v3 = vpop.permute.xlu0 %8837 }
0x1003   :  { %v8840_v4 = vunpack.i.h.bf16 %v12908_v3  ;;  %v8839_v48 = vunpack.i.l.bf16 %v12908_v3 }
0x1005   :  { %v5702_v53 = vsel %vm290_vm0, %v8839_v48, %v8840_v4  ;;  %v5701_v37 = vsel %vm290_vm0, %v8855_v23, %v8839_v48 }
0x1006   :  { %v5774_v2 = vrot.slane %v5702_v53, 4  ;;  %v5773_v5 = vrot.slane %v5701_v37, 4  ;;  %v8899_v53 = vunpack.i.l.bf16 %v12904_v51 }
0x1007   :  { %v12915_v19 = vpop.permute.xlu1 %8847 }
0x1008   :  { %v8850_v22 = vunpack.i.h.bf16 %v12915_v19  ;;  %v8849_v44 = vunpack.i.l.bf16 %v12915_v19  ;;  %v12919_v7 = vpop.permute.xlu2 %5718 }
0x1009   :  { %v5725_v42 = vsel %vm327_vm3, %v5717_v43, %v12919_v7 }
0x100a   :  { %v12923_v20 = vpop.permute.xlu0 %8842  ;;  %7512 = vmatpush.msk.msra.mxu3 %vm410_vm4, %v5725_v42  ;;  %v5676_v33 = vsel %vm249_vm1, %v8849_v44, %v8850_v22 }
0x100b   :  { %v8845_v57 = vunpack.i.h.bf16 %v12923_v20  ;;  %v8844_v27 = vunpack.i.l.bf16 %v12923_v20  ;;  %v5804_v0 = vsel %vm410_vm4, %v5676_v33, %v5774_v2 }
0x100c   :  { %5881 = vmatpush.msra.mxu2 %v5804_v0 }
0x100d   :  { %v5654_v61 = vsel %vm212_vm2, %v8844_v27, %v8845_v57 }
0x100e   :  { %v5761_v52 = vrot.slane %v5654_v61, 4 }
0x100f   :  { %v8868_v12 = vpop.permute.xlu1 %8867 }
0x1010   :  { %v8870_v60 = vunpack.i.h.bf16 %v8868_v12  ;;  %v8869_v39 = vunpack.i.l.bf16 %v8868_v12  ;;  %v5798_v36 = vsel %vm410_vm4, %v12826_v32, %v5761_v52  ;;  %v12952_v11 = vpop.permute.xlu2 %8907 }
0x1011   :  { %5882 = vmatpush.msra.mxu2 %v5798_v36  ;;  %v12982_v36 = vld [vmem:[%s14021_s2 + $0x30] sm:$0xf] }
0x1012   :  { %v12939_v34 = vpop.permute.xlu0 %8857  ;;  %v5674_v62 = vsel %vm249_vm1, %v8869_v39, %v8870_v60  ;;  %v5675_v28 = vsel %vm249_vm1, %v8870_v60, %v8849_v44 }
0x1013   :  { %v8860_v29 = vunpack.i.h.bf16 %v12939_v34  ;;  %v8859_v63 = vunpack.i.l.bf16 %v12939_v34  ;;  %v5802_v46 = vsel %vm410_vm4, %v5674_v62, %v5772_v47  ;;  %v5803_v56 = vsel %vm410_vm4, %v5675_v28, %v5773_v5 }
0x1014   :  { %5841 = vmatpush.msra.mxu0 %v5802_v46  ;;  %5861 = vmatpush.msra.mxu1 %v5803_v56  ;;  %v8909_v62 = vunpack.i.l.bf16 %v12952_v11 }
0x1015   :  { %v5634_v55 = vsel %vm181_vm6, %v8859_v63, %v8860_v29 }
0x1016   :  { %v5748_v50 = vrot.slane %v5634_v55, 4  ;;  %v5703_v46 = vsel %vm290_vm0, %v8840_v4, %v8909_v62 }
0x1017   :  { %v12948_v16 = vpop.permute.xlu1 %8877 }
0x1018   :  { %v8880_v9 = vunpack.i.h.bf16 %v12948_v16  ;;  %v8879_v26 = vunpack.i.l.bf16 %v12948_v16  ;;  %v12971_v2 = vpop.permute.xlu2 %8912 }
0x1019   :  { %v8914_v47 = vunpack.i.l.bf16 %v12971_v2 }
0x101a   :  { %v8863_v54 = vpop.permute.xlu0 %8862  ;;  %v5608_v49 = vsel %vm141_vm5, %v8879_v26, %v8880_v9 }
0x101b   :  { %v8865_v25 = vunpack.i.h.bf16 %v8863_v54  ;;  %v8864_v59 = vunpack.i.l.bf16 %v8863_v54  ;;  %v5792_v43 = vsel %vm410_vm4, %v5608_v49, %v5748_v50  ;;  %v5655_v56 = vsel %vm212_vm2, %v8845_v57, %v8914_v47 }
0x101c   :  { %5883 = vmatpush.msra.mxu2 %v5792_v43  ;;  %v5775_v50 = vrot.slane %v5703_v46, 4  ;;  %v5762_v4 = vrot.slane %v5655_v56, 4 }
0x101d   :  { %v5653_v18 = vsel %vm212_vm2, %v8865_v25, %v8844_v27  ;;  %v5652_v38 = vsel %vm212_vm2, %v8864_v59, %v8865_v25  ;;  %v5607_v27 = vsel %vm141_vm5, %v8899_v53, %v8879_v26 }
0x101e   :  { %v5759_v31 = vrot.slane %v5652_v38, 4  ;;  %v5760_v58 = vrot.slane %v5653_v18, 4 }
0x101f   :  { %v12960_v41 = vpop.permute.xlu1 %8882 }
0x1020   :  { %v8884_v1 = vunpack.i.l.bf16 %v12960_v41  ;;  %v5796_v8 = vsel %vm410_vm4, %v12817_v40, %v5759_v31  ;;  %v5797_v48 = vsel %vm410_vm4, %v12839_v15, %v5760_v58  ;;  %v8923_v28 = vpop.permute.xlu2 %8922  ;;  %v8885_v5 = vunpack.i.h.bf16 %v12960_v41 }
0x1021   :  { %5842 = vmatpush.msra.mxu0 %v5796_v8  ;;  %5862 = vmatpush.msra.mxu1 %v5797_v48  ;;  %v8915_v31 = vunpack.i.h.bf16 %v12971_v2  ;;  %v5799_v58 = vsel %vm410_vm4, %v12829_v24, %v5762_v4  ;;  %v8925_v46 = vunpack.i.h.bf16 %v8923_v28  ;;  %v8924_v56 = vunpack.i.l.bf16 %v8923_v28 }
0x1022   :  { %v5633_v44 = vsel %vm181_vm6, %v8884_v1, %v8859_v63  ;;  %v8873_v42 = vpop.permute.xlu0 %8872  ;;  %v5635_v49 = vsel %vm181_vm6, %v8860_v29, %v8885_v5  ;;  %v8900_v29 = vunpack.i.h.bf16 %v12904_v51  ;;  %v5962_v51 = vld.sshfl [vmem:[#allocation1 + $0x10] sm:$0xff pattern:$0x75316420] }
0x1023   :  { %v8875_v23 = vunpack.i.h.bf16 %v8873_v42  ;;  %v8874_v33 = vunpack.i.l.bf16 %v8873_v42  ;;  %v5747_v14 = vrot.slane %v5633_v44, 4  ;;  %v5749_v43 = vrot.slane %v5635_v49, 4 }
0x1024   :  { %v5609_v8 = vsel %vm141_vm5, %v8880_v9, %v8900_v29  ;;  %v5777_v9 = vrot.slane %v12892_v30, 4 }
0x1025   :  { %v5791_v0 = vsel %vm410_vm4, %v5607_v27, %v5747_v14  ;;  %v5586_v61 = vsel %vm104_vm7, %v8874_v33, %v8875_v23 }
0x1026   :  { %5863 = vmatpush.msra.mxu1 %v5791_v0  ;;  %v5735_v12 = vrot.slane %v5586_v61, 4 }
0x1027   :  { %v8888_v52 = vpop.permute.xlu1 %8887 }
0x1028   :  { %v8890_v17 = vunpack.i.h.bf16 %v8888_v52  ;;  %v8889_v37 = vunpack.i.l.bf16 %v8888_v52  ;;  %v5659_v18 = vpop.permute.xlu2 %5658 }
0x1029   :  { %v5661_v42 = vsel %vm14047_vm11, %v8915_v31, %v5659_v18  ;;  %vm14048_vm11 = vcmask 72704  }
0x102a   :  { %v5619_v60 = vpop.permute.xlu0 %5618  ;;  %v5559_v39 = vsel %vm62_vm8, %v8889_v37, %v8890_v17  ;;  %v5764_v61 = vrot.slane %v5661_v42, 4 }
0x102b   :  { %v5786_v34 = vsel %vm410_vm4, %v5559_v39, %v5735_v12 }
0x102c   :  { %5884 = vmatpush.msra.mxu2 %v5786_v34 }
0x102d   :  { %7511 = vmatmul.msk.f32.vlgmr.msra.gmra.mxu2 %vm440_vm9, %v12982_v36 }
0x102f   :  { %v12990_v63 = vpop.permute.xlu1 %8892 }
0x1030   :  { %v8895_v55 = vunpack.i.h.bf16 %v12990_v63  ;;  %v8894_v26 = vunpack.i.l.bf16 %v12990_v63 }
0x1032   :  { %v13004_v54 = vpop.permute.xlu0 %8917  ;;  %v5585_v57 = vsel %vm104_vm7, %v8894_v26, %v8874_v33  ;;  %v5587_v25 = vsel %vm104_vm7, %v8875_v23, %v8895_v55  ;;  %v5793_v33 = vsel %vm410_vm4, %v5609_v8, %v5749_v43 }
0x1033   :  { %v8919_v3 = vunpack.i.l.bf16 %v13004_v54  ;;  %v5734_v48 = vrot.slane %v5585_v57, 4  ;;  %v5736_v44 = vrot.slane %v5587_v25, 4  ;;  %v5573_v57 = vsel %vm81_vm10, %v8924_v56, %v8925_v46 }
0x1035   :  { %v5677_v20 = vsel %vm249_vm1, %v8850_v22, %v8919_v3 }
0x1036   :  { %v5805_v59 = vsel %vm410_vm4, %v5677_v20, %v5775_v50 }
0x1037   :  { %v13021_v38 = vpop.permute.xlu1 %8902  ;;  %5901 = vmatpush.msra.mxu3 %v5805_v59 }
0x1038   :  { %v8905_v19 = vunpack.i.h.bf16 %v13021_v38  ;;  %v8904_v22 = vunpack.i.l.bf16 %v13021_v38  ;;  %v5961_v38 = vld.sshfl [vmem:[#allocation1 + $0x8] sm:$0xff pattern:$0x75316420] }
0x1039   :  { %5902 = vmatpush.msra.mxu3 %v5799_v58 }
0x103a   :  { %v5685_v23 = vpop.permute.xlu0 %5684  ;;  %v5558_v14 = vsel %vm62_vm8, %v8904_v22, %v8889_v37  ;;  %v5560_v27 = vsel %vm62_vm8, %v8890_v17, %v8905_v19  ;;  %v5801_v17 = vsel %vm410_vm4, %v12864_v21, %v5764_v61  ;;  %v5639_v37 = vsel %vm181_vm6, %v5619_v60, %v8884_v1 }
0x103b   :  { %5903 = vmatpush.msra.mxu3 %v5793_v33  ;;  %v5785_v0 = vsel %vm410_vm4, %v5558_v14, %v5734_v48  ;;  %v5787_v16 = vsel %vm410_vm4, %v5560_v27, %v5736_v44  ;;  %v5807_v52 = vsel %vm410_vm4, %v5685_v23, %v5777_v9  ;;  %v5746_v49 = vrot.slane %v5639_v37, 4 }
0x103c   :  { %5864 = vmatpush.msra.mxu1 %v5785_v0  ;;  %v8910_v1 = vunpack.i.h.bf16 %v12952_v11  ;;  %v5590_v60 = vsel %vm104_vm7, %v5573_v57, %v8894_v26  ;;  %v5656_v26 = vsel %vm212_vm2, %v8914_v47, %v8915_v31 }
0x103d   :  { %7509 = vmatmul.msk.f32.vlgmr.msra.gmra.mxu1 %vm440_vm9, %v12982_v36  ;;  %5904 = vmatpush.msra.mxu3 %v5787_v16  ;;  %v5733_v18 = vrot.slane %v5590_v60, 4  ;;  %v5763_v27 = vrot.slane %v5656_v26, 4 }
0x103e   :  { %7516 = vmatpush.msk.msrb.mxu1 %vm410_vm4, %v12898_v13  ;;  %7513 = vmatmul.msk.f32.vlgmr.msra.gmra.mxu3 %vm440_vm9, %v12982_v36  ;;  %v5704_v58 = vsel %vm290_vm0, %v8909_v62, %v8910_v1 }
0x103f   :  { %v8938_v8 = vpop.permute.xlu1 %8937  ;;  %v5709_v11 = vsel %vm302_vm14, %v5704_v58, %v12892_v30  ;;  %v5584_v30 = vpop.permute.xlu2 %5583 }
0x1040   :  { %5941 = vmatpush.msrb.mxu1 %v5807_v52  ;;  %v8940_v42 = vunpack.i.h.bf16 %v8938_v8  ;;  %v8939_v33 = vunpack.i.l.bf16 %v8938_v8  ;;  %v5776_v31 = vrot.slane %v5709_v11, 4  ;;  %v5738_v52 = vrot.slane %v5584_v30, 4 }
0x1042   :  { %5942 = vmatpush.msrb.mxu1 %v5801_v17  ;;  %v8928_v12 = vpop.permute.xlu0 %8927  ;;  %v5636_v0 = vsel %vm181_vm6, %v8885_v5, %v8939_v33 }
0x1043   :  { %v8930_v39 = vunpack.i.h.bf16 %v8928_v12  ;;  %v8929_v34 = vunpack.i.l.bf16 %v8928_v12  ;;  %v5750_v61 = vrot.slane %v5636_v0, 4 }
0x1045   :  { %v5595_v50 = vsel %vm14048_vm11, %v8929_v34, %v8930_v39 }
0x1046   :  { %v5617_v4 = vsel %vm141_vm5, %v5595_v50, %v8899_v53  ;;  %v8920_v53 = vunpack.i.h.bf16 %v13004_v54  ;;  %v5637_v54 = vsel %vm181_vm6, %v8939_v33, %v8940_v42  ;;  %v5965_v50 = vld.sshfl [vmem:[#allocation1 + $0x28] sm:$0xff pattern:$0x75316420] }
0x1047   :  { %v5790_v20 = vsel %vm410_vm4, %v5617_v4, %v5746_v49  ;;  %v5751_v16 = vrot.slane %v5637_v54, 4  ;;  %v5811_v39 = vpop.permute.xlu2 %5810  ;;  %v5964_v4 = vld.sshfl [vmem:[#allocation1 + $0x20] sm:$0xff pattern:$0x75316420] }
0x1048   :  { %5843 = vmatpush.msra.mxu0 %v5790_v20  ;;  %v5678_v62 = vsel %vm249_vm1, %v8919_v3, %v8920_v53  ;;  %6395 = vst [vmem:[#allocation1 + $0x20] ss:$2 sm:$0xff] %v9681_v10 }
0x1049   :  { %v5687_v14 = vsel %vm265_vm15, %v5678_v62, %v5685_v23  ;;  %v5557_v23 = vpop.permute.xlu1 %5556 }
0x104a   :  { %v8933_v25 = vpop.permute.xlu0 %8932  ;;  %v5806_v3 = vsel %vm410_vm4, %v5687_v14, %v5776_v31  ;;  %v5561_v41 = vsel %vm62_vm8, %v8905_v19, %v5557_v23  ;;  %v5960_v19 = vld.sshfl [vmem:[#allocation1] sm:$0xff pattern:$0x75316420] }
0x104b   :  { %v8935_v59 = vunpack.i.h.bf16 %v8933_v25  ;;  %v8934_v43 = vunpack.i.l.bf16 %v8933_v25  ;;  %6391 = vst [vmem:[#allocation1] ss:$2 sm:$0xff] %v9662_v45 }
0x104d   :  { %v5542_v28 = vsel %vm37_vm13, %v8934_v43, %v8935_v59 }
0x104e   :  { %v5568_v48 = vsel %vm62_vm8, %v5542_v28, %v8904_v22 }
0x104f   :  { %v5784_v44 = vsel %vm410_vm4, %v5568_v48, %v5733_v18 }
0x1050   :  { %5844 = vmatpush.msra.mxu0 %v5784_v44 }
0x1051   :  { %7507 = vmatmul.msk.f32.vlgmr.msra.gmra.mxu0 %vm440_vm9, %v12982_v36 }
0x1052   :  { %v5721_v22 = vpop.permute.xlu0 %5720 }
0x1053   :  { %v5726_v2 = vsel %vm327_vm3, %v12919_v7, %v5721_v22  ;;  %v5800_v7 = vsel %vm410_vm4, %v12858_v35, %v5763_v27  ;;  %v7505_v27 = vld [vmem:[%s14022_s3 + $0x34] sm:$0xf] }
0x1054   :  { %v5731_v47 = vsel %vm339_vm12, %v5726_v2, %v12898_v13  ;;  %v5588_v13 = vsel %vm104_vm7, %v8895_v55, %v5584_v30  ;;  %v5789_v55 = vsel %vm410_vm4, %v5557_v23, %v5738_v52 }
0x1055   :  { %7514 = vmatpush.msk.msrb.mxu0 %vm410_vm4, %v5731_v47  ;;  %v5737_v37 = vrot.slane %v5588_v13, 4 }
0x1057   :  { %5921 = vmatpush.msrb.mxu0 %v5806_v3  ;;  %v5788_v12 = vsel %vm410_vm4, %v5561_v41, %v5737_v37 }
0x1059   :  { %5922 = vmatpush.msrb.mxu0 %v5800_v7 }
0x105a   :  { %v5606_v9 = vpop.permute.xlu0 %5605 }
0x105b   :  { %v5610_v5 = vsel %vm141_vm5, %v8900_v29, %v5606_v9  ;;  %v5795_v17 = vsel %vm410_vm4, %v5606_v9, %v5751_v16  ;;  %v5963_v29 = vld.sshfl [vmem:[#allocation1 + $0x18] sm:$0xff pattern:$0x75316420] }
0x105c   :  { %5943 = vmatpush.msrb.mxu1 %v5795_v17  ;;  %v5794_v63 = vsel %vm410_vm4, %v5610_v5, %v5750_v61  ;;  %6393 = vst [vmem:[#allocation1 + $0x10] ss:$2 sm:$0xff] %v9655_v6 }
0x105d   :  { %5923 = vmatpush.msrb.mxu0 %v5794_v63 }
0x105e   :  { %5944 = vmatpush.msrb.mxu1 %v5789_v55 }
0x105f   :  { %5924 = vmatpush.msrb.mxu0 %v5788_v12  ;;  %7517 = vmatmul.msk.f32.vlgmr.msrb.gmra.mxu1 %vm440_vm9, %v12982_v36 }
0x1060   :  { %7515 = vmatmul.msk.f32.vlgmr.msrb.gmra.mxu0 %vm440_vm9, %v12982_v36 }
0x10b0   :  { %v5886_v25 = vpop.f32.mrf.mxu2 }
0x10b1   :  { %v5887_v59 = vadd.f32 %v5886_v25, %v5811_v39 }
0x10b3   :  { %v5951_v43 = vmax.f32 %v5887_v59, 0.0 }
0x10b5   :  { %v13130_v18 = vmul.f32 %v5962_v51, %v5951_v43 }
0x10ba   :  { %v5866_v34 = vpop.f32.mrf.mxu1 }
0x10bb   :  { %v5867_v46 = vadd.f32 %v5866_v34, %v5811_v39 }
0x10bd   :  { %v5950_v56 = vmax.f32 %v5867_v46, 0.0 }
0x10bf   :  { %v13111_v49 = vmul.f32 %v5961_v38, %v5950_v56 }
0x10c1   :  { %6154 = vrot.lane.b32.xlu2 %v13111_v49, %s9267_s30  ;;  %v8966_v53 = vpack.i.bf16 %v13130_v18, %v13111_v49  ;;  %v5906_v8 = vpop.f32.mrf.mxu3 }
0x10c2   :  { %v5907_v48 = vadd.f32 %v5906_v8, %v5811_v39 }
0x10c4   :  { %v5952_v11 = vmax.f32 %v5907_v48, 0.0 }
0x10c6   :  { %v13144_v33 = vmul.f32 %v5963_v29, %v5952_v11 }
0x10c8   :  { %v9021_v31 = vpack.i.bf16 %v13144_v33, %v13130_v18 }
0x10ce   :  { %v5846_v36 = vpop.f32.mrf.mxu0 }
0x10cf   :  { %v5847_v20 = vadd.f32 %v5846_v36, %v5811_v39 }
0x10d1   :  { %v5949_v57 = vmax.f32 %v5847_v20, 0.0 }
0x10d3   :  { %v13116_v1 = vmul.f32 %v5960_v19, %v5949_v57 }
0x10d5   :  { %6148 = vrot.lane.b32.xlu2 %v13116_v1, %s9271_s8  ;;  %6152 = vrot.lane.b32.xlu0 %v13116_v1, %s9267_s30  ;;  %v8946_v60 = vpack.i.bf16 %v13111_v49, %v13116_v1  ;;  %v8986_v14 = vpack.i.bf16 %v13144_v33, %v13116_v1 }
0x10d7   :  { %8947 = vrot.lane.b32.xlu1 %v8946_v60, %s9260_s23 }
0x10dc   :  { %v5946_v28 = vpop.f32.mrf.mxu1 }
0x10dd   :  { %6170 = vrot.lane.b32.xlu2 %v13116_v1, %s9272_s9  ;;  %8942 = vrot.lane.b32.xlu0 %v8946_v60, %s9268_s5  ;;  %v5947_v58 = vadd.f32 %v5946_v28, %v5811_v39  ;;  %v5926_v26 = vpop.f32.mrf.mxu0 }
0x10de   :  { %v5927_v42 = vadd.f32 %v5926_v26, %v5811_v39 }
0x10df   :  { %6100 = vrot.lane.b32.xlu1 %v13116_v1, %s9269_s6  ;;  %v5954_v44 = vmax.f32 %v5947_v58, 0.0 }
0x10e0   :  { %v5953_v22 = vmax.f32 %v5927_v42, 0.0 }
0x10e1   :  { %v13138_v62 = vmul.f32 %v5965_v50, %v5954_v44 }
0x10e2   :  { %v13150_v2 = vmul.f32 %v5964_v4, %v5953_v22 }
0x10e4   :  { %v8991_v47 = vpack.i.bf16 %v13138_v62, %v13150_v2 }
0x10e5   :  { %6126 = vrot.lane.b32.xlu2 %v13116_v1, %s9270_s7  ;;  %8952 = vrot.lane.b32.xlu0 %v8946_v60, %s9264_s27 }
0x10e7   :  { %8967 = vrot.lane.b32.xlu1 %v8966_v53, %s9261_s24 }
0x10ed   :  { %8972 = vrot.lane.b32.xlu2 %v8966_v53, %s9263_s26  ;;  %8957 = vrot.lane.b32.xlu0 %v8946_v60, %s9258_s0 }
0x10ef   :  { %6060 = vrot.lane.b32.xlu1 %v13138_v62, %s9266_s29 }
0x10f5   :  { %8987 = vrot.lane.b32.xlu2 %v8986_v14, %s9263_s26  ;;  %8962 = vrot.lane.b32.xlu0 %v8966_v53, %s9265_s28 }
0x10f7   :  { %8977 = vrot.lane.b32.xlu1 %v8986_v14, %s9265_s28 }
0x10fd   :  { %8992 = vrot.lane.b32.xlu2 %v8991_v47, %s9265_s28  ;;  %6156 = vrot.lane.b32.xlu0 %v13130_v18, %s9267_s30 }
0x10ff   :  { %8982 = vrot.lane.b32.xlu1 %v8986_v14, %s9261_s24 }
0x1105   :  { %9002 = vrot.lane.b32.xlu2 %v8991_v47, %s9262_s25  ;;  %6162 = vrot.lane.b32.xlu0 %v13138_v62, %s9267_s30 }
0x1107   :  { %6158 = vrot.lane.b32.xlu1 %v13144_v33, %s9267_s30 }
0x110d   :  { %6160 = vrot.lane.b32.xlu2 %v13150_v2, %s9267_s30  ;;  %8997 = vrot.lane.b32.xlu0 %v8991_v47, %s9259_s22 }
0x110f   :  { %9012 = vrot.lane.b32.xlu1 %v8991_v47, %s9263_s26 }
0x1115   :  { %9017 = vrot.lane.b32.xlu2 %v8991_v47, %s9257_s21  ;;  %9007 = vrot.lane.b32.xlu0 %v8991_v47, %s9261_s24 }
0x1117   :  { %9022 = vrot.lane.b32.xlu1 %v9021_v31, %s9268_s5 }
0x111b   :  { %v6155_v30 = vpop.permute.xlu2 %6154 }
0x111d   :  { %6025 = vrot.lane.b32.xlu2 %v13150_v2, %s9260_s23  ;;  %9027 = vrot.lane.b32.xlu0 %v9021_v31, %s9260_s23 }
0x111f   :  { %9032 = vrot.lane.b32.xlu1 %v9021_v31, %s9264_s27 }
0x1125   :  { %6252 = vperm.xlu2 %7680, %v7505_v27   ;;  %9037 = vrot.lane.b32.xlu0 %v8991_v47, %s9268_s5 }
0x1127   :  { %9042 = vrot.lane.b32.xlu1 %v9021_v31, %s9258_s0 }
0x112d   :  { %6047 = vrot.lane.b32.xlu0 %v13150_v2, %s9264_s27 }
0x112f   :  { %v13184_v54 = vpop.permute.xlu2 %6148  ;;  %5998 = vrot.lane.b32.xlu1 %v13150_v2, %s9258_s0 }
0x1137   :  { %v13188_v3 = vpop.permute.xlu2 %6170 }
0x113f   :  { %v13190_v0 = vpop.permute.xlu2 %6126 }
0x1147   :  { %v6153_v23 = vpop.permute.xlu0 %6152  ;;  %v13193_v13 = vpop.permute.xlu2 %8972 }
0x1148   :  { %v6164_v7 = vsel %vm327_vm3, %v6153_v23, %v6155_v30  ;;  %v8975_v50 = vunpack.i.h.bf16 %v13193_v13  ;;  %v8974_v4 = vunpack.i.l.bf16 %v13193_v13 }
0x1149   :  { %v13195_v16 = vpop.permute.xlu1 %8947  ;;  %7518 = vmatpush.msk.msrb.mxu2 %vm410_vm4, %v6164_v7 }
0x114a   :  { %v8950_v36 = vunpack.i.h.bf16 %v13195_v16  ;;  %v8949_v43 = vunpack.i.l.bf16 %v13195_v16  ;;  %v6117_v22 = vsel %vm249_vm1, %v8974_v4, %v8975_v50 }
0x114f   :  { %v13198_v9 = vpop.permute.xlu0 %8942  ;;  %v13202_v52 = vpop.permute.xlu2 %8987 }
0x1150   :  { %v8989_v34 = vunpack.i.l.bf16 %v13202_v52  ;;  %v8945_v57 = vunpack.i.h.bf16 %v13198_v9  ;;  %v8944_v60 = vunpack.i.l.bf16 %v13198_v9 }
0x1151   :  { %v13200_v61 = vpop.permute.xlu1 %6100 }
0x1152   :  { %v6116_v58 = vsel %vm249_vm1, %v8989_v34, %v8974_v4  ;;  %v6075_v47 = vsel %vm181_vm6, %v8944_v60, %v8945_v57 }
0x1153   :  { %v6189_v4 = vrot.slane %v6075_v47, 4 }
0x1157   :  { %v13204_v41 = vpop.permute.xlu0 %8952  ;;  %v13208_v17 = vpop.permute.xlu2 %8992 }
0x1158   :  { %v8955_v28 = vunpack.i.h.bf16 %v13204_v41  ;;  %v8954_v8 = vunpack.i.l.bf16 %v13204_v41 }
0x1159   :  { %v13206_v5 = vpop.permute.xlu1 %8967 }
0x115a   :  { %v8970_v38 = vunpack.i.h.bf16 %v13206_v5  ;;  %v8969_v19 = vunpack.i.l.bf16 %v13206_v5 }
0x115c   :  { %v6095_v25 = vsel %vm212_vm2, %v8969_v19, %v8970_v38 }
0x115d   :  { %v6202_v14 = vrot.slane %v6095_v25, 4 }
0x115f   :  { %v13210_v37 = vpop.permute.xlu0 %8957  ;;  %v9003_v55 = vpop.permute.xlu2 %9002 }
0x1160   :  { %v9005_v48 = vunpack.i.h.bf16 %v9003_v55  ;;  %v9004_v44 = vunpack.i.l.bf16 %v9003_v55  ;;  %v8960_v31 = vunpack.i.h.bf16 %v13210_v37  ;;  %v8959_v27 = vunpack.i.l.bf16 %v13210_v37 }
0x1161   :  { %v6061_v63 = vpop.permute.xlu1 %6060 }
0x1167   :  { %v8963_v12 = vpop.permute.xlu0 %8962  ;;  %v13240_v23 = vpop.permute.xlu2 %6160 }
0x1168   :  { %v8965_v51 = vunpack.i.h.bf16 %v8963_v12  ;;  %v8964_v29 = vunpack.i.l.bf16 %v8963_v12 }
0x1169   :  { %v13214_v39 = vpop.permute.xlu1 %8977 }
0x116a   :  { %v8979_v46 = vunpack.i.l.bf16 %v13214_v39  ;;  %v6143_v56 = vsel %vm290_vm0, %v8964_v29, %v8965_v51  ;;  %v8980_v7 = vunpack.i.h.bf16 %v13214_v39  ;;  %v6049_v39 = vsel %vm141_vm5, %v8954_v8, %v8955_v28 }
0x116b   :  { %v6215_v53 = vrot.slane %v6143_v56, 4  ;;  %v6239_v56 = vsel %vm410_vm4, %v13111_v49, %v6202_v14 }
0x116c   :  { %v6142_v20 = vsel %vm290_vm0, %v8979_v46, %v8964_v29  ;;  %v6027_v29 = vsel %vm104_vm7, %v8949_v43, %v8950_v36  ;;  %v6037_v46 = vsel %vm14048_vm11, %v9004_v44, %v9005_v48  ;;  %v8990_v48 = vunpack.i.h.bf16 %v13202_v52 }
0x116d   :  { %v6214_v59 = vrot.slane %v6142_v20, 4  ;;  %v6245_v12 = vsel %vm410_vm4, %v6117_v22, %v6215_v53  ;;  %v6176_v53 = vrot.slane %v6027_v29, 4  ;;  %v8995_v29 = vunpack.i.h.bf16 %v13208_v17 }
0x116e   :  { %vm14049_vm11 = vcmask 56320  }
0x116f   :  { %v6157_v26 = vpop.permute.xlu0 %6156  ;;  %v6244_v11 = vsel %vm410_vm4, %v6116_v58, %v6214_v59  ;;  %v6000_v59 = vsel %vm62_vm8, %v8959_v27, %v8960_v31  ;;  %v6233_v58 = vsel %vm410_vm4, %v6049_v39, %v6189_v4  ;;  %v8994_v39 = vunpack.i.l.bf16 %v13208_v17 }
0x1170   :  { %v6165_v42 = vsel %vm327_vm3, %v6155_v30, %v6157_v26  ;;  %6283 = vmatpush.msrb.mxu2 %v6244_v11  ;;  %v6081_v30 = vsel %vm181_vm6, %v6061_v63, %v8944_v60  ;;  %v6144_v60 = vsel %vm290_vm0, %v8965_v51, %v8980_v7  ;;  %v13279_v11 = vld [vmem:[%s14021_s2 + $0x34] sm:$0xf] }
0x1171   :  { %v13243_v5 = vpop.permute.xlu1 %8982  ;;  %7520 = vmatpush.msk.msrb.mxu3 %vm410_vm4, %v6165_v42  ;;  %v6188_v20 = vrot.slane %v6081_v30, 4  ;;  %v6227_v42 = vsel %vm410_vm4, %v6000_v59, %v6176_v53  ;;  %v9018_v30 = vpop.permute.xlu2 %9017 }
0x1172   :  { %v8984_v55 = vunpack.i.l.bf16 %v13243_v5  ;;  %v8985_v34 = vunpack.i.h.bf16 %v13243_v5 }
0x1173   :  { %6303 = vmatpush.msrb.mxu3 %v6245_v12 }
0x1174   :  { %v6094_v63 = vsel %vm212_vm2, %v8984_v55, %v8969_v19  ;;  %v6059_v19 = vsel %vm141_vm5, %v6037_v46, %v8954_v8  ;;  %v6096_v49 = vsel %vm212_vm2, %v8970_v38, %v8985_v34  ;;  %v6216_v8 = vrot.slane %v6144_v60, 4 }
0x1175   :  { %6304 = vmatpush.msrb.mxu3 %v6239_v56  ;;  %v6201_v25 = vrot.slane %v6094_v63, 4  ;;  %v6232_v52 = vsel %vm410_vm4, %v6059_v19, %v6188_v20  ;;  %v6219_v38 = vrot.slane %v13184_v54, 4  ;;  %v6203_v47 = vrot.slane %v6096_v49, 4 }
0x1176   :  { %v6118_v55 = vsel %vm249_vm1, %v8975_v50, %v8990_v48  ;;  %v9020_v46 = vunpack.i.h.bf16 %v9018_v30  ;;  %v9019_v63 = vunpack.i.l.bf16 %v9018_v30  ;;  %v6145_v50 = vsel %vm290_vm0, %v8980_v7, %v8994_v39 }
0x1177   :  { %v6163_v51 = vpop.permute.xlu0 %6162  ;;  %6305 = vmatpush.msrb.mxu3 %v6233_v58  ;;  %v6238_v44 = vsel %vm410_vm4, %v13116_v1, %v6201_v25  ;;  %v6246_v12 = vsel %vm410_vm4, %v6118_v55, %v6216_v8  ;;  %v6240_v13 = vsel %vm410_vm4, %v13130_v18, %v6203_v47  ;;  %v6146_v60 = vsel %vm290_vm0, %v8994_v39, %v8995_v29 }
0x1178   :  { %6284 = vmatpush.msrb.mxu2 %v6238_v44  ;;  %v5984_v53 = vsel %vm37_vm13, %v9019_v63, %v9020_v46  ;;  %v6217_v19 = vrot.slane %v6145_v50, 4 }
0x1179   :  { %v6159_v22 = vpop.permute.xlu1 %6158  ;;  %6306 = vmatpush.msrb.mxu3 %v6227_v42  ;;  %v6168_v42 = vsel %vm327_vm3, %v13240_v23, %v6163_v51 }
0x117a   :  { %v6166_v14 = vsel %vm327_vm3, %v6157_v26, %v6159_v22  ;;  %v6167_v1 = vsel %vm327_vm3, %v6159_v22, %v13240_v23  ;;  %6285 = vmatpush.msrb.mxu2 %v6232_v52  ;;  %7521 = vmatmul.msk.f32.vlgmr.msrb.gmra.mxu3 %vm440_vm9, %v13279_v11  ;;  %v6249_v26 = vsel %vm410_vm4, %v13190_v0, %v6219_v38 }
0x117b   :  { %7528 = vmatpush.msk.msra.mxu3 %vm410_vm4, %v13188_v3  ;;  %7522 = vmatpush.msk.msra.mxu0 %vm410_vm4, %v6166_v14  ;;  %v6010_v22 = vsel %vm62_vm8, %v5984_v53, %v8959_v27  ;;  %v6151_v52 = vsel %vm302_vm14, %v6146_v60, %v13184_v54  ;;  %v6173_v23 = vsel %vm339_vm12, %v6168_v42, %v13188_v3 }
0x117c   :  { %7524 = vmatpush.msk.msra.mxu1 %vm410_vm4, %v6167_v1  ;;  %v6218_v27 = vrot.slane %v6151_v52, 4 }
0x117d   :  { %6383 = vmatpush.msra.mxu3 %v6249_v26  ;;  %6323 = vmatpush.msra.mxu0 %v6246_v12 }
0x117f   :  { %v8998_v56 = vpop.permute.xlu0 %8997  ;;  %6324 = vmatpush.msra.mxu0 %v6240_v13 }
0x1180   :  { %v9000_v4 = vunpack.i.h.bf16 %v8998_v56  ;;  %v8999_v20 = vunpack.i.l.bf16 %v8998_v56 }
0x1181   :  { %v9013_v25 = vpop.permute.xlu1 %9012 }
0x1182   :  { %v6015_v59 = vsel %vm81_vm10, %v8999_v20, %v9000_v4  ;;  %v9015_v58 = vunpack.i.h.bf16 %v9013_v25  ;;  %v9014_v17 = vunpack.i.l.bf16 %v9013_v25 }
0x1183   :  { %v6032_v18 = vsel %vm104_vm7, %v6015_v59, %v8949_v43 }
0x1184   :  { %v6119_v49 = vsel %vm249_vm1, %v8990_v48, %v9014_v17  ;;  %v6175_v44 = vrot.slane %v6032_v18, 4  ;;  %v6120_v7 = vsel %vm249_vm1, %v9014_v17, %v9015_v58 }
0x1185   :  { %v6247_v8 = vsel %vm410_vm4, %v6119_v49, %v6217_v19  ;;  %v6129_v48 = vsel %vm265_vm15, %v6120_v7, %v13190_v0 }
0x1186   :  { %6343 = vmatpush.msra.mxu1 %v6247_v8  ;;  %v6226_v43 = vsel %vm410_vm4, %v6010_v22, %v6175_v44  ;;  %v6248_v3 = vsel %vm410_vm4, %v6129_v48, %v6218_v27 }
0x1187   :  { %v9008_v38 = vpop.permute.xlu0 %9007  ;;  %6286 = vmatpush.msrb.mxu2 %v6226_v43 }
0x1188   :  { %v9010_v51 = vunpack.i.h.bf16 %v9008_v38  ;;  %v9009_v14 = vunpack.i.l.bf16 %v9008_v38  ;;  %7519 = vmatmul.msk.f32.vlgmr.msrb.gmra.mxu2 %vm440_vm9, %v13279_v11 }
0x1189   :  { %7526 = vmatpush.msk.msra.mxu2 %vm410_vm4, %v6173_v23  ;;  %v9023_v54 = vpop.permute.xlu1 %9022 }
0x118a   :  { %v6103_v1 = vsel %vm14049_vm11, %v9010_v51, %v13200_v61  ;;  %v6097_v47 = vsel %vm212_vm2, %v8985_v34, %v9009_v14  ;;  %v6098_v0 = vsel %vm212_vm2, %v9009_v14, %v9010_v51  ;;  %v9025_v12 = vunpack.i.h.bf16 %v9023_v54 }
0x118b   :  { %6363 = vmatpush.msra.mxu2 %v6248_v3  ;;  %v6204_v30 = vrot.slane %v6097_v47, 4  ;;  %v6205_v55 = vrot.slane %v6098_v0, 4  ;;  %v6206_v26 = vrot.slane %v6103_v1, 4  ;;  %v9024_v29 = vunpack.i.l.bf16 %v9023_v54  ;;  %v6397_v0 = vld.sshfl [vmem:[#allocation1 + $0x8] sm:$0xff pattern:$0x75316420] }
0x118c   :  { %v6396_v3 = vld.sshfl [vmem:[#allocation1] sm:$0xff pattern:$0x75316420] }
0x118d   :  { %v6241_v39 = vsel %vm410_vm4, %v13144_v33, %v6204_v30  ;;  %v6242_v61 = vsel %vm410_vm4, %v13150_v2, %v6205_v55  ;;  %v6243_v5 = vsel %vm410_vm4, %v13138_v62, %v6206_v26  ;;  %v6076_v46 = vsel %vm181_vm6, %v8945_v57, %v9024_v29  ;;  %6847 = vst [vmem:[#allocation1] ss:$2 sm:$0xff] %v9662_v45  ;;  %v6398_v30 = vld.sshfl [vmem:[#allocation1 + $0x10] sm:$0xff pattern:$0x75316420] }
0x118e   :  { %6344 = vmatpush.msra.mxu1 %v6241_v39  ;;  %6364 = vmatpush.msra.mxu2 %v6242_v61  ;;  %v6077_v63 = vsel %vm181_vm6, %v9024_v29, %v9025_v12  ;;  %v6190_v20 = vrot.slane %v6076_v46, 4  ;;  %v6399_v55 = vld.sshfl [vmem:[#allocation1 + $0x18] sm:$0xff pattern:$0x75316420] }
0x118f   :  { %6384 = vmatpush.msra.mxu3 %v6243_v5  ;;  %v9028_v34 = vpop.permute.xlu0 %9027  ;;  %v6191_v2 = vrot.slane %v6077_v63, 4  ;;  %6849 = vst [vmem:[#allocation1 + $0x10] ss:$2 sm:$0xff] %v9655_v6  ;;  %v6401_v26 = vld.sshfl [vmem:[#allocation1 + $0x28] sm:$0xff pattern:$0x75316420] }
0x1190   :  { %v9030_v33 = vunpack.i.h.bf16 %v9028_v34  ;;  %v9029_v4 = vunpack.i.l.bf16 %v9028_v34 }
0x1191   :  { %v9033_v13 = vpop.permute.xlu1 %9032 }
0x1192   :  { %v9035_v56 = vunpack.i.h.bf16 %v9033_v13  ;;  %v9034_v50 = vunpack.i.l.bf16 %v9033_v13  ;;  %v6028_v59 = vsel %vm104_vm7, %v8950_v36, %v9029_v4  ;;  %v6029_v58 = vsel %vm104_vm7, %v9029_v4, %v9030_v33  ;;  %v6026_v36 = vpop.permute.xlu2 %6025 }
0x1193   :  { %v6177_v49 = vrot.slane %v6028_v59, 4  ;;  %v6178_v44 = vrot.slane %v6029_v58, 4  ;;  %v6030_v52 = vsel %vm104_vm7, %v9030_v33, %v6026_v36 }
0x1194   :  { %v6050_v60 = vsel %vm141_vm5, %v8955_v28, %v9034_v50  ;;  %v6051_v62 = vsel %vm141_vm5, %v9034_v50, %v9035_v56  ;;  %v6179_v27 = vrot.slane %v6030_v52, 4 }
0x1195   :  { %v6234_v25 = vsel %vm410_vm4, %v6050_v60, %v6190_v20  ;;  %v6235_v9 = vsel %vm410_vm4, %v6051_v62, %v6191_v2 }
0x1196   :  { %6325 = vmatpush.msra.mxu0 %v6234_v25  ;;  %6345 = vmatpush.msra.mxu1 %v6235_v9 }
0x1197   :  { %v9038_v57 = vpop.permute.xlu0 %9037 }
0x1198   :  { %v9040_v17 = vunpack.i.h.bf16 %v9038_v57  ;;  %v9039_v53 = vunpack.i.l.bf16 %v9038_v57 }
0x1199   :  { %v9043_v41 = vpop.permute.xlu1 %9042 }
0x119a   :  { %v9045_v19 = vunpack.i.h.bf16 %v9043_v41  ;;  %v9044_v28 = vunpack.i.l.bf16 %v9043_v41  ;;  %v6079_v18 = vsel %vm181_vm6, %v9039_v53, %v9040_v17  ;;  %v6078_v7 = vsel %vm181_vm6, %v9025_v12, %v9039_v53  ;;  %v6400_v12 = vld.sshfl [vmem:[#allocation1 + $0x20] sm:$0xff pattern:$0x75316420]  ;;  %v6253_v29 = vpop.permute.xlu2 %6252 }
0x119b   :  { %v6193_v43 = vrot.slane %v6079_v18, 4  ;;  %v6192_v37 = vrot.slane %v6078_v7, 4  ;;  %6851 = vst [vmem:[#allocation1 + $0x20] ss:$2 sm:$0xff] %v9681_v10  ;;  %v7532_v18 = vld [vmem:[%s14022_s3 + $0x38] sm:$0xf] }
0x119c   :  { %v6001_v42 = vsel %vm62_vm8, %v8960_v31, %v9044_v28  ;;  %v6002_v16 = vsel %vm62_vm8, %v9044_v28, %v9045_v19  ;;  %v6180_v31 = vrot.slane %v6026_v36, 4 }
0x119d   :  { %v6228_v8 = vsel %vm410_vm4, %v6001_v42, %v6177_v49  ;;  %v6229_v22 = vsel %vm410_vm4, %v6002_v16, %v6178_v44 }
0x119e   :  { %6326 = vmatpush.msra.mxu0 %v6228_v8  ;;  %6346 = vmatpush.msra.mxu1 %v6229_v22 }
0x119f   :  { %v6048_v38 = vpop.permute.xlu0 %6047  ;;  %7523 = vmatmul.msk.f32.vlgmr.msra.gmra.mxu0 %vm440_vm9, %v13279_v11  ;;  %7525 = vmatmul.msk.f32.vlgmr.msra.gmra.mxu1 %vm440_vm9, %v13279_v11 }
0x11a0   :  { %v6052_v48 = vsel %vm141_vm5, %v9035_v56, %v6048_v38  ;;  %v6237_v23 = vsel %vm410_vm4, %v6048_v38, %v6193_v43 }
0x11a1   :  { %v5999_v51 = vpop.permute.xlu1 %5998  ;;  %6385 = vmatpush.msra.mxu3 %v6237_v23  ;;  %v6236_v14 = vsel %vm410_vm4, %v6052_v48, %v6192_v37 }
0x11a2   :  { %v6003_v54 = vsel %vm62_vm8, %v9045_v19, %v5999_v51  ;;  %6365 = vmatpush.msra.mxu2 %v6236_v14  ;;  %v6231_v1 = vsel %vm410_vm4, %v5999_v51, %v6180_v31 }
0x11a3   :  { %6386 = vmatpush.msra.mxu3 %v6231_v1  ;;  %v6230_v47 = vsel %vm410_vm4, %v6003_v54, %v6179_v27 }
0x11a4   :  { %6366 = vmatpush.msra.mxu2 %v6230_v47  ;;  %7529 = vmatmul.msk.f32.vlgmr.msra.gmra.mxu3 %vm440_vm9, %v13279_v11 }
0x11a5   :  { %7527 = vmatmul.msk.f32.vlgmr.msra.gmra.mxu2 %vm440_vm9, %v13279_v11 }
0x11fd   :  { %v6308_v39 = vpop.f32.mrf.mxu3 }
0x11fe   :  { %v6309_v63 = vadd.f32 %v6308_v39, %v6253_v29 }
0x1200   :  { %v6409_v33 = vmul.f32 %v6397_v0, %v6309_v63 }
0x1202   :  { %v13395_v20 = vadd.f32 %v6409_v33, %v12839_v15 }
0x121c   :  { %v6328_v61 = vpop.f32.mrf.mxu0  ;;  %v6348_v5 = vpop.f32.mrf.mxu1 }
0x121d   :  { %v6329_v34 = vadd.f32 %v6328_v61, %v6253_v29  ;;  %v6349_v46 = vadd.f32 %v6348_v5, %v6253_v29 }
0x121f   :  { %v6410_v11 = vmul.f32 %v6398_v30, %v6329_v34  ;;  %v6411_v13 = vmul.f32 %v6399_v55, %v6349_v46 }
0x1221   :  { %v13382_v56 = vadd.f32 %v6410_v11, %v12826_v32  ;;  %v13385_v50 = vadd.f32 %v6411_v13, %v12829_v24  ;;  %v6288_v24 = vpop.f32.mrf.mxu2 }
0x1222   :  { %v6289_v2 = vadd.f32 %v6288_v24, %v6253_v29 }
0x1223   :  { %6608 = vrot.lane.b32.xlu2 %v13385_v50, %s9267_s30  ;;  %6606 = vrot.lane.b32.xlu1 %v13382_v56, %s9267_s30  ;;  %v9046_v4 = vpack.i.bf16 %v13385_v50, %v13382_v56  ;;  %v9061_v32 = vpack.i.bf16 %v13382_v56, %v13395_v20 }
0x1224   :  { %v6408_v60 = vmul.f32 %v6396_v3, %v6289_v2 }
0x1225   :  { %9047 = vrot.lane.b32.xlu0 %v9046_v4, %s9265_s28 }
0x1226   :  { %v13406_v15 = vadd.f32 %v6408_v60, %v12817_v40 }
0x1227   :  { %v6388_v40 = vpop.f32.mrf.mxu3 }
0x1228   :  { %v9091_v62 = vpack.i.bf16 %v13406_v15, %v13395_v20  ;;  %v9096_v25 = vpack.i.bf16 %v13385_v50, %v13406_v15  ;;  %v6389_v9 = vadd.f32 %v6388_v40, %v6253_v29 }
0x1229   :  { %v6368_v57 = vpop.f32.mrf.mxu2 }
0x122a   :  { %v6413_v59 = vmul.f32 %v6401_v26, %v6389_v9  ;;  %v6369_v58 = vadd.f32 %v6368_v57, %v6253_v29 }
0x122b   :  { %9057 = vrot.lane.b32.xlu1 %v9046_v4, %s9263_s26  ;;  %9062 = vrot.lane.b32.xlu2 %v9061_v32, %s9268_s5 }
0x122c   :  { %v13426_v17 = vadd.f32 %v6413_v59, %v12864_v21  ;;  %v6412_v53 = vmul.f32 %v6400_v12, %v6369_v58 }
0x122d   :  { %9052 = vrot.lane.b32.xlu0 %v9046_v4, %s9261_s24 }
0x122e   :  { %v13433_v41 = vadd.f32 %v6412_v53, %v12858_v35  ;;  %v9106_v19 = vpack.i.bf16 %v13385_v50, %v13426_v17 }
0x1230   :  { %v9111_v21 = vpack.i.bf16 %v13433_v41, %v13406_v15  ;;  %v9116_v35 = vpack.i.bf16 %v13426_v17, %v13433_v41  ;;  %v9136_v28 = vpack.i.bf16 %v13433_v41, %v13426_v17  ;;  %v9146_v49 = vpack.i.bf16 %v13433_v41, %v13385_v50 }
0x1233   :  { %6604 = vrot.lane.b32.xlu1 %v13395_v20, %s9267_s30  ;;  %9067 = vrot.lane.b32.xlu2 %v9061_v32, %s9260_s23 }
0x1235   :  { %9072 = vrot.lane.b32.xlu0 %v9061_v32, %s9264_s27 }
0x123b   :  { %9077 = vrot.lane.b32.xlu1 %v9061_v32, %s9258_s0  ;;  %9092 = vrot.lane.b32.xlu2 %v9091_v62, %s9263_s26 }
0x123d   :  { %9082 = vrot.lane.b32.xlu0 %v9091_v62, %s9265_s28 }
0x1243   :  { %9087 = vrot.lane.b32.xlu1 %v9091_v62, %s9261_s24  ;;  %9097 = vrot.lane.b32.xlu2 %v9096_v25, %s9260_s23 }
0x1245   :  { %6602 = vrot.lane.b32.xlu0 %v13406_v15, %s9267_s30 }
0x124b   :  { %9102 = vrot.lane.b32.xlu1 %v9096_v25, %s9264_s27  ;;  %6598 = vrot.lane.b32.xlu2 %v13406_v15, %s9271_s8 }
0x124d   :  { %6440 = vrot.lane.b32.xlu0 %v13406_v15, %s9258_s0 }
0x1253   :  { %6612 = vrot.lane.b32.xlu1 %v13426_v17, %s9267_s30  ;;  %6620 = vrot.lane.b32.xlu2 %v13406_v15, %s9272_s9 }
0x1255   :  { %6550 = vrot.lane.b32.xlu0 %v13406_v15, %s9269_s6 }
0x125b   :  { %9107 = vrot.lane.b32.xlu1 %v9106_v19, %s9268_s5  ;;  %9112 = vrot.lane.b32.xlu2 %v9111_v21, %s9268_s5  ;;  %v13544_v19 = vld [vmem:[%s14021_s2 + $0x38] sm:$0xf] }
0x125d   :  { %6576 = vrot.lane.b32.xlu0 %v13406_v15, %s9270_s7 }
0x1263   :  { %9117 = vrot.lane.b32.xlu1 %v9116_v35, %s9259_s22  ;;  %9127 = vrot.lane.b32.xlu2 %v9116_v35, %s9257_s21 }
0x1265   :  { %6510 = vrot.lane.b32.xlu0 %v13426_v17, %s9266_s29 }
0x126b   :  { %9132 = vrot.lane.b32.xlu1 %v9116_v35, %s9265_s28  ;;  %9137 = vrot.lane.b32.xlu2 %v9136_v28, %s9261_s24 }
0x126d   :  { %9122 = vrot.lane.b32.xlu0 %v9116_v35, %s9262_s25 }
0x1273   :  { %9142 = vrot.lane.b32.xlu1 %v9116_v35, %s9263_s26  ;;  %6475 = vrot.lane.b32.xlu2 %v13433_v41, %s9260_s23 }
0x1275   :  { %6610 = vrot.lane.b32.xlu0 %v13433_v41, %s9267_s30 }
0x127b   :  { %9147 = vrot.lane.b32.xlu1 %v9146_v49, %s9258_s0  ;;  %6702 = vperm.xlu2 %7680, %v7532_v18  }
0x127d   :  { %v13467_v44 = vpop.permute.xlu2 %6608  ;;  %6497 = vrot.lane.b32.xlu0 %v13433_v41, %s9264_s27 }
0x1285   :  { %v13471_v7 = vpop.permute.xlu2 %9062 }
0x1286   :  { %v9065_v30 = vunpack.i.h.bf16 %v13471_v7  ;;  %v9064_v55 = vunpack.i.l.bf16 %v13471_v7 }
0x1288   :  { %v6526_v34 = vsel %vm181_vm6, %v9064_v55, %v9065_v30 }
0x1289   :  { %v6640_v4 = vrot.slane %v6526_v34, 4 }
0x128d   :  { %v13473_v42 = vpop.permute.xlu2 %9067 }
0x128e   :  { %v9070_v48 = vunpack.i.h.bf16 %v13473_v42  ;;  %v9069_v11 = vunpack.i.l.bf16 %v13473_v42 }
0x1290   :  { %v6478_v2 = vsel %vm104_vm7, %v9069_v11, %v9070_v48 }
0x1291   :  { %v6627_v57 = vrot.slane %v6478_v2, 4 }
0x1295   :  { %v6607_v16 = vpop.permute.xlu1 %6606  ;;  %v13475_v36 = vpop.permute.xlu2 %9092 }
0x1296   :  { %v6616_v8 = vsel %vm327_vm3, %v6607_v16, %v13467_v44  ;;  %v9094_v35 = vunpack.i.l.bf16 %v13475_v36 }
0x1297   :  { %v13479_v22 = vpop.permute.xlu0 %9047  ;;  %7538 = vmatpush.msk.msrb.mxu2 %vm410_vm4, %v6616_v8 }
0x1298   :  { %v9050_v52 = vunpack.i.h.bf16 %v13479_v22  ;;  %v9049_v43 = vunpack.i.l.bf16 %v13479_v22 }
0x129a   :  { %v6594_v38 = vsel %vm290_vm0, %v9049_v43, %v9050_v52 }
0x129b   :  { %v6666_v0 = vrot.slane %v6594_v38, 4 }
0x129d   :  { %v13487_v37 = vpop.permute.xlu1 %9057  ;;  %v13489_v31 = vpop.permute.xlu2 %9097 }
0x129e   :  { %v9060_v23 = vunpack.i.h.bf16 %v13487_v37  ;;  %v9059_v51 = vunpack.i.l.bf16 %v13487_v37  ;;  %v9100_v14 = vunpack.i.h.bf16 %v13489_v31 }
0x129f   :  { %v13495_v27 = vpop.permute.xlu0 %9052 }
0x12a0   :  { %v13500_v54 = vsel %vm104_vm7, %v9070_v48, %v9100_v14  ;;  %v9055_v1 = vunpack.i.h.bf16 %v13495_v27  ;;  %v9054_v47 = vunpack.i.l.bf16 %v13495_v27  ;;  %v6568_v3 = vsel %vm249_vm1, %v9059_v51, %v9060_v23 }
0x12a1   :  { %v6696_v12 = vsel %vm410_vm4, %v6568_v3, %v6666_v0  ;;  %v6567_v42 = vsel %vm249_vm1, %v9094_v35, %v9059_v51 }
0x12a2   :  { %v6546_v26 = vsel %vm212_vm2, %v9054_v47, %v9055_v1  ;;  %6773 = vmatpush.msrb.mxu2 %v6696_v12 }
0x12a3   :  { %v6653_v29 = vrot.slane %v6546_v26, 4 }
0x12a5   :  { %v6605_v39 = vpop.permute.xlu1 %6604  ;;  %v13513_v61 = vpop.permute.xlu2 %6598  ;;  %v6690_v5 = vsel %vm410_vm4, %v13382_v56, %v6653_v29 }
0x12a6   :  { %v6615_v46 = vsel %vm327_vm3, %v6605_v39, %v6607_v16  ;;  %6774 = vmatpush.msrb.mxu2 %v6690_v5  ;;  %v9095_v16 = vunpack.i.h.bf16 %v13475_v36 }
0x12a7   :  { %v13521_v63 = vpop.permute.xlu0 %9072  ;;  %7536 = vmatpush.msk.msrb.mxu1 %vm410_vm4, %v6615_v46 }
0x12a8   :  { %v9075_v13 = vunpack.i.h.bf16 %v13521_v63  ;;  %v9074_v33 = vunpack.i.l.bf16 %v13521_v63  ;;  %v6566_v36 = vsel %vm249_vm1, %v9095_v16, %v9094_v35 }
0x12aa   :  { %v6500_v32 = vsel %vm141_vm5, %v9074_v33, %v9075_v13 }
0x12ab   :  { %v6684_v24 = vsel %vm410_vm4, %v6500_v32, %v6640_v4  ;;  %v9099_v4 = vunpack.i.l.bf16 %v13489_v31  ;;  %v6628_v31 = vrot.slane %v13500_v54, 4 }
0x12ac   :  { %6775 = vmatpush.msrb.mxu2 %v6684_v24 }
0x12ad   :  { %v13532_v60 = vpop.permute.xlu1 %9077  ;;  %v13534_v62 = vpop.permute.xlu2 %6620 }
0x12ae   :  { %v9080_v25 = vunpack.i.h.bf16 %v13532_v60  ;;  %v9079_v40 = vunpack.i.l.bf16 %v13532_v60 }
0x12af   :  { %v9083_v9 = vpop.permute.xlu0 %9082 }
0x12b0   :  { %v9085_v59 = vunpack.i.h.bf16 %v9083_v9  ;;  %v9084_v58 = vunpack.i.l.bf16 %v9083_v9  ;;  %v6451_v53 = vsel %vm62_vm8, %v9079_v40, %v9080_v25 }
0x12b1   :  { %v6678_v21 = vsel %vm410_vm4, %v6451_v53, %v6627_v57  ;;  %v6477_v57 = vsel %vm104_vm7, %v9099_v4, %v9069_v11 }
0x12b2   :  { %v6593_v28 = vsel %vm290_vm0, %v9084_v58, %v9049_v43  ;;  %6776 = vmatpush.msrb.mxu2 %v6678_v21  ;;  %v6592_v18 = vsel %vm290_vm0, %v9085_v59, %v9084_v58 }
0x12b3   :  { %7539 = vmatmul.msk.f32.vlgmr.msrb.gmra.mxu2 %vm440_vm9, %v13544_v19  ;;  %v6665_v49 = vrot.slane %v6593_v28, 4  ;;  %v6664_v43 = vrot.slane %v6592_v18, 4  ;;  %v6626_v18 = vrot.slane %v6477_v57, 4 }
0x12b5   :  { %v9088_v8 = vpop.permute.xlu1 %9087  ;;  %v13554_v38 = vpop.permute.xlu2 %9112  ;;  %v6695_v48 = vsel %vm410_vm4, %v6567_v42, %v6665_v49  ;;  %v6694_v32 = vsel %vm410_vm4, %v6566_v36, %v6664_v43 }
0x12b6   :  { %v9090_v0 = vunpack.i.h.bf16 %v9088_v8  ;;  %v9089_v3 = vunpack.i.l.bf16 %v9088_v8  ;;  %6753 = vmatpush.msrb.mxu1 %v6695_v48  ;;  %v9114_v5 = vunpack.i.l.bf16 %v13554_v38  ;;  %v6669_v8 = vrot.slane %v13513_v61, 4 }
0x12b7   :  { %v6603_v26 = vpop.permute.xlu0 %6602 }
0x12b8   :  { %v6544_v12 = vsel %vm212_vm2, %v9090_v0, %v9089_v3  ;;  %v6545_v29 = vsel %vm212_vm2, %v9089_v3, %v9054_v47  ;;  %v6614_v51 = vsel %vm327_vm3, %v6603_v26, %v6605_v39  ;;  %v6525_v2 = vsel %vm181_vm6, %v9114_v5, %v9064_v55 }
0x12b9   :  { %7534 = vmatpush.msk.msrb.mxu0 %vm410_vm4, %v6614_v51  ;;  %v6652_v34 = vrot.slane %v6545_v29, 4  ;;  %v6651_v46 = vrot.slane %v6544_v12, 4  ;;  %v6639_v53 = vrot.slane %v6525_v2, 4 }
0x12bb   :  { %6733 = vmatpush.msrb.mxu0 %v6694_v32  ;;  %v6689_v24 = vsel %vm410_vm4, %v13395_v20, %v6652_v34  ;;  %v6688_v47 = vsel %vm410_vm4, %v13406_v15, %v6651_v46 }
0x12bc   :  { %6754 = vmatpush.msrb.mxu1 %v6689_v24 }
0x12bd   :  { %v13570_v39 = vpop.permute.xlu1 %9102  ;;  %v9128_v9 = vpop.permute.xlu2 %9127  ;;  %6734 = vmatpush.msrb.mxu0 %v6688_v47 }
0x12be   :  { %v9104_v59 = vunpack.i.l.bf16 %v13570_v39  ;;  %v9130_v46 = vunpack.i.h.bf16 %v9128_v9  ;;  %v9129_v32 = vunpack.i.l.bf16 %v9128_v9 }
0x12bf   :  { %v6441_v58 = vpop.permute.xlu0 %6440 }
0x12c0   :  { %v6450_v21 = vsel %vm62_vm8, %v6441_v58, %v9079_v40  ;;  %v6499_v35 = vsel %vm141_vm5, %v9104_v59, %v9074_v33 }
0x12c1   :  { %v6683_v28 = vsel %vm410_vm4, %v6499_v35, %v6639_v53  ;;  %v6677_v55 = vsel %vm410_vm4, %v6450_v21, %v6626_v18 }
0x12c2   :  { %6755 = vmatpush.msrb.mxu1 %v6683_v28 }
0x12c4   :  { %6756 = vmatpush.msrb.mxu1 %v6677_v55  ;;  %v6434_v55 = vsel %vm37_vm13, %v9129_v32, %v9130_v46 }
0x12c5   :  { %v6613_v49 = vpop.permute.xlu1 %6612  ;;  %v9138_v42 = vpop.permute.xlu2 %9137  ;;  %7537 = vmatmul.msk.f32.vlgmr.msrb.gmra.mxu1 %vm440_vm9, %v13544_v19  ;;  %v6460_v27 = vsel %vm62_vm8, %v6434_v55, %v6441_v58 }
0x12c6   :  { %7544 = vmatpush.msk.msra.mxu1 %vm410_vm4, %v13534_v62  ;;  %v9139_v11 = vunpack.i.l.bf16 %v9138_v42  ;;  %v9140_v2 = vunpack.i.h.bf16 %v9138_v42 }
0x12c7   :  { %v6551_v16 = vpop.permute.xlu0 %6550 }
0x12c8   :  { %v6553_v40 = vsel %vm14049_vm11, %v9139_v11, %v6551_v16  ;;  %vm14050_vm11 = vcmask 72704   ;;  %v6547_v9 = vsel %vm212_vm2, %v9055_v1, %v9140_v2  ;;  %v6548_v1 = vsel %vm212_vm2, %v9140_v2, %v9139_v11 }
0x12c9   :  { %v6656_v48 = vrot.slane %v6553_v40, 4  ;;  %v6655_v46 = vrot.slane %v6548_v1, 4  ;;  %v6856_v1 = vld.sshfl [vmem:[#allocation1 + $0x20] sm:$0xff pattern:$0x75316420] }
0x12cb   :  { %v6693_v43 = vsel %vm410_vm4, %v13426_v17, %v6656_v48  ;;  %v6692_v2 = vsel %vm410_vm4, %v13433_v41, %v6655_v46 }
0x12cd   :  { %v13583_v33 = vpop.permute.xlu1 %9107 }
0x12ce   :  { %v9110_v42 = vunpack.i.h.bf16 %v13583_v33 }
0x12cf   :  { %v6577_v0 = vpop.permute.xlu0 %6576 }
0x12d0   :  { %v6699_v3 = vsel %vm410_vm4, %v6577_v0, %v6669_v8 }
0x12d1   :  { %6833 = vmatpush.msra.mxu1 %v6699_v3 }
0x12d3   :  { %6834 = vmatpush.msra.mxu1 %v6693_v43  ;;  %v9115_v43 = vunpack.i.h.bf16 %v13554_v38 }
0x12d5   :  { %v9118_v26 = vpop.permute.xlu1 %9117 }
0x12d6   :  { %v9120_v29 = vunpack.i.h.bf16 %v9118_v26  ;;  %v9119_v51 = vunpack.i.l.bf16 %v9118_v26  ;;  %v9105_v26 = vunpack.i.h.bf16 %v13570_v39 }
0x12d7   :  { %v6511_v12 = vpop.permute.xlu0 %6510 }
0x12d8   :  { %v6465_v36 = vsel %vm81_vm10, %v9119_v51, %v9120_v29  ;;  %v6531_v57 = vsel %vm181_vm6, %v6511_v12, %v9114_v5  ;;  %v9109_v51 = vunpack.i.l.bf16 %v13583_v33 }
0x12d9   :  { %v6482_v21 = vsel %vm104_vm7, %v6465_v36, %v9099_v4  ;;  %v6638_v16 = vrot.slane %v6531_v57, 4  ;;  %v6501_v57 = vsel %vm141_vm5, %v9075_v13, %v9105_v26 }
0x12da   :  { %v6625_v8 = vrot.slane %v6482_v21, 4 }
0x12dc   :  { %v6676_v22 = vsel %vm410_vm4, %v6460_v27, %v6625_v8  ;;  %v6857_v27 = vld.sshfl [vmem:[#allocation1 + $0x28] sm:$0xff pattern:$0x75316420] }
0x12dd   :  { %v9133_v34 = vpop.permute.xlu1 %9132  ;;  %7287 = vst [vmem:[#allocation1 + $0x20] ss:$2 sm:$0xff] %v9681_v10 }
0x12de   :  { %v9135_v24 = vunpack.i.h.bf16 %v9133_v34  ;;  %v9134_v47 = vunpack.i.l.bf16 %v9133_v34 }
0x12df   :  { %v9123_v53 = vpop.permute.xlu0 %9122 }
0x12e0   :  { %v9125_v35 = vunpack.i.h.bf16 %v9123_v53  ;;  %v9124_v28 = vunpack.i.l.bf16 %v9123_v53  ;;  %v6596_v18 = vsel %vm290_vm0, %v9134_v47, %v9135_v24  ;;  %v6595_v4 = vsel %vm290_vm0, %v9050_v52, %v9134_v47 }
0x12e1   :  { %v6601_v3 = vsel %vm302_vm14, %v6596_v18, %v13513_v61  ;;  %v6654_v52 = vrot.slane %v6547_v9, 4  ;;  %v6527_v61 = vsel %vm181_vm6, %v9065_v30, %v9110_v42  ;;  %v6667_v39 = vrot.slane %v6595_v4, 4 }
0x12e2   :  { %v6487_v40 = vsel %vm14050_vm11, %v9124_v28, %v9125_v35  ;;  %v6668_v36 = vrot.slane %v6601_v3, 4  ;;  %v6641_v37 = vrot.slane %v6527_v61, 4  ;;  %v6528_v24 = vsel %vm181_vm6, %v9110_v42, %v9115_v43 }
0x12e3   :  { %v6509_v5 = vsel %vm141_vm5, %v6487_v40, %v9104_v59  ;;  %vm14051_vm11 = vcmask 56320  }
0x12e4   :  { %v6682_v48 = vsel %vm410_vm4, %v6509_v5, %v6638_v16  ;;  %v6685_v35 = vsel %vm410_vm4, %v6501_v57, %v6641_v37 }
0x12e5   :  { %v9143_v12 = vpop.permute.xlu1 %9142  ;;  %6735 = vmatpush.msrb.mxu0 %v6682_v48  ;;  %v6853_v48 = vld.sshfl [vmem:[#allocation1 + $0x8] sm:$0xff pattern:$0x75316420] }
0x12e6   :  { %v9145_v59 = vunpack.i.h.bf16 %v9143_v12  ;;  %v9144_v29 = vunpack.i.l.bf16 %v9143_v12  ;;  %v6854_v12 = vld.sshfl [vmem:[#allocation1 + $0x10] sm:$0xff pattern:$0x75316420] }
0x12e7   :  { %v6611_v38 = vpop.permute.xlu0 %6610  ;;  %6736 = vmatpush.msrb.mxu0 %v6676_v22 }
0x12e8   :  { %v6617_v58 = vsel %vm327_vm3, %v13467_v44, %v6611_v38  ;;  %v6618_v11 = vsel %vm327_vm3, %v6611_v38, %v6613_v49  ;;  %7535 = vmatmul.msk.f32.vlgmr.msrb.gmra.mxu0 %vm440_vm9, %v13544_v19  ;;  %v6569_v33 = vsel %vm249_vm1, %v9060_v23, %v9144_v29  ;;  %v6570_v7 = vsel %vm249_vm1, %v9144_v29, %v9145_v59  ;;  %v6476_v49 = vpop.permute.xlu2 %6475  ;;  %v6855_v59 = vld.sshfl [vmem:[#allocation1 + $0x18] sm:$0xff pattern:$0x75316420] }
0x12e9   :  { %v6623_v30 = vsel %vm339_vm12, %v6618_v11, %v13534_v62  ;;  %7540 = vmatpush.msk.msrb.mxu3 %vm410_vm4, %v6617_v58  ;;  %v6697_v34 = vsel %vm410_vm4, %v6569_v33, %v6667_v39  ;;  %v6579_v44 = vsel %vm265_vm15, %v6570_v7, %v6577_v0  ;;  %v6529_v23 = vsel %vm181_vm6, %v9115_v43, %v9109_v51 }
0x12ea   :  { %7542 = vmatpush.msk.msra.mxu0 %vm410_vm4, %v6623_v30  ;;  %v6698_v32 = vsel %vm410_vm4, %v6579_v44, %v6668_v36  ;;  %v6691_v62 = vsel %vm410_vm4, %v13385_v50, %v6654_v52  ;;  %v6480_v0 = vsel %vm104_vm7, %v9100_v14, %v6476_v49  ;;  %v6643_v28 = vrot.slane %v6529_v23, 4  ;;  %7285 = vst [vmem:[#allocation1 + $0x10] ss:$2 sm:$0xff] %v9655_v6 }
0x12eb   :  { %6793 = vmatpush.msrb.mxu3 %v6697_v34  ;;  %v6642_v14 = vrot.slane %v6528_v24, 4  ;;  %v6630_v55 = vrot.slane %v6476_v49, 4  ;;  %v6629_v13 = vrot.slane %v6480_v0, 4 }
0x12ec   :  { %6813 = vmatpush.msra.mxu0 %v6698_v32 }
0x12ed   :  { %v9148_v47 = vpop.permute.xlu1 %9147  ;;  %6794 = vmatpush.msrb.mxu3 %v6691_v62 }
0x12ee   :  { %v9150_v53 = vunpack.i.h.bf16 %v9148_v47  ;;  %v9149_v21 = vunpack.i.l.bf16 %v9148_v47  ;;  %6814 = vmatpush.msra.mxu0 %v6692_v2  ;;  %v7533_v2 = vld [vmem:[%s14022_s3 + $0x3c] sm:$0xf] }
0x12ef   :  { %v6498_v18 = vpop.permute.xlu0 %6497  ;;  %6795 = vmatpush.msrb.mxu3 %v6685_v35 }
0x12f0   :  { %v6502_v16 = vsel %vm141_vm5, %v9105_v26, %v6498_v18  ;;  %v6687_v40 = vsel %vm410_vm4, %v6498_v18, %v6643_v28  ;;  %v6452_v63 = vsel %vm62_vm8, %v9080_v25, %v9149_v21  ;;  %v6453_v42 = vsel %vm62_vm8, %v9149_v21, %v9150_v53  ;;  %v6703_v25 = vpop.permute.xlu2 %6702  ;;  %v6852_v26 = vld.sshfl [vmem:[#allocation1] sm:$0xff pattern:$0x75316420] }
0x12f1   :  { %6835 = vmatpush.msra.mxu1 %v6687_v40  ;;  %v6679_v8 = vsel %vm410_vm4, %v6452_v63, %v6628_v31  ;;  %v6686_v9 = vsel %vm410_vm4, %v6502_v16, %v6642_v14  ;;  %v6681_v54 = vsel %vm410_vm4, %v9150_v53, %v6630_v55  ;;  %v6680_v60 = vsel %vm410_vm4, %v6453_v42, %v6629_v13 }
0x12f2   :  { %6796 = vmatpush.msrb.mxu3 %v6679_v8  ;;  %6815 = vmatpush.msra.mxu0 %v6686_v9  ;;  %7283 = vst [vmem:[#allocation1] ss:$2 sm:$0xff] %v9662_v45 }
0x12f3   :  { %7541 = vmatmul.msk.f32.vlgmr.msrb.gmra.mxu3 %vm440_vm9, %v13544_v19  ;;  %6836 = vmatpush.msra.mxu1 %v6681_v54 }
0x12f4   :  { %6816 = vmatpush.msra.mxu0 %v6680_v60  ;;  %7545 = vmatmul.msk.f32.vlgmr.msra.gmra.mxu1 %vm440_vm9, %v13544_v19 }
0x12f5   :  { %7543 = vmatmul.msk.f32.vlgmr.msra.gmra.mxu0 %vm440_vm9, %v13544_v19 }
0x1336   :  { %v6778_v52 = vpop.f32.mrf.mxu2 }
0x1337   :  { %v6779_v61 = vadd.f32 %v6778_v52, %v6703_v25 }
0x1339   :  { %v6843_v10 = vmax.f32 %v6779_v61, 0.0 }
0x133b   :  { %v13676_v39 = vmul.f32 %v6854_v12, %v6843_v10 }
0x1342   :  { %v6758_v5 = vpop.f32.mrf.mxu1 }
0x1343   :  { %v6759_v4 = vadd.f32 %v6758_v5, %v6703_v25 }
0x1345   :  { %v6842_v3 = vmax.f32 %v6759_v4, 0.0 }
0x1347   :  { %v13661_v43 = vmul.f32 %v6853_v48, %v6842_v3 }
0x1349   :  { %7046 = vrot.lane.b32.xlu1 %v13661_v43, %s9267_s30  ;;  %v9171_v46 = vpack.i.bf16 %v13676_v39, %v13661_v43 }
0x1365   :  { %v6738_v19 = vpop.f32.mrf.mxu0 }
0x1366   :  { %v6739_v29 = vadd.f32 %v6738_v19, %v6703_v25 }
0x1368   :  { %v6841_v22 = vmax.f32 %v6739_v29, 0.0 }
0x136a   :  { %v13668_v51 = vmul.f32 %v6852_v26, %v6841_v22 }
0x136c   :  { %7044 = vrot.lane.b32.xlu0 %v13668_v51, %s9267_s30  ;;  %v9161_v45 = vpack.i.bf16 %v13661_v43, %v13668_v51 }
0x136e   :  { %9162 = vrot.lane.b32.xlu2 %v9161_v45, %s9264_s27  ;;  %9152 = vrot.lane.b32.xlu1 %v9161_v45, %s9268_s5 }
0x1371   :  { %v6838_v38 = vpop.f32.mrf.mxu1 }
0x1372   :  { %v6839_v6 = vadd.f32 %v6838_v38, %v6703_v25  ;;  %v6818_v58 = vpop.f32.mrf.mxu0 }
0x1373   :  { %v6819_v33 = vadd.f32 %v6818_v58, %v6703_v25 }
0x1374   :  { %v6846_v36 = vmax.f32 %v6839_v6, 0.0  ;;  %9167 = vrot.lane.b32.xlu0 %v9161_v45, %s9258_s0 }
0x1375   :  { %v6845_v7 = vmax.f32 %v6819_v33, 0.0 }
0x1376   :  { %7048 = vrot.lane.b32.xlu2 %v13676_v39, %s9267_s30  ;;  %9157 = vrot.lane.b32.xlu1 %v9161_v45, %s9260_s23  ;;  %v13682_v11 = vmul.f32 %v6857_v27, %v6846_v36  ;;  %v6798_v32 = vpop.f32.mrf.mxu3 }
0x1377   :  { %v13691_v34 = vmul.f32 %v6856_v1, %v6845_v7  ;;  %v6799_v37 = vadd.f32 %v6798_v32, %v6703_v25 }
0x1378   :  { %v9186_v30 = vpack.i.bf16 %v13682_v11, %v13668_v51 }
0x1379   :  { %v9191_v44 = vpack.i.bf16 %v13691_v34, %v13668_v51  ;;  %v9206_v49 = vpack.i.bf16 %v13682_v11, %v13691_v34  ;;  %v6844_v23 = vmax.f32 %v6799_v37, 0.0 }
0x137b   :  { %v13711_v24 = vmul.f32 %v6855_v59, %v6844_v23 }
0x137c   :  { %7040 = vrot.lane.b32.xlu0 %v13668_v51, %s9271_s8 }
0x137d   :  { %v9221_v62 = vpack.i.bf16 %v13711_v24, %v13682_v11  ;;  %v9231_v0 = vpack.i.bf16 %v13711_v24, %v13691_v34  ;;  %v9236_v47 = vpack.i.bf16 %v13676_v39, %v13711_v24 }
0x137e   :  { %9187 = vrot.lane.b32.xlu2 %v9186_v30, %s9261_s24  ;;  %6992 = vrot.lane.b32.xlu1 %v13668_v51, %s9269_s6 }
0x1384   :  { %7018 = vrot.lane.b32.xlu0 %v13668_v51, %s9270_s7 }
0x1386   :  { %9192 = vrot.lane.b32.xlu2 %v9191_v44, %s9265_s28  ;;  %7062 = vrot.lane.b32.xlu1 %v13668_v51, %s9272_s9 }
0x138c   :  { %9172 = vrot.lane.b32.xlu0 %v9171_v46, %s9265_s28 }
0x138e   :  { %9207 = vrot.lane.b32.xlu2 %v9206_v49, %s9262_s25  ;;  %9182 = vrot.lane.b32.xlu1 %v9171_v46, %s9263_s26 }
0x1394   :  { %9177 = vrot.lane.b32.xlu0 %v9171_v46, %s9261_s24 }
0x1396   :  { %7052 = vrot.lane.b32.xlu2 %v13691_v34, %s9267_s30  ;;  %9202 = vrot.lane.b32.xlu1 %v9206_v49, %s9259_s22 }
0x139c   :  { %6952 = vrot.lane.b32.xlu0 %v13682_v11, %s9266_s29 }
0x139e   :  { %9222 = vrot.lane.b32.xlu2 %v9221_v62, %s9265_s28  ;;  %9212 = vrot.lane.b32.xlu1 %v9206_v49, %s9257_s21 }
0x13a4   :  { %7054 = vrot.lane.b32.xlu0 %v13682_v11, %s9267_s30 }
0x13a6   :  { %9227 = vrot.lane.b32.xlu2 %v9221_v62, %s9263_s26  ;;  %9217 = vrot.lane.b32.xlu1 %v9206_v49, %s9268_s5 }
0x13ac   :  { %9197 = vrot.lane.b32.xlu0 %v9191_v44, %s9263_s26 }
0x13ae   :  { %9232 = vrot.lane.b32.xlu2 %v9231_v0, %s9261_s24  ;;  %9242 = vrot.lane.b32.xlu1 %v9231_v0, %s9260_s23 }
0x13b4   :  { %9237 = vrot.lane.b32.xlu0 %v9236_v47, %s9268_s5 }
0x13b6   :  { %9247 = vrot.lane.b32.xlu2 %v9231_v0, %s9264_s27  ;;  %9252 = vrot.lane.b32.xlu1 %v9231_v0, %s9258_s0 }
0x13bb   :  { %v7047_v53 = vpop.permute.xlu1 %7046 }
0x13bc   :  { %7050 = vrot.lane.b32.xlu0 %v13711_v24, %s9267_s30 }
0x13be   :  { %6913 = vrot.lane.b32.xlu2 %v13676_v39, %s9260_s23  ;;  %6886 = vrot.lane.b32.xlu1 %v13676_v39, %s9258_s0 }
0x13c4   :  { %6935 = vrot.lane.b32.xlu0 %v13676_v39, %s9264_s27 }
0x13c6   :  { %7144 = vperm.xlu2 %7680, %v7533_v2  }
0x13c8   :  { %v13744_v57 = vpop.permute.xlu2 %9162 }
0x13c9   :  { %v14027_v58 = vunpack.i.h.bf16 %v13744_v57  ;;  %v9164_v33 = vunpack.i.l.bf16 %v13744_v57 }
0x13cb   :  { %v6941_v0 = vsel %vm141_vm5, %v9164_v33, %v14027_v58 }
0x13d0   :  { %v13746_v21 = vpop.permute.xlu2 %7048 }
0x13d1   :  { %v7057_v35 = vsel %vm327_vm3, %v7047_v53, %v13746_v21 }
0x13d2   :  { %7548 = vmatpush.msk.msra.mxu3 %vm410_vm4, %v7057_v35 }
0x13d8   :  { %v13751_v28 = vpop.permute.xlu2 %9187 }
0x13d9   :  { %v9190_v62 = vunpack.i.h.bf16 %v13751_v28 }
0x13de   :  { %v7045_v18 = vpop.permute.xlu0 %7044 }
0x13df   :  { %v7056_v31 = vsel %vm327_vm3, %v7045_v18, %v7047_v53  ;;  %v13843_v18 = vld [vmem:[%s14021_s2 + $0x3c] sm:$0xf] }
0x13e0   :  { %v13754_v14 = vpop.permute.xlu2 %9192  ;;  %7546 = vmatpush.msk.msra.mxu2 %vm410_vm4, %v7056_v31  ;;  %v13757_v55 = vpop.permute.xlu1 %9152 }
0x13e1   :  { %v9155_v12 = vunpack.i.h.bf16 %v13757_v55  ;;  %v9154_v59 = vunpack.i.l.bf16 %v13757_v55 }
0x13e3   :  { %v6967_v10 = vsel %vm181_vm6, %v9154_v59, %v9155_v12 }
0x13e4   :  { %v7081_v46 = vrot.slane %v6967_v10, 4 }
0x13e6   :  { %v13759_v16 = vpop.permute.xlu0 %9167  ;;  %v7125_v2 = vsel %vm410_vm4, %v6941_v0, %v7081_v46 }
0x13e7   :  { %v14028_v49 = vunpack.i.h.bf16 %v13759_v16  ;;  %v9169_v32 = vunpack.i.l.bf16 %v13759_v16 }
0x13e8   :  { %v13761_v40 = vpop.permute.xlu2 %9207  ;;  %v13763_v63 = vpop.permute.xlu1 %9157 }
0x13e9   :  { %v14029_v29 = vunpack.i.h.bf16 %v13763_v63  ;;  %v9159_v22 = vunpack.i.l.bf16 %v13763_v63  ;;  %v9210_v0 = vunpack.i.h.bf16 %v13761_v40 }
0x13eb   :  { %v6919_v7 = vsel %vm104_vm7, %v9159_v22, %v14029_v29 }
0x13ec   :  { %v7068_v23 = vrot.slane %v6919_v7, 4 }
0x13ee   :  { %v13765_v13 = vpop.permute.xlu0 %7040 }
0x13f0   :  { %v6993_v8 = vpop.permute.xlu1 %6992  ;;  %v13767_v9 = vpop.permute.xlu2 %7052 }
0x13f1   :  { %v6995_v53 = vsel %vm14051_vm11, %v9190_v62, %v6993_v8  ;;  %v7111_v8 = vrot.slane %v13765_v13, 4  ;;  %vm14052_vm11 = vcmask 72704  }
0x13f6   :  { %v13769_v42 = vpop.permute.xlu0 %7018 }
0x13f8   :  { %v13771_v54 = vpop.permute.xlu1 %7062  ;;  %v13773_v60 = vpop.permute.xlu2 %9222 }
0x13fe   :  { %v13775_v25 = vpop.permute.xlu0 %9172 }
0x13ff   :  { %v9175_v5 = vunpack.i.h.bf16 %v13775_v25  ;;  %v9174_v4 = vunpack.i.l.bf16 %v13775_v25 }
0x1400   :  { %v13779_v48 = vpop.permute.xlu1 %9182  ;;  %v13797_v52 = vpop.permute.xlu2 %9227 }
0x1401   :  { %v7035_v3 = vsel %vm290_vm0, %v9174_v4, %v9175_v5  ;;  %v9185_v26 = vunpack.i.h.bf16 %v13779_v48  ;;  %v9184_v27 = vunpack.i.l.bf16 %v13779_v48 }
0x1402   :  { %v7107_v1 = vrot.slane %v7035_v3, 4 }
0x1403   :  { %v7009_v19 = vsel %vm249_vm1, %v9184_v27, %v9185_v26 }
0x1404   :  { %v7137_v61 = vsel %vm410_vm4, %v7009_v19, %v7107_v1  ;;  %v7098_v1 = vrot.slane %v6995_v53, 4  ;;  %v7141_v19 = vsel %vm410_vm4, %v13769_v42, %v7111_v8  ;;  %v9209_v8 = vunpack.i.l.bf16 %v13761_v40 }
0x1405   :  { %7195 = vmatpush.msra.mxu3 %v7137_v61 }
0x1406   :  { %v13800_v45 = vpop.permute.xlu0 %9177  ;;  %v7135_v10 = vsel %vm410_vm4, %v13682_v11, %v7098_v1  ;;  %v9224_v1 = vunpack.i.l.bf16 %v13773_v60 }
0x1407   :  { %v9180_v38 = vunpack.i.h.bf16 %v13800_v45  ;;  %v9179_v6 = vunpack.i.l.bf16 %v13800_v45 }
0x1408   :  { %v9203_v36 = vpop.permute.xlu1 %9202  ;;  %v13833_v35 = vpop.permute.xlu2 %9232 }
0x1409   :  { %v6987_v30 = vsel %vm212_vm2, %v9179_v6, %v9180_v38  ;;  %v9205_v53 = vunpack.i.h.bf16 %v9203_v36  ;;  %v9234_v29 = vunpack.i.l.bf16 %v13833_v35 }
0x140a   :  { %v7094_v44 = vrot.slane %v6987_v30, 4 }
0x140c   :  { %v7131_v37 = vsel %vm410_vm4, %v13661_v43, %v7094_v44  ;;  %v6892_v43 = vsel %vm62_vm8, %v9169_v32, %v14028_v49 }
0x140d   :  { %7196 = vmatpush.msra.mxu3 %v7131_v37  ;;  %v7119_v3 = vsel %vm410_vm4, %v6892_v43, %v7068_v23  ;;  %v9189_v37 = vunpack.i.l.bf16 %v13751_v28  ;;  %v9194_v23 = vunpack.i.l.bf16 %v13754_v14  ;;  %v9204_v43 = vunpack.i.l.bf16 %v9203_v36 }
0x140e   :  { %v6953_v47 = vpop.permute.xlu0 %6952 }
0x140f   :  { %7197 = vmatpush.msra.mxu3 %v7125_v2  ;;  %v6973_v40 = vsel %vm181_vm6, %v6953_v47, %v9154_v59 }
0x1410   :  { %v9213_v31 = vpop.permute.xlu1 %9212  ;;  %v13857_v30 = vpop.permute.xlu2 %9247  ;;  %v7080_v59 = vrot.slane %v6973_v40, 4  ;;  %v9230_v40 = vunpack.i.h.bf16 %v13797_v52 }
0x1411   :  { %7198 = vmatpush.msra.mxu3 %v7119_v3  ;;  %v9249_v11 = vunpack.i.l.bf16 %v13857_v30  ;;  %v9214_v58 = vunpack.i.l.bf16 %v9213_v31  ;;  %v9250_v25 = vunpack.i.h.bf16 %v13857_v30 }
0x1412   :  { %7549 = vmatmul.msk.f32.vlgmr.msra.gmra.mxu3 %vm440_vm9, %v13843_v18  ;;  %v7010_v45 = vsel %vm249_vm1, %v9185_v26, %v9230_v40 }
0x1413   :  { %7556 = vmatpush.msk.msrb.mxu3 %vm410_vm4, %v13771_v54 }
0x1415   :  { %7275 = vmatpush.msrb.mxu3 %v7141_v19  ;;  %v7034_v19 = vsel %vm290_vm0, %v9194_v23, %v9174_v4  ;;  %v6907_v4 = vsel %vm81_vm10, %v9204_v43, %v9205_v53  ;;  %v9225_v43 = vunpack.i.h.bf16 %v13773_v60 }
0x1416   :  { %v7055_v61 = vpop.permute.xlu0 %7054 }
0x1417   :  { %7276 = vmatpush.msrb.mxu3 %v7135_v10  ;;  %v6986_v10 = vsel %vm212_vm2, %v9189_v37, %v9179_v6 }
0x1418   :  { %v13855_v7 = vpop.permute.xlu1 %9217  ;;  %v7093_v37 = vrot.slane %v6986_v10, 4 }
0x1419   :  { %v9220_v44 = vunpack.i.h.bf16 %v13855_v7  ;;  %v9219_v46 = vunpack.i.l.bf16 %v13855_v7  ;;  %v9215_v7 = vunpack.i.h.bf16 %v9213_v31  ;;  %v7106_v31 = vrot.slane %v7034_v19, 4 }
0x141a   :  { %v9229_v19 = vunpack.i.l.bf16 %v13797_v52 }
0x141b   :  { %v6971_v2 = vsel %vm181_vm6, %v9219_v46, %v9220_v44  ;;  %v9195_v44 = vunpack.i.h.bf16 %v13754_v14  ;;  %v6876_v53 = vsel %vm37_vm13, %v9214_v58, %v9215_v7  ;;  %v7060_v7 = vsel %vm327_vm3, %v13767_v9, %v7055_v61 }
0x141c   :  { %v7085_v3 = vrot.slane %v6971_v2, 4  ;;  %v6902_v60 = vsel %vm62_vm8, %v6876_v53, %v9169_v32 }
0x141d   :  { %v7038_v23 = vsel %vm290_vm0, %v9195_v44, %v9224_v1  ;;  %v6924_v1 = vsel %vm104_vm7, %v6907_v4, %v9159_v22  ;;  %v7037_v10 = vsel %vm290_vm0, %v9225_v43, %v9195_v44 }
0x141e   :  { %v13872_v49 = vpop.permute.xlu0 %9197  ;;  %v7129_v36 = vsel %vm410_vm4, %v9249_v11, %v7085_v3  ;;  %v6929_v3 = vsel %vm14052_vm11, %v9209_v8, %v9210_v0  ;;  %v7043_v22 = vsel %vm302_vm14, %v7038_v23, %v13765_v13  ;;  %v7067_v28 = vrot.slane %v6924_v1, 4 }
0x141f   :  { %v9199_v2 = vunpack.i.l.bf16 %v13872_v49  ;;  %7277 = vmatpush.msrb.mxu3 %v7129_v36  ;;  %v9200_v47 = vunpack.i.h.bf16 %v13872_v49  ;;  %v6990_v49 = vsel %vm212_vm2, %v9234_v29, %v9190_v62  ;;  %v6951_v58 = vsel %vm141_vm5, %v6929_v3, %v9164_v33 }
0x1420   :  { %v13883_v6 = vpop.permute.xlu1 %9242  ;;  %v9235_v33 = vunpack.i.h.bf16 %v13833_v35  ;;  %v7036_v13 = vsel %vm290_vm0, %v9175_v5, %v9225_v43  ;;  %v7118_v4 = vsel %vm410_vm4, %v6902_v60, %v7067_v28  ;;  %v7065_v5 = vsel %vm339_vm12, %v7060_v7, %v13771_v54 }
0x1421   :  { %v7008_v14 = vsel %vm249_vm1, %v9199_v2, %v9184_v27  ;;  %v7130_v27 = vsel %vm410_vm4, %v13668_v51, %v7093_v37  ;;  %v9244_v0 = vunpack.i.l.bf16 %v13883_v6  ;;  %v7124_v51 = vsel %vm410_vm4, %v6951_v58, %v7080_v59 }
0x1422   :  { %v7136_v36 = vsel %vm410_vm4, %v7008_v14, %v7106_v31  ;;  %v7012_v62 = vsel %vm249_vm1, %v9200_v47, %v9229_v19  ;;  %v7110_v31 = vrot.slane %v7043_v22, 4  ;;  %v9245_v44 = vunpack.i.h.bf16 %v13883_v6 }
0x1423   :  { %7175 = vmatpush.msra.mxu2 %v7136_v36  ;;  %v7021_v61 = vsel %vm265_vm15, %v7012_v62, %v13769_v42  ;;  %v7097_v37 = vrot.slane %v6990_v49, 4  ;;  %v7072_v52 = vrot.slane %v9244_v0, 4  ;;  %v7109_v54 = vrot.slane %v7037_v10, 4 }
0x1424   :  { %v7140_v42 = vsel %vm410_vm4, %v7021_v61, %v7110_v31  ;;  %v6989_v59 = vsel %vm212_vm2, %v9235_v33, %v9234_v29  ;;  %v6922_v36 = vsel %vm104_vm7, %v9245_v44, %v9244_v0  ;;  %v6944_v29 = vsel %vm141_vm5, %v9250_v25, %v9249_v11 }
0x1425   :  { %7176 = vmatpush.msra.mxu2 %v7130_v27  ;;  %v7134_v43 = vsel %vm410_vm4, %v13691_v34, %v7097_v37  ;;  %v7011_v1 = vsel %vm249_vm1, %v9230_v40, %v9200_v47  ;;  %v7071_v30 = vrot.slane %v6922_v36, 4  ;;  %v7096_v11 = vrot.slane %v6989_v59, 4  ;;  %v7289_v37 = vld.sshfl [vmem:[#allocation1 + $0x8] sm:$0xff pattern:$0x75316420] }
0x1426   :  { %v13913_v8 = vpop.permute.xlu0 %9237  ;;  %v7139_v58 = vsel %vm410_vm4, %v7011_v1, %v7109_v54  ;;  %v14053_v28 = vunpack.i.h.bf16 %v13763_v63  ;;  %vm7329_vm0 = vcmask 64516  }
0x1427   :  { %v9239_v32 = vunpack.i.l.bf16 %v13913_v8  ;;  %7177 = vmatpush.msra.mxu2 %v7124_v51  ;;  %v9240_v27 = vunpack.i.h.bf16 %v13913_v8  ;;  %v7133_v51 = vsel %vm410_vm4, %v13711_v24, %v7096_v11  ;;  %vm7330_vm1 = vmor %vm7329_vm0, %vm410_vm4 }
0x1428   :  { %v13926_v2 = vpop.permute.xlu1 %9252 }
0x1429   :  { %v6970_v35 = vsel %vm181_vm6, %v9239_v32, %v9219_v46  ;;  %7178 = vmatpush.msra.mxu2 %v7118_v4  ;;  %v9254_v23 = vunpack.i.l.bf16 %v13926_v2  ;;  %v6988_v46 = vsel %vm212_vm2, %v9180_v38, %v9235_v33  ;;  %v9255_v6 = vunpack.i.h.bf16 %v13926_v2 }
0x142a   :  { %7547 = vmatmul.msk.f32.vlgmr.msra.gmra.mxu2 %vm440_vm9, %v13843_v18  ;;  %v7084_v3 = vrot.slane %v6970_v35, 4  ;;  %v7108_v38 = vrot.slane %v7036_v13, 4  ;;  %v7095_v19 = vrot.slane %v6988_v46, 4  ;;  %v6968_v60 = vsel %vm181_vm6, %v9155_v12, %v9240_v27 }
0x142b   :  { %7554 = vmatpush.msk.msrb.mxu2 %vm410_vm4, %v7065_v5  ;;  %v7123_v14 = vsel %vm410_vm4, %v9254_v23, %v7072_v52  ;;  %v6895_v49 = vsel %vm62_vm8, %v9255_v6, %v9254_v23  ;;  %v6969_v22 = vsel %vm181_vm6, %v9240_v27, %v9239_v32  ;;  %v7082_v10 = vrot.slane %v6968_v60, 4  ;;  %v7288_v52 = vld.sshfl [vmem:[#allocation1] sm:$0xff pattern:$0x75316420] }
0x142c   :  { %7278 = vmatpush.msrb.mxu3 %v7123_v14  ;;  %v7128_v34 = vsel %vm410_vm4, %v6944_v29, %v7084_v3  ;;  %v7138_v47 = vsel %vm410_vm4, %v7010_v45, %v7108_v38  ;;  %v7132_v0 = vsel %vm410_vm4, %v13676_v39, %v7095_v19  ;;  %v7083_v33 = vrot.slane %v6969_v22, 4  ;;  %v7293_v14 = vld.sshfl [vmem:[#allocation1 + $0x28] sm:$0xff pattern:$0x75316420] }
0x142d   :  { %7255 = vmatpush.msrb.mxu2 %v7140_v42  ;;  %7557 = vmatmul.msk.f32.vlgmr.msrb.gmra.mxu3 %vm440_vm9, %v13843_v18  ;;  %v14054_v39 = vunpack.i.h.bf16 %v13759_v16  ;;  %v14055_v13 = vunpack.i.h.bf16 %v13744_v57  ;;  %v7292_v38 = vld.sshfl [vmem:[#allocation1 + $0x20] sm:$0xff pattern:$0x75316420]  ;;  %v7290_v29 = vld.sshfl [vmem:[#allocation1 + $0x10] sm:$0xff pattern:$0x75316420] }
0x142e   :  { %v7051_v53 = vpop.permute.xlu0 %7050  ;;  %v7291_v19 = vld.sshfl [vmem:[#allocation1 + $0x18] sm:$0xff pattern:$0x75316420] }
0x142f   :  { %v7058_v48 = vsel %vm327_vm3, %v13746_v21, %v7051_v53  ;;  %v7059_v26 = vsel %vm327_vm3, %v7051_v53, %v13767_v9  ;;  %7256 = vmatpush.msrb.mxu2 %v7134_v43  ;;  %v6914_v21 = vpop.permute.xlu2 %6913  ;;  %v7122_v9 = vsel %vm410_vm4, %v6895_v49, %v7071_v30 }
0x1430   :  { %7550 = vmatpush.msk.msrb.mxu0 %vm410_vm4, %v7058_v48  ;;  %7552 = vmatpush.msk.msrb.mxu1 %vm410_vm4, %v7059_v26  ;;  %v6887_v8 = vpop.permute.xlu1 %6886  ;;  %v6920_v55 = vsel %vm104_vm7, %v14053_v28, %v6914_v21  ;;  %v6921_v12 = vsel %vm104_vm7, %v6914_v21, %v9245_v44 }
0x1431   :  { %7257 = vmatpush.msrb.mxu2 %v7128_v34  ;;  %v6893_v7 = vsel %vm62_vm8, %v14054_v39, %v6887_v8  ;;  %v6894_v32 = vsel %vm62_vm8, %v6887_v8, %v9255_v6  ;;  %v7069_v40 = vrot.slane %v6920_v55, 4  ;;  %v7070_v31 = vrot.slane %v6921_v12, 4 }
0x1432   :  { %7215 = vmatpush.msrb.mxu0 %v7138_v47  ;;  %7235 = vmatpush.msrb.mxu1 %v7139_v58 }
0x1433   :  { %7258 = vmatpush.msrb.mxu2 %v7122_v9  ;;  %v7120_v16 = vsel %vm410_vm4, %v6893_v7, %v7069_v40  ;;  %v7121_v44 = vsel %vm410_vm4, %v6894_v32, %v7070_v31 }
0x1434   :  { %7555 = vmatmul.msk.f32.vlgmr.msrb.gmra.mxu2 %vm440_vm9, %v13843_v18  ;;  %7216 = vmatpush.msrb.mxu0 %v7132_v0 }
0x1435   :  { %7236 = vmatpush.msrb.mxu1 %v7133_v51 }
0x1436   :  { %v6936_v62 = vpop.permute.xlu0 %6935 }
0x1437   :  { %v6942_v24 = vsel %vm141_vm5, %v14055_v13, %v6936_v62  ;;  %v6943_v63 = vsel %vm141_vm5, %v6936_v62, %v9250_v25  ;;  %v7145_v35 = vpop.permute.xlu2 %7144 }
0x1438   :  { %v7126_v2 = vsel %vm410_vm4, %v6942_v24, %v7082_v10  ;;  %v7127_v4 = vsel %vm410_vm4, %v6943_v63, %v7083_v33 }
0x1439   :  { %7217 = vmatpush.msrb.mxu0 %v7126_v2  ;;  %7237 = vmatpush.msrb.mxu1 %v7127_v4 }
0x143b   :  { %7218 = vmatpush.msrb.mxu0 %v7120_v16  ;;  %7238 = vmatpush.msrb.mxu1 %v7121_v44 }
0x143c   :  { %7551 = vmatmul.msk.f32.vlgmr.msrb.gmra.mxu0 %vm440_vm9, %v13843_v18  ;;  %7553 = vmatmul.msk.f32.vlgmr.msrb.gmra.mxu1 %vm440_vm9, %v13843_v18 }
0x1495   :  { %v7200_v57 = vpop.f32.mrf.mxu3 }
0x1496   :  { %v7201_v61 = vadd.f32 %v7200_v57, %v7145_v35 }
0x1498   :  { %v7301_v25 = vmul.f32 %v7289_v37, %v7201_v61 }
0x149a   :  { %v7307_v23 = vadd.f32 %v7301_v25, %v13395_v20 }
0x149c   :  { %v7318_v3 = vrot.slane %v7307_v23, 4 }
0x14ad   :  { %v7180_v5 = vpop.f32.mrf.mxu2 }
0x14ae   :  { %v7181_v46 = vadd.f32 %v7180_v5, %v7145_v35 }
0x14b0   :  { %v7300_v6 = vmul.f32 %v7288_v52, %v7181_v46  ;;  %v7280_v42 = vpop.f32.mrf.mxu3 }
0x14b1   :  { %v7281_v59 = vadd.f32 %v7280_v42, %v7145_v35 }
0x14b2   :  { %v7306_v54 = vadd.f32 %v7300_v6, %v13406_v15 }
0x14b3   :  { %v7305_v18 = vmul.f32 %v7293_v14, %v7281_v59 }
0x14b4   :  { %v7321_v36 = vsel %vm410_vm4, %v7306_v54, %v7318_v3 }
0x14b5   :  { %7327 = vst [vmem:[%s14024_s4] sm:$0xff] %v7321_v36  ;;  %v7311_v53 = vadd.f32 %v7305_v18, %v13426_v17 }
0x14b7   :  { %v7260_v45 = vpop.f32.mrf.mxu2  ;;  %v7320_v26 = vrot.slane %v7311_v53, 4 }
0x14b8   :  { %v7261_v20 = vadd.f32 %v7260_v45, %v7145_v35 }
0x14b9   :  { %v7220_v43 = vpop.f32.mrf.mxu0  ;;  %v7240_v1 = vpop.f32.mrf.mxu1 }
0x14ba   :  { %v7304_v27 = vmul.f32 %v7292_v38, %v7261_v20  ;;  %v7221_v15 = vadd.f32 %v7220_v43, %v7145_v35  ;;  %v7241_v48 = vadd.f32 %v7240_v1, %v7145_v35 }
0x14bc   :  { %v7310_v49 = vadd.f32 %v7304_v27, %v13433_v41  ;;  %v7302_v34 = vmul.f32 %v7290_v29, %v7221_v15  ;;  %v7303_v30 = vmul.f32 %v7291_v19, %v7241_v48 }
0x14be   :  { %v7323_v11 = vsel %vm410_vm4, %v7310_v49, %v7320_v26  ;;  %v7309_v17 = vadd.f32 %v7303_v30, %v13385_v50  ;;  %v7308_v47 = vadd.f32 %v7302_v34, %v13382_v56 }
0x14bf   :  { %7331 = vst.msk [vmem:[%s14024_s4 + $0x10] sm:$0xff] %vm7330_vm1, %v7323_v11 }
0x14c0   :  { %v7319_v58 = vrot.slane %v7309_v17, 4 }
0x14c2   :  { %v7322_v21 = vsel %vm410_vm4, %v7308_v47, %v7319_v58 }
0x14c3   :  { %7328 = vst [vmem:[%s14024_s4 + $0x8] sm:$0xff] %v7322_v21 }

</bundles_post_ra>
